<compile_context>
chip_gen: v5e
topology: v5e:2x2
jax: 0.10.0
libtpu: 0.0.40
codegen_flags: <defaults>
</compile_context>

<pallas_src>
import functools

import jax
import jax.numpy as jnp
from jax import lax
from jax.experimental import pallas as pl
from jax.experimental.pallas import tpu as pltpu

LEAKY_SLOPE = 0.01   # nn.LeakyReLU default
BN_EPS = 1e-5        # nn.BatchNorm2d default

_IM2COL_ROW_CAP = 2048  # rows of the (rows, Cin) matmul per tile; amortizes the
                        # ~0.35us/step overhead on 128 MiB parts (v5e/v6e) while
                        # staying comfortable on v7x (64 MiB VMEM).


# --------------------------------------------------------------------------
# Kernels
# --------------------------------------------------------------------------
def _conv_stats_kernel(x_ref, w_ref, y_ref, stat_ref, acc_ref, *,
                       ksize, stride, th, wo, cin, cout):
    """Pass 1: conv for one (sample, output-row tile) block.

    x_ref : (1, P, Hq, Wq, Cin) bf16 -- one sample's zero-padded input, split
            into P = stride*stride parity planes so every tap slice below is a
            contiguous window (no strided ref reads).
    w_ref : (k*k, Cin, Cout) bf16 -- conv weight, tap-major.
    y_ref : (1, th, wo, Cout) bf16 -- conv activation (pre-BN), written once.
    stat_ref : (1, 1, 2, Cout) f32 -- packed per-tile (sum, sum-of-squares).
    acc_ref : (th*wo, Cout) f32 VMEM scratch accumulator.
    """
    h0 = pl.program_id(1) * th
    if th % 8 == 0:
        h0 = pl.multiple_of(h0, 8)

    acc_ref[...] = jnp.zeros_like(acc_ref)
    for kh in range(ksize):
        for kw in range(ksize):
            plane = (kh % stride) * stride + (kw % stride)
            r0 = kh // stride
            c0 = kw // stride
            # (th, wo, cin) contiguous window of the parity plane.
            patch = x_ref[0, plane, pl.ds(h0 + r0, th), pl.ds(c0, wo), :]
            acc_ref[...] += jnp.dot(
                patch.reshape(th * wo, cin),
                w_ref[kh * ksize + kw],
                preferred_element_type=jnp.float32,
            )

    y = acc_ref[...]                                   # (th*wo, cout) f32
    s1 = jnp.sum(y, axis=0, keepdims=True)             # (1, cout)
    s2 = jnp.sum(y * y, axis=0, keepdims=True)         # (1, cout)
    # Pack both moments into one (2, cout) slab without a sublane concat.
    row = lax.broadcasted_iota(jnp.int32, (2, 1), 0)
    stat_ref[...] = jnp.where(row == 0, s1, s2).reshape(1, 1, 2, cout)
    # Store the (un-normalized) conv activation once, in bf16.
    y_ref[...] = y.reshape(1, th, wo, cout).astype(y_ref.dtype)


def _bn_act_kernel(y_ref, scale_ref, shift_ref, o_ref):
    """Pass 2: elementwise BN scale/shift + LeakyReLU on a lane-dense block.

    y_ref     : (1, th, Wo*Cout) bf16
    scale_ref : (1, 1, Wo*Cout) f32  (per-channel scale, pre-tiled across Wo)
    shift_ref : (1, 1, Wo*Cout) f32
    o_ref     : (1, th, Wo*Cout) out dtype
    """
    z = y_ref[...].astype(jnp.float32) * scale_ref[...] + shift_ref[...]
    o_ref[...] = jnp.where(z >= 0, z, LEAKY_SLOPE * z).astype(o_ref.dtype)


# --------------------------------------------------------------------------
# Host-side helpers
# --------------------------------------------------------------------------
def _round_up(x, m):
    return -(-x // m) * m


def _vmem_bytes(shape, dtype):
    """Rough padded-VMEM footprint of one buffer (native (sublane,128) tiling)."""
    itemsize = jnp.dtype(dtype).itemsize
    sub = {4: 8, 2: 16, 1: 32}.get(itemsize, 8)
    s = list(shape)
    if s:
        s[-1] = _round_up(s[-1], 128)
    if len(s) >= 2:
        s[-2] = _round_up(s[-2], sub)
    n = 1
    for d in s:
        n *= d
    return n * itemsize


def _pick_row_tile(ho, wo):
    """Largest multiple-of-8 divisor of Ho with <= _IM2COL_ROW_CAP rows/tile."""
    cands = [d for d in range(8, ho + 1, 8)
             if ho % d == 0 and d * wo <= _IM2COL_ROW_CAP]
    if cands:
        return max(cands)
    if ho % 8 == 0:
        return 8
    # TODO(synk): odd spatial sizes fall back to one full-height tile; pad Ho
    # or add a masked tail tile if such shapes ever matter.
    return ho


def _conv_bn_lrelu_layer(x_nhwc, w_oihw, gamma, beta, *, stride, ksize,
                         out_dtype):
    """One `conv(..., BN=True, act=LeakyReLU)` layer. x_nhwc: (N, H, W, Cin)."""
    N, H, W, Cin = x_nhwc.shape
    Cout = w_oihw.shape[0]
    pad = ksize // 2
    Ho = (H + 2 * pad - ksize) // stride + 1
    Wo = (W + 2 * pad - ksize) // stride + 1
    Hq = Ho + (ksize - 1) // stride
    Wq = Wo + (ksize - 1) // stride
    P = stride * stride

    # ---- glue: bf16 FIRST, then pad / parity-split (1x bytes, bf16) --------
    xb = x_nhwc.astype(jnp.bfloat16)
    xp = jnp.pad(xb, ((0, 0), (pad, pad), (pad, pad), (0, 0)))
    if stride == 1:
        xplanes = xp[:, None]                 # (N, 1, Hq, Wq, Cin), free
    else:
        planes = []
        for ph in range(stride):
            for pw in range(stride):
                p = xp[:, ph::stride, pw::stride, :][:, :Hq, :Wq, :]
                if p.shape[1] != Hq or p.shape[2] != Wq:
                    p = jnp.pad(p, ((0, 0), (0, Hq - p.shape[1]),
                                    (0, Wq - p.shape[2]), (0, 0)))
                planes.append(p)
        xplanes = jnp.stack(planes, axis=1)   # (N, P, Hq, Wq, Cin) bf16

    # (Cout, Cin, kh, kw) -> (kh*kw, Cin, Cout), bf16 for the MXU.
    # Conv bias is dropped: training-mode BN cancels a per-channel bias
    # exactly (and it is 0 in this module).
    wmat = jnp.transpose(w_oihw, (2, 3, 1, 0)).reshape(ksize * ksize, Cin, Cout)
    wmat = wmat.astype(jnp.bfloat16)

    TH = _pick_row_tile(Ho, Wo)
    HT = Ho // TH
    grid = (N, HT)

    # ---- derived VMEM limit (double-buffered blocks + scratch + margin) ----
    need = 2 * (_vmem_bytes((P, Hq, Wq, Cin), jnp.bfloat16)
                + _vmem_bytes((ksize * ksize, Cin, Cout), jnp.bfloat16)
                + _vmem_bytes((TH, Wo, Cout), jnp.bfloat16)
                + _vmem_bytes((2, Cout), jnp.float32)
                + _vmem_bytes((TH, Wo * Cout), jnp.bfloat16)
                + _vmem_bytes((TH, Wo * Cout), jnp.float32))
    need += _vmem_bytes((TH * Wo, Cout), jnp.float32)   # acc scratch
    need += 4 * 1024 * 1024                             # temporaries / Mosaic
    vmem_limit = int(min(max(need, 32 * 1024 * 1024), 48 * 1024 * 1024))

    cparams = pltpu.CompilerParams(
        dimension_semantics=("parallel", "parallel"),
        vmem_limit_bytes=vmem_limit,
    )

    # ---- pass 1: conv (once) + bf16 activation + packed per-tile stats -----
    x_spec = pl.BlockSpec((1, P, Hq, Wq, Cin), lambda n, t: (n, 0, 0, 0, 0))
    w_spec = pl.BlockSpec((ksize * ksize, Cin, Cout), lambda n, t: (0, 0, 0))

    y_conv, stats = pl.pallas_call(
        functools.partial(_conv_stats_kernel, ksize=ksize, stride=stride,
                          th=TH, wo=Wo, cin=Cin, cout=Cout),
        grid=grid,
        in_specs=[x_spec, w_spec],
        out_specs=[pl.BlockSpec((1, TH, Wo, Cout), lambda n, t: (n, t, 0, 0)),
                   pl.BlockSpec((1, 1, 2, Cout), lambda n, t: (n, t, 0, 0))],
        out_shape=(jax.ShapeDtypeStruct((N, Ho, Wo, Cout), jnp.bfloat16),
                   jax.ShapeDtypeStruct((N, HT, 2, Cout), jnp.float32)),
        scratch_shapes=[pltpu.VMEM((TH * Wo, Cout), jnp.float32)],
        compiler_params=cparams,
    )(xplanes, wmat)

    # ---- tiny finalize in plain JAX: (N*HT, 2, Cout) -> scale/shift --------
    tot = jnp.sum(stats, axis=(0, 1))                    # (2, Cout)
    m = jnp.float32(N * Ho * Wo)
    mean = tot[0] / m
    var = jnp.maximum(tot[1] / m - mean * mean, 0.0)
    rstd = lax.rsqrt(var + BN_EPS)
    scale = gamma.astype(jnp.float32) * rstd             # (Cout,)
    shift = beta.astype(jnp.float32) - mean * scale      # (Cout,)
    # Pre-tile to the lane-dense (Wo*Cout) layout: index w*Cout + c -> chan c.
    scale_t = jnp.tile(scale, Wo).reshape(1, 1, Wo * Cout)
    shift_t = jnp.tile(shift, Wo).reshape(1, 1, Wo * Cout)
    # TODO(synk): BatchNorm2d running_mean/running_var buffer updates (a
    # training-time side effect) are not modeled; forward output unaffected.

    # ---- pass 2: elementwise BN + LeakyReLU on the lane-dense view ---------
    y_flat = y_conv.reshape(N, Ho, Wo * Cout)            # free, row-major
    out = pl.pallas_call(
        _bn_act_kernel,
        grid=grid,
        in_specs=[pl.BlockSpec((1, TH, Wo * Cout), lambda n, t: (n, t, 0)),
                  pl.BlockSpec((1, 1, Wo * Cout), lambda n, t: (0, 0, 0)),
                  pl.BlockSpec((1, 1, Wo * Cout), lambda n, t: (0, 0, 0))],
        out_specs=pl.BlockSpec((1, TH, Wo * Cout), lambda n, t: (n, t, 0)),
        out_shape=jax.ShapeDtypeStruct((N, Ho, Wo * Cout), out_dtype),
        compiler_params=cparams,
    )(y_flat, scale_t, shift_t)

    return out.reshape(N, Ho, Wo, Cout)


# --------------------------------------------------------------------------
# Module wrapper, params, reference
# --------------------------------------------------------------------------
def init_discrim_block_params(key, in_feats, out_feats, ksize):
    """Deterministic parameter init mirroring the PyTorch module __init__."""
    k1, k2 = jax.random.split(key)
    return {
        # layer 1: Conv2d(in_feats -> out_feats, k, stride=1)
        "w1": 0.02 * jax.random.normal(k1, (out_feats, in_feats, ksize, ksize),
                                       jnp.float32),
        "b1": jnp.zeros((out_feats,), jnp.float32),   # kept for fidelity; bias
        "g1": jnp.ones((out_feats,), jnp.float32),    # is cancelled by BN.
        "beta1": jnp.zeros((out_feats,), jnp.float32),
        # layer 2: Conv2d(out_feats -> out_feats, k, stride=2)
        "w2": 0.02 * jax.random.normal(k2, (out_feats, out_feats, ksize, ksize),
                                       jnp.float32),
        "b2": jnp.zeros((out_feats,), jnp.float32),
        "g2": jnp.ones((out_feats,), jnp.float32),
        "beta2": jnp.zeros((out_feats,), jnp.float32),
    }


@functools.partial(jax.jit, static_argnames=("ksize",))
def discrim_block_forward(x_nchw, params, *, ksize=3):
    """Forward pass of discrim_block. Input/output are NCHW like PyTorch."""
    x = jnp.transpose(x_nchw, (0, 2, 3, 1))                      # NCHW -> NHWC
    # Layer-1 output stays bf16 (layer 2 consumes bf16 anyway).
    x = _conv_bn_lrelu_layer(x, params["w1"], params["g1"], params["beta1"],
                             stride=1, ksize=ksize, out_dtype=jnp.bfloat16)
    x = _conv_bn_lrelu_layer(x, params["w2"], params["g2"], params["beta2"],
                             stride=2, ksize=ksize, out_dtype=jnp.float32)
    return jnp.transpose(x, (0, 3, 1, 2))                        # NHWC -> NCHW


def _reference_forward(x_nchw, params, *, ksize=3):
    """Plain-JAX f32 reference (Conv2d + training-mode BN + LeakyReLU)."""
    def layer(x, w, b, g, be, stride):
        y = lax.conv_general_dilated(
            x, w, window_strides=(stride, stride),
            padding=[(ksize // 2, ksize // 2)] * 2,
            dimension_numbers=("NCHW", "OIHW", "NCHW"),
            precision=lax.Precision.HIGHEST)
        y = y + b.reshape(1, -1, 1, 1)
        mean = jnp.mean(y, axis=(0, 2, 3), keepdims=True)
        var = jnp.mean(jnp.square(y - mean), axis=(0, 2, 3), keepdims=True)
        z = (y - mean) * lax.rsqrt(var + BN_EPS)
        z = z * g.reshape(1, -1, 1, 1) + be.reshape(1, -1, 1, 1)
        return jnp.where(z >= 0, z, LEAKY_SLOPE * z)

    x = layer(x_nchw, params["w1"], params["b1"], params["g1"],
              params["beta1"], 1)
    x = layer(x, params["w2"], params["b2"], params["g2"], params["beta2"], 2)
    return x


if __name__ == "__main__":
    in_feats, out_feats, ksize = 4, 8, 3
    N, H, W = 2, 16, 16

    key = jax.random.PRNGKey(0)
    kx, kp = jax.random.split(key)
    x = jax.random.normal(kx, (N, in_feats, H, W), jnp.float32)
    params = init_discrim_block_params(kp, in_feats, out_feats, ksize)

    out = discrim_block_forward(x, params, ksize=ksize)
    out = jax.block_until_ready(out)
    assert out.shape == (N, out_feats, H // 2, W // 2), out.shape

    # Sanity check against the f32 reference (loose tol: bf16 MXU inputs and
    # bf16 intermediate activations).
    ref = _reference_forward(x, params, ksize=ksize)
    assert jnp.allclose(out, ref, atol=1e-1, rtol=1e-1), \
        float(jnp.max(jnp.abs(out - ref)))

    print("KERNEL_OK")
</pallas_src>

<mosaic_0001>
module attributes {stable_mosaic.version = 11 : i64} {
  func.func @_conv_stats_kernel(%arg0: i32, %arg1: i32, %arg2: memref<1x1x18x18x4xbf16, #tpu.memory_space<vmem>>, %arg3: memref<9x4x8xbf16, #tpu.memory_space<vmem>>, %arg4: memref<1x16x16x8xbf16, #tpu.memory_space<vmem>>, %arg5: memref<1x1x2x8xf32, #tpu.memory_space<vmem>>, %arg6: memref<256x8xf32, #tpu.memory_space<vmem>>) attributes {dimension_semantics = [#tpu.dimension_semantics<parallel>, #tpu.dimension_semantics<parallel>], iteration_bounds = array<i64: 2, 1>, scalar_prefetch = 0 : i64, scratch_operands = 1 : i64, tpu.core_type = #tpu.core_type<tc>, window_params = [{transform_indices = @transform_0, window_bounds = array<i64: 1, 1, 18, 18, 4>}, {pipeline_mode = #tpu.pipeline_mode<synchronous>, transform_indices = @transform_1, window_bounds = array<i64: 9, 4, 8>}, {transform_indices = @transform_2, window_bounds = array<i64: 1, 16, 16, 8>}, {transform_indices = @transform_3, window_bounds = array<i64: 1, 1, 2, 8>}]} {
    %c16_i32 = arith.constant 16 : i32
    %0 = arith.muli %arg1, %c16_i32 : i32
    %1 = tpu.assume_multiple %0, 8 : i32
    %cst = arith.constant 0.000000e+00 : f32
    %2 = vector.broadcast %cst : f32 to vector<256x8xf32>
    %c0 = arith.constant 0 : index
    %c0_0 = arith.constant 0 : index
    %3 = vector.load %arg6[%c0, %c0_0] : memref<256x8xf32, #tpu.memory_space<vmem>>, vector<256x8xf32>
    tpu.vector_store %arg6[%c0, %c0_0], %2 {strides = array<i32>} : memref<256x8xf32, #tpu.memory_space<vmem>>, vector<256x8xf32>,
    %c0_i32 = arith.constant 0 : i32
    %4 = arith.addi %1, %c0_i32 : i32
    %c0_1 = arith.constant 0 : index
    %c0_2 = arith.constant 0 : index
    %5 = arith.index_cast %4 : i32 to index
    %c0_3 = arith.constant 0 : index
    %c0_4 = arith.constant 0 : index
    %6 = vector.load %arg2[%c0_1, %c0_2, %5, %c0_3, %c0_4] : memref<1x1x18x18x4xbf16, #tpu.memory_space<vmem>>, vector<1x1x16x16x4xbf16>
    %7 = vector.shape_cast %6 : vector<1x1x16x16x4xbf16> to vector<16x16x4xbf16>
    %c0_5 = arith.constant 0 : index
    %c0_6 = arith.constant 0 : index
    %8 = vector.load %arg6[%c0_5, %c0_6] : memref<256x8xf32, #tpu.memory_space<vmem>>, vector<256x8xf32>
    %9 = vector.shape_cast %7 : vector<16x16x4xbf16> to vector<256x4xbf16>
    %c0_7 = arith.constant 0 : index
    %c0_8 = arith.constant 0 : index
    %c0_9 = arith.constant 0 : index
    %10 = vector.load %arg3[%c0_7, %c0_8, %c0_9] : memref<9x4x8xbf16, #tpu.memory_space<vmem>>, vector<1x4x8xbf16>
    %11 = vector.shape_cast %10 : vector<1x4x8xbf16> to vector<4x8xbf16>
    %cst_10 = arith.constant dense<0.000000e+00> : vector<256x8xf32>
    %12 = tpu.matmul %9, %11, %cst_10 {dimension_numbers = #tpu.dot_dimension_numbers<[1], [0], [0], [1], [0, 0, 1, 1], [], []>} : vector<256x4xbf16>, vector<4x8xbf16>, vector<256x8xf32> -> vector<256x8xf32>
    %13 = arith.addf %8, %12 : vector<256x8xf32>
    %c0_11 = arith.constant 0 : index
    %c0_12 = arith.constant 0 : index
    %14 = vector.load %arg6[%c0_11, %c0_12] : memref<256x8xf32, #tpu.memory_space<vmem>>, vector<256x8xf32>
    tpu.vector_store %arg6[%c0_11, %c0_12], %13 {strides = array<i32>} : memref<256x8xf32, #tpu.memory_space<vmem>>, vector<256x8xf32>,
    %c0_i32_13 = arith.constant 0 : i32
    %15 = arith.addi %1, %c0_i32_13 : i32
    %c0_14 = arith.constant 0 : index
    %c0_15 = arith.constant 0 : index
    %16 = arith.index_cast %15 : i32 to index
    %c1 = arith.constant 1 : index
    %c0_16 = arith.constant 0 : index
    %17 = vector.load %arg2[%c0_14, %c0_15, %16, %c1, %c0_16] : memref<1x1x18x18x4xbf16, #tpu.memory_space<vmem>>, vector<1x1x16x16x4xbf16>
    %18 = vector.shape_cast %17 : vector<1x1x16x16x4xbf16> to vector<16x16x4xbf16>
    %c0_17 = arith.constant 0 : index
    %c0_18 = arith.constant 0 : index
    %19 = vector.load %arg6[%c0_17, %c0_18] : memref<256x8xf32, #tpu.memory_space<vmem>>, vector<256x8xf32>
    %20 = vector.shape_cast %18 : vector<16x16x4xbf16> to vector<256x4xbf16>
    %c1_19 = arith.constant 1 : index
    %c0_20 = arith.constant 0 : index
    %c0_21 = arith.constant 0 : index
    %21 = vector.load %arg3[%c1_19, %c0_20, %c0_21] : memref<9x4x8xbf16, #tpu.memory_space<vmem>>, vector<1x4x8xbf16>
    %22 = vector.shape_cast %21 : vector<1x4x8xbf16> to vector<4x8xbf16>
    %cst_22 = arith.constant dense<0.000000e+00> : vector<256x8xf32>
    %23 = tpu.matmul %20, %22, %cst_22 {dimension_numbers = #tpu.dot_dimension_numbers<[1], [0], [0], [1], [0, 0, 1, 1], [], []>} : vector<256x4xbf16>, vector<4x8xbf16>, vector<256x8xf32> -> vector<256x8xf32>
    %24 = arith.addf %19, %23 : vector<256x8xf32>
    %c0_23 = arith.constant 0 : index
    %c0_24 = arith.constant 0 : index
    %25 = vector.load %arg6[%c0_23, %c0_24] : memref<256x8xf32, #tpu.memory_space<vmem>>, vector<256x8xf32>
    tpu.vector_store %arg6[%c0_23, %c0_24], %24 {strides = array<i32>} : memref<256x8xf32, #tpu.memory_space<vmem>>, vector<256x8xf32>,
    %c0_i32_25 = arith.constant 0 : i32
    %26 = arith.addi %1, %c0_i32_25 : i32
    %c0_26 = arith.constant 0 : index
    %c0_27 = arith.constant 0 : index
    %27 = arith.index_cast %26 : i32 to index
    %c2 = arith.constant 2 : index
    %c0_28 = arith.constant 0 : index
    %28 = vector.load %arg2[%c0_26, %c0_27, %27, %c2, %c0_28] : memref<1x1x18x18x4xbf16, #tpu.memory_space<vmem>>, vector<1x1x16x16x4xbf16>
    %29 = vector.shape_cast %28 : vector<1x1x16x16x4xbf16> to vector<16x16x4xbf16>
    %c0_29 = arith.constant 0 : index
    %c0_30 = arith.constant 0 : index
    %30 = vector.load %arg6[%c0_29, %c0_30] : memref<256x8xf32, #tpu.memory_space<vmem>>, vector<256x8xf32>
    %31 = vector.shape_cast %29 : vector<16x16x4xbf16> to vector<256x4xbf16>
    %c2_31 = arith.constant 2 : index
    %c0_32 = arith.constant 0 : index
    %c0_33 = arith.constant 0 : index
    %32 = vector.load %arg3[%c2_31, %c0_32, %c0_33] : memref<9x4x8xbf16, #tpu.memory_space<vmem>>, vector<1x4x8xbf16>
    %33 = vector.shape_cast %32 : vector<1x4x8xbf16> to vector<4x8xbf16>
    %cst_34 = arith.constant dense<0.000000e+00> : vector<256x8xf32>
    %34 = tpu.matmul %31, %33, %cst_34 {dimension_numbers = #tpu.dot_dimension_numbers<[1], [0], [0], [1], [0, 0, 1, 1], [], []>} : vector<256x4xbf16>, vector<4x8xbf16>, vector<256x8xf32> -> vector<256x8xf32>
    %35 = arith.addf %30, %34 : vector<256x8xf32>
    %c0_35 = arith.constant 0 : index
    %c0_36 = arith.constant 0 : index
    %36 = vector.load %arg6[%c0_35, %c0_36] : memref<256x8xf32, #tpu.memory_space<vmem>>, vector<256x8xf32>
    tpu.vector_store %arg6[%c0_35, %c0_36], %35 {strides = array<i32>} : memref<256x8xf32, #tpu.memory_space<vmem>>, vector<256x8xf32>,
    %c1_i32 = arith.constant 1 : i32
    %37 = arith.addi %1, %c1_i32 : i32
    %c0_37 = arith.constant 0 : index
    %c0_38 = arith.constant 0 : index
    %38 = arith.index_cast %37 : i32 to index
    %c0_39 = arith.constant 0 : index
    %c0_40 = arith.constant 0 : index
    %39 = vector.load %arg2[%c0_37, %c0_38, %38, %c0_39, %c0_40] : memref<1x1x18x18x4xbf16, #tpu.memory_space<vmem>>, vector<1x1x16x16x4xbf16>
    %40 = vector.shape_cast %39 : vector<1x1x16x16x4xbf16> to vector<16x16x4xbf16>
    %c0_41 = arith.constant 0 : index
    %c0_42 = arith.constant 0 : index
    %41 = vector.load %arg6[%c0_41, %c0_42] : memref<256x8xf32, #tpu.memory_space<vmem>>, vector<256x8xf32>
    %42 = vector.shape_cast %40 : vector<16x16x4xbf16> to vector<256x4xbf16>
    %c3 = arith.constant 3 : index
    %c0_43 = arith.constant 0 : index
    %c0_44 = arith.constant 0 : index
    %43 = vector.load %arg3[%c3, %c0_43, %c0_44] : memref<9x4x8xbf16, #tpu.memory_space<vmem>>, vector<1x4x8xbf16>
    %44 = vector.shape_cast %43 : vector<1x4x8xbf16> to vector<4x8xbf16>
    %cst_45 = arith.constant dense<0.000000e+00> : vector<256x8xf32>
    %45 = tpu.matmul %42, %44, %cst_45 {dimension_numbers = #tpu.dot_dimension_numbers<[1], [0], [0], [1], [0, 0, 1, 1], [], []>} : vector<256x4xbf16>, vector<4x8xbf16>, vector<256x8xf32> -> vector<256x8xf32>
    %46 = arith.addf %41, %45 : vector<256x8xf32>
    %c0_46 = arith.constant 0 : index
    %c0_47 = arith.constant 0 : index
    %47 = vector.load %arg6[%c0_46, %c0_47] : memref<256x8xf32, #tpu.memory_space<vmem>>, vector<256x8xf32>
    tpu.vector_store %arg6[%c0_46, %c0_47], %46 {strides = array<i32>} : memref<256x8xf32, #tpu.memory_space<vmem>>, vector<256x8xf32>,
    %c1_i32_48 = arith.constant 1 : i32
    %48 = arith.addi %1, %c1_i32_48 : i32
    %c0_49 = arith.constant 0 : index
    %c0_50 = arith.constant 0 : index
    %49 = arith.index_cast %48 : i32 to index
    %c1_51 = arith.constant 1 : index
    %c0_52 = arith.constant 0 : index
    %50 = vector.load %arg2[%c0_49, %c0_50, %49, %c1_51, %c0_52] : memref<1x1x18x18x4xbf16, #tpu.memory_space<vmem>>, vector<1x1x16x16x4xbf16>
    %51 = vector.shape_cast %50 : vector<1x1x16x16x4xbf16> to vector<16x16x4xbf16>
    %c0_53 = arith.constant 0 : index
    %c0_54 = arith.constant 0 : index
    %52 = vector.load %arg6[%c0_53, %c0_54] : memref<256x8xf32, #tpu.memory_space<vmem>>, vector<256x8xf32>
    %53 = vector.shape_cast %51 : vector<16x16x4xbf16> to vector<256x4xbf16>
    %c4 = arith.constant 4 : index
    %c0_55 = arith.constant 0 : index
    %c0_56 = arith.constant 0 : index
    %54 = vector.load %arg3[%c4, %c0_55, %c0_56] : memref<9x4x8xbf16, #tpu.memory_space<vmem>>, vector<1x4x8xbf16>
    %55 = vector.shape_cast %54 : vector<1x4x8xbf16> to vector<4x8xbf16>
    %cst_57 = arith.constant dense<0.000000e+00> : vector<256x8xf32>
    %56 = tpu.matmul %53, %55, %cst_57 {dimension_numbers = #tpu.dot_dimension_numbers<[1], [0], [0], [1], [0, 0, 1, 1], [], []>} : vector<256x4xbf16>, vector<4x8xbf16>, vector<256x8xf32> -> vector<256x8xf32>
    %57 = arith.addf %52, %56 : vector<256x8xf32>
    %c0_58 = arith.constant 0 : index
    %c0_59 = arith.constant 0 : index
    %58 = vector.load %arg6[%c0_58, %c0_59] : memref<256x8xf32, #tpu.memory_space<vmem>>, vector<256x8xf32>
    tpu.vector_store %arg6[%c0_58, %c0_59], %57 {strides = array<i32>} : memref<256x8xf32, #tpu.memory_space<vmem>>, vector<256x8xf32>,
    %c1_i32_60 = arith.constant 1 : i32
    %59 = arith.addi %1, %c1_i32_60 : i32
    %c0_61 = arith.constant 0 : index
    %c0_62 = arith.constant 0 : index
    %60 = arith.index_cast %59 : i32 to index
    %c2_63 = arith.constant 2 : index
    %c0_64 = arith.constant 0 : index
    %61 = vector.load %arg2[%c0_61, %c0_62, %60, %c2_63, %c0_64] : memref<1x1x18x18x4xbf16, #tpu.memory_space<vmem>>, vector<1x1x16x16x4xbf16>
    %62 = vector.shape_cast %61 : vector<1x1x16x16x4xbf16> to vector<16x16x4xbf16>
    %c0_65 = arith.constant 0 : index
    %c0_66 = arith.constant 0 : index
    %63 = vector.load %arg6[%c0_65, %c0_66] : memref<256x8xf32, #tpu.memory_space<vmem>>, vector<256x8xf32>
    %64 = vector.shape_cast %62 : vector<16x16x4xbf16> to vector<256x4xbf16>
    %c5 = arith.constant 5 : index
    %c0_67 = arith.constant 0 : index
    %c0_68 = arith.constant 0 : index
    %65 = vector.load %arg3[%c5, %c0_67, %c0_68] : memref<9x4x8xbf16, #tpu.memory_space<vmem>>, vector<1x4x8xbf16>
    %66 = vector.shape_cast %65 : vector<1x4x8xbf16> to vector<4x8xbf16>
    %cst_69 = arith.constant dense<0.000000e+00> : vector<256x8xf32>
    %67 = tpu.matmul %64, %66, %cst_69 {dimension_numbers = #tpu.dot_dimension_numbers<[1], [0], [0], [1], [0, 0, 1, 1], [], []>} : vector<256x4xbf16>, vector<4x8xbf16>, vector<256x8xf32> -> vector<256x8xf32>
    %68 = arith.addf %63, %67 : vector<256x8xf32>
    %c0_70 = arith.constant 0 : index
    %c0_71 = arith.constant 0 : index
    %69 = vector.load %arg6[%c0_70, %c0_71] : memref<256x8xf32, #tpu.memory_space<vmem>>, vector<256x8xf32>
    tpu.vector_store %arg6[%c0_70, %c0_71], %68 {strides = array<i32>} : memref<256x8xf32, #tpu.memory_space<vmem>>, vector<256x8xf32>,
    %c2_i32 = arith.constant 2 : i32
    %70 = arith.addi %1, %c2_i32 : i32
    %c0_72 = arith.constant 0 : index
    %c0_73 = arith.constant 0 : index
    %71 = arith.index_cast %70 : i32 to index
    %c0_74 = arith.constant 0 : index
    %c0_75 = arith.constant 0 : index
    %72 = vector.load %arg2[%c0_72, %c0_73, %71, %c0_74, %c0_75] : memref<1x1x18x18x4xbf16, #tpu.memory_space<vmem>>, vector<1x1x16x16x4xbf16>
    %73 = vector.shape_cast %72 : vector<1x1x16x16x4xbf16> to vector<16x16x4xbf16>
    %c0_76 = arith.constant 0 : index
    %c0_77 = arith.constant 0 : index
    %74 = vector.load %arg6[%c0_76, %c0_77] : memref<256x8xf32, #tpu.memory_space<vmem>>, vector<256x8xf32>
    %75 = vector.shape_cast %73 : vector<16x16x4xbf16> to vector<256x4xbf16>
    %c6 = arith.constant 6 : index
    %c0_78 = arith.constant 0 : index
    %c0_79 = arith.constant 0 : index
    %76 = vector.load %arg3[%c6, %c0_78, %c0_79] : memref<9x4x8xbf16, #tpu.memory_space<vmem>>, vector<1x4x8xbf16>
    %77 = vector.shape_cast %76 : vector<1x4x8xbf16> to vector<4x8xbf16>
    %cst_80 = arith.constant dense<0.000000e+00> : vector<256x8xf32>
    %78 = tpu.matmul %75, %77, %cst_80 {dimension_numbers = #tpu.dot_dimension_numbers<[1], [0], [0], [1], [0, 0, 1, 1], [], []>} : vector<256x4xbf16>, vector<4x8xbf16>, vector<256x8xf32> -> vector<256x8xf32>
    %79 = arith.addf %74, %78 : vector<256x8xf32>
    %c0_81 = arith.constant 0 : index
    %c0_82 = arith.constant 0 : index
    %80 = vector.load %arg6[%c0_81, %c0_82] : memref<256x8xf32, #tpu.memory_space<vmem>>, vector<256x8xf32>
    tpu.vector_store %arg6[%c0_81, %c0_82], %79 {strides = array<i32>} : memref<256x8xf32, #tpu.memory_space<vmem>>, vector<256x8xf32>,
    %c2_i32_83 = arith.constant 2 : i32
    %81 = arith.addi %1, %c2_i32_83 : i32
    %c0_84 = arith.constant 0 : index
    %c0_85 = arith.constant 0 : index
    %82 = arith.index_cast %81 : i32 to index
    %c1_86 = arith.constant 1 : index
    %c0_87 = arith.constant 0 : index
    %83 = vector.load %arg2[%c0_84, %c0_85, %82, %c1_86, %c0_87] : memref<1x1x18x18x4xbf16, #tpu.memory_space<vmem>>, vector<1x1x16x16x4xbf16>
    %84 = vector.shape_cast %83 : vector<1x1x16x16x4xbf16> to vector<16x16x4xbf16>
    %c0_88 = arith.constant 0 : index
    %c0_89 = arith.constant 0 : index
    %85 = vector.load %arg6[%c0_88, %c0_89] : memref<256x8xf32, #tpu.memory_space<vmem>>, vector<256x8xf32>
    %86 = vector.shape_cast %84 : vector<16x16x4xbf16> to vector<256x4xbf16>
    %c7 = arith.constant 7 : index
    %c0_90 = arith.constant 0 : index
    %c0_91 = arith.constant 0 : index
    %87 = vector.load %arg3[%c7, %c0_90, %c0_91] : memref<9x4x8xbf16, #tpu.memory_space<vmem>>, vector<1x4x8xbf16>
    %88 = vector.shape_cast %87 : vector<1x4x8xbf16> to vector<4x8xbf16>
    %cst_92 = arith.constant dense<0.000000e+00> : vector<256x8xf32>
    %89 = tpu.matmul %86, %88, %cst_92 {dimension_numbers = #tpu.dot_dimension_numbers<[1], [0], [0], [1], [0, 0, 1, 1], [], []>} : vector<256x4xbf16>, vector<4x8xbf16>, vector<256x8xf32> -> vector<256x8xf32>
    %90 = arith.addf %85, %89 : vector<256x8xf32>
    %c0_93 = arith.constant 0 : index
    %c0_94 = arith.constant 0 : index
    %91 = vector.load %arg6[%c0_93, %c0_94] : memref<256x8xf32, #tpu.memory_space<vmem>>, vector<256x8xf32>
    tpu.vector_store %arg6[%c0_93, %c0_94], %90 {strides = array<i32>} : memref<256x8xf32, #tpu.memory_space<vmem>>, vector<256x8xf32>,
    %c2_i32_95 = arith.constant 2 : i32
    %92 = arith.addi %1, %c2_i32_95 : i32
    %c0_96 = arith.constant 0 : index
    %c0_97 = arith.constant 0 : index
    %93 = arith.index_cast %92 : i32 to index
    %c2_98 = arith.constant 2 : index
    %c0_99 = arith.constant 0 : index
    %94 = vector.load %arg2[%c0_96, %c0_97, %93, %c2_98, %c0_99] : memref<1x1x18x18x4xbf16, #tpu.memory_space<vmem>>, vector<1x1x16x16x4xbf16>
    %95 = vector.shape_cast %94 : vector<1x1x16x16x4xbf16> to vector<16x16x4xbf16>
    %c0_100 = arith.constant 0 : index
    %c0_101 = arith.constant 0 : index
    %96 = vector.load %arg6[%c0_100, %c0_101] : memref<256x8xf32, #tpu.memory_space<vmem>>, vector<256x8xf32>
    %97 = vector.shape_cast %95 : vector<16x16x4xbf16> to vector<256x4xbf16>
    %c8 = arith.constant 8 : index
    %c0_102 = arith.constant 0 : index
    %c0_103 = arith.constant 0 : index
    %98 = vector.load %arg3[%c8, %c0_102, %c0_103] : memref<9x4x8xbf16, #tpu.memory_space<vmem>>, vector<1x4x8xbf16>
    %99 = vector.shape_cast %98 : vector<1x4x8xbf16> to vector<4x8xbf16>
    %cst_104 = arith.constant dense<0.000000e+00> : vector<256x8xf32>
    %100 = tpu.matmul %97, %99, %cst_104 {dimension_numbers = #tpu.dot_dimension_numbers<[1], [0], [0], [1], [0, 0, 1, 1], [], []>} : vector<256x4xbf16>, vector<4x8xbf16>, vector<256x8xf32> -> vector<256x8xf32>
    %101 = arith.addf %96, %100 : vector<256x8xf32>
    %c0_105 = arith.constant 0 : index
    %c0_106 = arith.constant 0 : index
    %102 = vector.load %arg6[%c0_105, %c0_106] : memref<256x8xf32, #tpu.memory_space<vmem>>, vector<256x8xf32>
    tpu.vector_store %arg6[%c0_105, %c0_106], %101 {strides = array<i32>} : memref<256x8xf32, #tpu.memory_space<vmem>>, vector<256x8xf32>,
    %c0_107 = arith.constant 0 : index
    %c0_108 = arith.constant 0 : index
    %103 = vector.load %arg6[%c0_107, %c0_108] : memref<256x8xf32, #tpu.memory_space<vmem>>, vector<256x8xf32>
    %cst_109 = arith.constant dense<0.000000e+00> : vector<8xf32>
    %104 = vector.multi_reduction <add>, %103, %cst_109 [0] : vector<256x8xf32> to vector<8xf32>
    %105 = vector.shape_cast %104 : vector<8xf32> to vector<1x8xf32>
    %106 = arith.mulf %103, %103 : vector<256x8xf32>
    %cst_110 = arith.constant dense<0.000000e+00> : vector<8xf32>
    %107 = vector.multi_reduction <add>, %106, %cst_110 [0] : vector<256x8xf32> to vector<8xf32>
    %108 = vector.shape_cast %107 : vector<8xf32> to vector<1x8xf32>
    %109 = tpu.iota {dimensions = array<i32: 0>} : vector<2x1xi32>
    %c0_i32_111 = arith.constant 0 : i32
    %110 = vector.broadcast %c0_i32_111 : i32 to vector<2x1xi32>
    %111 = arith.cmpi eq, %109, %110 : vector<2x1xi32>
    %112 = vector.shape_cast %111 : vector<2x1xi1> to vector<2x1xi1>
    %113 = vector.broadcast %112 : vector<2x1xi1> to vector<2x8xi1>
    %114 = vector.shape_cast %105 : vector<1x8xf32> to vector<1x8xf32>
    %115 = vector.broadcast %114 : vector<1x8xf32> to vector<2x8xf32>
    %116 = vector.shape_cast %108 : vector<1x8xf32> to vector<1x8xf32>
    %117 = vector.broadcast %116 : vector<1x8xf32> to vector<2x8xf32>
    %118 = arith.select %113, %115, %117 : vector<2x8xi1>, vector<2x8xf32>
    %119 = vector.shape_cast %118 : vector<2x8xf32> to vector<1x1x2x8xf32>
    %c0_112 = arith.constant 0 : index
    %c0_113 = arith.constant 0 : index
    %c0_114 = arith.constant 0 : index
    %c0_115 = arith.constant 0 : index
    %120 = vector.load %arg5[%c0_112, %c0_113, %c0_114, %c0_115] : memref<1x1x2x8xf32, #tpu.memory_space<vmem>>, vector<1x1x2x8xf32>
    tpu.vector_store %arg5[%c0_112, %c0_113, %c0_114, %c0_115], %119 {strides = array<i32>} : memref<1x1x2x8xf32, #tpu.memory_space<vmem>>, vector<1x1x2x8xf32>,
    %121 = vector.shape_cast %103 : vector<256x8xf32> to vector<1x16x16x8xf32>
    %122 = arith.truncf %121 : vector<1x16x16x8xf32> to vector<1x16x16x8xbf16>
    %c0_116 = arith.constant 0 : index
    %c0_117 = arith.constant 0 : index
    %c0_118 = arith.constant 0 : index
    %c0_119 = arith.constant 0 : index
    %123 = vector.load %arg4[%c0_116, %c0_117, %c0_118, %c0_119] : memref<1x16x16x8xbf16, #tpu.memory_space<vmem>>, vector<1x16x16x8xbf16>
    tpu.vector_store %arg4[%c0_116, %c0_117, %c0_118, %c0_119], %122 {strides = array<i32>} : memref<1x16x16x8xbf16, #tpu.memory_space<vmem>>, vector<1x16x16x8xbf16>,
    return
  }
  func.func @transform_0(%arg0: i32, %arg1: i32) -> (i32, i32, i32, i32, i32) {
    %c0_i32 = arith.constant 0 : i32
    %c0_i32_0 = arith.constant 0 : i32
    %c0_i32_1 = arith.constant 0 : i32
    %c0_i32_2 = arith.constant 0 : i32
    %c0_i32_3 = arith.constant 0 : i32
    return %arg0, %c0_i32, %c0_i32_0, %c0_i32_1, %c0_i32_2 : i32, i32, i32, i32, i32
  }
  func.func @transform_1(%arg0: i32, %arg1: i32) -> (i32, i32, i32) {
    %c0_i32 = arith.constant 0 : i32
    %c0_i32_0 = arith.constant 0 : i32
    %c0_i32_1 = arith.constant 0 : i32
    %c0_i32_2 = arith.constant 0 : i32
    return %c0_i32, %c0_i32_0, %c0_i32_1 : i32, i32, i32
  }
  func.func @transform_2(%arg0: i32, %arg1: i32) -> (i32, i32, i32, i32) {
    %c0_i32 = arith.constant 0 : i32
    %c0_i32_0 = arith.constant 0 : i32
    %c0_i32_1 = arith.constant 0 : i32
    return %arg0, %arg1, %c0_i32, %c0_i32_0 : i32, i32, i32, i32
  }
  func.func @transform_3(%arg0: i32, %arg1: i32) -> (i32, i32, i32, i32) {
    %c0_i32 = arith.constant 0 : i32
    %c0_i32_0 = arith.constant 0 : i32
    %c0_i32_1 = arith.constant 0 : i32
    return %arg0, %arg1, %c0_i32, %c0_i32_0 : i32, i32, i32, i32
  }
}

module attributes {stable_mosaic.version = 11 : i64} {
  func.func @_bn_act_kernel(%arg0: i32, %arg1: i32, %arg2: memref<1x16x128xbf16, #tpu.memory_space<vmem>>, %arg3: memref<1x1x128xf32, #tpu.memory_space<vmem>>, %arg4: memref<1x1x128xf32, #tpu.memory_space<vmem>>, %arg5: memref<1x16x128xbf16, #tpu.memory_space<vmem>>) attributes {dimension_semantics = [#tpu.dimension_semantics<parallel>, #tpu.dimension_semantics<parallel>], iteration_bounds = array<i64: 2, 1>, scalar_prefetch = 0 : i64, scratch_operands = 0 : i64, tpu.core_type = #tpu.core_type<tc>, window_params = [{transform_indices = @transform_0, window_bounds = array<i64: 1, 16, 128>}, {pipeline_mode = #tpu.pipeline_mode<synchronous>, transform_indices = @transform_1, window_bounds = array<i64: 1, 1, 128>}, {pipeline_mode = #tpu.pipeline_mode<synchronous>, transform_indices = @transform_2, window_bounds = array<i64: 1, 1, 128>}, {transform_indices = @transform_3, window_bounds = array<i64: 1, 16, 128>}]} {
    %c0 = arith.constant 0 : index
    %c0_0 = arith.constant 0 : index
    %c0_1 = arith.constant 0 : index
    %0 = vector.load %arg2[%c0, %c0_0, %c0_1] : memref<1x16x128xbf16, #tpu.memory_space<vmem>>, vector<1x16x128xbf16>
    %1 = arith.extf %0 : vector<1x16x128xbf16> to vector<1x16x128xf32>
    %c0_2 = arith.constant 0 : index
    %c0_3 = arith.constant 0 : index
    %c0_4 = arith.constant 0 : index
    %2 = vector.load %arg3[%c0_2, %c0_3, %c0_4] : memref<1x1x128xf32, #tpu.memory_space<vmem>>, vector<1x1x128xf32>
    %3 = vector.broadcast %2 : vector<1x1x128xf32> to vector<1x16x128xf32>
    %4 = arith.mulf %1, %3 : vector<1x16x128xf32>
    %c0_5 = arith.constant 0 : index
    %c0_6 = arith.constant 0 : index
    %c0_7 = arith.constant 0 : index
    %5 = vector.load %arg4[%c0_5, %c0_6, %c0_7] : memref<1x1x128xf32, #tpu.memory_space<vmem>>, vector<1x1x128xf32>
    %6 = vector.broadcast %5 : vector<1x1x128xf32> to vector<1x16x128xf32>
    %7 = arith.addf %4, %6 : vector<1x16x128xf32>
    %cst = arith.constant 0.000000e+00 : f32
    %8 = vector.broadcast %cst : f32 to vector<1x16x128xf32>
    %9 = arith.cmpf oge, %7, %8 : vector<1x16x128xf32>
    %cst_8 = arith.constant 0.00999999977 : f32
    %10 = vector.broadcast %cst_8 : f32 to vector<1x16x128xf32>
    %11 = arith.mulf %10, %7 : vector<1x16x128xf32>
    %12 = arith.select %9, %7, %11 : vector<1x16x128xi1>, vector<1x16x128xf32>
    %13 = arith.truncf %12 : vector<1x16x128xf32> to vector<1x16x128xbf16>
    %c0_9 = arith.constant 0 : index
    %c0_10 = arith.constant 0 : index
    %c0_11 = arith.constant 0 : index
    %14 = vector.load %arg5[%c0_9, %c0_10, %c0_11] : memref<1x16x128xbf16, #tpu.memory_space<vmem>>, vector<1x16x128xbf16>
    tpu.vector_store %arg5[%c0_9, %c0_10, %c0_11], %13 {strides = array<i32>} : memref<1x16x128xbf16, #tpu.memory_space<vmem>>, vector<1x16x128xbf16>,
    return
  }
  func.func @transform_0(%arg0: i32, %arg1: i32) -> (i32, i32, i32) {
    %c0_i32 = arith.constant 0 : i32
    %c0_i32_0 = arith.constant 0 : i32
    return %arg0, %arg1, %c0_i32 : i32, i32, i32
  }
  func.func @transform_1(%arg0: i32, %arg1: i32) -> (i32, i32, i32) {
    %c0_i32 = arith.constant 0 : i32
    %c0_i32_0 = arith.constant 0 : i32
    %c0_i32_1 = arith.constant 0 : i32
    %c0_i32_2 = arith.constant 0 : i32
    return %c0_i32, %c0_i32_0, %c0_i32_1 : i32, i32, i32
  }
  func.func @transform_2(%arg0: i32, %arg1: i32) -> (i32, i32, i32) {
    %c0_i32 = arith.constant 0 : i32
    %c0_i32_0 = arith.constant 0 : i32
    %c0_i32_1 = arith.constant 0 : i32
    %c0_i32_2 = arith.constant 0 : i32
    return %c0_i32, %c0_i32_0, %c0_i32_1 : i32, i32, i32
  }
  func.func @transform_3(%arg0: i32, %arg1: i32) -> (i32, i32, i32) {
    %c0_i32 = arith.constant 0 : i32
    %c0_i32_0 = arith.constant 0 : i32
    return %arg0, %arg1, %c0_i32 : i32, i32, i32
  }
}

module attributes {stable_mosaic.version = 11 : i64} {
  func.func @_conv_stats_kernel(%arg0: i32, %arg1: i32, %arg2: memref<1x4x9x9x8xbf16, #tpu.memory_space<vmem>>, %arg3: memref<9x8x8xbf16, #tpu.memory_space<vmem>>, %arg4: memref<1x8x8x8xbf16, #tpu.memory_space<vmem>>, %arg5: memref<1x1x2x8xf32, #tpu.memory_space<vmem>>, %arg6: memref<64x8xf32, #tpu.memory_space<vmem>>) attributes {dimension_semantics = [#tpu.dimension_semantics<parallel>, #tpu.dimension_semantics<parallel>], iteration_bounds = array<i64: 2, 1>, scalar_prefetch = 0 : i64, scratch_operands = 1 : i64, tpu.core_type = #tpu.core_type<tc>, window_params = [{transform_indices = @transform_0, window_bounds = array<i64: 1, 4, 9, 9, 8>}, {pipeline_mode = #tpu.pipeline_mode<synchronous>, transform_indices = @transform_1, window_bounds = array<i64: 9, 8, 8>}, {transform_indices = @transform_2, window_bounds = array<i64: 1, 8, 8, 8>}, {transform_indices = @transform_3, window_bounds = array<i64: 1, 1, 2, 8>}]} {
    %c8_i32 = arith.constant 8 : i32
    %0 = arith.muli %arg1, %c8_i32 : i32
    %1 = tpu.assume_multiple %0, 8 : i32
    %cst = arith.constant 0.000000e+00 : f32
    %2 = vector.broadcast %cst : f32 to vector<64x8xf32>
    %c0 = arith.constant 0 : index
    %c0_0 = arith.constant 0 : index
    %3 = vector.load %arg6[%c0, %c0_0] : memref<64x8xf32, #tpu.memory_space<vmem>>, vector<64x8xf32>
    tpu.vector_store %arg6[%c0, %c0_0], %2 {strides = array<i32>} : memref<64x8xf32, #tpu.memory_space<vmem>>, vector<64x8xf32>,
    %c0_i32 = arith.constant 0 : i32
    %4 = arith.addi %1, %c0_i32 : i32
    %c0_1 = arith.constant 0 : index
    %c0_2 = arith.constant 0 : index
    %5 = arith.index_cast %4 : i32 to index
    %c0_3 = arith.constant 0 : index
    %c0_4 = arith.constant 0 : index
    %6 = vector.load %arg2[%c0_1, %c0_2, %5, %c0_3, %c0_4] : memref<1x4x9x9x8xbf16, #tpu.memory_space<vmem>>, vector<1x1x8x8x8xbf16>
    %7 = vector.shape_cast %6 : vector<1x1x8x8x8xbf16> to vector<8x8x8xbf16>
    %c0_5 = arith.constant 0 : index
    %c0_6 = arith.constant 0 : index
    %8 = vector.load %arg6[%c0_5, %c0_6] : memref<64x8xf32, #tpu.memory_space<vmem>>, vector<64x8xf32>
    %9 = vector.shape_cast %7 : vector<8x8x8xbf16> to vector<64x8xbf16>
    %c0_7 = arith.constant 0 : index
    %c0_8 = arith.constant 0 : index
    %c0_9 = arith.constant 0 : index
    %10 = vector.load %arg3[%c0_7, %c0_8, %c0_9] : memref<9x8x8xbf16, #tpu.memory_space<vmem>>, vector<1x8x8xbf16>
    %11 = vector.shape_cast %10 : vector<1x8x8xbf16> to vector<8x8xbf16>
    %cst_10 = arith.constant dense<0.000000e+00> : vector<64x8xf32>
    %12 = tpu.matmul %9, %11, %cst_10 {dimension_numbers = #tpu.dot_dimension_numbers<[1], [0], [0], [1], [0, 0, 1, 1], [], []>} : vector<64x8xbf16>, vector<8x8xbf16>, vector<64x8xf32> -> vector<64x8xf32>
    %13 = arith.addf %8, %12 : vector<64x8xf32>
    %c0_11 = arith.constant 0 : index
    %c0_12 = arith.constant 0 : index
    %14 = vector.load %arg6[%c0_11, %c0_12] : memref<64x8xf32, #tpu.memory_space<vmem>>, vector<64x8xf32>
    tpu.vector_store %arg6[%c0_11, %c0_12], %13 {strides = array<i32>} : memref<64x8xf32, #tpu.memory_space<vmem>>, vector<64x8xf32>,
    %c0_i32_13 = arith.constant 0 : i32
    %15 = arith.addi %1, %c0_i32_13 : i32
    %c0_14 = arith.constant 0 : index
    %c1 = arith.constant 1 : index
    %16 = arith.index_cast %15 : i32 to index
    %c0_15 = arith.constant 0 : index
    %c0_16 = arith.constant 0 : index
    %17 = vector.load %arg2[%c0_14, %c1, %16, %c0_15, %c0_16] : memref<1x4x9x9x8xbf16, #tpu.memory_space<vmem>>, vector<1x1x8x8x8xbf16>
    %18 = vector.shape_cast %17 : vector<1x1x8x8x8xbf16> to vector<8x8x8xbf16>
    %c0_17 = arith.constant 0 : index
    %c0_18 = arith.constant 0 : index
    %19 = vector.load %arg6[%c0_17, %c0_18] : memref<64x8xf32, #tpu.memory_space<vmem>>, vector<64x8xf32>
    %20 = vector.shape_cast %18 : vector<8x8x8xbf16> to vector<64x8xbf16>
    %c1_19 = arith.constant 1 : index
    %c0_20 = arith.constant 0 : index
    %c0_21 = arith.constant 0 : index
    %21 = vector.load %arg3[%c1_19, %c0_20, %c0_21] : memref<9x8x8xbf16, #tpu.memory_space<vmem>>, vector<1x8x8xbf16>
    %22 = vector.shape_cast %21 : vector<1x8x8xbf16> to vector<8x8xbf16>
    %cst_22 = arith.constant dense<0.000000e+00> : vector<64x8xf32>
    %23 = tpu.matmul %20, %22, %cst_22 {dimension_numbers = #tpu.dot_dimension_numbers<[1], [0], [0], [1], [0, 0, 1, 1], [], []>} : vector<64x8xbf16>, vector<8x8xbf16>, vector<64x8xf32> -> vector<64x8xf32>
    %24 = arith.addf %19, %23 : vector<64x8xf32>
    %c0_23 = arith.constant 0 : index
    %c0_24 = arith.constant 0 : index
    %25 = vector.load %arg6[%c0_23, %c0_24] : memref<64x8xf32, #tpu.memory_space<vmem>>, vector<64x8xf32>
    tpu.vector_store %arg6[%c0_23, %c0_24], %24 {strides = array<i32>} : memref<64x8xf32, #tpu.memory_space<vmem>>, vector<64x8xf32>,
    %c0_i32_25 = arith.constant 0 : i32
    %26 = arith.addi %1, %c0_i32_25 : i32
    %c0_26 = arith.constant 0 : index
    %c0_27 = arith.constant 0 : index
    %27 = arith.index_cast %26 : i32 to index
    %c1_28 = arith.constant 1 : index
    %c0_29 = arith.constant 0 : index
    %28 = vector.load %arg2[%c0_26, %c0_27, %27, %c1_28, %c0_29] : memref<1x4x9x9x8xbf16, #tpu.memory_space<vmem>>, vector<1x1x8x8x8xbf16>
    %29 = vector.shape_cast %28 : vector<1x1x8x8x8xbf16> to vector<8x8x8xbf16>
    %c0_30 = arith.constant 0 : index
    %c0_31 = arith.constant 0 : index
    %30 = vector.load %arg6[%c0_30, %c0_31] : memref<64x8xf32, #tpu.memory_space<vmem>>, vector<64x8xf32>
    %31 = vector.shape_cast %29 : vector<8x8x8xbf16> to vector<64x8xbf16>
    %c2 = arith.constant 2 : index
    %c0_32 = arith.constant 0 : index
    %c0_33 = arith.constant 0 : index
    %32 = vector.load %arg3[%c2, %c0_32, %c0_33] : memref<9x8x8xbf16, #tpu.memory_space<vmem>>, vector<1x8x8xbf16>
    %33 = vector.shape_cast %32 : vector<1x8x8xbf16> to vector<8x8xbf16>
    %cst_34 = arith.constant dense<0.000000e+00> : vector<64x8xf32>
    %34 = tpu.matmul %31, %33, %cst_34 {dimension_numbers = #tpu.dot_dimension_numbers<[1], [0], [0], [1], [0, 0, 1, 1], [], []>} : vector<64x8xbf16>, vector<8x8xbf16>, vector<64x8xf32> -> vector<64x8xf32>
    %35 = arith.addf %30, %34 : vector<64x8xf32>
    %c0_35 = arith.constant 0 : index
    %c0_36 = arith.constant 0 : index
    %36 = vector.load %arg6[%c0_35, %c0_36] : memref<64x8xf32, #tpu.memory_space<vmem>>, vector<64x8xf32>
    tpu.vector_store %arg6[%c0_35, %c0_36], %35 {strides = array<i32>} : memref<64x8xf32, #tpu.memory_space<vmem>>, vector<64x8xf32>,
    %c0_i32_37 = arith.constant 0 : i32
    %37 = arith.addi %1, %c0_i32_37 : i32
    %c0_38 = arith.constant 0 : index
    %c2_39 = arith.constant 2 : index
    %38 = arith.index_cast %37 : i32 to index
    %c0_40 = arith.constant 0 : index
    %c0_41 = arith.constant 0 : index
    %39 = vector.load %arg2[%c0_38, %c2_39, %38, %c0_40, %c0_41] : memref<1x4x9x9x8xbf16, #tpu.memory_space<vmem>>, vector<1x1x8x8x8xbf16>
    %40 = vector.shape_cast %39 : vector<1x1x8x8x8xbf16> to vector<8x8x8xbf16>
    %c0_42 = arith.constant 0 : index
    %c0_43 = arith.constant 0 : index
    %41 = vector.load %arg6[%c0_42, %c0_43] : memref<64x8xf32, #tpu.memory_space<vmem>>, vector<64x8xf32>
    %42 = vector.shape_cast %40 : vector<8x8x8xbf16> to vector<64x8xbf16>
    %c3 = arith.constant 3 : index
    %c0_44 = arith.constant 0 : index
    %c0_45 = arith.constant 0 : index
    %43 = vector.load %arg3[%c3, %c0_44, %c0_45] : memref<9x8x8xbf16, #tpu.memory_space<vmem>>, vector<1x8x8xbf16>
    %44 = vector.shape_cast %43 : vector<1x8x8xbf16> to vector<8x8xbf16>
    %cst_46 = arith.constant dense<0.000000e+00> : vector<64x8xf32>
    %45 = tpu.matmul %42, %44, %cst_46 {dimension_numbers = #tpu.dot_dimension_numbers<[1], [0], [0], [1], [0, 0, 1, 1], [], []>} : vector<64x8xbf16>, vector<8x8xbf16>, vector<64x8xf32> -> vector<64x8xf32>
    %46 = arith.addf %41, %45 : vector<64x8xf32>
    %c0_47 = arith.constant 0 : index
    %c0_48 = arith.constant 0 : index
    %47 = vector.load %arg6[%c0_47, %c0_48] : memref<64x8xf32, #tpu.memory_space<vmem>>, vector<64x8xf32>
    tpu.vector_store %arg6[%c0_47, %c0_48], %46 {strides = array<i32>} : memref<64x8xf32, #tpu.memory_space<vmem>>, vector<64x8xf32>,
    %c0_i32_49 = arith.constant 0 : i32
    %48 = arith.addi %1, %c0_i32_49 : i32
    %c0_50 = arith.constant 0 : index
    %c3_51 = arith.constant 3 : index
    %49 = arith.index_cast %48 : i32 to index
    %c0_52 = arith.constant 0 : index
    %c0_53 = arith.constant 0 : index
    %50 = vector.load %arg2[%c0_50, %c3_51, %49, %c0_52, %c0_53] : memref<1x4x9x9x8xbf16, #tpu.memory_space<vmem>>, vector<1x1x8x8x8xbf16>
    %51 = vector.shape_cast %50 : vector<1x1x8x8x8xbf16> to vector<8x8x8xbf16>
    %c0_54 = arith.constant 0 : index
    %c0_55 = arith.constant 0 : index
    %52 = vector.load %arg6[%c0_54, %c0_55] : memref<64x8xf32, #tpu.memory_space<vmem>>, vector<64x8xf32>
    %53 = vector.shape_cast %51 : vector<8x8x8xbf16> to vector<64x8xbf16>
    %c4 = arith.constant 4 : index
    %c0_56 = arith.constant 0 : index
    %c0_57 = arith.constant 0 : index
    %54 = vector.load %arg3[%c4, %c0_56, %c0_57] : memref<9x8x8xbf16, #tpu.memory_space<vmem>>, vector<1x8x8xbf16>
    %55 = vector.shape_cast %54 : vector<1x8x8xbf16> to vector<8x8xbf16>
    %cst_58 = arith.constant dense<0.000000e+00> : vector<64x8xf32>
    %56 = tpu.matmul %53, %55, %cst_58 {dimension_numbers = #tpu.dot_dimension_numbers<[1], [0], [0], [1], [0, 0, 1, 1], [], []>} : vector<64x8xbf16>, vector<8x8xbf16>, vector<64x8xf32> -> vector<64x8xf32>
    %57 = arith.addf %52, %56 : vector<64x8xf32>
    %c0_59 = arith.constant 0 : index
    %c0_60 = arith.constant 0 : index
    %58 = vector.load %arg6[%c0_59, %c0_60] : memref<64x8xf32, #tpu.memory_space<vmem>>, vector<64x8xf32>
    tpu.vector_store %arg6[%c0_59, %c0_60], %57 {strides = array<i32>} : memref<64x8xf32, #tpu.memory_space<vmem>>, vector<64x8xf32>,
    %c0_i32_61 = arith.constant 0 : i32
    %59 = arith.addi %1, %c0_i32_61 : i32
    %c0_62 = arith.constant 0 : index
    %c2_63 = arith.constant 2 : index
    %60 = arith.index_cast %59 : i32 to index
    %c1_64 = arith.constant 1 : index
    %c0_65 = arith.constant 0 : index
    %61 = vector.load %arg2[%c0_62, %c2_63, %60, %c1_64, %c0_65] : memref<1x4x9x9x8xbf16, #tpu.memory_space<vmem>>, vector<1x1x8x8x8xbf16>
    %62 = vector.shape_cast %61 : vector<1x1x8x8x8xbf16> to vector<8x8x8xbf16>
    %c0_66 = arith.constant 0 : index
    %c0_67 = arith.constant 0 : index
    %63 = vector.load %arg6[%c0_66, %c0_67] : memref<64x8xf32, #tpu.memory_space<vmem>>, vector<64x8xf32>
    %64 = vector.shape_cast %62 : vector<8x8x8xbf16> to vector<64x8xbf16>
    %c5 = arith.constant 5 : index
    %c0_68 = arith.constant 0 : index
    %c0_69 = arith.constant 0 : index
    %65 = vector.load %arg3[%c5, %c0_68, %c0_69] : memref<9x8x8xbf16, #tpu.memory_space<vmem>>, vector<1x8x8xbf16>
    %66 = vector.shape_cast %65 : vector<1x8x8xbf16> to vector<8x8xbf16>
    %cst_70 = arith.constant dense<0.000000e+00> : vector<64x8xf32>
    %67 = tpu.matmul %64, %66, %cst_70 {dimension_numbers = #tpu.dot_dimension_numbers<[1], [0], [0], [1], [0, 0, 1, 1], [], []>} : vector<64x8xbf16>, vector<8x8xbf16>, vector<64x8xf32> -> vector<64x8xf32>
    %68 = arith.addf %63, %67 : vector<64x8xf32>
    %c0_71 = arith.constant 0 : index
    %c0_72 = arith.constant 0 : index
    %69 = vector.load %arg6[%c0_71, %c0_72] : memref<64x8xf32, #tpu.memory_space<vmem>>, vector<64x8xf32>
    tpu.vector_store %arg6[%c0_71, %c0_72], %68 {strides = array<i32>} : memref<64x8xf32, #tpu.memory_space<vmem>>, vector<64x8xf32>,
    %c1_i32 = arith.constant 1 : i32
    %70 = arith.addi %1, %c1_i32 : i32
    %c0_73 = arith.constant 0 : index
    %c0_74 = arith.constant 0 : index
    %71 = arith.index_cast %70 : i32 to index
    %c0_75 = arith.constant 0 : index
    %c0_76 = arith.constant 0 : index
    %72 = vector.load %arg2[%c0_73, %c0_74, %71, %c0_75, %c0_76] : memref<1x4x9x9x8xbf16, #tpu.memory_space<vmem>>, vector<1x1x8x8x8xbf16>
    %73 = vector.shape_cast %72 : vector<1x1x8x8x8xbf16> to vector<8x8x8xbf16>
    %c0_77 = arith.constant 0 : index
    %c0_78 = arith.constant 0 : index
    %74 = vector.load %arg6[%c0_77, %c0_78] : memref<64x8xf32, #tpu.memory_space<vmem>>, vector<64x8xf32>
    %75 = vector.shape_cast %73 : vector<8x8x8xbf16> to vector<64x8xbf16>
    %c6 = arith.constant 6 : index
    %c0_79 = arith.constant 0 : index
    %c0_80 = arith.constant 0 : index
    %76 = vector.load %arg3[%c6, %c0_79, %c0_80] : memref<9x8x8xbf16, #tpu.memory_space<vmem>>, vector<1x8x8xbf16>
    %77 = vector.shape_cast %76 : vector<1x8x8xbf16> to vector<8x8xbf16>
    %cst_81 = arith.constant dense<0.000000e+00> : vector<64x8xf32>
    %78 = tpu.matmul %75, %77, %cst_81 {dimension_numbers = #tpu.dot_dimension_numbers<[1], [0], [0], [1], [0, 0, 1, 1], [], []>} : vector<64x8xbf16>, vector<8x8xbf16>, vector<64x8xf32> -> vector<64x8xf32>
    %79 = arith.addf %74, %78 : vector<64x8xf32>
    %c0_82 = arith.constant 0 : index
    %c0_83 = arith.constant 0 : index
    %80 = vector.load %arg6[%c0_82, %c0_83] : memref<64x8xf32, #tpu.memory_space<vmem>>, vector<64x8xf32>
    tpu.vector_store %arg6[%c0_82, %c0_83], %79 {strides = array<i32>} : memref<64x8xf32, #tpu.memory_space<vmem>>, vector<64x8xf32>,
    %c1_i32_84 = arith.constant 1 : i32
    %81 = arith.addi %1, %c1_i32_84 : i32
    %c0_85 = arith.constant 0 : index
    %c1_86 = arith.constant 1 : index
    %82 = arith.index_cast %81 : i32 to index
    %c0_87 = arith.constant 0 : index
    %c0_88 = arith.constant 0 : index
    %83 = vector.load %arg2[%c0_85, %c1_86, %82, %c0_87, %c0_88] : memref<1x4x9x9x8xbf16, #tpu.memory_space<vmem>>, vector<1x1x8x8x8xbf16>
    %84 = vector.shape_cast %83 : vector<1x1x8x8x8xbf16> to vector<8x8x8xbf16>
    %c0_89 = arith.constant 0 : index
    %c0_90 = arith.constant 0 : index
    %85 = vector.load %arg6[%c0_89, %c0_90] : memref<64x8xf32, #tpu.memory_space<vmem>>, vector<64x8xf32>
    %86 = vector.shape_cast %84 : vector<8x8x8xbf16> to vector<64x8xbf16>
    %c7 = arith.constant 7 : index
    %c0_91 = arith.constant 0 : index
    %c0_92 = arith.constant 0 : index
    %87 = vector.load %arg3[%c7, %c0_91, %c0_92] : memref<9x8x8xbf16, #tpu.memory_space<vmem>>, vector<1x8x8xbf16>
    %88 = vector.shape_cast %87 : vector<1x8x8xbf16> to vector<8x8xbf16>
    %cst_93 = arith.constant dense<0.000000e+00> : vector<64x8xf32>
    %89 = tpu.matmul %86, %88, %cst_93 {dimension_numbers = #tpu.dot_dimension_numbers<[1], [0], [0], [1], [0, 0, 1, 1], [], []>} : vector<64x8xbf16>, vector<8x8xbf16>, vector<64x8xf32> -> vector<64x8xf32>
    %90 = arith.addf %85, %89 : vector<64x8xf32>
    %c0_94 = arith.constant 0 : index
    %c0_95 = arith.constant 0 : index
    %91 = vector.load %arg6[%c0_94, %c0_95] : memref<64x8xf32, #tpu.memory_space<vmem>>, vector<64x8xf32>
    tpu.vector_store %arg6[%c0_94, %c0_95], %90 {strides = array<i32>} : memref<64x8xf32, #tpu.memory_space<vmem>>, vector<64x8xf32>,
    %c1_i32_96 = arith.constant 1 : i32
    %92 = arith.addi %1, %c1_i32_96 : i32
    %c0_97 = arith.constant 0 : index
    %c0_98 = arith.constant 0 : index
    %93 = arith.index_cast %92 : i32 to index
    %c1_99 = arith.constant 1 : index
    %c0_100 = arith.constant 0 : index
    %94 = vector.load %arg2[%c0_97, %c0_98, %93, %c1_99, %c0_100] : memref<1x4x9x9x8xbf16, #tpu.memory_space<vmem>>, vector<1x1x8x8x8xbf16>
    %95 = vector.shape_cast %94 : vector<1x1x8x8x8xbf16> to vector<8x8x8xbf16>
    %c0_101 = arith.constant 0 : index
    %c0_102 = arith.constant 0 : index
    %96 = vector.load %arg6[%c0_101, %c0_102] : memref<64x8xf32, #tpu.memory_space<vmem>>, vector<64x8xf32>
    %97 = vector.shape_cast %95 : vector<8x8x8xbf16> to vector<64x8xbf16>
    %c8 = arith.constant 8 : index
    %c0_103 = arith.constant 0 : index
    %c0_104 = arith.constant 0 : index
    %98 = vector.load %arg3[%c8, %c0_103, %c0_104] : memref<9x8x8xbf16, #tpu.memory_space<vmem>>, vector<1x8x8xbf16>
    %99 = vector.shape_cast %98 : vector<1x8x8xbf16> to vector<8x8xbf16>
    %cst_105 = arith.constant dense<0.000000e+00> : vector<64x8xf32>
    %100 = tpu.matmul %97, %99, %cst_105 {dimension_numbers = #tpu.dot_dimension_numbers<[1], [0], [0], [1], [0, 0, 1, 1], [], []>} : vector<64x8xbf16>, vector<8x8xbf16>, vector<64x8xf32> -> vector<64x8xf32>
    %101 = arith.addf %96, %100 : vector<64x8xf32>
    %c0_106 = arith.constant 0 : index
    %c0_107 = arith.constant 0 : index
    %102 = vector.load %arg6[%c0_106, %c0_107] : memref<64x8xf32, #tpu.memory_space<vmem>>, vector<64x8xf32>
    tpu.vector_store %arg6[%c0_106, %c0_107], %101 {strides = array<i32>} : memref<64x8xf32, #tpu.memory_space<vmem>>, vector<64x8xf32>,
    %c0_108 = arith.constant 0 : index
    %c0_109 = arith.constant 0 : index
    %103 = vector.load %arg6[%c0_108, %c0_109] : memref<64x8xf32, #tpu.memory_space<vmem>>, vector<64x8xf32>
    %cst_110 = arith.constant dense<0.000000e+00> : vector<8xf32>
    %104 = vector.multi_reduction <add>, %103, %cst_110 [0] : vector<64x8xf32> to vector<8xf32>
    %105 = vector.shape_cast %104 : vector<8xf32> to vector<1x8xf32>
    %106 = arith.mulf %103, %103 : vector<64x8xf32>
    %cst_111 = arith.constant dense<0.000000e+00> : vector<8xf32>
    %107 = vector.multi_reduction <add>, %106, %cst_111 [0] : vector<64x8xf32> to vector<8xf32>
    %108 = vector.shape_cast %107 : vector<8xf32> to vector<1x8xf32>
    %109 = tpu.iota {dimensions = array<i32: 0>} : vector<2x1xi32>
    %c0_i32_112 = arith.constant 0 : i32
    %110 = vector.broadcast %c0_i32_112 : i32 to vector<2x1xi32>
    %111 = arith.cmpi eq, %109, %110 : vector<2x1xi32>
    %112 = vector.shape_cast %111 : vector<2x1xi1> to vector<2x1xi1>
    %113 = vector.broadcast %112 : vector<2x1xi1> to vector<2x8xi1>
    %114 = vector.shape_cast %105 : vector<1x8xf32> to vector<1x8xf32>
    %115 = vector.broadcast %114 : vector<1x8xf32> to vector<2x8xf32>
    %116 = vector.shape_cast %108 : vector<1x8xf32> to vector<1x8xf32>
    %117 = vector.broadcast %116 : vector<1x8xf32> to vector<2x8xf32>
    %118 = arith.select %113, %115, %117 : vector<2x8xi1>, vector<2x8xf32>
    %119 = vector.shape_cast %118 : vector<2x8xf32> to vector<1x1x2x8xf32>
    %c0_113 = arith.constant 0 : index
    %c0_114 = arith.constant 0 : index
    %c0_115 = arith.constant 0 : index
    %c0_116 = arith.constant 0 : index
    %120 = vector.load %arg5[%c0_113, %c0_114, %c0_115, %c0_116] : memref<1x1x2x8xf32, #tpu.memory_space<vmem>>, vector<1x1x2x8xf32>
    tpu.vector_store %arg5[%c0_113, %c0_114, %c0_115, %c0_116], %119 {strides = array<i32>} : memref<1x1x2x8xf32, #tpu.memory_space<vmem>>, vector<1x1x2x8xf32>,
    %121 = vector.shape_cast %103 : vector<64x8xf32> to vector<1x8x8x8xf32>
    %122 = arith.truncf %121 : vector<1x8x8x8xf32> to vector<1x8x8x8xbf16>
    %c0_117 = arith.constant 0 : index
    %c0_118 = arith.constant 0 : index
    %c0_119 = arith.constant 0 : index
    %c0_120 = arith.constant 0 : index
    %123 = vector.load %arg4[%c0_117, %c0_118, %c0_119, %c0_120] : memref<1x8x8x8xbf16, #tpu.memory_space<vmem>>, vector<1x8x8x8xbf16>
    tpu.vector_store %arg4[%c0_117, %c0_118, %c0_119, %c0_120], %122 {strides = array<i32>} : memref<1x8x8x8xbf16, #tpu.memory_space<vmem>>, vector<1x8x8x8xbf16>,
    return
  }
  func.func @transform_0(%arg0: i32, %arg1: i32) -> (i32, i32, i32, i32, i32) {
    %c0_i32 = arith.constant 0 : i32
    %c0_i32_0 = arith.constant 0 : i32
    %c0_i32_1 = arith.constant 0 : i32
    %c0_i32_2 = arith.constant 0 : i32
    %c0_i32_3 = arith.constant 0 : i32
    return %arg0, %c0_i32, %c0_i32_0, %c0_i32_1, %c0_i32_2 : i32, i32, i32, i32, i32
  }
  func.func @transform_1(%arg0: i32, %arg1: i32) -> (i32, i32, i32) {
    %c0_i32 = arith.constant 0 : i32
    %c0_i32_0 = arith.constant 0 : i32
    %c0_i32_1 = arith.constant 0 : i32
    %c0_i32_2 = arith.constant 0 : i32
    return %c0_i32, %c0_i32_0, %c0_i32_1 : i32, i32, i32
  }
  func.func @transform_2(%arg0: i32, %arg1: i32) -> (i32, i32, i32, i32) {
    %c0_i32 = arith.constant 0 : i32
    %c0_i32_0 = arith.constant 0 : i32
    %c0_i32_1 = arith.constant 0 : i32
    return %arg0, %arg1, %c0_i32, %c0_i32_0 : i32, i32, i32, i32
  }
  func.func @transform_3(%arg0: i32, %arg1: i32) -> (i32, i32, i32, i32) {
    %c0_i32 = arith.constant 0 : i32
    %c0_i32_0 = arith.constant 0 : i32
    %c0_i32_1 = arith.constant 0 : i32
    return %arg0, %arg1, %c0_i32, %c0_i32_0 : i32, i32, i32, i32
  }
}

module attributes {stable_mosaic.version = 11 : i64} {
  func.func @_bn_act_kernel(%arg0: i32, %arg1: i32, %arg2: memref<1x8x64xbf16, #tpu.memory_space<vmem>>, %arg3: memref<1x1x64xf32, #tpu.memory_space<vmem>>, %arg4: memref<1x1x64xf32, #tpu.memory_space<vmem>>, %arg5: memref<1x8x64xf32, #tpu.memory_space<vmem>>) attributes {dimension_semantics = [#tpu.dimension_semantics<parallel>, #tpu.dimension_semantics<parallel>], iteration_bounds = array<i64: 2, 1>, scalar_prefetch = 0 : i64, scratch_operands = 0 : i64, tpu.core_type = #tpu.core_type<tc>, window_params = [{transform_indices = @transform_0, window_bounds = array<i64: 1, 8, 64>}, {pipeline_mode = #tpu.pipeline_mode<synchronous>, transform_indices = @transform_1, window_bounds = array<i64: 1, 1, 64>}, {pipeline_mode = #tpu.pipeline_mode<synchronous>, transform_indices = @transform_2, window_bounds = array<i64: 1, 1, 64>}, {transform_indices = @transform_3, window_bounds = array<i64: 1, 8, 64>}]} {
    %c0 = arith.constant 0 : index
    %c0_0 = arith.constant 0 : index
    %c0_1 = arith.constant 0 : index
    %0 = vector.load %arg2[%c0, %c0_0, %c0_1] : memref<1x8x64xbf16, #tpu.memory_space<vmem>>, vector<1x8x64xbf16>
    %1 = arith.extf %0 : vector<1x8x64xbf16> to vector<1x8x64xf32>
    %c0_2 = arith.constant 0 : index
    %c0_3 = arith.constant 0 : index
    %c0_4 = arith.constant 0 : index
    %2 = vector.load %arg3[%c0_2, %c0_3, %c0_4] : memref<1x1x64xf32, #tpu.memory_space<vmem>>, vector<1x1x64xf32>
    %3 = vector.broadcast %2 : vector<1x1x64xf32> to vector<1x8x64xf32>
    %4 = arith.mulf %1, %3 : vector<1x8x64xf32>
    %c0_5 = arith.constant 0 : index
    %c0_6 = arith.constant 0 : index
    %c0_7 = arith.constant 0 : index
    %5 = vector.load %arg4[%c0_5, %c0_6, %c0_7] : memref<1x1x64xf32, #tpu.memory_space<vmem>>, vector<1x1x64xf32>
    %6 = vector.broadcast %5 : vector<1x1x64xf32> to vector<1x8x64xf32>
    %7 = arith.addf %4, %6 : vector<1x8x64xf32>
    %cst = arith.constant 0.000000e+00 : f32
    %8 = vector.broadcast %cst : f32 to vector<1x8x64xf32>
    %9 = arith.cmpf oge, %7, %8 : vector<1x8x64xf32>
    %cst_8 = arith.constant 0.00999999977 : f32
    %10 = vector.broadcast %cst_8 : f32 to vector<1x8x64xf32>
    %11 = arith.mulf %10, %7 : vector<1x8x64xf32>
    %12 = arith.select %9, %7, %11 : vector<1x8x64xi1>, vector<1x8x64xf32>
    %c0_9 = arith.constant 0 : index
    %c0_10 = arith.constant 0 : index
    %c0_11 = arith.constant 0 : index
    %13 = vector.load %arg5[%c0_9, %c0_10, %c0_11] : memref<1x8x64xf32, #tpu.memory_space<vmem>>, vector<1x8x64xf32>
    tpu.vector_store %arg5[%c0_9, %c0_10, %c0_11], %12 {strides = array<i32>} : memref<1x8x64xf32, #tpu.memory_space<vmem>>, vector<1x8x64xf32>,
    return
  }
  func.func @transform_0(%arg0: i32, %arg1: i32) -> (i32, i32, i32) {
    %c0_i32 = arith.constant 0 : i32
    %c0_i32_0 = arith.constant 0 : i32
    return %arg0, %arg1, %c0_i32 : i32, i32, i32
  }
  func.func @transform_1(%arg0: i32, %arg1: i32) -> (i32, i32, i32) {
    %c0_i32 = arith.constant 0 : i32
    %c0_i32_0 = arith.constant 0 : i32
    %c0_i32_1 = arith.constant 0 : i32
    %c0_i32_2 = arith.constant 0 : i32
    return %c0_i32, %c0_i32_0, %c0_i32_1 : i32, i32, i32
  }
  func.func @transform_2(%arg0: i32, %arg1: i32) -> (i32, i32, i32) {
    %c0_i32 = arith.constant 0 : i32
    %c0_i32_0 = arith.constant 0 : i32
    %c0_i32_1 = arith.constant 0 : i32
    %c0_i32_2 = arith.constant 0 : i32
    return %c0_i32, %c0_i32_0, %c0_i32_1 : i32, i32, i32
  }
  func.func @transform_3(%arg0: i32, %arg1: i32) -> (i32, i32, i32) {
    %c0_i32 = arith.constant 0 : i32
    %c0_i32_0 = arith.constant 0 : i32
    return %arg0, %arg1, %c0_i32 : i32, i32, i32
  }
}

</mosaic_0001>

<bundles_post_ra>
// kernel: tile.23
= control target key start
LH: loop header
LB: loop body
LE: loop exit
PB: predicated region body
PF: predicated region fallthrough
CT: control target
= control target key end

     0   :  { %s28_s0 = inlined_call_operand.vmem [shape: f32[8], index: 0, kind: input, shape index: {}]   ;;  %s29_s1 = inlined_call_operand.vmem [shape: f32[16,8], index: 1, kind: output, shape index: {}]  }
   0x1   :  { %v4_v0 = vld [vmem:[%s28_s0] ss:$0 sm:$0xff] }
   0x2   :  { %5 = vst [vmem:[%s29_s1] sm:$0xff] %v4_v0 }
   0x3   :  { %8 = vst [vmem:[%s29_s1 + $0x8] sm:$0xff] %v4_v0 }

// kernel: tile.24
= control target key start
LH: loop header
LB: loop body
LE: loop exit
PB: predicated region body
PF: predicated region fallthrough
CT: control target
= control target key end

     0   :  { %s131_s10 = smov 120   ;;  %s132_s11 = smov 104   ;;  %vm3_vm0 = vcmask 64512   ;;  %vm9_vm1 = vcmask 1048512   ;;  %vm15_vm2 = vcmask 982912   ;;  %vm21_vm3 = vcmask 917312   ;;  %s207_s0 = inlined_call_operand.vmem [shape: f32[16,8], index: 0, kind: input, shape index: {}]   ;;  %s208_s1 = inlined_call_operand.vmem [shape: f32[1,1,128], index: 1, kind: output, shape index: {}]  }
   0x1   :  { %v101_v0 = vld [vmem:[%s207_s0 + $0xf] sm:$0x1]   ;;  %v103_v1 = vld [vmem:[%s207_s0 + $0xd] sm:$0x1]   ;;  %v105_v2 = vld [vmem:[%s207_s0 + $0xb] sm:$0x1]  }
   0x2   :  { %7 = vrot.lane.b32.xlu0 %v101_v0, %s131_s10  ;;  %19 = vrot.lane.b32.xlu1 %v103_v1, %s132_s11  ;;  %s133_s14 = smov 88   ;;  %v102_v3 = vld [vmem:[%s207_s0 + $0xe] sm:$0x1]   ;;  %v104_v4 = vld [vmem:[%s207_s0 + $0xc] sm:$0x1]   ;;  %s134_s19 = smov 112  }
   0x3   :  { %31 = vrot.lane.b32.xlu2 %v105_v2, %s133_s14  ;;  %s135_s20 = smov 96   ;;  %v106_v5 = vld [vmem:[%s207_s0 + $0xa] sm:$0x1]   ;;  %s136_s23 = smov 80   ;;  %v107_v6 = vld [vmem:[%s207_s0 + $0x9] sm:$0x1]  }
   0x4   :  { %v108_v7 = vld [vmem:[%s207_s0 + $0x8] sm:$0x1]   ;;  %s137_s28 = smov 72   ;;  %s138_s29 = smov 64   ;;  %v109_v8 = vld [vmem:[%s207_s0 + $0x7] sm:$0x1]  }
   0x5   :  { %s139_s3 = smov 56   ;;  %v110_v9 = vld [vmem:[%s207_s0 + $0x6] sm:$0x1]   ;;  %v111_v10 = vld [vmem:[%s207_s0 + $0x5] sm:$0x1]   ;;  %s140_s8 = smov 48  }
   0x6   :  { %s141_s9 = smov 40   ;;  %v112_v11 = vld [vmem:[%s207_s0 + $0x4] sm:$0x1]   ;;  %s142_s12 = smov 32   ;;  %v113_v12 = vld [vmem:[%s207_s0 + $0x3] sm:$0x1]  }
   0x7   :  { %v114_v13 = vld [vmem:[%s207_s0 + $0x2] sm:$0x1]   ;;  %s143_s17 = smov 24   ;;  %s144_s18 = smov 16   ;;  %v115_v14 = vld [vmem:[%s207_s0 + $0x1] sm:$0x1]  }
   0x8   :  { %s145_s21 = smov 8   ;;  %v2_v15 = vld [vmem:[%s207_s0] sm:$0x1]   ;;  %vm27_vm4 = vcmask 851712   ;;  %vm33_vm5 = vcmask 786112   ;;  %vm39_vm6 = vcmask 720512  }
   0x9   :  { %4 = vst.msk [vmem:[#allocation0] sm:$0x1] %vm3_vm0, %v2_v15   ;;  %vm45_vm7 = vcmask 654912   ;;  %vm51_vm8 = vcmask 589312   ;;  %vm57_vm9 = vcmask 523712   ;;  %vm63_vm10 = vcmask 458112  }
   0xa   :  { %13 = vrot.lane.b32.xlu0 %v102_v3, %s134_s19  ;;  %25 = vrot.lane.b32.xlu1 %v104_v4, %s135_s20  ;;  %vm69_vm11 = vcmask 392512   ;;  %vm75_vm12 = vcmask 326912   ;;  %vm81_vm13 = vcmask 261312   ;;  %vm87_vm14 = vcmask 195712  }
   0xb   :  { %37 = vrot.lane.b32.xlu2 %v106_v5, %s136_s23  ;;  %vm93_vm15 = vcmask 130112  }
  0x12   :  { %43 = vrot.lane.b32.xlu0 %v107_v6, %s137_s28  ;;  %49 = vrot.lane.b32.xlu1 %v108_v7, %s138_s29 }
  0x13   :  { %55 = vrot.lane.b32.xlu2 %v109_v8, %s139_s3 }
  0x1a   :  { %61 = vrot.lane.b32.xlu0 %v110_v9, %s140_s8  ;;  %67 = vrot.lane.b32.xlu1 %v111_v10, %s141_s9 }
  0x1b   :  { %73 = vrot.lane.b32.xlu2 %v112_v11, %s142_s12 }
  0x22   :  { %79 = vrot.lane.b32.xlu0 %v113_v12, %s143_s17  ;;  %85 = vrot.lane.b32.xlu1 %v114_v13, %s144_s18 }
  0x23   :  { %91 = vrot.lane.b32.xlu2 %v115_v14, %s145_s21 }
  0x5d   :  { %v32_v16 = vpop.permute.xlu2 %31  }
  0x65   :  { %v38_v17 = vpop.permute.xlu2 %37  }
  0x6d   :  { %v56_v18 = vpop.permute.xlu2 %55  }
  0x74   :  { %v8_v19 = vpop.permute.xlu0 %7   ;;  %v20_v20 = vpop.permute.xlu1 %19  }
  0x75   :  { %10 = vst.msk [vmem:[#allocation0] sm:$0x1] %vm9_vm1, %v8_v19   ;;  %v74_v21 = vpop.permute.xlu2 %73  }
  0x7c   :  { %v14_v22 = vpop.permute.xlu0 %13   ;;  %v26_v23 = vpop.permute.xlu1 %25  }
  0x7d   :  { %16 = vst.msk [vmem:[#allocation0] sm:$0x1] %vm15_vm2, %v14_v22   ;;  %v92_v24 = vpop.permute.xlu2 %91  }
  0x7e   :  { %22 = vst.msk [vmem:[#allocation0] sm:$0x1] %vm21_vm3, %v20_v20  }
  0x7f   :  { %28 = vst.msk [vmem:[#allocation0] sm:$0x1] %vm27_vm4, %v26_v23  }
  0x80   :  { %34 = vst.msk [vmem:[#allocation0] sm:$0x1] %vm33_vm5, %v32_v16  }
  0x81   :  { %40 = vst.msk [vmem:[#allocation0] sm:$0x1] %vm39_vm6, %v38_v17  }
  0x84   :  { %v44_v25 = vpop.permute.xlu0 %43   ;;  %v50_v26 = vpop.permute.xlu1 %49  }
  0x85   :  { %46 = vst.msk [vmem:[#allocation0] sm:$0x1] %vm45_vm7, %v44_v25  }
  0x86   :  { %52 = vst.msk [vmem:[#allocation0] sm:$0x1] %vm51_vm8, %v50_v26  }
  0x87   :  { %58 = vst.msk [vmem:[#allocation0] sm:$0x1] %vm57_vm9, %v56_v18  }
  0x8c   :  { %v62_v27 = vpop.permute.xlu0 %61   ;;  %v68_v28 = vpop.permute.xlu1 %67  }
  0x8d   :  { %64 = vst.msk [vmem:[#allocation0] sm:$0x1] %vm63_vm10, %v62_v27  }
  0x8e   :  { %70 = vst.msk [vmem:[#allocation0] sm:$0x1] %vm69_vm11, %v68_v28  }
  0x8f   :  { %76 = vst.msk [vmem:[#allocation0] sm:$0x1] %vm75_vm12, %v74_v21  }
  0x94   :  { %v80_v29 = vpop.permute.xlu0 %79   ;;  %v86_v30 = vpop.permute.xlu1 %85  }
  0x95   :  { %82 = vst.msk [vmem:[#allocation0] sm:$0x1] %vm81_vm13, %v80_v29  }
  0x96   :  { %88 = vst.msk [vmem:[#allocation0] sm:$0x1] %vm87_vm14, %v86_v30  }
  0x97   :  { %94 = vst.msk [vmem:[#allocation0] sm:$0x1] %vm93_vm15, %v92_v24  }
  0x9e   :  { %v97_v31 = vld [vmem:[#allocation0] sm:$0x1] }
  0x9f   :  { %100 = vst [vmem:[%s208_s1] sm:$0x1] %v97_v31 }

// kernel: discrim_block_forward.5
= control target key start
LH: loop header
LB: loop body
LE: loop exit
PB: predicated region body
PF: predicated region fallthrough
CT: control target
= control target key end

     0   :  { %s415_s12 = smov 0   ;;  %s417_s13 = smov 0   ;;  %s451_s0 = inlined_call_operand.vmem [shape: bf16[2,16,128], index: 0, kind: input, shape index: {}]   ;;  %s452_s1 = inlined_call_operand.vmem [shape: f32[1,1,128], index: 1, kind: input, shape index: {}]   ;;  %s453_s2 = inlined_call_operand.vmem [shape: f32[1,1,128], index: 2, kind: input, shape index: {}]   ;;  %s454_s3 = inlined_call_operand.vmem [shape: bf16[2,16,128], index: 3, kind: output, shape index: {}]  }
   0x1   :  { %s419_s14 = smov 0  }
   0x2 LB: > { %s25_s15 = sadd.s32 1, %s389_s13  ;;  %p327_p0 = scmp.ge.s32.totalorder %s393_s14, 1  ;;  %s393_s14 = sphi %s419_s14, %s13_s14   ;;  %s389_s13 = sphi %s417_s13, %s456_s13   ;;  %s385_s12 = sphi %s415_s12, %s455_s12  }
   0x3   : > { %p27_p1 = scmp.ge.s32.totalorder %s25_s15, 2  ;;  %p158_p2 = scmp.lt.s32.totalorder %s393_s14, 3 }
   0x5   : > { %s458_s15 = smov (%p27_p1, %s25_s15), 0  ;;  %p159_p3 = pnand %p327_p0, %p158_p2 }
   0x6   : > { %p191_p4 = scmp.lt.s32.totalorder (!%p159_p3), %s385_s12, 1 }
   0x7   : > { %162 = sbr.rel (%p159_p3) target bundleno = 28 (0x1c), region = 32 }
   0xc   : > { %s460_s12 = smov (!%p191_p4, %s385_s12), 1  ;;  %v369_v0 = vld [vmem:[%s452_s1] ss:$0 sm:$0xff] }
   0xd   : > { %s334_s16 = sshll.u32 %s460_s12, 3  ;;  %v370_v4 = vld [vmem:[%s453_s2] ss:$0 sm:$0xff] }
   0xe   : > { %s198_s19 = scalar_lea.vmem %s451_s0, %s334_s16  ;;  %s208_s26 = scalar_lea.vmem %s454_s3, %s334_s16 }
   0xf   : > { %v337_v1 = vld [vmem:[%s198_s19] sm:$0xff]  }
  0x10   : > { %v338_v2 = vunpack.c.l.bf16 %v337_v1  ;;  %v339_v3 = vunpack.c.h.bf16 %v337_v1 }
  0x12   : > { %v218_v5 = vmul.f32 %v369_v0, %v338_v2  ;;  %v219_v6 = vmul.f32 %v369_v0, %v339_v3 }
  0x14   : > { %v224_v7 = vadd.f32 %v370_v4, %v218_v5  ;;  %v225_v8 = vadd.f32 %v370_v4, %v219_v6 }
  0x16   : > { %vm226_vm0 = vcmp.ge.f32.partialorder %v224_v7, 0.0  ;;  %vm227_vm1 = vcmp.ge.f32.partialorder %v225_v8, 0.0  ;;  %v228_v9 = vmul.f32 0.01, %v224_v7  ;;  %v229_v10 = vmul.f32 0.01, %v225_v8 }
  0x18   : > { %v230_v11 = vsel %vm226_vm0, %v224_v7, %v228_v9  ;;  %v231_v12 = vsel %vm227_vm1, %v225_v8, %v229_v10 }
  0x19   : > { %v343_v13 = vpack.c.bf16 %v231_v12, %v230_v11 }
  0x1b   : > { %344 = vst [vmem:[%s208_s26] sm:$0xff] %v343_v13  }
  0x1c PF: > { %s13_s14 = sadd.s32 1, %s393_s14   ;;  %s455_s12 = smov %s389_s13 }
  0x1d   : > { %p10_p5 = scmp.ge.s32.totalorder %s13_s14, 4   ;;  %s456_s13 = smov %s458_s15 }
  0x1f   :  { %12 = sbr.rel (!%p10_p5) target bundleno = 2 (0x2), region = 62 }

// kernel: tile.33
= control target key start
LH: loop header
LB: loop body
LE: loop exit
PB: predicated region body
PF: predicated region fallthrough
CT: control target
= control target key end

     0   :  { %s22_s0 = inlined_call_operand.vmem [shape: f32[8], index: 0, kind: input, shape index: {}]   ;;  %s23_s1 = inlined_call_operand.vmem [shape: f32[8,8], index: 1, kind: output, shape index: {}]  }
   0x1   :  { %v4_v0 = vld [vmem:[%s22_s0] ss:$0 sm:$0xff] }
   0x2   :  { %5 = vst [vmem:[%s23_s1] sm:$0xff] %v4_v0 }

// kernel: tile.34
= control target key start
LH: loop header
LB: loop body
LE: loop exit
PB: predicated region body
PF: predicated region fallthrough
CT: control target
= control target key end

     0   :  { %s67_s10 = smov 56   ;;  %s68_s11 = smov 40   ;;  %vm3_vm0 = vcmask 64512   ;;  %vm9_vm1 = vcmask 523712   ;;  %vm15_vm2 = vcmask 458112   ;;  %vm21_vm3 = vcmask 392512   ;;  %s111_s0 = inlined_call_operand.vmem [shape: f32[8,8], index: 0, kind: input, shape index: {}]   ;;  %s112_s1 = inlined_call_operand.vmem [shape: f32[1,1,64], index: 1, kind: output, shape index: {}]  }
   0x1   :  { %v53_v0 = vld [vmem:[%s111_s0 + $0x7] sm:$0x1]   ;;  %v55_v1 = vld [vmem:[%s111_s0 + $0x5] sm:$0x1]   ;;  %v57_v2 = vld [vmem:[%s111_s0 + $0x3] sm:$0x1]  }
   0x2   :  { %7 = vrot.lane.b32.xlu0 %v53_v0, %s67_s10  ;;  %19 = vrot.lane.b32.xlu1 %v55_v1, %s68_s11  ;;  %s69_s14 = smov 24   ;;  %v54_v3 = vld [vmem:[%s111_s0 + $0x6] sm:$0x1]   ;;  %v56_v4 = vld [vmem:[%s111_s0 + $0x4] sm:$0x1]   ;;  %s70_s21 = smov 48  }
   0x3   :  { %31 = vrot.lane.b32.xlu2 %v57_v2, %s69_s14  ;;  %v58_v5 = vld [vmem:[%s111_s0 + $0x2] sm:$0x1]   ;;  %s71_s22 = smov 32   ;;  %s72_s23 = smov 16   ;;  %v59_v6 = vld [vmem:[%s111_s0 + $0x1] sm:$0x1]  }
   0x4   :  { %s73_s26 = smov 8   ;;  %v2_v7 = vld [vmem:[%s111_s0] sm:$0x1]   ;;  %vm27_vm4 = vcmask 326912   ;;  %vm33_vm5 = vcmask 261312   ;;  %vm39_vm6 = vcmask 195712  }
   0x5   :  { %4 = vst.msk [vmem:[#allocation0] sm:$0x1] %vm3_vm0, %v2_v7   ;;  %vm45_vm7 = vcmask 130112  }
   0xa   :  { %13 = vrot.lane.b32.xlu0 %v54_v3, %s70_s21  ;;  %25 = vrot.lane.b32.xlu1 %v56_v4, %s71_s22 }
   0xb   :  { %37 = vrot.lane.b32.xlu2 %v58_v5, %s72_s23 }
  0x12   :  { %43 = vrot.lane.b32.xlu0 %v59_v6, %s73_s26 }
  0x5d   :  { %v32_v8 = vpop.permute.xlu2 %31  }
  0x65   :  { %v38_v9 = vpop.permute.xlu2 %37  }
  0x74   :  { %v8_v10 = vpop.permute.xlu0 %7   ;;  %v20_v11 = vpop.permute.xlu1 %19  }
  0x75   :  { %10 = vst.msk [vmem:[#allocation0] sm:$0x1] %vm9_vm1, %v8_v10  }
  0x7c   :  { %v14_v12 = vpop.permute.xlu0 %13   ;;  %v26_v13 = vpop.permute.xlu1 %25  }
  0x7d   :  { %16 = vst.msk [vmem:[#allocation0] sm:$0x1] %vm15_vm2, %v14_v12  }
  0x7e   :  { %22 = vst.msk [vmem:[#allocation0] sm:$0x1] %vm21_vm3, %v20_v11  }
  0x7f   :  { %28 = vst.msk [vmem:[#allocation0] sm:$0x1] %vm27_vm4, %v26_v13  }
  0x80   :  { %34 = vst.msk [vmem:[#allocation0] sm:$0x1] %vm33_vm5, %v32_v8  }
  0x81   :  { %40 = vst.msk [vmem:[#allocation0] sm:$0x1] %vm39_vm6, %v38_v9  }
  0x84   :  { %v44_v14 = vpop.permute.xlu0 %43  }
  0x85   :  { %46 = vst.msk [vmem:[#allocation0] sm:$0x1] %vm45_vm7, %v44_v14  }
  0x8c   :  { %v49_v15 = vld [vmem:[#allocation0] sm:$0x1] }
  0x8d   :  { %52 = vst [vmem:[%s112_s1] sm:$0x1] %v49_v15 }

// kernel: discrim_block_forward.7
= control target key start
LH: loop header
LB: loop body
LE: loop exit
PB: predicated region body
PF: predicated region fallthrough
CT: control target
= control target key end

     0   :  { %s367_s12 = smov 0   ;;  %s369_s13 = smov 0   ;;  %s399_s0 = inlined_call_operand.vmem [shape: bf16[2,8,64], index: 0, kind: input, shape index: {}]   ;;  %s400_s1 = inlined_call_operand.vmem [shape: f32[1,1,64], index: 1, kind: input, shape index: {}]   ;;  %s401_s2 = inlined_call_operand.vmem [shape: f32[1,1,64], index: 2, kind: input, shape index: {}]   ;;  %s402_s3 = inlined_call_operand.vmem [shape: f32[2,8,64], index: 3, kind: output, shape index: {}]  }
   0x1   :  { %s371_s14 = smov 0  }
   0x2 LB: > { %s25_s15 = sadd.s32 1, %s341_s13  ;;  %p292_p0 = scmp.ge.s32.totalorder %s345_s14, 1  ;;  %s345_s14 = sphi %s371_s14, %s13_s14   ;;  %s341_s13 = sphi %s369_s13, %s404_s13   ;;  %s337_s12 = sphi %s367_s12, %s403_s12  }
   0x3   : > { %p27_p1 = scmp.ge.s32.totalorder %s25_s15, 2  ;;  %p155_p2 = scmp.lt.s32.totalorder %s345_s14, 3 }
   0x5   : > { %s406_s15 = smov (%p27_p1, %s25_s15), 0  ;;  %p156_p3 = pnand %p292_p0, %p155_p2 }
   0x6   : > { %p183_p4 = scmp.lt.s32.totalorder (!%p156_p3), %s337_s12, 1 }
   0x7   : > { %159 = sbr.rel (%p156_p3) target bundleno = 26 (0x1a), region = 32 }
   0xc   : > { %s408_s12 = smov (!%p183_p4, %s337_s12), 1  ;;  %v321_v0 = vld [vmem:[%s400_s1] ss:$0 sm:$0xff]  ;;  %vm212_vm1 = vcmask 523264  }
   0xd   : > { %s293_s16 = sshll.u32 %s408_s12, 2  ;;  %v322_v3 = vld [vmem:[%s401_s2] ss:$0 sm:$0xff]  ;;  %s294_s24 = sshll.u32 %s408_s12, 3 }
   0xe   : > { %s189_s19 = scalar_lea.vmem %s399_s0, %s293_s16  ;;  %s196_s27 = scalar_lea.vmem %s402_s3, %s294_s24 }
   0xf   : > { %v197_v1 = vld [vmem:[%s189_s19] sm:$0xf] }
  0x10   : > { %v198_v2 = vunpack.c.l.bf16 %v197_v1 }
  0x12   : > { %v203_v4 = vmul.f32 %v321_v0, %v198_v2 }
  0x14   : > { %v208_v5 = vadd.f32 %v322_v3, %v203_v4 }
  0x16   : > { %vm209_vm0 = vcmp.ge.f32.partialorder %v208_v5, 0.0  ;;  %v210_v6 = vmul.f32 0.01, %v208_v5 }
  0x18   : > { %v211_v7 = vsel %vm209_vm0, %v208_v5, %v210_v6 }
  0x19   : > { %213 = vst.msk [vmem:[%s196_s27] sm:$0xff] %vm212_vm1, %v211_v7 }
  0x1a PF: > { %s13_s14 = sadd.s32 1, %s345_s14   ;;  %s403_s12 = smov %s341_s13 }
  0x1b   : > { %p10_p5 = scmp.ge.s32.totalorder %s13_s14, 4   ;;  %s404_s13 = smov %s406_s15 }
  0x1d   :  { %12 = sbr.rel (!%p10_p5) target bundleno = 2 (0x2), region = 62 }

// kernel: discrim_block_forward.6
= control target key start
LH: loop header
LB: loop body
LE: loop exit
PB: predicated region body
PF: predicated region fallthrough
CT: control target
= control target key end

     0   :  { %s2014_s12 = smov 0   ;;  %s2016_s13 = smov 0   ;;  %s2405_s0 = inlined_call_operand.vmem [shape: bf16[2,4,9,9,8], index: 0, kind: input, shape index: {}]   ;;  %s2406_s1 = inlined_call_operand.vmem [shape: bf16[9,8,8], index: 1, kind: input, shape index: {}]   ;;  %s2407_s2 = inlined_call_operand.vmem [shape: bf16[2,8,8,8], index: 2, kind: output, shape index: {0}]   ;;  %s2408_s3 = inlined_call_operand.vmem [shape: f32[2,1,2,8], index: 3, kind: output, shape index: {1}]  }
   0x1   :  { %s2018_s14 = smov 0  }
   0x2 LB: > { %s26_s15 = sadd.s32 1, %s1987_s13  ;;  %p1696_p0 = scmp.ge.s32.totalorder %s1991_s14, 1  ;;  %s1991_s14 = sphi %s2018_s14, %s14_s14   ;;  %s1987_s13 = sphi %s2016_s13, %s2412_s13   ;;  %s1983_s12 = sphi %s2014_s12, %s2411_s12  }
   0x3   : > { %p28_p1 = scmp.ge.s32.totalorder %s26_s15, 2  ;;  %p156_p2 = scmp.lt.s32.totalorder %s1991_s14, 3 }
   0x5   : > { %s2414_s15 = smov (%p28_p1, %s26_s15), 0  ;;  %p157_p3 = pnand %p1696_p0, %p156_p2 }
   0x6   : > { %p191_p4 = scmp.lt.s32.totalorder (!%p157_p3), %s1983_s12, 1 }
   0x7   : > { %160 = sbr.rel (%p157_p3) target bundleno = 342 (0x156), region = 28 }
   0xc   : > { %v243_v0 = vld [vmem:[%s2406_s1] sm:$0xf]  ;;  %vm276_vm0 = vcmask 1043456   ;;  %v1729_v2 = vld [vmem:[%s2406_s1 + $0x4] sm:$0xf]  ;;  %s2416_s12 = smov (!%p191_p4, %s1983_s12), 1 }
   0xd   : > { %v278_v1 = vsel %vm276_vm0, %v243_v0, 0  ;;  %v1750_v3 = vld [vmem:[%s2406_s1 + $0x8] sm:$0xf]  ;;  %v379_v4 = vsel %vm276_vm0, %v1729_v2, 0  ;;  %v1763_v6 = vld [vmem:[%s2406_s1 + $0xc] sm:$0xf] }
   0xe   : > { %1940 = vmatpush.bf16.msra.mxu1 %v278_v1  ;;  %1941 = vmatpush.bf16.msra.mxu2 %v278_v1  ;;  %v592_v5 = vsel %vm276_vm0, %v1750_v3, 0  ;;  %v693_v7 = vsel %vm276_vm0, %v1763_v6, 0  ;;  %s1943_s24 = smul.u32 288, %s2416_s12  ;;  %v1829_v8 = vld [vmem:[%s2406_s1 + $0x14] sm:$0xf]  ;;  %vm215_vm1 = vcmask 64512  }
   0xf   : > { %287 = vmatpush.bf16.msra.mxu0 %v278_v1  ;;  %1942 = vmatpush.bf16.msra.mxu3 %v278_v1  ;;  %v1792_v9 = vld [vmem:[%s2406_s1 + $0x10] sm:$0xf]  ;;  %v1842_v10 = vld [vmem:[%s2406_s1 + $0x18] sm:$0xf]  ;;  %v1871_v12 = vld [vmem:[%s2406_s1 + $0x1c] sm:$0xf] }
  0x10   : > { %s2060_s4 = scalar_lea.vmem %s2405_s0, %s1943_s24  ;;  %v794_v11 = vsel %vm276_vm0, %v1792_v9, 0  ;;  %v1004_v24 = vsel %vm276_vm0, %v1829_v8, 0  ;;  %v1106_v28 = vsel %vm276_vm0, %v1842_v10, 0  ;;  %v1207_v29 = vsel %vm276_vm0, %v1871_v12, 0  ;;  %s1915_s11 = sshll.u32 %s2416_s12, 5 }
  0x11   : > { %v1707_v13 = vld [vmem:[%s2060_s4 + $0x10] sm:$0xf]  ;;  %v1917_v14 = vld [vmem:[%s2060_s4 + $0x14] sm:$0xf0]  ;;  %v1711_v15 = vld [vmem:[%s2060_s4 + $0x20] sm:$0xf]  ;;  %s2325_s18 = scalar_lea.vmem %s2407_s2, %s1915_s11 }
  0x12   : > { %388 = vmatpush.bf16.msrb.mxu1 %v379_v4  ;;  %601 = vmatpush.bf16.msrb.mxu2 %v592_v5  ;;  %v1708_v16 = vor.u32 %v1917_v14, %v1707_v13  ;;  %v1918_v17 = vld [vmem:[%s2060_s4 + $0x24] sm:$0xf0]  ;;  %v1703_v18 = vld [vmem:[%s2060_s4] sm:$0xf]  ;;  %v1715_v22 = vld [vmem:[%s2060_s4 + $0x30] sm:$0xf] }
  0x13   : > { %702 = vmatpush.bf16.msrb.mxu3 %v693_v7  ;;  %803 = vmatpush.bf16.msrb.mxu0 %v794_v11  ;;  %v1916_v19 = vld [vmem:[%s2060_s4 + $0x4] sm:$0xf0]  ;;  %v1712_v20 = vor.u32 %v1918_v17, %v1711_v15  ;;  %v1919_v23 = vld [vmem:[%s2060_s4 + $0x34] sm:$0xf0]  ;;  %v426_v26 = vld [vmem:[%s2060_s4] sm:$0xf] }
  0x14   : > { %v1704_v21 = vor.u32 %v1916_v19, %v1703_v18  ;;  %1718 = vmatmul.msk.bf16.vlgmr.msra.gmra.mxu1 %vm215_vm1, %v1708_v16  ;;  %v1716_v25 = vor.u32 %v1919_v23, %v1715_v22  ;;  %v427_v27 = vld [vmem:[%s2060_s4 + $0x4] sm:$0x1]  ;;  %v428_v30 = vld [vmem:[%s2060_s4 + $0x8] sm:$0xf]  ;;  %v429_v31 = vld [vmem:[%s2060_s4 + $0xc] sm:$0x1] }
  0x15   : > { %1719 = vmatmul.msk.bf16.vlgmr.msra.gmra.mxu2 %vm215_vm1, %v1712_v20  ;;  %v454_v32 = vshrl.u32 %v426_v26, 16  ;;  %v457_v33 = vshll.u32 %v426_v26, 16  ;;  %v463_v34 = vshll.u32 %v427_v27, 16  ;;  %v468_v35 = vshrl.u32 %v428_v30, 16  ;;  %v430_v44 = vld [vmem:[%s2060_s4 + $0x10] sm:$0xf] }
  0x16   : > { %1717 = vmatmul.msk.bf16.vlgmr.msra.gmra.mxu0 %vm215_vm1, %v1704_v21  ;;  %1720 = vmatmul.msk.bf16.vlgmr.msra.gmra.mxu3 %vm215_vm1, %v1716_v25  ;;  %v471_v36 = vshll.u32 %v428_v30, 16  ;;  %v477_v37 = vshll.u32 %v429_v31, 16  ;;  %vm450_vm2 = vsmask.f32 3328  ;;  %vm451_vm3 = vsmask.f32 7440 }
  0x17   : > { %1013 = vmatpush.bf16.msra.mxu1 %v1004_v24  ;;  %v456_v38 = vrot.slane %v454_v32, 4  ;;  %v459_v39 = vrot.slane %v457_v33, 5  ;;  %1115 = vmatpush.bf16.msra.mxu2 %v1106_v28  ;;  %v470_v40 = vrot.slane %v468_v35, 4  ;;  %v465_v43 = vrot.slane %v463_v34, 5  ;;  %v432_v45 = vld [vmem:[%s2060_s4 + $0x18] sm:$0xf]  ;;  %vm2090_vm4 = vmor %vm450_vm2, %vm451_vm3 }
  0x18   : > { %1216 = vmatpush.bf16.msra.mxu3 %v1207_v29  ;;  %v473_v41 = vrot.slane %v471_v36, 5  ;;  %v479_v48 = vrot.slane %v477_v37, 5  ;;  %v482_v49 = vshrl.u32 %v430_v44, 16  ;;  %v485_v50 = vshll.u32 %v430_v44, 16  ;;  %v1732_v51 = vld [vmem:[%s2060_s4 + $0x48] sm:$0xf] }
  0x19   : > { %v460_v42 = vor.u32 %v459_v39, %v456_v38  ;;  %v496_v53 = vshrl.u32 %v432_v45, 16  ;;  %v499_v54 = vshll.u32 %v432_v45, 16  ;;  %v1920_v55 = vld [vmem:[%s2060_s4 + $0x4c] sm:$0xf0]  ;;  %v1924_v60 = vld [vmem:[%s2060_s4 + $0x94] sm:$0xf0] }
  0x1a   : > { %v474_v47 = vor.u32 %v473_v41, %v470_v40  ;;  %v1766_v57 = vld [vmem:[%s2060_s4 + $0x90] sm:$0xf]  ;;  %v484_v58 = vrot.slane %v482_v49, 4  ;;  %v487_v61 = vrot.slane %v485_v50, 5  ;;  %v1795_v2 = vld [vmem:[%s2060_s4 + $0xd8] sm:$0xf]  ;;  %v1733_v9 = vor.u32 %v1920_v55, %v1732_v51 }
  0x1b   : > { %v461_v52 = vrot.slane %v460_v42, 4  ;;  %v498_v62 = vrot.slane %v496_v53, 4  ;;  %v501_v63 = vrot.slane %v499_v54, 5  ;;  %v1928_v3 = vld [vmem:[%s2060_s4 + $0xdc] sm:$0xf0]  ;;  %v1767_v11 = vor.u32 %v1924_v60, %v1766_v57  ;;  %s1700_s19 = sshll.u32 %s2416_s12, 1 }
  0x1c   : > { %v475_v56 = vrot.slane %v474_v47, 4  ;;  %v1908_v4 = vld [vmem:[%s2406_s1 + $0x20] sm:$0xf]  ;;  %v431_v6 = vld [vmem:[%s2060_s4 + $0x14] sm:$0x1]  ;;  %v1796_v12 = vor.u32 %v1928_v3, %v1795_v2  ;;  %v488_v13 = vor.u32 %v487_v61, %v484_v58  ;;  %vm1538_vm5 = vcmask 60416   ;;  %s212_s22 = scalar_lea.vmem %s2408_s3, %s1700_s19 }
  0x1d   : > { %v466_v59 = vsel %vm2090_vm4, %v461_v52, %v465_v43  ;;  %v433_v7 = vld [vmem:[%s2060_s4 + $0x1c] sm:$0x1]  ;;  %v1417_v8 = vsel %vm276_vm0, %v1908_v4, 0  ;;  %v491_v14 = vshll.u32 %v431_v6, 16  ;;  %v502_v15 = vor.u32 %v501_v63, %v498_v62  ;;  %v434_v21 = vld [vmem:[%s2060_s4 + $0x20] sm:$0xf] }
  0x1e   : > { %v480_v0 = vsel %vm2090_vm4, %v475_v56, %v479_v48  ;;  %v567_v1 = vunpack.c.l.b16 %v466_v59  ;;  %1426 = vmatpush.bf16.msra.mxu0 %v1417_v8  ;;  %v505_v16 = vshll.u32 %v433_v7, 16  ;;  %v489_v17 = vrot.slane %v488_v13, 4  ;;  %v436_v22 = vld [vmem:[%s2060_s4 + $0x28] sm:$0xf]  ;;  %v1736_v29 = vld [vmem:[%s2060_s4 + $0x58] sm:$0xf] }
  0x1f   : > { %v568_v5 = vunpack.c.l.b16 %v480_v0  ;;  %v493_v18 = vrot.slane %v491_v14, 5  ;;  %v503_v19 = vrot.slane %v502_v15, 4  ;;  %v510_v23 = vshrl.u32 %v434_v21, 16  ;;  %v1921_v30 = vld [vmem:[%s2060_s4 + $0x5c] sm:$0xf0] }
  0x20   : > { %v507_v20 = vrot.slane %v505_v16, 5  ;;  %v513_v24 = vshll.u32 %v434_v21, 16  ;;  %v524_v27 = vshrl.u32 %v436_v22, 16  ;;  %v527_v28 = vshll.u32 %v436_v22, 16  ;;  %v1770_v33 = vld [vmem:[%s2060_s4 + $0xa0] sm:$0xf] }
  0x21   : > { %v575_v10 = vpack.c.b16 %v568_v5, %v567_v1  ;;  %v494_v25 = vsel %vm2090_vm4, %v489_v17, %v493_v18  ;;  %v1925_v34 = vld [vmem:[%s2060_s4 + $0xa4] sm:$0xf0]  ;;  %v512_v35 = vrot.slane %v510_v23, 4  ;;  %v1929_v40 = vld [vmem:[%s2060_s4 + $0xec] sm:$0xf0]  ;;  %v1737_v43 = vor.u32 %v1921_v30, %v1736_v29 }
  0x22   : > { %v508_v26 = vsel %vm2090_vm4, %v503_v19, %v507_v20  ;;  %v569_v31 = vunpack.c.l.b16 %v494_v25  ;;  %v515_v36 = vrot.slane %v513_v24, 5  ;;  %v526_v37 = vrot.slane %v524_v27, 4  ;;  %v1799_v39 = vld [vmem:[%s2060_s4 + $0xe8] sm:$0xf]  ;;  %v435_v41 = vld [vmem:[%s2060_s4 + $0x24] sm:$0x1] }
  0x23   : > { %v570_v32 = vunpack.c.l.b16 %v508_v26  ;;  %v529_v38 = vrot.slane %v527_v28, 5  ;;  %v437_v42 = vld [vmem:[%s2060_s4 + $0x2c] sm:$0x1]  ;;  %v1771_v45 = vor.u32 %v1925_v34, %v1770_v33  ;;  %v1800_v47 = vor.u32 %v1929_v40, %v1799_v39  ;;  %v438_v52 = vld [vmem:[%s2060_s4 + $0x30] sm:$0xf] }
  0x24   : > { %1746 = vmatmul.msk.bf16.vlgmr.msrb.gmra.mxu1 %vm215_vm1, %v1733_v9  ;;  %v516_v48 = vor.u32 %v515_v36, %v512_v35  ;;  %v519_v49 = vshll.u32 %v435_v41, 16  ;;  %v533_v51 = vshll.u32 %v437_v42, 16  ;;  %v440_v53 = vld [vmem:[%s2060_s4 + $0x38] sm:$0xf]  ;;  %v538_v58 = vshrl.u32 %v438_v52, 16 }
  0x25   : > { %1751 = vmatmul.msk.bf16.vlgmr.msrb.gmra.mxu2 %vm215_vm1, %v575_v10  ;;  %v576_v44 = vpack.c.b16 %v570_v32, %v569_v31  ;;  %v530_v50 = vor.u32 %v529_v38, %v526_v37  ;;  %v541_v59 = vshll.u32 %v438_v52, 16  ;;  %v552_v60 = vshrl.u32 %v440_v53, 16  ;;  %v439_v4 = vld [vmem:[%s2060_s4 + $0x34] sm:$0x1]  ;;  %v441_v5 = vld [vmem:[%s2060_s4 + $0x3c] sm:$0x1] }
  0x26   : > { %1809 = vmatmul.msk.bf16.vlgmr.msrb.gmra.mxu0 %vm215_vm1, %v1796_v12  ;;  %1780 = vmatmul.msk.bf16.vlgmr.msrb.gmra.mxu3 %vm215_vm1, %v1767_v11  ;;  %v517_v54 = vrot.slane %v516_v48, 4  ;;  %v521_v55 = vrot.slane %v519_v49, 5  ;;  %v535_v57 = vrot.slane %v533_v51, 5  ;;  %v555_v61 = vshll.u32 %v440_v53, 16  ;;  %v1740_v6 = vld [vmem:[%s2060_s4 + $0x68] sm:$0xf] }
  0x27   : > { %v531_v56 = vrot.slane %v530_v50, 4  ;;  %v540_v0 = vrot.slane %v538_v58, 4  ;;  %v543_v1 = vrot.slane %v541_v59, 5  ;;  %v554_v2 = vrot.slane %v552_v60, 4  ;;  %v1922_v7 = vld [vmem:[%s2060_s4 + $0x6c] sm:$0xf0] }
  0x28   : > { %v522_v62 = vsel %vm2090_vm4, %v517_v54, %v521_v55  ;;  %v557_v3 = vrot.slane %v555_v61, 5  ;;  %v1803_v10 = vld [vmem:[%s2060_s4 + $0xf8] sm:$0xf]  ;;  %v1930_v11 = vld [vmem:[%s2060_s4 + $0xfc] sm:$0xf0]  ;;  %v547_v15 = vshll.u32 %v439_v4, 16  ;;  %v1741_v18 = vor.u32 %v1922_v7, %v1740_v6 }
  0x29   : > { %v536_v63 = vsel %vm2090_vm4, %v531_v56, %v535_v57  ;;  %v571_v8 = vunpack.c.l.b16 %v522_v62  ;;  %v1774_v12 = vld [vmem:[%s2060_s4 + $0xb0] sm:$0xf]  ;;  %v1926_v13 = vld [vmem:[%s2060_s4 + $0xb4] sm:$0xf0]  ;;  %v544_v14 = vor.u32 %v543_v1, %v540_v0  ;;  %v561_v17 = vshll.u32 %v441_v5, 16 }
  0x2a   : > { %v572_v9 = vunpack.c.l.b16 %v536_v63  ;;  %v558_v16 = vor.u32 %v557_v3, %v554_v2  ;;  %v1804_v20 = vor.u32 %v1930_v11, %v1803_v10  ;;  %v1775_v21 = vor.u32 %v1926_v13, %v1774_v12  ;;  %v1813_v26 = vld [vmem:[%s2060_s4 + $0x90] sm:$0xf]  ;;  %v1815_v27 = vld [vmem:[%s2060_s4 + $0x98] sm:$0xf]  ;;  %v1923_v35 = vld [vmem:[%s2060_s4 + $0x7c] sm:$0xf0] }
  0x2b   : > { %v545_v22 = vrot.slane %v544_v14, 4  ;;  %v549_v23 = vrot.slane %v547_v15, 5  ;;  %v563_v25 = vrot.slane %v561_v17, 5  ;;  %v866_v30 = vshrl.u32 %v1813_v26, 16  ;;  %v1744_v34 = vld [vmem:[%s2060_s4 + $0x78] sm:$0xf] }
  0x2c   : > { %v577_v19 = vpack.c.b16 %v572_v9, %v571_v8  ;;  %v559_v24 = vrot.slane %v558_v16, 4  ;;  %v869_v31 = vshll.u32 %v1813_v26, 16  ;;  %v880_v32 = vshrl.u32 %v1815_v27, 16  ;;  %v1814_v38 = vld [vmem:[%s2060_s4 + $0x94] sm:$0x1] }
  0x2d   : > { %v550_v28 = vsel %vm2090_vm4, %v545_v22, %v549_v23  ;;  %v883_v33 = vshll.u32 %v1815_v27, 16  ;;  %v1816_v39 = vld [vmem:[%s2060_s4 + $0x9c] sm:$0x1]  ;;  %v868_v40 = vrot.slane %v866_v30, 4  ;;  %v1931_v48 = vld [vmem:[%s2060_s4 + $0x10c] sm:$0xf0]  ;;  %v1745_v52 = vor.u32 %v1923_v35, %v1744_v34 }
  0x2e   : > { %v564_v29 = vsel %vm2090_vm4, %v559_v24, %v563_v25  ;;  %v573_v36 = vunpack.c.l.b16 %v550_v28  ;;  %v871_v41 = vrot.slane %v869_v31, 5  ;;  %v882_v42 = vrot.slane %v880_v32, 4  ;;  %v1778_v54 = vld [vmem:[%s2060_s4 + $0xc0] sm:$0xf]  ;;  %v1927_v55 = vld [vmem:[%s2060_s4 + $0xc4] sm:$0xf0] }
  0x2f   : > { %v574_v37 = vunpack.c.l.b16 %v564_v29  ;;  %v875_v56 = vshll.u32 %v1814_v38, 16  ;;  %v889_v59 = vshll.u32 %v1816_v39, 16  ;;  %v1893_v0 = vld [vmem:[%s2060_s4 + $0xc] sm:$0x1]  ;;  %v1895_v1 = vld [vmem:[%s2060_s4 + $0x14] sm:$0x1]  ;;  %v1779_v4 = vor.u32 %v1927_v55, %v1778_v54 }
  0x30   : > { %v872_v58 = vor.u32 %v871_v41, %v868_v40  ;;  %v1288_v6 = vshll.u32 %v1893_v0, 16  ;;  %v1302_v7 = vshll.u32 %v1895_v1, 16  ;;  %v1817_v9 = vld [vmem:[%s2060_s4 + $0xa0] sm:$0xf]  ;;  %v1819_v10 = vld [vmem:[%s2060_s4 + $0xa8] sm:$0xf] }
  0x31   : > { %v578_v53 = vpack.c.b16 %v574_v37, %v573_v36  ;;  %v877_v12 = vrot.slane %v875_v56, 5  ;;  %v891_v14 = vrot.slane %v889_v59, 5  ;;  %v911_v22 = vshll.u32 %v1819_v10, 16  ;;  %v1818_v27 = vld [vmem:[%s2060_s4 + $0xa4] sm:$0x1] }
  0x32   : > { %v873_v11 = vrot.slane %v872_v58, 4  ;;  %v1290_v16 = vrot.slane %v1288_v6, 5  ;;  %v1845_v34 = vld [vmem:[%s2060_s4 + $0x8] sm:$0xf]  ;;  %v1932_v35 = vld [vmem:[%s2060_s4 + $0xc] sm:$0xf0] }
  0x33   : > { %v913_v31 = vrot.slane %v911_v22, 5  ;;  %v1820_v36 = vld [vmem:[%s2060_s4 + $0xac] sm:$0x1]  ;;  %v1874_v37 = vld [vmem:[%s2060_s4 + $0x50] sm:$0xf]  ;;  %vm1528_vm7 = vcmask 58368  }
  0x34   : > { %1747 = vmatmul.msk.bf16.gmra.mxu1 %vm215_vm1, %v1737_v43  ;;  %v885_v43 = vrot.slane %v883_v33, 5  ;;  %v878_v23 = vsel %vm2090_vm4, %v873_v11, %v877_v12  ;;  %v1896_v40 = vld [vmem:[%s2060_s4 + $0x18] sm:$0xf]  ;;  %v1898_v41 = vld [vmem:[%s2060_s4 + $0x20] sm:$0xf] }
  0x35   : > { %1752 = vmatmul.msk.bf16.gmra.mxu2 %vm215_vm1, %v576_v44  ;;  %v1807_v44 = vld [vmem:[%s2060_s4 + $0x108] sm:$0xf]  ;;  %v979_v32 = vunpack.c.l.b16 %v878_v23  ;;  %v1897_v58 = vld [vmem:[%s2060_s4 + $0x1c] sm:$0x1]  ;;  %v1899_v59 = vld [vmem:[%s2060_s4 + $0x24] sm:$0x1] }
  0x36   : > { %1810 = vmatmul.msk.bf16.gmra.mxu0 %vm215_vm1, %v1800_v47  ;;  %1781 = vmatmul.msk.bf16.gmra.mxu3 %vm215_vm1, %v1771_v45  ;;  %v1892_v45 = vld [vmem:[%s2060_s4 + $0x8] sm:$0xf]  ;;  %v1894_v47 = vld [vmem:[%s2060_s4 + $0x10] sm:$0xf]  ;;  %v886_v62 = vor.u32 %v885_v43, %v882_v42  ;;  %v1808_v63 = vor.u32 %v1931_v48, %v1807_v44  ;;  %v1936_v42 = vld [vmem:[%s2060_s4 + $0x54] sm:$0xf0] }
  0x37   : > { %v1279_v49 = vshrl.u32 %v1892_v45, 16  ;;  %v1282_v50 = vshll.u32 %v1892_v45, 16  ;;  %v1293_v51 = vshrl.u32 %v1894_v47, 16  ;;  %v1296_v57 = vshll.u32 %v1894_v47, 16  ;;  %v1821_v6 = vld [vmem:[%s2060_s4 + $0xb0] sm:$0xf] }
  0x38   : > { %v887_v13 = vrot.slane %v886_v62, 4  ;;  %v903_v43 = vshll.u32 %v1818_v27, 16  ;;  %v1307_v44 = vshrl.u32 %v1896_v40, 16  ;;  %v1310_v45 = vshll.u32 %v1896_v40, 16  ;;  %v1822_v23 = vld [vmem:[%s2060_s4 + $0xb4] sm:$0x1] }
  0x39   : > { %v1281_v60 = vrot.slane %v1279_v49, 4  ;;  %v1284_v61 = vrot.slane %v1282_v50, 5  ;;  %v1295_v2 = vrot.slane %v1293_v51, 4  ;;  %v1298_v3 = vrot.slane %v1296_v57, 5 }
  0x3a   : > { %v892_v24 = vsel %vm2090_vm4, %v887_v13, %v891_v14  ;;  %v1321_v47 = vshrl.u32 %v1898_v41, 16  ;;  %v917_v50 = vshll.u32 %v1820_v36, 16  ;;  %v1324_v51 = vshll.u32 %v1898_v41, 16  ;;  %v1878_v36 = vld [vmem:[%s2060_s4 + $0x60] sm:$0xf] }
  0x3b   : > { %v1285_v5 = vor.u32 %v1284_v61, %v1281_v60  ;;  %v1299_v8 = vor.u32 %v1298_v3, %v1295_v2  ;;  %v980_v33 = vunpack.c.l.b16 %v892_v24  ;;  %v1309_v54 = vrot.slane %v1307_v44, 4  ;;  %v1824_v24 = vld [vmem:[%s2060_s4 + $0xbc] sm:$0x1] }
  0x3c   : > { %v1312_v55 = vrot.slane %v1310_v45, 5  ;;  %v1875_v56 = vor.u32 %v1936_v42, %v1874_v37  ;;  %v1323_v60 = vrot.slane %v1321_v47, 4  ;;  %v1326_v61 = vrot.slane %v1324_v51, 5  ;;  %v1903_v51 = vld [vmem:[%s2060_s4 + $0x34] sm:$0x1] }
  0x3d   : > { %v1286_v15 = vrot.slane %v1285_v5, 4  ;;  %v1300_v17 = vrot.slane %v1299_v8, 4  ;;  %v905_v62 = vrot.slane %v903_v43, 5  ;;  %v1316_v0 = vshll.u32 %v1897_v58, 16 }
  0x3e   : > { %v1330_v1 = vshll.u32 %v1899_v59, 16  ;;  %v1327_v5 = vor.u32 %v1326_v61, %v1323_v60  ;;  %v1993_v14 = vmov 0.0   ;;  %v945_v45 = vshll.u32 %v1824_v24, 16 }
  0x3f   : > { %v1291_v25 = vsel %vm2090_vm4, %v1286_v15, %v1290_v16  ;;  %218 = vst.msk [vmem:[#allocation2 + $0x10] sm:$0xff] %vm215_vm1, %v1993_v14  ;;  %v922_v15 = vshrl.u32 %v1821_v6, 16  ;;  %v925_v16 = vshll.u32 %v1821_v6, 16  ;;  %v1358_v59 = vshll.u32 %v1903_v51, 16 }
  0x40   : > { %v1392_v38 = vunpack.c.l.b16 %v1291_v25  ;;  %v1332_v11 = vrot.slane %v1330_v1, 5  ;;  %216 = vst.msk [vmem:[#allocation2] sm:$0xff] %vm215_vm1, %v1993_v14  ;;  %v1849_v25 = vld [vmem:[%s2060_s4 + $0x18] sm:$0xf]  ;;  %v1827_v1 = vld [vmem:[%s2060_s4 + $0xc8] sm:$0xf] }
  0x41   : > { %217 = vst.msk [vmem:[#allocation2 + $0x8] sm:$0xff] %vm215_vm1, %v1993_v14  ;;  %v927_v27 = vrot.slane %v925_v16, 5  ;;  %v1853_v16 = vld [vmem:[%s2060_s4 + $0x28] sm:$0xf] }
  0x42   : > { %219 = vst.msk [vmem:[#allocation2 + $0x18] sm:$0xff] %vm215_vm1, %v1993_v14 }
  0x43   : > { %220 = vst.msk [vmem:[#allocation2 + $0x20] sm:$0xff] %vm215_vm1, %v1993_v14 }
  0x44   : > { %1748 = vmatmul.msk.bf16.gmra.mxu1 %vm215_vm1, %v1741_v18  ;;  %v1304_v18 = vrot.slane %v1302_v7, 5  ;;  %v1823_v7 = vld [vmem:[%s2060_s4 + $0xb8] sm:$0xf]  ;;  %221 = vst.msk [vmem:[#allocation2 + $0x28] sm:$0xff] %vm215_vm1, %v1993_v14 }
  0x45   : > { %1753 = vmatmul.msk.bf16.gmra.mxu2 %vm215_vm1, %v577_v19  ;;  %v894_v19 = vshrl.u32 %v1817_v9, 16  ;;  %222 = vst.msk [vmem:[#allocation2 + $0x30] sm:$0xff] %vm215_vm1, %v1993_v14 }
  0x46   : > { %1811 = vmatmul.msk.bf16.gmra.mxu0 %vm215_vm1, %v1804_v20  ;;  %1782 = vmatmul.msk.bf16.gmra.mxu3 %vm215_vm1, %v1775_v21  ;;  %v897_v20 = vshll.u32 %v1817_v9, 16  ;;  %v908_v21 = vshrl.u32 %v1819_v10, 16  ;;  %v1305_v26 = vsel %vm2090_vm4, %v1300_v17, %v1304_v18  ;;  %v1318_v9 = vrot.slane %v1316_v0, 5  ;;  %223 = vst.msk [vmem:[#allocation2 + $0x38] sm:$0xff] %vm215_vm1, %v1993_v14 }
  0x47   : > { %v896_v28 = vrot.slane %v894_v19, 4  ;;  %v1393_v39 = vunpack.c.l.b16 %v1305_v26  ;;  %v1328_v10 = vrot.slane %v1327_v5, 4  ;;  %v936_v17 = vshrl.u32 %v1823_v7, 16 }
  0x48   : > { %v899_v29 = vrot.slane %v897_v20, 5  ;;  %v910_v30 = vrot.slane %v908_v21, 4  ;;  %v939_v18 = vshll.u32 %v1823_v7, 16  ;;  %v924_v26 = vrot.slane %v922_v15, 4 }
  0x49   : > { %v1400_v57 = vpack.c.b16 %v1393_v39, %v1392_v38  ;;  %v1333_v22 = vsel %vm2090_vm4, %v1328_v10, %v1332_v11  ;;  %v1937_v38 = vld [vmem:[%s2060_s4 + $0x64] sm:$0xf0]  ;;  %v931_v39 = vshll.u32 %v1822_v23, 16  ;;  %v1360_v5 = vrot.slane %v1358_v59, 5 }
  0x4a   : > { %v900_v48 = vor.u32 %v899_v29, %v896_v28  ;;  %v914_v49 = vor.u32 %v913_v31, %v910_v30  ;;  %v938_v28 = vrot.slane %v936_v17, 4  ;;  %v941_v29 = vrot.slane %v939_v18, 5  ;;  %v1934_v17 = vld [vmem:[%s2060_s4 + $0x2c] sm:$0xf0]  ;;  %v239_v46 = vld [vmem:[#allocation2 + $0x20] sm:$0xff] }
  0x4b   : > { %v1395_v31 = vunpack.c.l.b16 %v1333_v22  ;;  %v928_v43 = vor.u32 %v927_v27, %v924_v26  ;;  %v964_v10 = vshrl.u32 %v1827_v1, 16  ;;  %v967_v11 = vshll.u32 %v1827_v1, 16  ;;  %v1826_v22 = vld [vmem:[%s2060_s4 + $0xc4] sm:$0x1]  ;;  %v1904_v27 = vld [vmem:[%s2060_s4 + $0x38] sm:$0xf] }
  0x4c   : > { %v901_v2 = vrot.slane %v900_v48, 4  ;;  %v915_v3 = vrot.slane %v914_v49, 4  ;;  %v942_v44 = vor.u32 %v941_v29, %v938_v28  ;;  %v1906_v28 = vld [vmem:[%s2060_s4 + $0x40] sm:$0xf]  ;;  %v1828_v29 = vld [vmem:[%s2060_s4 + $0xcc] sm:$0x1] }
  0x4d   : > { %v929_v60 = vrot.slane %v928_v43, 4  ;;  %v966_v23 = vrot.slane %v964_v10, 4  ;;  %v969_v24 = vrot.slane %v967_v11, 5  ;;  %v235_v11 = vld [vmem:[#allocation2] sm:$0xff] }
  0x4e   : > { %v906_v12 = vsel %vm2090_vm4, %v901_v2, %v905_v62  ;;  %v943_v61 = vrot.slane %v942_v44, 4  ;;  %v947_v62 = vrot.slane %v945_v45, 5  ;;  %v973_v44 = vshll.u32 %v1828_v29, 16 }
  0x4f   : > { %v981_v19 = vunpack.c.l.b16 %v906_v12  ;;  %v970_v43 = vor.u32 %v969_v24, %v966_v23 }
  0x54   : > { %1749 = vmatmul.msk.bf16.gmra.mxu1 %vm215_vm1, %v1745_v52  ;;  %v987_v52 = vpack.c.b16 %v980_v33, %v979_v32  ;;  %v1900_v32 = vld [vmem:[%s2060_s4 + $0x28] sm:$0xf]  ;;  %v1902_v33 = vld [vmem:[%s2060_s4 + $0x30] sm:$0xf] }
  0x55   : > { %1754 = vmatmul.msk.bf16.gmra.mxu2 %vm215_vm1, %v578_v53  ;;  %v1846_v53 = vor.u32 %v1932_v35, %v1845_v34  ;;  %v1933_v35 = vld [vmem:[%s2060_s4 + $0x1c] sm:$0xf0]  ;;  %v1335_v37 = vshrl.u32 %v1900_v32, 16  ;;  %v1338_v40 = vshll.u32 %v1900_v32, 16  ;;  %v1349_v41 = vshrl.u32 %v1902_v33, 16 }
  0x56   : > { %1812 = vmatmul.msk.bf16.gmra.mxu0 %vm215_vm1, %v1808_v63  ;;  %1783 = vmatmul.msk.bf16.gmra.mxu3 %vm215_vm1, %v1779_v4  ;;  %v1313_v63 = vor.u32 %v1312_v55, %v1309_v54  ;;  %v919_v4 = vrot.slane %v917_v50, 5  ;;  %v1352_v42 = vshll.u32 %v1902_v33, 16  ;;  %v1850_v48 = vor.u32 %v1933_v35, %v1849_v25  ;;  %v1901_v50 = vld [vmem:[%s2060_s4 + $0x2c] sm:$0x1] }
  0x57   : > { %v1337_v47 = vrot.slane %v1335_v37, 4  ;;  %v1879_v54 = vor.u32 %v1937_v38, %v1878_v36  ;;  %v1344_v55 = vshll.u32 %v1901_v50, 16  ;;  %v1377_v32 = vshrl.u32 %v1906_v28, 16 }
  0x58   : > { %v1314_v8 = vrot.slane %v1313_v63, 4  ;;  %v920_v13 = vsel %vm2090_vm4, %v915_v3, %v919_v4  ;;  %v1825_v63 = vld [vmem:[%s2060_s4 + $0xc0] sm:$0xf]  ;;  %v1380_v33 = vshll.u32 %v1906_v28, 16  ;;  %v1854_v35 = vor.u32 %v1934_v17, %v1853_v16 }
  0x59   : > { %v982_v20 = vunpack.c.l.b16 %v920_v13  ;;  %v1346_v3 = vrot.slane %v1344_v55, 5  ;;  %v950_v6 = vshrl.u32 %v1825_v63, 16  ;;  %v953_v7 = vshll.u32 %v1825_v63, 16 }
  0x5a   : > { %v1319_v21 = vsel %vm2090_vm4, %v1314_v8, %v1318_v9  ;;  %v948_v9 = vsel %vm2090_vm4, %v943_v61, %v947_v62  ;;  %v971_v55 = vrot.slane %v970_v43, 4 }
  0x5b   : > { %v1394_v30 = vunpack.c.l.b16 %v1319_v21  ;;  %v988_v34 = vpack.c.b16 %v982_v20, %v981_v19  ;;  %v984_v15 = vunpack.c.l.b16 %v948_v9  ;;  %v952_v18 = vrot.slane %v950_v6, 4  ;;  %v1882_v20 = vld [vmem:[%s2060_s4 + $0x70] sm:$0xf]  ;;  %v1938_v21 = vld [vmem:[%s2060_s4 + $0x74] sm:$0xf0] }
  0x5c   : > { %v955_v19 = vrot.slane %v953_v7, 5  ;;  %v1883_v36 = vor.u32 %v1938_v21, %v1882_v20  ;;  %v1935_v6 = vld [vmem:[%s2060_s4 + $0x3c] sm:$0xf0]  ;;  %v237_v7 = vld [vmem:[#allocation2 + $0x10] sm:$0xff]  ;;  %v1939_v9 = vld [vmem:[%s2060_s4 + $0x84] sm:$0xf0] }
  0x5d   : > { %v1401_v49 = vpack.c.b16 %v1395_v31, %v1394_v30  ;;  %v1363_v30 = vshrl.u32 %v1904_v27, 16  ;;  %v1366_v31 = vshll.u32 %v1904_v27, 16  ;;  %v241_v20 = vld [vmem:[#allocation2 + $0x30] sm:$0xff] }
  0x5e   : > { %v956_v37 = vor.u32 %v955_v19, %v952_v18  ;;  %v238_v19 = vld [vmem:[#allocation2 + $0x18] sm:$0xff] }
  0x5f   : > { %v1365_v38 = vrot.slane %v1363_v30, 4  ;;  %v240_v30 = vld [vmem:[#allocation2 + $0x28] sm:$0xff] }
  0x64   : > { %1830 = vmatmul.msk.bf16.vlgmr.msra.gmra.mxu1 %vm215_vm1, %v987_v52  ;;  %v1340_v52 = vrot.slane %v1338_v40, 5  ;;  %v1379_v40 = vrot.slane %v1377_v32, 4  ;;  %v242_v32 = vld [vmem:[#allocation2 + $0x38] sm:$0xff] }
  0x65   : > { %1859 = vmatmul.msk.bf16.vlgmr.msra.gmra.mxu2 %vm215_vm1, %v1846_v53  ;;  %v1351_v53 = vrot.slane %v1349_v41, 4  ;;  %v1382_v41 = vrot.slane %v1380_v33, 5 }
  0x66   : > { %1909 = vmatmul.msk.bf16.vlgmr.msra.gmra.mxu0 %vm215_vm1, %v1400_v57  ;;  %1888 = vmatmul.msk.bf16.vlgmr.msra.gmra.mxu3 %vm215_vm1, %v1875_v56  ;;  %v1354_v56 = vrot.slane %v1352_v42, 5  ;;  %v933_v57 = vrot.slane %v931_v39, 5  ;;  %v1341_v58 = vor.u32 %v1340_v52, %v1337_v47  ;;  %v1368_v39 = vrot.slane %v1366_v31, 5  ;;  %v1905_v47 = vld [vmem:[%s2060_s4 + $0x3c] sm:$0x1] }
  0x67   : > { %v959_v42 = vshll.u32 %v1826_v22, 16  ;;  %v1372_v50 = vshll.u32 %v1905_v47, 16  ;;  %v1383_v51 = vor.u32 %v1382_v41, %v1379_v40  ;;  %v236_v22 = vld [vmem:[#allocation2 + $0x8] sm:$0xff] }
  0x68   : > { %v1355_v0 = vor.u32 %v1354_v56, %v1351_v53  ;;  %v1342_v2 = vrot.slane %v1341_v58, 4  ;;  %v934_v8 = vsel %vm2090_vm4, %v929_v60, %v933_v57  ;;  %v957_v53 = vrot.slane %v956_v37, 4 }
  0x69   : > { %v983_v14 = vunpack.c.l.b16 %v934_v8  ;;  %v975_v56 = vrot.slane %v973_v44, 5  ;;  %v1374_v58 = vrot.slane %v1372_v50, 5  ;;  %v1384_v59 = vrot.slane %v1383_v51, 4  ;;  %v1886_v8 = vld [vmem:[%s2060_s4 + $0x80] sm:$0xf] }
  0x6a   : > { %v1356_v4 = vrot.slane %v1355_v0, 4  ;;  %v1347_v12 = vsel %vm2090_vm4, %v1342_v2, %v1346_v3  ;;  %v1887_v17 = vor.u32 %v1939_v9, %v1886_v8 }
  0x6b   : > { %v1396_v25 = vunpack.c.l.b16 %v1347_v12  ;;  %v976_v62 = vsel %vm2090_vm4, %v971_v55, %v975_v56 }
  0x6c   : > { %v1361_v13 = vsel %vm2090_vm4, %v1356_v4, %v1360_v5  ;;  %v986_v2 = vunpack.c.l.b16 %v976_v62  ;;  %v1857_v5 = vld [vmem:[%s2060_s4 + $0x38] sm:$0xf] }
  0x6d   : > { %v1397_v26 = vunpack.c.l.b16 %v1361_v13  ;;  %v1858_v13 = vor.u32 %v1935_v6, %v1857_v5 }
  0x6f   : > { %v1402_v45 = vpack.c.b16 %v1397_v26, %v1396_v25 }
  0x74   : > { %1831 = vmatmul.msk.bf16.gmra.mxu1 %vm215_vm1, %v988_v34  ;;  %v989_v34 = vpack.c.b16 %v984_v15, %v983_v14 }
  0x75   : > { %1860 = vmatmul.msk.bf16.gmra.mxu2 %vm215_vm1, %v1850_v48  ;;  %v1907_v48 = vld [vmem:[%s2060_s4 + $0x44] sm:$0x1] }
  0x76   : > { %1910 = vmatmul.msk.bf16.gmra.mxu0 %vm215_vm1, %v1401_v49  ;;  %1889 = vmatmul.msk.bf16.gmra.mxu3 %vm215_vm1, %v1879_v54  ;;  %v1369_v49 = vor.u32 %v1368_v39, %v1365_v38  ;;  %v1386_v52 = vshll.u32 %v1907_v48, 16  ;;  %v961_v54 = vrot.slane %v959_v42, 5 }
  0x78   : > { %v1370_v57 = vrot.slane %v1369_v49, 4  ;;  %v1388_v60 = vrot.slane %v1386_v52, 5  ;;  %v962_v61 = vsel %vm2090_vm4, %v957_v53, %v961_v54 }
  0x79   : > { %v985_v1 = vunpack.c.l.b16 %v962_v61 }
  0x7a   : > { %v1375_v63 = vsel %vm2090_vm4, %v1370_v57, %v1374_v58  ;;  %v1389_v0 = vsel %vm2090_vm4, %v1384_v59, %v1388_v60 }
  0x7b   : > { %v1398_v3 = vunpack.c.l.b16 %v1375_v63  ;;  %v1399_v4 = vunpack.c.l.b16 %v1389_v0  ;;  %v990_v10 = vpack.c.b16 %v986_v2, %v985_v1 }
  0x7d   : > { %v1403_v14 = vpack.c.b16 %v1399_v4, %v1398_v3 }
  0x84   : > { %1832 = vmatmul.msk.bf16.gmra.mxu1 %vm215_vm1, %v989_v34 }
  0x85   : > { %1861 = vmatmul.msk.bf16.gmra.mxu2 %vm215_vm1, %v1854_v35 }
  0x86   : > { %1911 = vmatmul.msk.bf16.gmra.mxu0 %vm215_vm1, %v1402_v45  ;;  %1890 = vmatmul.msk.bf16.gmra.mxu3 %vm215_vm1, %v1883_v36 }
  0x91   : > { %v294_v12 = vpop.f32.mrf.mxu1 }
  0x92   : > { %v311_v15 = vadd.f32 %v294_v12, %v237_v7 }
  0x93   : > { %v289_v16 = vpop.f32.mrf.mxu0 }
  0x94   : > { %v309_v18 = vadd.f32 %v289_v16, %v235_v11  ;;  %319 = vst.msk [vmem:[#allocation2 + $0x10] sm:$0xff] %vm215_vm1, %v311_v15  ;;  %1833 = vmatmul.msk.bf16.gmra.mxu1 %vm215_vm1, %v990_v10 }
  0x95   : > { %1862 = vmatmul.msk.bf16.gmra.mxu2 %vm215_vm1, %v1858_v13 }
  0x96   : > { %317 = vst.msk [vmem:[#allocation2] sm:$0xff] %vm215_vm1, %v309_v18  ;;  %1912 = vmatmul.msk.bf16.gmra.mxu0 %vm215_vm1, %v1403_v14  ;;  %1891 = vmatmul.msk.bf16.gmra.mxu3 %vm215_vm1, %v1887_v17 }
  0x98   : > { %v299_v21 = vpop.f32.mrf.mxu2 }
  0x99   : > { %v313_v23 = vadd.f32 %v299_v21, %v239_v46  ;;  %v296_v24 = vpop.f32.mrf.mxu1  ;;  %v304_v25 = vpop.f32.mrf.mxu3 }
  0x9a   : > { %v312_v26 = vadd.f32 %v296_v24, %v238_v19  ;;  %v315_v27 = vadd.f32 %v304_v25, %v241_v20 }
  0x9b   : > { %v291_v28 = vpop.f32.mrf.mxu0  ;;  %321 = vst.msk [vmem:[#allocation2 + $0x20] sm:$0xff] %vm215_vm1, %v313_v23  ;;  %v338_v50 = vld [vmem:[#allocation2 + $0x10] sm:$0xff] }
  0x9c   : > { %v310_v29 = vadd.f32 %v291_v28, %v236_v22  ;;  %320 = vst.msk [vmem:[#allocation2 + $0x18] sm:$0xff] %vm215_vm1, %v312_v26 }
  0x9d   : > { %323 = vst.msk [vmem:[#allocation2 + $0x30] sm:$0xff] %vm215_vm1, %v315_v27  ;;  %v336_v31 = vld [vmem:[#allocation2] sm:$0xff] }
  0x9e   : > { %318 = vst.msk [vmem:[#allocation2 + $0x8] sm:$0xff] %vm215_vm1, %v310_v29 }
  0xa0   : > { %v301_v33 = vpop.f32.mrf.mxu2 }
  0xa1   : > { %v314_v34 = vadd.f32 %v301_v33, %v240_v30  ;;  %v390_v35 = vpop.f32.mrf.mxu1  ;;  %v306_v36 = vpop.f32.mrf.mxu3 }
  0xa2   : > { %v410_v37 = vadd.f32 %v390_v35, %v336_v31  ;;  %v316_v38 = vadd.f32 %v306_v36, %v242_v32  ;;  %v340_v8 = vld [vmem:[#allocation2 + $0x20] sm:$0xff] }
  0xa3   : > { %v805_v39 = vpop.f32.mrf.mxu0  ;;  %322 = vst.msk [vmem:[#allocation2 + $0x28] sm:$0xff] %vm215_vm1, %v314_v34  ;;  %v339_v60 = vld [vmem:[#allocation2 + $0x18] sm:$0xff] }
  0xa4   : > { %418 = vst.msk [vmem:[#allocation2] sm:$0xff] %vm215_vm1, %v410_v37  ;;  %v342_v30 = vld [vmem:[#allocation2 + $0x30] sm:$0xff] }
  0xa5   : > { %324 = vst.msk [vmem:[#allocation2 + $0x38] sm:$0xff] %vm215_vm1, %v316_v38  ;;  %v337_v40 = vld [vmem:[#allocation2 + $0x8] sm:$0xff] }
  0xa8   : > { %v603_v41 = vpop.f32.mrf.mxu2 }
  0xa9   : > { %v392_v42 = vpop.f32.mrf.mxu1  ;;  %v704_v43 = vpop.f32.mrf.mxu3 }
  0xaa   : > { %v411_v44 = vadd.f32 %v392_v42, %v337_v40  ;;  %v341_v19 = vld [vmem:[#allocation2 + $0x28] sm:$0xff] }
  0xab   : > { %v807_v45 = vpop.f32.mrf.mxu0  ;;  %v442_v47 = vld [vmem:[#allocation2] sm:$0xff] }
  0xac   : > { %v623_v48 = vadd.f32 %v603_v41, %v442_v47  ;;  %419 = vst.msk [vmem:[#allocation2 + $0x8] sm:$0xff] %vm215_vm1, %v411_v44  ;;  %v343_v42 = vld [vmem:[#allocation2 + $0x38] sm:$0xff] }
  0xae   : > { %631 = vst.msk [vmem:[#allocation2] sm:$0xff] %vm215_vm1, %v623_v48 }
  0xb0   : > { %v605_v49 = vpop.f32.mrf.mxu2 }
  0xb1   : > { %v395_v51 = vpop.f32.mrf.mxu1  ;;  %v706_v52 = vpop.f32.mrf.mxu3 }
  0xb2   : > { %v412_v53 = vadd.f32 %v395_v51, %v338_v50 }
  0xb3   : > { %v443_v54 = vld [vmem:[#allocation2 + $0x8] sm:$0xff]  ;;  %v810_v56 = vpop.f32.mrf.mxu0 }
  0xb4   : > { %v624_v55 = vadd.f32 %v605_v49, %v443_v54  ;;  %420 = vst.msk [vmem:[#allocation2 + $0x10] sm:$0xff] %vm215_vm1, %v412_v53 }
  0xb5   : > { %v650_v57 = vld [vmem:[#allocation2] sm:$0xff] }
  0xb6   : > { %v724_v58 = vadd.f32 %v704_v43, %v650_v57  ;;  %632 = vst.msk [vmem:[#allocation2 + $0x8] sm:$0xff] %vm215_vm1, %v624_v55 }
  0xb8   : > { %732 = vst.msk [vmem:[#allocation2] sm:$0xff] %vm215_vm1, %v724_v58  ;;  %v608_v59 = vpop.f32.mrf.mxu2 }
  0xb9   : > { %v397_v61 = vpop.f32.mrf.mxu1  ;;  %v709_v62 = vpop.f32.mrf.mxu3 }
  0xba   : > { %v413_v63 = vadd.f32 %v397_v61, %v339_v60 }
  0xbb   : > { %v444_v0 = vld [vmem:[#allocation2 + $0x10] sm:$0xff]  ;;  %v812_v4 = vpop.f32.mrf.mxu0 }
  0xbc   : > { %v625_v1 = vadd.f32 %v608_v59, %v444_v0  ;;  %421 = vst.msk [vmem:[#allocation2 + $0x18] sm:$0xff] %vm215_vm1, %v413_v63 }
  0xbd   : > { %v651_v2 = vld [vmem:[#allocation2 + $0x8] sm:$0xff] }
  0xbe   : > { %v725_v3 = vadd.f32 %v706_v52, %v651_v2  ;;  %633 = vst.msk [vmem:[#allocation2 + $0x10] sm:$0xff] %vm215_vm1, %v625_v1 }
  0xbf   : > { %v751_v5 = vld [vmem:[#allocation2] sm:$0xff] }
  0xc0   : > { %733 = vst.msk [vmem:[#allocation2 + $0x8] sm:$0xff] %vm215_vm1, %v725_v3  ;;  %v825_v6 = vadd.f32 %v805_v39, %v751_v5  ;;  %v610_v7 = vpop.f32.mrf.mxu2 }
  0xc1   : > { %v400_v9 = vpop.f32.mrf.mxu1  ;;  %v711_v10 = vpop.f32.mrf.mxu3 }
  0xc2   : > { %833 = vst.msk [vmem:[#allocation2] sm:$0xff] %vm215_vm1, %v825_v6  ;;  %v414_v11 = vadd.f32 %v400_v9, %v340_v8 }
  0xc3   : > { %v445_v12 = vld [vmem:[#allocation2 + $0x18] sm:$0xff]  ;;  %v815_v46 = vpop.f32.mrf.mxu0 }
  0xc4   : > { %v626_v13 = vadd.f32 %v610_v7, %v445_v12  ;;  %422 = vst.msk [vmem:[#allocation2 + $0x20] sm:$0xff] %vm215_vm1, %v414_v11 }
  0xc5   : > { %v652_v14 = vld [vmem:[#allocation2 + $0x10] sm:$0xff] }
  0xc6   : > { %v726_v15 = vadd.f32 %v709_v62, %v652_v14  ;;  %634 = vst.msk [vmem:[#allocation2 + $0x18] sm:$0xff] %vm215_vm1, %v626_v13 }
  0xc7   : > { %v752_v16 = vld [vmem:[#allocation2 + $0x8] sm:$0xff] }
  0xc8   : > { %734 = vst.msk [vmem:[#allocation2 + $0x10] sm:$0xff] %vm215_vm1, %v726_v15  ;;  %v826_v17 = vadd.f32 %v807_v45, %v752_v16  ;;  %v613_v18 = vpop.f32.mrf.mxu2 }
  0xc9   : > { %v402_v20 = vpop.f32.mrf.mxu1  ;;  %v714_v21 = vpop.f32.mrf.mxu3  ;;  %v857_v55 = vld [vmem:[#allocation2] sm:$0xff] }
  0xca   : > { %834 = vst.msk [vmem:[#allocation2 + $0x8] sm:$0xff] %vm215_vm1, %v826_v17  ;;  %v415_v22 = vadd.f32 %v402_v20, %v341_v19 }
  0xcb   : > { %v446_v23 = vld [vmem:[#allocation2 + $0x20] sm:$0xff]  ;;  %v817_v35 = vpop.f32.mrf.mxu0 }
  0xcc   : > { %v627_v24 = vadd.f32 %v613_v18, %v446_v23  ;;  %423 = vst.msk [vmem:[#allocation2 + $0x28] sm:$0xff] %vm215_vm1, %v415_v22 }
  0xcd   : > { %v653_v25 = vld [vmem:[#allocation2 + $0x18] sm:$0xff] }
  0xce   : > { %v727_v26 = vadd.f32 %v711_v10, %v653_v25  ;;  %635 = vst.msk [vmem:[#allocation2 + $0x20] sm:$0xff] %vm215_vm1, %v627_v24 }
  0xcf   : > { %v753_v27 = vld [vmem:[#allocation2 + $0x10] sm:$0xff] }
  0xd0   : > { %735 = vst.msk [vmem:[#allocation2 + $0x18] sm:$0xff] %vm215_vm1, %v727_v26  ;;  %v827_v28 = vadd.f32 %v810_v56, %v753_v27  ;;  %v615_v29 = vpop.f32.mrf.mxu2 }
  0xd1   : > { %v405_v31 = vpop.f32.mrf.mxu1  ;;  %v716_v32 = vpop.f32.mrf.mxu3  ;;  %v858_v3 = vld [vmem:[#allocation2 + $0x8] sm:$0xff] }
  0xd2   : > { %835 = vst.msk [vmem:[#allocation2 + $0x10] sm:$0xff] %vm215_vm1, %v827_v28  ;;  %v416_v33 = vadd.f32 %v405_v31, %v342_v30 }
  0xd3   : > { %v447_v34 = vld [vmem:[#allocation2 + $0x28] sm:$0xff]  ;;  %v820_v50 = vpop.f32.mrf.mxu0 }
  0xd4   : > { %v628_v36 = vadd.f32 %v615_v29, %v447_v34  ;;  %424 = vst.msk [vmem:[#allocation2 + $0x30] sm:$0xff] %vm215_vm1, %v416_v33 }
  0xd5   : > { %v654_v37 = vld [vmem:[#allocation2 + $0x20] sm:$0xff] }
  0xd6   : > { %v728_v38 = vadd.f32 %v714_v21, %v654_v37  ;;  %636 = vst.msk [vmem:[#allocation2 + $0x28] sm:$0xff] %vm215_vm1, %v628_v36 }
  0xd7   : > { %v754_v39 = vld [vmem:[#allocation2 + $0x18] sm:$0xff] }
  0xd8   : > { %736 = vst.msk [vmem:[#allocation2 + $0x20] sm:$0xff] %vm215_vm1, %v728_v38  ;;  %v828_v40 = vadd.f32 %v812_v4, %v754_v39  ;;  %v618_v41 = vpop.f32.mrf.mxu2 }
  0xd9   : > { %v407_v43 = vpop.f32.mrf.mxu1  ;;  %v719_v44 = vpop.f32.mrf.mxu3  ;;  %v859_v14 = vld [vmem:[#allocation2 + $0x10] sm:$0xff] }
  0xda   : > { %836 = vst.msk [vmem:[#allocation2 + $0x18] sm:$0xff] %vm215_vm1, %v828_v40  ;;  %v417_v45 = vadd.f32 %v407_v43, %v343_v42 }
  0xdb   : > { %v448_v47 = vld [vmem:[#allocation2 + $0x30] sm:$0xff]  ;;  %v822_v0 = vpop.f32.mrf.mxu0 }
  0xdc   : > { %v629_v48 = vadd.f32 %v618_v41, %v448_v47  ;;  %425 = vst.msk [vmem:[#allocation2 + $0x38] sm:$0xff] %vm215_vm1, %v417_v45 }
  0xdd   : > { %v655_v49 = vld [vmem:[#allocation2 + $0x28] sm:$0xff] }
  0xde   : > { %v729_v51 = vadd.f32 %v716_v32, %v655_v49  ;;  %637 = vst.msk [vmem:[#allocation2 + $0x30] sm:$0xff] %vm215_vm1, %v629_v48 }
  0xdf   : > { %v755_v52 = vld [vmem:[#allocation2 + $0x20] sm:$0xff] }
  0xe0   : > { %737 = vst.msk [vmem:[#allocation2 + $0x28] sm:$0xff] %vm215_vm1, %v729_v51  ;;  %v829_v53 = vadd.f32 %v815_v46, %v755_v52  ;;  %v620_v54 = vpop.f32.mrf.mxu2 }
  0xe1   : > { %v1015_v56 = vpop.f32.mrf.mxu1  ;;  %v721_v57 = vpop.f32.mrf.mxu3  ;;  %v860_v25 = vld [vmem:[#allocation2 + $0x18] sm:$0xff] }
  0xe2   : > { %837 = vst.msk [vmem:[#allocation2 + $0x20] sm:$0xff] %vm215_vm1, %v829_v53  ;;  %v1035_v58 = vadd.f32 %v1015_v56, %v857_v55 }
  0xe3   : > { %v449_v59 = vld [vmem:[#allocation2 + $0x38] sm:$0xff]  ;;  %v1428_v16 = vpop.f32.mrf.mxu0 }
  0xe4   : > { %v630_v60 = vadd.f32 %v620_v54, %v449_v59  ;;  %1043 = vst.msk [vmem:[#allocation2] sm:$0xff] %vm215_vm1, %v1035_v58 }
  0xe5   : > { %v656_v61 = vld [vmem:[#allocation2 + $0x30] sm:$0xff] }
  0xe6   : > { %v730_v62 = vadd.f32 %v719_v44, %v656_v61  ;;  %638 = vst.msk [vmem:[#allocation2 + $0x38] sm:$0xff] %vm215_vm1, %v630_v60 }
  0xe7   : > { %v756_v63 = vld [vmem:[#allocation2 + $0x28] sm:$0xff] }
  0xe8   : > { %738 = vst.msk [vmem:[#allocation2 + $0x30] sm:$0xff] %vm215_vm1, %v730_v62  ;;  %v830_v1 = vadd.f32 %v817_v35, %v756_v63  ;;  %v1117_v2 = vpop.f32.mrf.mxu2 }
  0xe9   : > { %v1017_v4 = vpop.f32.mrf.mxu1  ;;  %v1218_v5 = vpop.f32.mrf.mxu3  ;;  %v861_v37 = vld [vmem:[#allocation2 + $0x20] sm:$0xff] }
  0xea   : > { %838 = vst.msk [vmem:[#allocation2 + $0x28] sm:$0xff] %vm215_vm1, %v830_v1  ;;  %v1036_v6 = vadd.f32 %v1017_v4, %v858_v3 }
  0xeb   : > { %v1063_v7 = vld [vmem:[#allocation2] sm:$0xff]  ;;  %v1430_v29 = vpop.f32.mrf.mxu0 }
  0xec   : > { %v1137_v8 = vadd.f32 %v1117_v2, %v1063_v7  ;;  %1044 = vst.msk [vmem:[#allocation2 + $0x8] sm:$0xff] %vm215_vm1, %v1036_v6 }
  0xed   : > { %v657_v9 = vld [vmem:[#allocation2 + $0x38] sm:$0xff] }
  0xee   : > { %v731_v10 = vadd.f32 %v721_v57, %v657_v9  ;;  %1145 = vst.msk [vmem:[#allocation2] sm:$0xff] %vm215_vm1, %v1137_v8 }
  0xef   : > { %v757_v11 = vld [vmem:[#allocation2 + $0x30] sm:$0xff] }
  0xf0   : > { %739 = vst.msk [vmem:[#allocation2 + $0x38] sm:$0xff] %vm215_vm1, %v731_v10  ;;  %v831_v12 = vadd.f32 %v820_v50, %v757_v11  ;;  %v1119_v13 = vpop.f32.mrf.mxu2 }
  0xf1   : > { %v1020_v15 = vpop.f32.mrf.mxu1  ;;  %v1220_v18 = vpop.f32.mrf.mxu3  ;;  %v862_v51 = vld [vmem:[#allocation2 + $0x28] sm:$0xff] }
  0xf2   : > { %839 = vst.msk [vmem:[#allocation2 + $0x30] sm:$0xff] %vm215_vm1, %v831_v12  ;;  %v1037_v17 = vadd.f32 %v1020_v15, %v859_v14 }
  0xf3   : > { %v1064_v46 = vld [vmem:[#allocation2 + $0x8] sm:$0xff]  ;;  %v1433_v43 = vpop.f32.mrf.mxu0 }
  0xf4   : > { %v1138_v19 = vadd.f32 %v1119_v13, %v1064_v46  ;;  %1045 = vst.msk [vmem:[#allocation2 + $0x10] sm:$0xff] %vm215_vm1, %v1037_v17 }
  0xf5   : > { %v1164_v20 = vld [vmem:[#allocation2] sm:$0xff] }
  0xf6   : > { %v1238_v21 = vadd.f32 %v1218_v5, %v1164_v20  ;;  %1146 = vst.msk [vmem:[#allocation2 + $0x8] sm:$0xff] %vm215_vm1, %v1138_v19 }
  0xf7   : > { %v758_v22 = vld [vmem:[#allocation2 + $0x38] sm:$0xff] }
  0xf8   : > { %1246 = vst.msk [vmem:[#allocation2] sm:$0xff] %vm215_vm1, %v1238_v21  ;;  %v832_v23 = vadd.f32 %v822_v0, %v758_v22  ;;  %v1122_v24 = vpop.f32.mrf.mxu2 }
  0xf9   : > { %v1022_v26 = vpop.f32.mrf.mxu1  ;;  %v1223_v31 = vpop.f32.mrf.mxu3  ;;  %v863_v1 = vld [vmem:[#allocation2 + $0x30] sm:$0xff] }
  0xfa   : > { %840 = vst.msk [vmem:[#allocation2 + $0x38] sm:$0xff] %vm215_vm1, %v832_v23  ;;  %v1038_v27 = vadd.f32 %v1022_v26, %v860_v25 }
  0xfb   : > { %v1065_v28 = vld [vmem:[#allocation2 + $0x10] sm:$0xff]  ;;  %v1435_v60 = vpop.f32.mrf.mxu0 }
  0xfc   : > { %v1139_v30 = vadd.f32 %v1122_v24, %v1065_v28  ;;  %1046 = vst.msk [vmem:[#allocation2 + $0x18] sm:$0xff] %vm215_vm1, %v1038_v27 }
  0xfd   : > { %v1165_v32 = vld [vmem:[#allocation2 + $0x8] sm:$0xff] }
  0xfe   : > { %v1239_v33 = vadd.f32 %v1220_v18, %v1165_v32  ;;  %1147 = vst.msk [vmem:[#allocation2 + $0x10] sm:$0xff] %vm215_vm1, %v1139_v30 }
  0xff   : > { %v1270_v34 = vld [vmem:[#allocation2] sm:$0xff] }
 0x100   : > { %1247 = vst.msk [vmem:[#allocation2 + $0x8] sm:$0xff] %vm215_vm1, %v1239_v33  ;;  %v1448_v35 = vadd.f32 %v1428_v16, %v1270_v34  ;;  %v1124_v36 = vpop.f32.mrf.mxu2 }
 0x101   : > { %v1025_v38 = vpop.f32.mrf.mxu1  ;;  %v1225_v45 = vpop.f32.mrf.mxu3  ;;  %v864_v13 = vld [vmem:[#allocation2 + $0x38] sm:$0xff] }
 0x102   : > { %1456 = vst.msk [vmem:[#allocation2] sm:$0xff] %vm215_vm1, %v1448_v35  ;;  %v1039_v39 = vadd.f32 %v1025_v38, %v861_v37 }
 0x103   : > { %v1066_v40 = vld [vmem:[#allocation2 + $0x18] sm:$0xff]  ;;  %v1438_v12 = vpop.f32.mrf.mxu0 }
 0x104   : > { %v1140_v41 = vadd.f32 %v1124_v36, %v1066_v40  ;;  %1047 = vst.msk [vmem:[#allocation2 + $0x20] sm:$0xff] %vm215_vm1, %v1039_v39 }
 0x105   : > { %v1166_v42 = vld [vmem:[#allocation2 + $0x10] sm:$0xff] }
 0x106   : > { %v1240_v44 = vadd.f32 %v1223_v31, %v1166_v42  ;;  %1148 = vst.msk [vmem:[#allocation2 + $0x18] sm:$0xff] %vm215_vm1, %v1140_v41 }
 0x107   : > { %v1271_v47 = vld [vmem:[#allocation2 + $0x8] sm:$0xff] }
 0x108   : > { %1248 = vst.msk [vmem:[#allocation2 + $0x10] sm:$0xff] %vm215_vm1, %v1240_v44  ;;  %v1449_v48 = vadd.f32 %v1430_v29, %v1271_v47  ;;  %v1127_v49 = vpop.f32.mrf.mxu2 }
 0x109   : > { %v2327_v50 = vld [vmem:[#allocation2] sm:$0xff]  ;;  %v1027_v52 = vpop.f32.mrf.mxu1  ;;  %v1228_v62 = vpop.f32.mrf.mxu3 }
 0x10a   : > { %v1530_v53 = vpack.c.bf16 %v2327_v50, %v2327_v50  ;;  %1457 = vst.msk [vmem:[#allocation2 + $0x8] sm:$0xff] %vm215_vm1, %v1449_v48  ;;  %v1040_v54 = vadd.f32 %v1027_v52, %v862_v51  ;;  %v1493_v47 = vmul.f32 %v2327_v50, %v2327_v50  ;;  %v1472_v51 = vsel %vm215_vm1, %v2327_v50, 0.0 }
 0x10b   : > { %v1067_v55 = vld [vmem:[#allocation2 + $0x20] sm:$0xff]  ;;  %v1440_v26 = vpop.f32.mrf.mxu0 }
 0x10c   : > { %1539 = vst.msk [vmem:[%s2325_s18] sm:$0xf] %vm1538_vm5, %v1530_v53  ;;  %v1141_v56 = vadd.f32 %v1127_v49, %v1067_v55  ;;  %v1501_v55 = vsel %vm215_vm1, %v1493_v47, 0.0 }
 0x10d   : > { %v1167_v57 = vld [vmem:[#allocation2 + $0x18] sm:$0xff]  ;;  %1048 = vst.msk [vmem:[#allocation2 + $0x28] sm:$0xff] %vm215_vm1, %v1040_v54 }
 0x10e   : > { %v1241_v58 = vadd.f32 %v1225_v45, %v1167_v57  ;;  %1149 = vst.msk [vmem:[#allocation2 + $0x20] sm:$0xff] %vm215_vm1, %v1141_v56 }
 0x10f   : > { %v1272_v59 = vld [vmem:[#allocation2 + $0x10] sm:$0xff] }
 0x110   : > { %1249 = vst.msk [vmem:[#allocation2 + $0x18] sm:$0xff] %vm215_vm1, %v1241_v58  ;;  %v1450_v61 = vadd.f32 %v1433_v43, %v1272_v59  ;;  %v1129_v63 = vpop.f32.mrf.mxu2 }
 0x111   : > { %v2337_v0 = vld [vmem:[#allocation2 + $0x8] sm:$0xff]  ;;  %v1030_v2 = vpop.f32.mrf.mxu1  ;;  %v1230_v16 = vpop.f32.mrf.mxu3 }
 0x112   : > { %v1531_v3 = vpack.c.bf16 %v2337_v0, %v2337_v0  ;;  %1458 = vst.msk [vmem:[#allocation2 + $0x10] sm:$0xff] %vm215_vm1, %v1450_v61  ;;  %v1041_v4 = vadd.f32 %v1030_v2, %v863_v1  ;;  %v1494_v44 = vmul.f32 %v2337_v0, %v2337_v0  ;;  %v1473_v48 = vsel %vm215_vm1, %v2337_v0, 0.0 }
 0x113   : > { %v1443_v39 = vpop.f32.mrf.mxu0  ;;  %v1474_v56 = vadd.f32 %v1473_v48, %v1472_v51 }
 0x114   : > { %1540 = vst.msk [vmem:[%s2325_s18 + $0x4] sm:$0xf] %vm1538_vm5, %v1531_v3  ;;  %v1068_v5 = vld [vmem:[#allocation2 + $0x28] sm:$0xff]  ;;  %v1502_v52 = vsel %vm215_vm1, %v1494_v44, 0.0 }
 0x115   : > { %v1168_v6 = vld [vmem:[#allocation2 + $0x20] sm:$0xff]  ;;  %v1142_v7 = vadd.f32 %v1129_v63, %v1068_v5  ;;  %1049 = vst.msk [vmem:[#allocation2 + $0x30] sm:$0xff] %vm215_vm1, %v1041_v4  ;;  %v1503_v63 = vadd.f32 %v1502_v52, %v1501_v55 }
 0x116   : > { %v1242_v8 = vadd.f32 %v1228_v62, %v1168_v6 }
 0x117   : > { %1150 = vst.msk [vmem:[#allocation2 + $0x28] sm:$0xff] %vm215_vm1, %v1142_v7  ;;  %v1273_v9 = vld [vmem:[#allocation2 + $0x18] sm:$0xff] }
 0x118   : > { %1250 = vst.msk [vmem:[#allocation2 + $0x20] sm:$0xff] %vm215_vm1, %v1242_v8  ;;  %v1451_v10 = vadd.f32 %v1435_v60, %v1273_v9  ;;  %v1132_v17 = vpop.f32.mrf.mxu2 }
 0x119   : > { %v1466_v11 = vld [vmem:[#allocation2 + $0x10] sm:$0xff]  ;;  %v1032_v14 = vpop.f32.mrf.mxu1  ;;  %v1233_v27 = vpop.f32.mrf.mxu3 }
 0x11a   : > { %v1532_v15 = vpack.c.bf16 %v1466_v11, %v1466_v11  ;;  %1459 = vst.msk [vmem:[#allocation2 + $0x18] sm:$0xff] %vm215_vm1, %v1451_v10  ;;  %v1042_v18 = vadd.f32 %v1032_v14, %v864_v13  ;;  %v1495_v49 = vmul.f32 %v1466_v11, %v1466_v11  ;;  %v1475_v53 = vsel %vm215_vm1, %v1466_v11, 0.0 }
 0x11b   : > { %v1445_v58 = vpop.f32.mrf.mxu0  ;;  %v1476_v0 = vadd.f32 %v1475_v53, %v1474_v56 }
 0x11c   : > { %1541 = vst.msk [vmem:[%s2325_s18 + $0x8] sm:$0xf] %vm1538_vm5, %v1532_v15  ;;  %v1069_v46 = vld [vmem:[#allocation2 + $0x30] sm:$0xff]  ;;  %v1504_v59 = vsel %vm215_vm1, %v1495_v49, 0.0 }
 0x11d   : > { %v1143_v19 = vadd.f32 %v1132_v17, %v1069_v46  ;;  %1050 = vst.msk [vmem:[#allocation2 + $0x38] sm:$0xff] %vm215_vm1, %v1042_v18  ;;  %v1505_v5 = vadd.f32 %v1504_v59, %v1503_v63 }
 0x11e   : > { %v1169_v20 = vld [vmem:[#allocation2 + $0x28] sm:$0xff] }
 0x11f   : > { %v1243_v21 = vadd.f32 %v1230_v16, %v1169_v20  ;;  %1151 = vst.msk [vmem:[#allocation2 + $0x30] sm:$0xff] %vm215_vm1, %v1143_v19  ;;  %v1274_v22 = vld [vmem:[#allocation2 + $0x20] sm:$0xff] }
 0x120   : > { %v1452_v23 = vadd.f32 %v1438_v12, %v1274_v22  ;;  %v1134_v29 = vpop.f32.mrf.mxu2 }
 0x121   : > { %v1467_v24 = vld [vmem:[#allocation2 + $0x18] sm:$0xff]  ;;  %1251 = vst.msk [vmem:[#allocation2 + $0x28] sm:$0xff] %vm215_vm1, %v1243_v21  ;;  %v1235_v38 = vpop.f32.mrf.mxu3 }
 0x122   : > { %v1533_v25 = vpack.c.bf16 %v1467_v24, %v1467_v24  ;;  %1460 = vst.msk [vmem:[#allocation2 + $0x20] sm:$0xff] %vm215_vm1, %v1452_v23  ;;  %v1496_v54 = vmul.f32 %v1467_v24, %v1467_v24  ;;  %v1477_v60 = vsel %vm215_vm1, %v1467_v24, 0.0 }
 0x123   : > { %v1478_v6 = vadd.f32 %v1477_v60, %v1476_v0 }
 0x124   : > { %1542 = vst.msk [vmem:[%s2325_s18 + $0xc] sm:$0xf] %vm1538_vm5, %v1533_v25  ;;  %v1070_v28 = vld [vmem:[#allocation2 + $0x38] sm:$0xff]  ;;  %v1506_v1 = vsel %vm215_vm1, %v1496_v54, 0.0 }
 0x125   : > { %v1144_v30 = vadd.f32 %v1134_v29, %v1070_v28  ;;  %v1507_v10 = vadd.f32 %v1506_v1, %v1505_v5  ;;  %v1522_v29 = vlaneseq }
 0x126   : > { %v1170_v31 = vld [vmem:[#allocation2 + $0x30] sm:$0xff] }
 0x127   : > { %v1244_v32 = vadd.f32 %v1233_v27, %v1170_v31  ;;  %1152 = vst.msk [vmem:[#allocation2 + $0x38] sm:$0xff] %vm215_vm1, %v1144_v30 }
 0x128   : > { %v1275_v33 = vld [vmem:[#allocation2 + $0x28] sm:$0xff] }
 0x129   : > { %v1468_v34 = vld [vmem:[#allocation2 + $0x20] sm:$0xff]  ;;  %1252 = vst.msk [vmem:[#allocation2 + $0x30] sm:$0xff] %vm215_vm1, %v1244_v32  ;;  %v1453_v35 = vadd.f32 %v1440_v26, %v1275_v33 }
 0x12a   : > { %v1534_v36 = vpack.c.bf16 %v1468_v34, %v1468_v34  ;;  %v1497_v61 = vmul.f32 %v1468_v34, %v1468_v34  ;;  %v1479_v2 = vsel %vm215_vm1, %v1468_v34, 0.0  ;;  %v1523_v34 = vshrl.u32 %v1522_v29, 7 }
 0x12b   : > { %1461 = vst.msk [vmem:[#allocation2 + $0x28] sm:$0xff] %vm215_vm1, %v1453_v35  ;;  %v1480_v11 = vadd.f32 %v1479_v2, %v1478_v6 }
 0x12c   : > { %1543 = vst.msk [vmem:[%s2325_s18 + $0x10] sm:$0xf] %vm1538_vm5, %v1534_v36  ;;  %v1508_v7 = vsel %vm215_vm1, %v1497_v61, 0.0  ;;  %vm1524_vm6 = vcmp.eq.s32.totalorder %v1523_v34, 0 }
 0x12d   : > { %v1509_v14 = vadd.f32 %v1508_v7, %v1507_v10 }
 0x12e   : > { %v1171_v37 = vld [vmem:[#allocation2 + $0x38] sm:$0xff] }
 0x12f   : > { %v1245_v40 = vadd.f32 %v1235_v38, %v1171_v37 }
 0x130   : > { %v1276_v41 = vld [vmem:[#allocation2 + $0x30] sm:$0xff] }
 0x131   : > { %1253 = vst.msk [vmem:[#allocation2 + $0x38] sm:$0xff] %vm215_vm1, %v1245_v40  ;;  %v1454_v42 = vadd.f32 %v1443_v39, %v1276_v41 }
 0x132   : > { %v1469_v43 = vld [vmem:[#allocation2 + $0x28] sm:$0xff] }
 0x133   : > { %v1535_v45 = vpack.c.bf16 %v1469_v43, %v1469_v43  ;;  %1462 = vst.msk [vmem:[#allocation2 + $0x30] sm:$0xff] %vm215_vm1, %v1454_v42  ;;  %v1498_v3 = vmul.f32 %v1469_v43, %v1469_v43  ;;  %v1481_v8 = vsel %vm215_vm1, %v1469_v43, 0.0 }
 0x134   : > { %v1482_v15 = vadd.f32 %v1481_v8, %v1480_v11 }
 0x135   : > { %1544 = vst.msk [vmem:[%s2325_s18 + $0x14] sm:$0xf] %vm1538_vm5, %v1535_v45  ;;  %v1510_v12 = vsel %vm215_vm1, %v1498_v3, 0.0 }
 0x136   : > { %v1511_v17 = vadd.f32 %v1510_v12, %v1509_v14 }
 0x138   : > { %v1277_v57 = vld [vmem:[#allocation2 + $0x38] sm:$0xff] }
 0x139   : > { %v1455_v62 = vadd.f32 %v1445_v58, %v1277_v57 }
 0x13a   : > { %v1470_v50 = vld [vmem:[#allocation2 + $0x30] sm:$0xff] }
 0x13b   : > { %v1536_v4 = vpack.c.bf16 %v1470_v50, %v1470_v50  ;;  %1463 = vst.msk [vmem:[#allocation2 + $0x38] sm:$0xff] %vm215_vm1, %v1455_v62  ;;  %v1499_v9 = vmul.f32 %v1470_v50, %v1470_v50  ;;  %v1483_v13 = vsel %vm215_vm1, %v1470_v50, 0.0 }
 0x13c   : > { %v1484_v18 = vadd.f32 %v1483_v13, %v1482_v15 }
 0x13d   : > { %1545 = vst.msk [vmem:[%s2325_s18 + $0x18] sm:$0xf] %vm1538_vm5, %v1536_v4  ;;  %v1512_v16 = vsel %vm215_vm1, %v1499_v9, 0.0 }
 0x13e   : > { %v1513_v22 = vadd.f32 %v1512_v16, %v1511_v17 }
 0x142   : > { %v1471_v46 = vld [vmem:[#allocation2 + $0x38] sm:$0xff] }
 0x143   : > { %v1485_v19 = vsel %vm215_vm1, %v1471_v46, 0.0  ;;  %v1500_v20 = vmul.f32 %v1471_v46, %v1471_v46  ;;  %v1537_v21 = vpack.c.bf16 %v1471_v46, %v1471_v46 }
 0x144   : > { %v1486_v23 = vadd.f32 %v1485_v19, %v1484_v18 }
 0x145   : > { %v1514_v24 = vsel %vm215_vm1, %v1500_v20, 0.0  ;;  %1546 = vst.msk [vmem:[%s2325_s18 + $0x1c] sm:$0xf] %vm1538_vm5, %v1537_v21 }
 0x146   : > { %v1487_v25 = vrot.slane %v1486_v23, 4  ;;  %v1515_v26 = vadd.f32 %v1514_v24, %v1513_v22 }
 0x148   : > { %v1488_v27 = vadd.f32 %v1487_v25, %v1486_v23  ;;  %v1516_v28 = vrot.slane %v1515_v26, 4 }
 0x14a   : > { %v1489_v30 = vrot.slane %v1488_v27, 2  ;;  %v1517_v31 = vadd.f32 %v1516_v28, %v1515_v26 }
 0x14c   : > { %v1490_v32 = vadd.f32 %v1489_v30, %v1488_v27  ;;  %v1518_v33 = vrot.slane %v1517_v31, 2 }
 0x14e   : > { %v1491_v35 = vrot.slane %v1490_v32, 1  ;;  %v1519_v36 = vadd.f32 %v1518_v33, %v1517_v31 }
 0x150   : > { %v1520_v37 = vrot.slane %v1519_v36, 1  ;;  %v1492_v38 = vadd.f32 %v1491_v35, %v1490_v32 }
 0x152   : > { %v1521_v39 = vadd.f32 %v1520_v37, %v1519_v36 }
 0x154   : > { %v1527_v40 = vsel %vm1524_vm6, %v1492_v38, %v1521_v39 }
 0x155   : > { %1529 = vst.msk [vmem:[%s212_s22] sm:$0x3] %vm1528_vm7, %v1527_v40 }
 0x156 PF: > { %s14_s14 = sadd.s32 1, %s1991_s14   ;;  %s2411_s12 = smov %s1987_s13 }
 0x157   : > { %p11_p5 = scmp.ge.s32.totalorder %s14_s14, 4   ;;  %s2412_s13 = smov %s2414_s15 }
 0x159   :  { %13 = sbr.rel (!%p11_p5) target bundleno = 2 (0x2), region = 84 }

// kernel: discrim_block_forward.4
= control target key start
LH: loop header
LB: loop body
LE: loop exit
PB: predicated region body
PF: predicated region fallthrough
CT: control target
= control target key end

     0   :  { %s6149_s12 = smov 0   ;;  %s6151_s13 = smov 0   ;;  %s8199_s0 = inlined_call_operand.vmem [shape: bf16[2,1,18,18,4], index: 0, kind: input, shape index: {}]   ;;  %s8200_s1 = inlined_call_operand.vmem [shape: bf16[9,4,8], index: 1, kind: input, shape index: {}]   ;;  %s8201_s2 = inlined_call_operand.vmem [shape: bf16[2,16,16,8], index: 2, kind: output, shape index: {0}]   ;;  %s8202_s3 = inlined_call_operand.vmem [shape: f32[2,1,2,8], index: 3, kind: output, shape index: {1}]  }
   0x1   :  { %s6153_s14 = smov 0  }
   0x2 LB: > { %s26_s15 = sadd.s32 1, %s6122_s13  ;;  %p5371_p0 = scmp.ge.s32.totalorder %s6126_s14, 1  ;;  %s6126_s14 = sphi %s6153_s14, %s14_s14   ;;  %s6122_s13 = sphi %s6151_s13, %s8208_s13   ;;  %s6118_s12 = sphi %s6149_s12, %s8207_s12  }
   0x3   : > { %p28_p1 = scmp.ge.s32.totalorder %s26_s15, 2  ;;  %p156_p2 = scmp.lt.s32.totalorder %s6126_s14, 3 }
   0x5   : > { %s8210_s15 = smov (%p28_p1, %s26_s15), 0  ;;  %p157_p3 = pnand %p5371_p0, %p156_p2 }
   0x6   : > { %p192_p4 = scmp.lt.s32.totalorder (!%p157_p3), %s6118_s12, 1 }
   0x7   : > { %160 = sbr.rel (%p157_p3) target bundleno = 773 (0x305), region = 28 }
   0xc   : > { %v317_v0 = vld [vmem:[%s8200_s1] sm:$0x3]  ;;  %vm447_vm0 = vcmask 1041408   ;;  %v5456_v2 = vld [vmem:[%s8200_s1 + $0x2] sm:$0x3]  ;;  %s8212_s12 = smov (!%p192_p4, %s6118_s12), 1 }
   0xd   : > { %v449_v1 = vsel %vm447_vm0, %v317_v0, 0  ;;  %v5489_v3 = vld [vmem:[%s8200_s1 + $0x4] sm:$0x3]  ;;  %v1170_v4 = vsel %vm447_vm0, %v5456_v2, 0  ;;  %v5538_v6 = vld [vmem:[%s8200_s1 + $0x6] sm:$0x3] }
   0xe   : > { %6075 = vmatpush.bf16.msra.mxu1 %v449_v1  ;;  %6076 = vmatpush.bf16.msra.mxu2 %v449_v1  ;;  %v1667_v5 = vsel %vm447_vm0, %v5489_v3, 0  ;;  %v2021_v7 = vsel %vm447_vm0, %v5538_v6, 0  ;;  %v5667_v8 = vld [vmem:[%s8200_s1 + $0x8] sm:$0x3]  ;;  %s6078_s26 = smul.u32 216, %s8212_s12  ;;  %vm398_vm1 = vcmask 31744  }
   0xf   : > { %6077 = vmatpush.bf16.msra.mxu3 %v449_v1  ;;  %v2739_v9 = vsel %vm447_vm0, %v5667_v8, 0  ;;  %458 = vmatpush.bf16.msra.mxu0 %v449_v1  ;;  %v5748_v24 = vld [vmem:[%s8200_s1 + $0xa] sm:$0x3]  ;;  %v5797_v25 = vld [vmem:[%s8200_s1 + $0xc] sm:$0x3]  ;;  %vm1453_vm4 = vcmask 1042432  }
  0x10   : > { %s6193_s29 = scalar_lea.vmem %s8199_s0, %s6078_s26  ;;  %v3233_v28 = vsel %vm447_vm0, %v5748_v24, 0  ;;  %v3587_v29 = vsel %vm447_vm0, %v5797_v25, 0  ;;  %v5926_v30 = vld [vmem:[%s8200_s1 + $0xe] sm:$0x3]  ;;  %vm684_vm2 = vsmask.f32 3328 }
  0x11   : > { %v6031_v10 = vld [vmem:[%s6193_s29 + $0x30] sm:$0xff]  ;;  %v6035_v11 = vld [vmem:[%s6193_s29 + $0x60] sm:$0xff]  ;;  %v6033_v18 = vld [vmem:[%s6193_s29 + $0x48] sm:$0xff]  ;;  %v4305_v33 = vsel %vm447_vm0, %v5926_v30, 0  ;;  %vm685_vm3 = vsmask.f32 7440 }
  0x12   : > { %1179 = vmatpush.bf16.msrb.mxu1 %v1170_v4  ;;  %1676 = vmatpush.bf16.msrb.mxu2 %v1667_v5  ;;  %v6039_v12 = vld [vmem:[%s6193_s29 + $0x90] sm:$0xff]  ;;  %v6027_v13 = vld [vmem:[%s6193_s29] sm:$0xff]  ;;  %v6037_v19 = vld [vmem:[%s6193_s29 + $0x78] sm:$0xff]  ;;  %vm1454_vm5 = vcmask 1046532   ;;  %vm217_vm8 = vcmask 64512   ;;  %s6026_s11 = sshll.u32 %s8212_s12, 7 }
  0x13   : > { %2030 = vmatpush.bf16.msrb.mxu3 %v2021_v7  ;;  %2748 = vmatpush.bf16.msrb.mxu0 %v2739_v9  ;;  %v6032_v14 = vld [vmem:[%s6193_s29 + $0x3c] sm:$0xff]  ;;  %v6036_v15 = vld [vmem:[%s6193_s29 + $0x6c] sm:$0xff]  ;;  %v605_v23 = vld [vmem:[%s6193_s29 + $0x4] sm:$0xf]  ;;  %s7648_s18 = scalar_lea.vmem %s8201_s2, %s6026_s11  ;;  %vm5196_vm9 = vcmask 60416   ;;  %s5375_s19 = sshll.u32 %s8212_s12, 1 }
  0x14   : > { %5444 = vmatmul.msk.bf16.vlgmr.msra.gmra.mxu1 %vm398_vm1, %v6031_v10  ;;  %5448 = vmatmul.msk.bf16.vlgmr.msra.gmra.mxu2 %vm398_vm1, %v6035_v11  ;;  %v6040_v16 = vld [vmem:[%s6193_s29 + $0x9c] sm:$0xff]  ;;  %v6028_v17 = vld [vmem:[%s6193_s29 + $0xc] sm:$0xff]  ;;  %v697_v31 = vshll.u32 %v605_v23, 16  ;;  %v701_v32 = vshrl.u32 %v605_v23, 16  ;;  %v606_v34 = vld [vmem:[%s6193_s29 + $0x8] sm:$0x1]  ;;  %s214_s22 = scalar_lea.vmem %s8202_s3, %s5375_s19 }
  0x15   : > { %5452 = vmatmul.msk.bf16.vlgmr.msra.gmra.mxu3 %vm398_vm1, %v6039_v12  ;;  %5440 = vmatmul.msk.bf16.vlgmr.msra.gmra.mxu0 %vm398_vm1, %v6027_v13  ;;  %v6041_v20 = vld [vmem:[%s6193_s29 + $0xa8] sm:$0xff]  ;;  %v6029_v21 = vld [vmem:[%s6193_s29 + $0x18] sm:$0xff]  ;;  %v604_v22 = vld [vmem:[%s6193_s29] sm:$0xf]  ;;  %v707_v39 = vshll.u32 %v606_v34, 16  ;;  %vm5162_vm11 = vcmask 58368  }
  0x16   : > { %v688_v26 = vshrl.u32 %v604_v22, 16  ;;  %v691_v27 = vshll.u32 %v604_v22, 16  ;;  %3242 = vmatpush.bf16.msra.mxu1 %v3233_v28  ;;  %3596 = vmatpush.bf16.msra.mxu2 %v3587_v29  ;;  %v699_v37 = vrot.slane %v697_v31, 5  ;;  %v703_v38 = vrot.slane %v701_v32, 4  ;;  %v1326_v40 = vld [vmem:[%s6193_s29 + $0x4] sm:$0xf]  ;;  %vm6246_vm6 = vmor %vm684_vm2, %vm685_vm3 }
  0x17   : > { %4314 = vmatpush.bf16.msra.mxu3 %v4305_v33  ;;  %v5619_v41 = vld [vmem:[%s6193_s29 + $0xc] sm:$0xf]  ;;  %v5620_v43 = vld [vmem:[%s6193_s29 + $0x10] sm:$0xf]  ;;  %v6034_v44 = vld [vmem:[%s6193_s29 + $0x54] sm:$0xff]  ;;  %v1458_v51 = vrot.slane %v1326_v40, 5 }
  0x18   : > { %v690_v35 = vrot.slane %v688_v26, 4  ;;  %v693_v36 = vrot.slane %v691_v27, 5  ;;  %v6038_v45 = vld [vmem:[%s6193_s29 + $0x84] sm:$0xff]  ;;  %v704_v46 = vor.u32 %v703_v38, %v699_v37  ;;  %v2257_v47 = vshrl.u32 %v5619_v41, 16  ;;  %v1325_v50 = vld [vmem:[%s6193_s29] sm:$0xe]  ;;  %vm6254_vm7 = vmor %vm1453_vm4, %vm1454_vm5 }
  0x19   : > { %v2260_v48 = vshll.u32 %v5619_v41, 16  ;;  %v2266_v49 = vshll.u32 %v5620_v43, 16  ;;  %v2270_v52 = vshrl.u32 %v5620_v43, 16  ;;  %v709_v53 = vrot.slane %v707_v39, 5  ;;  %v1327_v54 = vld [vmem:[%s6193_s29 + $0x8] sm:$0x1] }
  0x1a   : > { %v694_v42 = vor.u32 %v693_v36, %v690_v35  ;;  %v5621_v55 = vld [vmem:[%s6193_s29 + $0x14] sm:$0x1]  ;;  %v6030_v57 = vld [vmem:[%s6193_s29 + $0x24] sm:$0xff]  ;;  %v2259_v58 = vrot.slane %v2257_v47, 4  ;;  %v705_v62 = vrot.slane %v704_v46, 4  ;;  %v5473_v2 = vrot.slane %v1325_v50, 9 }
  0x1b   : > { %v6042_v56 = vld [vmem:[%s6193_s29 + $0xb4] sm:$0xff]  ;;  %v2262_v59 = vrot.slane %v2260_v48, 5  ;;  %v2268_v60 = vrot.slane %v2266_v49, 5  ;;  %v2272_v63 = vrot.slane %v2270_v52, 4  ;;  %v2276_v0 = vshll.u32 %v5621_v55, 16  ;;  %v6043_v50 = vld [vmem:[%s6193_s29 + $0xc] sm:$0xff] }
  0x1c   : > { %v695_v61 = vrot.slane %v694_v42, 4  ;;  %v1460_v3 = vrot.slane %v1458_v51, 4  ;;  %v1461_v4 = vrot.slane %v1327_v54, 5  ;;  %v607_v8 = vld [vmem:[%s6193_s29 + $0xc] sm:$0xf] }
  0x1d   : > { %v2263_v5 = vor.u32 %v2262_v59, %v2259_v58  ;;  %v2273_v7 = vor.u32 %v2272_v63, %v2268_v60  ;;  %v608_v9 = vld [vmem:[%s6193_s29 + $0x10] sm:$0xf]  ;;  %v2278_v13 = vrot.slane %v2276_v0, 5  ;;  %v5622_v33 = vld [vmem:[%s6193_s29 + $0x18] sm:$0xf] }
  0x1e   : > { %v6007_v10 = vld [vmem:[%s8200_s1 + $0x10] sm:$0x3]  ;;  %v725_v22 = vshrl.u32 %v608_v9, 16  ;;  %v609_v34 = vld [vmem:[%s6193_s29 + $0x14] sm:$0x1]  ;;  %v2281_v39 = vshrl.u32 %v5622_v33, 16 }
  0x1f   : > { %v2264_v11 = vrot.slane %v2263_v5, 4  ;;  %v2274_v12 = vrot.slane %v2273_v7, 4  ;;  %v1329_v35 = vld [vmem:[%s6193_s29 + $0x10] sm:$0xf]  ;;  %v5623_v38 = vld [vmem:[%s6193_s29 + $0x1c] sm:$0xf] }
  0x20   : > { %v727_v32 = vrot.slane %v725_v22, 4  ;;  %v2284_v40 = vshll.u32 %v5622_v33, 16  ;;  %v2290_v41 = vshll.u32 %v5623_v38, 16  ;;  %v731_v47 = vshll.u32 %v609_v34, 16  ;;  %v5624_v49 = vld [vmem:[%s6193_s29 + $0x20] sm:$0x1] }
  0x21   : > { %v2269_v23 = vsel %vm6246_vm6, %v2264_v11, %v2268_v60  ;;  %v2279_v24 = vsel %vm6246_vm6, %v2274_v12, %v2278_v13  ;;  %v1465_v48 = vrot.slane %v1329_v35, 5  ;;  %v2300_v59 = vshll.u32 %v5624_v49, 16  ;;  %v611_v5 = vld [vmem:[%s6193_s29 + $0x1c] sm:$0xf]  ;;  %v5626_v34 = vld [vmem:[%s6193_s29 + $0x28] sm:$0xf] }
  0x22   : > { %v2642_v36 = vunpack.c.l.b16 %v2269_v23  ;;  %v2286_v54 = vrot.slane %v2284_v40, 5  ;;  %v2292_v55 = vrot.slane %v2290_v41, 5  ;;  %v733_v63 = vrot.slane %v731_v47, 5  ;;  %v1331_v41 = vld [vmem:[%s6193_s29 + $0x18] sm:$0xe] }
  0x23   : > { %v2302_v11 = vrot.slane %v2300_v59, 5  ;;  %v2314_v49 = vshll.u32 %v5626_v34, 16 }
  0x24   : > { %5445 = vmatmul.msk.bf16.gmra.mxu1 %vm398_vm1, %v6032_v14  ;;  %5449 = vmatmul.msk.bf16.gmra.mxu2 %vm398_vm1, %v6036_v15  ;;  %v4799_v14 = vsel %vm447_vm0, %v6007_v10, 0  ;;  %v700_v15 = vsel %vm6246_vm6, %v695_v61, %v699_v37  ;;  %v2643_v37 = vunpack.c.l.b16 %v2279_v24 }
  0x25   : > { %5453 = vmatmul.msk.bf16.gmra.mxu3 %vm398_vm1, %v6040_v16  ;;  %5441 = vmatmul.msk.bf16.gmra.mxu0 %vm398_vm1, %v6028_v17  ;;  %v710_v16 = vsel %vm6246_vm6, %v705_v62, %v709_v53  ;;  %v1459_v17 = vsel %vm6254_vm7, %v5473_v2, %v1458_v51  ;;  %v1073_v25 = vunpack.c.l.b16 %v700_v15  ;;  %v1328_v51 = vld [vmem:[%s6193_s29 + $0xc] sm:$0xe]  ;;  %v2283_v53 = vrot.slane %v2281_v39, 4 }
  0x26   : > { %4808 = vmatpush.bf16.msra.mxu0 %v4799_v14  ;;  %v1074_v26 = vunpack.c.l.b16 %v710_v16  ;;  %v1570_v27 = vunpack.c.l.b16 %v1459_v17  ;;  %v2674_v52 = vpack.c.b16 %v2643_v37, %v2642_v36  ;;  %v5474_v2 = vrot.slane %v1328_v51, 9 }
  0x27   : > { %v2287_v60 = vor.u32 %v2286_v54, %v2283_v53  ;;  %v745_v14 = vshll.u32 %v611_v5, 16  ;;  %v749_v15 = vshrl.u32 %v611_v5, 16  ;;  %v613_v53 = vld [vmem:[%s6193_s29 + $0x24] sm:$0xf]  ;;  %v6128_v5 = vmov 0.0  }
  0x28   : > { %v1105_v42 = vpack.c.b16 %v1074_v26, %v1073_v25  ;;  %v1466_v16 = vsel %vm6254_vm7, %v5474_v2, %v1465_v48  ;;  %v612_v26 = vld [vmem:[%s6193_s29 + $0x20] sm:$0x1]  ;;  %v760_v2 = vshrl.u32 %v613_v53, 16  ;;  %226 = vst.msk [vmem:[#allocation2 + $0x40] sm:$0xff] %vm217_vm8, %v6128_v5 }
  0x29   : > { %v1572_v24 = vunpack.c.l.b16 %v1466_v16  ;;  %218 = vst.msk [vmem:[#allocation2] sm:$0xff] %vm217_vm8, %v6128_v5 }
  0x2a   : > { %219 = vst.msk [vmem:[#allocation2 + $0x8] sm:$0xff] %vm217_vm8, %v6128_v5 }
  0x2b   : > { %220 = vst.msk [vmem:[#allocation2 + $0x10] sm:$0xff] %vm217_vm8, %v6128_v5 }
  0x2c   : > { %221 = vst.msk [vmem:[#allocation2 + $0x18] sm:$0xff] %vm217_vm8, %v6128_v5 }
  0x2d   : > { %222 = vst.msk [vmem:[#allocation2 + $0x20] sm:$0xff] %vm217_vm8, %v6128_v5 }
  0x2e   : > { %223 = vst.msk [vmem:[#allocation2 + $0x28] sm:$0xff] %vm217_vm8, %v6128_v5 }
  0x2f   : > { %224 = vst.msk [vmem:[#allocation2 + $0x30] sm:$0xff] %vm217_vm8, %v6128_v5 }
  0x30   : > { %225 = vst.msk [vmem:[#allocation2 + $0x38] sm:$0xff] %vm217_vm8, %v6128_v5 }
  0x31   : > { %227 = vst.msk [vmem:[#allocation2 + $0x48] sm:$0xff] %vm217_vm8, %v6128_v5 }
  0x32   : > { %228 = vst.msk [vmem:[#allocation2 + $0x50] sm:$0xff] %vm217_vm8, %v6128_v5 }
  0x33   : > { %229 = vst.msk [vmem:[#allocation2 + $0x58] sm:$0xff] %vm217_vm8, %v6128_v5 }
  0x34   : > { %5446 = vmatmul.msk.bf16.gmra.mxu1 %vm398_vm1, %v6033_v18  ;;  %5450 = vmatmul.msk.bf16.gmra.mxu2 %vm398_vm1, %v6037_v19  ;;  %v1462_v18 = vsel %vm6254_vm7, %v1460_v3, %v1461_v4  ;;  %v712_v19 = vshrl.u32 %v607_v8, 16  ;;  %v1467_v3 = vrot.slane %v1465_v48, 4  ;;  %230 = vst.msk [vmem:[#allocation2 + $0x60] sm:$0xff] %vm217_vm8, %v6128_v5 }
  0x35   : > { %5454 = vmatmul.msk.bf16.gmra.mxu3 %vm398_vm1, %v6041_v20  ;;  %5442 = vmatmul.msk.bf16.gmra.mxu0 %vm398_vm1, %v6029_v21  ;;  %v715_v20 = vshll.u32 %v607_v8, 16  ;;  %v721_v21 = vshll.u32 %v608_v9, 16  ;;  %v1571_v28 = vunpack.c.l.b16 %v1462_v18  ;;  %v2288_v9 = vrot.slane %v2287_v60, 4  ;;  %231 = vst.msk [vmem:[#allocation2 + $0x68] sm:$0xff] %vm217_vm8, %v6128_v5 }
  0x36   : > { %v714_v29 = vrot.slane %v712_v19, 4  ;;  %232 = vst.msk [vmem:[#allocation2 + $0x70] sm:$0xff] %vm217_vm8, %v6128_v5 }
  0x37   : > { %v717_v30 = vrot.slane %v715_v20, 5  ;;  %v723_v31 = vrot.slane %v721_v21, 5  ;;  %v1602_v43 = vpack.c.b16 %v1571_v28, %v1570_v27  ;;  %v2293_v20 = vsel %vm6246_vm6, %v2288_v9, %v2292_v55  ;;  %233 = vst.msk [vmem:[#allocation2 + $0x78] sm:$0xff] %vm217_vm8, %v6128_v5 }
  0x38   : > { %v747_v27 = vrot.slane %v745_v14, 5  ;;  %v751_v28 = vrot.slane %v749_v15, 4  ;;  %v615_v14 = vld [vmem:[%s6193_s29 + $0x2c] sm:$0x1]  ;;  %234 = vst.msk [vmem:[#allocation2 + $0x80] sm:$0xff] %vm217_vm8, %v6128_v5 }
  0x39   : > { %v728_v46 = vor.u32 %v727_v32, %v723_v31  ;;  %v5625_v32 = vld [vmem:[%s6193_s29 + $0x24] sm:$0xf]  ;;  %235 = vst.msk [vmem:[#allocation2 + $0x88] sm:$0xff] %vm217_vm8, %v6128_v5 }
  0x3a   : > { %v2305_v35 = vshrl.u32 %v5625_v32, 16  ;;  %v2308_v36 = vshll.u32 %v5625_v32, 16  ;;  %v752_v40 = vor.u32 %v751_v28, %v747_v27  ;;  %v1335_v28 = vld [vmem:[%s6193_s29 + $0x28] sm:$0xf]  ;;  %236 = vst.msk [vmem:[#allocation2 + $0x90] sm:$0xff] %vm217_vm8, %v6128_v5 }
  0x3b   : > { %v729_v62 = vrot.slane %v728_v46, 4  ;;  %v1333_v46 = vld [vmem:[%s6193_s29 + $0x20] sm:$0x1]  ;;  %237 = vst.msk [vmem:[#allocation2 + $0x98] sm:$0xff] %vm217_vm8, %v6128_v5 }
  0x3c   : > { %v2310_v48 = vrot.slane %v2308_v36, 5  ;;  %v1475_v60 = vrot.slane %v1333_v46, 5  ;;  %v1336_v46 = vld [vmem:[%s6193_s29 + $0x2c] sm:$0x1]  ;;  %238 = vst.msk [vmem:[#allocation2 + $0xa0] sm:$0xff] %vm217_vm8, %v6128_v5 }
  0x3d   : > { %v734_v13 = vsel %vm6246_vm6, %v729_v62, %v733_v63  ;;  %v753_v62 = vrot.slane %v752_v40, 4  ;;  %v5630_v40 = vld [vmem:[%s6193_s29 + $0x38] sm:$0x1]  ;;  %239 = vst.msk [vmem:[#allocation2 + $0xa8] sm:$0xff] %vm217_vm8, %v6128_v5 }
  0x3e   : > { %v1076_v23 = vunpack.c.l.b16 %v734_v13  ;;  %240 = vst.msk [vmem:[#allocation2 + $0xb0] sm:$0xff] %vm217_vm8, %v6128_v5 }
  0x3f   : > { %241 = vst.msk [vmem:[#allocation2 + $0xb8] sm:$0xff] %vm217_vm8, %v6128_v5 }
  0x40   : > { %242 = vst.msk [vmem:[#allocation2 + $0xc0] sm:$0xff] %vm217_vm8, %v6128_v5 }
  0x41   : > { %243 = vst.msk [vmem:[#allocation2 + $0xc8] sm:$0xff] %vm217_vm8, %v6128_v5 }
  0x42   : > { %244 = vst.msk [vmem:[#allocation2 + $0xd0] sm:$0xff] %vm217_vm8, %v6128_v5 }
  0x43   : > { %245 = vst.msk [vmem:[#allocation2 + $0xd8] sm:$0xff] %vm217_vm8, %v6128_v5 }
  0x44   : > { %5447 = vmatmul.msk.bf16.gmra.mxu1 %vm398_vm1, %v6034_v44  ;;  %5451 = vmatmul.msk.bf16.gmra.mxu2 %vm398_vm1, %v6038_v45  ;;  %v2294_v44 = vshrl.u32 %v5623_v38, 16  ;;  %v718_v45 = vor.u32 %v717_v30, %v714_v29  ;;  %v1332_v29 = vld [vmem:[%s6193_s29 + $0x1c] sm:$0xf]  ;;  %v2644_v30 = vunpack.c.l.b16 %v2293_v20  ;;  %v755_v38 = vshll.u32 %v612_v26, 16  ;;  %246 = vst.msk [vmem:[#allocation2 + $0xe0] sm:$0xff] %vm217_vm8, %v6128_v5 }
  0x45   : > { %5455 = vmatmul.msk.bf16.gmra.mxu3 %vm398_vm1, %v6042_v56  ;;  %5443 = vmatmul.msk.bf16.gmra.mxu0 %vm398_vm1, %v6030_v57  ;;  %v1330_v56 = vld [vmem:[%s6193_s29 + $0x14] sm:$0x1]  ;;  %v610_v57 = vld [vmem:[%s6193_s29 + $0x18] sm:$0xf]  ;;  %247 = vst.msk [vmem:[#allocation2 + $0xe8] sm:$0xff] %vm217_vm8, %v6128_v5 }
  0x46   : > { %v2296_v58 = vrot.slane %v2294_v44, 4  ;;  %v719_v61 = vrot.slane %v718_v45, 4  ;;  %v1468_v4 = vrot.slane %v1330_v56, 5  ;;  %v736_v7 = vshrl.u32 %v610_v57, 16  ;;  %v6044_v45 = vld [vmem:[%s6193_s29 + $0x18] sm:$0xff]  ;;  %248 = vst.msk [vmem:[#allocation2 + $0xf0] sm:$0xff] %vm217_vm8, %v6128_v5 }
  0x47   : > { %v739_v8 = vshll.u32 %v610_v57, 16  ;;  %v2307_v44 = vrot.slane %v2305_v35, 4  ;;  %v757_v57 = vrot.slane %v755_v38, 5  ;;  %249 = vst.msk [vmem:[#allocation2 + $0xf8] sm:$0xff] %vm217_vm8, %v6128_v5 }
  0x48   : > { %v2297_v0 = vor.u32 %v2296_v58, %v2292_v55  ;;  %v724_v12 = vsel %vm6246_vm6, %v719_v61, %v723_v31  ;;  %v1469_v17 = vsel %vm6254_vm7, %v1467_v3, %v1468_v4  ;;  %v738_v18 = vrot.slane %v736_v7, 4  ;;  %v614_v61 = vld [vmem:[%s6193_s29 + $0x28] sm:$0xf] }
  0x49   : > { %v741_v19 = vrot.slane %v739_v8, 5  ;;  %v1075_v22 = vunpack.c.l.b16 %v724_v12  ;;  %v1573_v25 = vunpack.c.l.b16 %v1469_v17  ;;  %v2311_v54 = vor.u32 %v2310_v48, %v2307_v44 }
  0x4a   : > { %v2298_v10 = vrot.slane %v2297_v0, 4  ;;  %v2316_v55 = vrot.slane %v2314_v49, 5  ;;  %v5475_v58 = vrot.slane %v1331_v41, 9  ;;  %v763_v7 = vshll.u32 %v613_v53, 16  ;;  %v617_v53 = vld [vmem:[%s6193_s29 + $0x34] sm:$0xf] }
  0x4b   : > { %v742_v33 = vor.u32 %v741_v19, %v738_v18  ;;  %v1106_v37 = vpack.c.b16 %v1076_v23, %v1075_v22  ;;  %v1603_v39 = vpack.c.b16 %v1573_v25, %v1572_v24  ;;  %v2312_v3 = vrot.slane %v2311_v54, 4 }
  0x4c   : > { %v2303_v21 = vsel %vm6246_vm6, %v2298_v10, %v2302_v11  ;;  %v769_v8 = vshll.u32 %v614_v61, 16  ;;  %v773_v9 = vshrl.u32 %v614_v61, 16  ;;  %v758_v11 = vsel %vm6246_vm6, %v753_v62, %v757_v57 }
  0x4d   : > { %v2645_v31 = vunpack.c.l.b16 %v2303_v21  ;;  %v743_v51 = vrot.slane %v742_v33, 4  ;;  %v2317_v16 = vsel %vm6246_vm6, %v2312_v3, %v2316_v55  ;;  %v762_v18 = vrot.slane %v760_v2, 4  ;;  %v5629_v33 = vld [vmem:[%s6193_s29 + $0x34] sm:$0xf] }
  0x4e   : > { %v765_v19 = vrot.slane %v763_v7, 5  ;;  %v6341_v20 = vrot.slane %v769_v8, 5  ;;  %v775_v21 = vrot.slane %v773_v9, 4  ;;  %v1078_v22 = vunpack.c.l.b16 %v758_v11 }
  0x4f   : > { %v2675_v47 = vpack.c.b16 %v2645_v31, %v2644_v30  ;;  %v748_v0 = vsel %vm6246_vm6, %v743_v51, %v747_v27  ;;  %v779_v25 = vshll.u32 %v615_v14, 16  ;;  %v2646_v26 = vunpack.c.l.b16 %v2317_v16  ;;  %v6045_v30 = vld [vmem:[%s6193_s29 + $0x24] sm:$0xff] }
  0x50   : > { %v1077_v15 = vunpack.c.l.b16 %v748_v0  ;;  %v766_v31 = vor.u32 %v765_v19, %v762_v18  ;;  %v776_v32 = vor.u32 %v775_v21, %v6341_v20  ;;  %v1479_v41 = vrot.slane %v1335_v28, 5  ;;  %v1337_v28 = vld [vmem:[%s6193_s29 + $0x30] sm:$0xe] }
  0x51   : > { %v781_v38 = vrot.slane %v779_v25, 5  ;;  %v2342_v48 = vshrl.u32 %v5629_v33, 16  ;;  %v2348_v49 = vshll.u32 %v5630_v40, 16  ;;  %v797_v9 = vshrl.u32 %v617_v53, 16 }
  0x52   : > { %v1107_v36 = vpack.c.b16 %v1078_v22, %v1077_v15  ;;  %v777_v51 = vrot.slane %v776_v32, 4  ;;  %v6410_v22 = vld [vmem:[%s6193_s29 + $0x34] sm:$0xf] }
  0x53   : > { %v799_v21 = vrot.slane %v797_v9, 4 }
  0x54   : > { %5457 = vmatmul.msk.bf16.vlgmr.msrb.gmra.mxu1 %vm398_vm1, %v1105_v42  ;;  %5490 = vmatmul.msk.bf16.vlgmr.msrb.gmra.mxu2 %vm398_vm1, %v1602_v43  ;;  %v1472_v42 = vrot.slane %v1332_v29, 5  ;;  %v5627_v43 = vld [vmem:[%s6193_s29 + $0x2c] sm:$0x1]  ;;  %v5628_v29 = vld [vmem:[%s6193_s29 + $0x30] sm:$0xf]  ;;  %v782_v2 = vsel %vm6246_vm6, %v777_v51, %v781_v38 }
  0x55   : > { %5603 = vmatmul.msk.bf16.vlgmr.msrb.gmra.mxu3 %vm398_vm1, %v6043_v50  ;;  %5668 = vmatmul.msk.bf16.vlgmr.msrb.gmra.mxu0 %vm398_vm1, %v2674_v52  ;;  %v2318_v50 = vshrl.u32 %v5626_v34, 16  ;;  %v2324_v52 = vshll.u32 %v5627_v43, 16  ;;  %v2329_v34 = vshrl.u32 %v5628_v29, 16  ;;  %v2332_v35 = vshll.u32 %v5628_v29, 16  ;;  %v616_v43 = vld [vmem:[%s6193_s29 + $0x30] sm:$0xf] }
  0x56   : > { %v1474_v59 = vrot.slane %v1472_v42, 4  ;;  %v1473_v12 = vsel %vm6254_vm7, %v5475_v58, %v1472_v42  ;;  %v2344_v58 = vrot.slane %v2342_v48, 4  ;;  %v1080_v15 = vunpack.c.l.b16 %v782_v2  ;;  %v1339_v38 = vld [vmem:[%s6193_s29 + $0x38] sm:$0x1] }
  0x57   : > { %v2320_v56 = vrot.slane %v2318_v50, 4  ;;  %v2326_v4 = vrot.slane %v2324_v52, 5  ;;  %v1574_v23 = vunpack.c.l.b16 %v1473_v12  ;;  %v2331_v44 = vrot.slane %v2329_v34, 4 }
  0x58   : > { %v1476_v13 = vsel %vm6254_vm7, %v1474_v59, %v1475_v60  ;;  %v767_v50 = vrot.slane %v766_v31, 4  ;;  %v1481_v59 = vrot.slane %v1479_v41, 4  ;;  %v1482_v60 = vrot.slane %v1336_v46, 5  ;;  %v5632_v31 = vld [vmem:[%s6193_s29 + $0x40] sm:$0xf] }
  0x59   : > { %v2321_v63 = vor.u32 %v2320_v56, %v2316_v55  ;;  %v1575_v24 = vunpack.c.l.b16 %v1476_v13  ;;  %v784_v55 = vshrl.u32 %v616_v43, 16  ;;  %v787_v56 = vshll.u32 %v616_v43, 16 }
  0x5a   : > { %v772_v0 = vsel %vm6246_vm6, %v767_v50, %v6341_v20  ;;  %v1483_v11 = vsel %vm6254_vm7, %v1481_v59, %v1482_v60  ;;  %v1486_v29 = vrot.slane %v6410_v22, 5  ;;  %v293_v22 = vld [vmem:[#allocation2 + $0x40] sm:$0xff] }
  0x5b   : > { %v2322_v10 = vrot.slane %v2321_v63, 4  ;;  %v2350_v63 = vrot.slane %v2348_v49, 5  ;;  %v786_v7 = vrot.slane %v784_v55, 4  ;;  %v789_v8 = vrot.slane %v787_v56, 5 }
  0x5c   : > { %v1079_v14 = vunpack.c.l.b16 %v772_v0  ;;  %v1577_v18 = vunpack.c.l.b16 %v1483_v11  ;;  %v1488_v56 = vrot.slane %v1486_v29, 4 }
  0x5d   : > { %v2327_v17 = vsel %vm6246_vm6, %v2322_v10, %v2326_v4  ;;  %v793_v4 = vshll.u32 %v617_v53, 16  ;;  %v790_v19 = vor.u32 %v789_v8, %v786_v7 }
  0x5e   : > { %v2647_v27 = vunpack.c.l.b16 %v2327_v17  ;;  %v618_v17 = vld [vmem:[%s6193_s29 + $0x38] sm:$0x1]  ;;  %v1108_v32 = vpack.c.b16 %v1080_v15, %v1079_v14 }
  0x5f   : > { %v6407_v20 = vrot.slane %v793_v4, 5  ;;  %v803_v25 = vshll.u32 %v618_v17, 16  ;;  %v791_v34 = vrot.slane %v790_v19, 4 }
  0x60   : > { %v2676_v42 = vpack.c.b16 %v2647_v27, %v2646_v26  ;;  %v619_v26 = vld [vmem:[%s6193_s29 + $0x3c] sm:$0xf]  ;;  %v6046_v27 = vld [vmem:[%s6193_s29 + $0x30] sm:$0xff] }
  0x61   : > { %v808_v40 = vshrl.u32 %v619_v26, 16  ;;  %v811_v43 = vshll.u32 %v619_v26, 16  ;;  %v805_v51 = vrot.slane %v803_v25, 5  ;;  %v796_v5 = vsel %vm6246_vm6, %v791_v34, %v6407_v20 }
  0x62   : > { %v1081_v15 = vunpack.c.l.b16 %v796_v5 }
  0x63   : > { %v810_v59 = vrot.slane %v808_v40, 4  ;;  %v813_v60 = vrot.slane %v811_v43, 5  ;;  %v5636_v40 = vld [vmem:[%s6193_s29 + $0x50] sm:$0x1] }
  0x64   : > { %5458 = vmatmul.msk.bf16.gmra.mxu1 %vm398_vm1, %v1106_v37  ;;  %5491 = vmatmul.msk.bf16.gmra.mxu2 %vm398_vm1, %v1603_v39  ;;  %v1604_v37 = vpack.c.b16 %v1575_v24, %v1574_v23  ;;  %v1334_v39 = vld [vmem:[%s6193_s29 + $0x24] sm:$0xe] }
  0x65   : > { %5604 = vmatmul.msk.bf16.gmra.mxu3 %vm398_vm1, %v6044_v45  ;;  %5669 = vmatmul.msk.bf16.gmra.mxu0 %vm398_vm1, %v2675_v47  ;;  %v2334_v45 = vrot.slane %v2332_v35, 5  ;;  %v2338_v47 = vshll.u32 %v5629_v33, 16  ;;  %v5476_v52 = vrot.slane %v1334_v39, 9  ;;  %v800_v35 = vor.u32 %v799_v21, %v6407_v20  ;;  %v1340_v20 = vld [vmem:[%s6193_s29 + $0x3c] sm:$0xe] }
  0x66   : > { %v814_v11 = vor.u32 %v813_v60, %v810_v59  ;;  %v301_v60 = vld [vmem:[#allocation2 + $0x80] sm:$0xff] }
  0x67   : > { %v2335_v54 = vor.u32 %v2334_v45, %v2331_v44  ;;  %v2340_v57 = vrot.slane %v2338_v47, 5  ;;  %v1480_v3 = vsel %vm6254_vm7, %v5476_v52, %v1479_v41  ;;  %v2362_v44 = vshll.u32 %v5632_v31, 16 }
  0x68   : > { %v1576_v16 = vunpack.c.l.b16 %v1480_v3  ;;  %v2366_v45 = vshrl.u32 %v5632_v31, 16  ;;  %v5477_v52 = vrot.slane %v1337_v28, 9  ;;  %v801_v55 = vrot.slane %v800_v35, 4  ;;  %v622_v28 = vld [vmem:[%s6193_s29 + $0x48] sm:$0xf] }
  0x69   : > { %v2336_v61 = vrot.slane %v2335_v54, 4  ;;  %v2345_v62 = vor.u32 %v2344_v58, %v2340_v57  ;;  %v2364_v53 = vrot.slane %v2362_v44, 5  ;;  %v6464_v26 = vrot.slane %v814_v11, 4 }
  0x6a   : > { %v1605_v33 = vpack.c.b16 %v1577_v18, %v1576_v16  ;;  %v2368_v54 = vrot.slane %v2366_v45, 4  ;;  %v806_v7 = vsel %vm6246_vm6, %v801_v55, %v805_v51  ;;  %v1487_v8 = vsel %vm6254_vm7, %v5477_v52, %v1486_v29  ;;  %v5634_v29 = vld [vmem:[%s6193_s29 + $0x48] sm:$0xf] }
  0x6b   : > { %v2346_v10 = vrot.slane %v2345_v62, 4  ;;  %v2341_v12 = vsel %vm6246_vm6, %v2336_v61, %v2340_v57  ;;  %v1489_v57 = vrot.slane %v1339_v38, 5  ;;  %v1082_v17 = vunpack.c.l.b16 %v806_v7  ;;  %v285_v38 = vld [vmem:[#allocation2] sm:$0xff]  ;;  %v294_v7 = vld [vmem:[#allocation2 + $0x48] sm:$0xff] }
  0x6c   : > { %v2648_v23 = vunpack.c.l.b16 %v2341_v12  ;;  %v2369_v61 = vor.u32 %v2368_v54, %v2364_v53  ;;  %v1578_v18 = vunpack.c.l.b16 %v1487_v8  ;;  %v5478_v31 = vrot.slane %v1340_v20, 9 }
  0x6d   : > { %v2351_v13 = vsel %vm6246_vm6, %v2346_v10, %v2350_v63  ;;  %v621_v63 = vld [vmem:[%s6193_s29 + $0x44] sm:$0x1]  ;;  %v1490_v9 = vsel %vm6254_vm7, %v1488_v56, %v1489_v57  ;;  %v1341_v10 = vld [vmem:[%s6193_s29 + $0x40] sm:$0xf]  ;;  %v2380_v34 = vshll.u32 %v5634_v29, 16  ;;  %v1109_v35 = vpack.c.b16 %v1082_v17, %v1081_v15 }
  0x6e   : > { %v2649_v24 = vunpack.c.l.b16 %v2351_v13  ;;  %v2370_v4 = vrot.slane %v2369_v61, 4  ;;  %v827_v12 = vshll.u32 %v621_v63, 16  ;;  %v1579_v19 = vunpack.c.l.b16 %v1490_v9 }
  0x6f   : > { %v1493_v21 = vrot.slane %v1341_v10, 5  ;;  %v832_v45 = vshrl.u32 %v622_v28, 16  ;;  %v2396_v55 = vshll.u32 %v5636_v40, 16 }
  0x70   : > { %v2677_v39 = vpack.c.b16 %v2649_v24, %v2648_v23  ;;  %v1342_v23 = vld [vmem:[%s6193_s29 + $0x44] sm:$0x1] }
  0x71   : > { %v1496_v43 = vrot.slane %v1342_v23, 5  ;;  %v1494_v63 = vsel %vm6254_vm7, %v5478_v31, %v1493_v21  ;;  %v2398_v5 = vrot.slane %v2396_v55, 5  ;;  %v834_v9 = vrot.slane %v832_v45, 4  ;;  %v6499_v23 = vld [vmem:[%s6193_s29 + $0x4c] sm:$0xf] }
  0x72   : > { %v5637_v45 = vld [vmem:[%s6193_s29 + $0x54] sm:$0xf]  ;;  %v1345_v55 = vld [vmem:[%s6193_s29 + $0x50] sm:$0x1] }
  0x74   : > { %5459 = vmatmul.msk.bf16.gmra.mxu1 %vm398_vm1, %v1107_v36  ;;  %5492 = vmatmul.msk.bf16.gmra.mxu2 %vm398_vm1, %v1604_v37  ;;  %v620_v36 = vld [vmem:[%s6193_s29 + $0x40] sm:$0xf]  ;;  %v5633_v37 = vld [vmem:[%s6193_s29 + $0x44] sm:$0x1] }
  0x75   : > { %5605 = vmatmul.msk.bf16.gmra.mxu3 %vm398_vm1, %v6045_v30  ;;  %5670 = vmatmul.msk.bf16.gmra.mxu0 %vm398_vm1, %v2676_v42  ;;  %v5631_v30 = vld [vmem:[%s6193_s29 + $0x3c] sm:$0xf]  ;;  %v2372_v46 = vshll.u32 %v5633_v37, 16  ;;  %v817_v47 = vshll.u32 %v620_v36, 16  ;;  %v821_v48 = vshrl.u32 %v620_v36, 16  ;;  %v1606_v36 = vpack.c.b16 %v1579_v19, %v1578_v18 }
  0x76   : > { %v2353_v41 = vshrl.u32 %v5631_v30, 16  ;;  %v2356_v42 = vshll.u32 %v5631_v30, 16  ;;  %v1495_v37 = vrot.slane %v1493_v21, 4  ;;  %v624_v19 = vld [vmem:[%s6193_s29 + $0x50] sm:$0x1] }
  0x77   : > { %v2374_v62 = vrot.slane %v2372_v46, 5  ;;  %v6445_v0 = vrot.slane %v817_v47, 5  ;;  %v823_v2 = vrot.slane %v821_v48, 4 }
  0x78   : > { %v2355_v49 = vrot.slane %v2353_v41, 4  ;;  %v2358_v50 = vrot.slane %v2356_v42, 5  ;;  %v6047_v42 = vld [vmem:[%s6193_s29 + $0x3c] sm:$0xff] }
  0x79   : > { %v2375_v14 = vsel %vm6246_vm6, %v2370_v4, %v2374_v62  ;;  %v824_v16 = vor.u32 %v823_v2, %v6445_v0  ;;  %v820_v61 = vsel %vm6246_vm6, %v6464_v26, %v6445_v0  ;;  %v309_v62 = vld [vmem:[#allocation2 + $0xc0] sm:$0xff]  ;;  %v1497_v0 = vsel %vm6254_vm7, %v1495_v37, %v1496_v43  ;;  %v295_v37 = vld [vmem:[#allocation2 + $0x50] sm:$0xff]  ;;  %v6048_v43 = vld [vmem:[%s6193_s29 + $0x48] sm:$0xff] }
  0x7a   : > { %v2359_v58 = vor.u32 %v2358_v50, %v2355_v49  ;;  %v2651_v25 = vunpack.c.l.b16 %v2375_v14  ;;  %v2382_v49 = vrot.slane %v2380_v34, 5  ;;  %v1083_v21 = vunpack.c.l.b16 %v820_v61 }
  0x7b   : > { %v6470_v30 = vrot.slane %v824_v16, 4  ;;  %v1500_v34 = vrot.slane %v6499_v23, 5 }
  0x7c   : > { %v2360_v3 = vrot.slane %v2359_v58, 4 }
  0x7e   : > { %v2365_v13 = vsel %vm6246_vm6, %v2360_v3, %v2364_v53  ;;  %v835_v53 = vshll.u32 %v622_v28, 16  ;;  %v1581_v28 = vunpack.c.l.b16 %v1497_v0  ;;  %v1503_v0 = vrot.slane %v1345_v55, 5  ;;  %v312_v55 = vld [vmem:[#allocation2 + $0xd8] sm:$0xff] }
  0x7f   : > { %v2650_v24 = vunpack.c.l.b16 %v2365_v13  ;;  %v286_v13 = vld [vmem:[#allocation2 + $0x8] sm:$0xff] }
  0x80   : > { %v837_v10 = vrot.slane %v835_v53, 5 }
  0x81   : > { %v2678_v44 = vpack.c.b16 %v2651_v25, %v2650_v24 }
  0x84   : > { %5460 = vmatmul.msk.bf16.gmra.mxu1 %vm398_vm1, %v1108_v32  ;;  %5493 = vmatmul.msk.bf16.gmra.mxu2 %vm398_vm1, %v1605_v33  ;;  %v5635_v32 = vld [vmem:[%s6193_s29 + $0x4c] sm:$0xf]  ;;  %v2377_v33 = vshrl.u32 %v5634_v29, 16 }
  0x85   : > { %5606 = vmatmul.msk.bf16.gmra.mxu3 %vm398_vm1, %v6046_v27  ;;  %5671 = vmatmul.msk.bf16.gmra.mxu0 %vm398_vm1, %v2677_v39  ;;  %v6466_v27 = vrot.slane %v827_v12, 5  ;;  %v623_v39 = vld [vmem:[%s6193_s29 + $0x4c] sm:$0xf]  ;;  %v2386_v50 = vshll.u32 %v5635_v32, 16  ;;  %v2390_v51 = vshrl.u32 %v5635_v32, 16  ;;  %v851_v32 = vshll.u32 %v624_v19, 16 }
  0x86   : > { %v2379_v46 = vrot.slane %v2377_v33, 4  ;;  %v841_v54 = vshll.u32 %v623_v39, 16  ;;  %v845_v56 = vshrl.u32 %v623_v39, 16  ;;  %v302_v33 = vld [vmem:[#allocation2 + $0x88] sm:$0xff] }
  0x87   : > { %v2388_v58 = vrot.slane %v2386_v50, 5  ;;  %v2392_v59 = vrot.slane %v2390_v51, 4  ;;  %v830_v8 = vsel %vm6246_vm6, %v6470_v30, %v6466_v27  ;;  %v1580_v27 = vunpack.c.l.b16 %v1494_v63  ;;  %v1343_v39 = vld [vmem:[%s6193_s29 + $0x48] sm:$0xe]  ;;  %v287_v51 = vld [vmem:[#allocation2 + $0x10] sm:$0xff] }
  0x88   : > { %v2383_v57 = vor.u32 %v2382_v49, %v2379_v46  ;;  %v6494_v14 = vrot.slane %v841_v54, 5  ;;  %v847_v15 = vrot.slane %v845_v56, 4  ;;  %v1084_v26 = vunpack.c.l.b16 %v830_v8  ;;  %v5639_v63 = vld [vmem:[%s6193_s29 + $0x5c] sm:$0x1] }
  0x89   : > { %v2393_v3 = vor.u32 %v2392_v59, %v2388_v58  ;;  %v838_v30 = vor.u32 %v837_v10, %v834_v9  ;;  %v6518_v50 = vrot.slane %v851_v32, 5  ;;  %v5479_v56 = vrot.slane %v1343_v39, 9  ;;  %v626_v59 = vld [vmem:[%s6193_s29 + $0x58] sm:$0xf] }
  0x8a   : > { %v2384_v2 = vrot.slane %v2383_v57, 4  ;;  %v848_v31 = vor.u32 %v847_v15, %v6494_v14  ;;  %v1502_v57 = vrot.slane %v1500_v34, 4  ;;  %v865_v9 = vshll.u32 %v626_v59, 16  ;;  %v288_v32 = vld [vmem:[#allocation2 + $0x18] sm:$0xff] }
  0x8b   : > { %v2394_v16 = vrot.slane %v2393_v3, 4  ;;  %v2404_v3 = vshll.u32 %v5637_v45, 16 }
  0x8c   : > { %v2389_v24 = vsel %vm6246_vm6, %v2384_v2, %v2388_v58  ;;  %v6516_v49 = vrot.slane %v848_v31, 4  ;;  %v2401_v2 = vshrl.u32 %v5637_v45, 16  ;;  %v1504_v31 = vsel %vm6254_vm7, %v1502_v57, %v1503_v0  ;;  %v6556_v45 = vld [vmem:[%s6193_s29 + $0x58] sm:$0xf]  ;;  %v289_v0 = vld [vmem:[#allocation2 + $0x20] sm:$0xff] }
  0x8d   : > { %v2399_v25 = vsel %vm6246_vm6, %v2394_v16, %v2398_v5  ;;  %v1507_v57 = vrot.slane %v6556_v45, 5 }
  0x8e   : > { %v2403_v10 = vrot.slane %v2401_v2, 4 }
  0x91   : > { %v480_v41 = vpop.f32.mrf.mxu1 }
  0x92   : > { %v548_v47 = vadd.f32 %v480_v41, %v293_v22  ;;  %v460_v48 = vpop.f32.mrf.mxu0  ;;  %v1110_v41 = vpack.c.b16 %v1084_v26, %v1083_v21 }
  0x93   : > { %v540_v52 = vadd.f32 %v460_v48, %v285_v38  ;;  %v310_v38 = vld [vmem:[#allocation2 + $0xc8] sm:$0xff]  ;;  %v6514_v48 = vrot.slane %v838_v30, 4 }
  0x94   : > { %580 = vst.msk [vmem:[#allocation2 + $0x40] sm:$0xff] %vm217_vm8, %v548_v47  ;;  %5461 = vmatmul.msk.bf16.gmra.mxu1 %vm398_vm1, %v1109_v35  ;;  %5494 = vmatmul.msk.bf16.gmra.mxu2 %vm398_vm1, %v1606_v36  ;;  %v2652_v35 = vunpack.c.l.b16 %v2389_v24  ;;  %v2653_v36 = vunpack.c.l.b16 %v2399_v25  ;;  %v296_v24 = vld [vmem:[#allocation2 + $0x58] sm:$0xff] }
  0x95   : > { %5607 = vmatmul.msk.bf16.gmra.mxu3 %vm398_vm1, %v6047_v42  ;;  %572 = vst.msk [vmem:[#allocation2] sm:$0xff] %vm217_vm8, %v540_v52  ;;  %5672 = vmatmul.msk.bf16.gmra.mxu0 %vm398_vm1, %v2678_v44  ;;  %v1607_v42 = vpack.c.b16 %v1581_v28, %v1580_v27  ;;  %v625_v44 = vld [vmem:[%s6193_s29 + $0x54] sm:$0xf]  ;;  %v5638_v52 = vld [vmem:[%s6193_s29 + $0x58] sm:$0xf]  ;;  %v844_v19 = vsel %vm6246_vm6, %v6514_v48, %v6494_v14 }
  0x96   : > { %v2679_v58 = vpack.c.b16 %v2653_v36, %v2652_v35  ;;  %v2414_v8 = vshrl.u32 %v5638_v52, 16  ;;  %v1501_v14 = vsel %vm6254_vm7, %v5479_v56, %v1500_v34  ;;  %v1346_v56 = vld [vmem:[%s6193_s29 + $0x54] sm:$0xe] }
  0x97   : > { %v500_v4 = vpop.f32.mrf.mxu2  ;;  %v1582_v48 = vunpack.c.l.b16 %v1501_v14 }
  0x98   : > { %v556_v11 = vadd.f32 %v500_v4, %v301_v60  ;;  %v520_v12 = vpop.f32.mrf.mxu3  ;;  %v859_v4 = vshll.u32 %v625_v44, 16  ;;  %v2416_v16 = vrot.slane %v2414_v8, 4  ;;  %v1348_v8 = vld [vmem:[%s6193_s29 + $0x5c] sm:$0x1] }
  0x99   : > { %v482_v17 = vpop.f32.mrf.mxu1  ;;  %v564_v18 = vadd.f32 %v520_v12, %v309_v62  ;;  %v856_v62 = vshrl.u32 %v625_v44, 16  ;;  %v303_v12 = vld [vmem:[#allocation2 + $0x90] sm:$0xff] }
  0x9a   : > { %588 = vst.msk [vmem:[#allocation2 + $0x80] sm:$0xff] %vm217_vm8, %v556_v11  ;;  %v549_v20 = vadd.f32 %v482_v17, %v294_v7  ;;  %v462_v22 = vpop.f32.mrf.mxu0  ;;  %v2410_v7 = vshll.u32 %v5638_v52, 16  ;;  %v2406_v11 = vrot.slane %v2404_v3, 5  ;;  %v2420_v17 = vshll.u32 %v5639_v63, 16 }
  0x9b   : > { %596 = vst.msk [vmem:[#allocation2 + $0xc0] sm:$0xff] %vm217_vm8, %v564_v18  ;;  %v541_v29 = vadd.f32 %v462_v22, %v286_v13  ;;  %v869_v13 = vshrl.u32 %v626_v59, 16  ;;  %v311_v18 = vld [vmem:[#allocation2 + $0xd0] sm:$0xff]  ;;  %v858_v25 = vrot.slane %v856_v62, 4  ;;  %v861_v26 = vrot.slane %v859_v4, 5 }
  0x9c   : > { %581 = vst.msk [vmem:[#allocation2 + $0x48] sm:$0xff] %vm217_vm8, %v549_v20  ;;  %v2412_v15 = vrot.slane %v2410_v7, 5  ;;  %v854_v20 = vsel %vm6246_vm6, %v6516_v49, %v6518_v50  ;;  %v2407_v21 = vor.u32 %v2406_v11, %v2403_v10  ;;  %v2422_v28 = vrot.slane %v2420_v17, 5  ;;  %v5642_v17 = vld [vmem:[%s6193_s29 + $0x68] sm:$0x1] }
  0x9d   : > { %573 = vst.msk [vmem:[#allocation2 + $0x8] sm:$0xff] %vm217_vm8, %v541_v29  ;;  %v871_v39 = vrot.slane %v869_v13, 4  ;;  %v862_v44 = vor.u32 %v861_v26, %v858_v25  ;;  %v1583_v49 = vunpack.c.l.b16 %v1504_v31  ;;  %v5480_v13 = vrot.slane %v1346_v56, 9 }
  0x9e   : > { %v2417_v27 = vor.u32 %v2416_v16, %v2412_v15  ;;  %v628_v16 = vld [vmem:[%s6193_s29 + $0x60] sm:$0xf]  ;;  %v1510_v25 = vrot.slane %v1348_v8, 5  ;;  %v2444_v31 = vshll.u32 %v5642_v17, 16 }
  0x9f   : > { %v502_v40 = vpop.f32.mrf.mxu2  ;;  %v6567_v62 = vrot.slane %v862_v44, 4 }
  0xa0   : > { %v557_v46 = vadd.f32 %v502_v40, %v302_v33  ;;  %v522_v47 = vpop.f32.mrf.mxu3  ;;  %v2408_v33 = vrot.slane %v2407_v21, 4  ;;  %v2418_v40 = vrot.slane %v2417_v27, 4  ;;  %v629_v21 = vld [vmem:[%s6193_s29 + $0x64] sm:$0xf] }
  0xa1   : > { %v485_v53 = vpop.f32.mrf.mxu1  ;;  %v565_v54 = vadd.f32 %v522_v47, %v310_v38  ;;  %v6549_v38 = vrot.slane %v865_v9, 5  ;;  %v1086_v47 = vunpack.c.l.b16 %v854_v20  ;;  %v5641_v9 = vld [vmem:[%s6193_s29 + $0x64] sm:$0xf] }
  0xa2   : > { %589 = vst.msk [vmem:[#allocation2 + $0x88] sm:$0xff] %vm217_vm8, %v557_v46  ;;  %v550_v60 = vadd.f32 %v485_v53, %v295_v37  ;;  %v465_v61 = vpop.f32.mrf.mxu0  ;;  %v627_v37 = vld [vmem:[%s6193_s29 + $0x5c] sm:$0x1]  ;;  %v2413_v34 = vsel %vm6246_vm6, %v2408_v33, %v2412_v15  ;;  %v2423_v46 = vsel %vm6246_vm6, %v2418_v40, %v2422_v28  ;;  %v2434_v27 = vshll.u32 %v5641_v9, 16 }
  0xa3   : > { %597 = vst.msk [vmem:[#allocation2 + $0xc8] sm:$0xff] %vm217_vm8, %v565_v54  ;;  %v542_v5 = vadd.f32 %v465_v61, %v287_v51  ;;  %v875_v50 = vshll.u32 %v627_v37, 16  ;;  %v304_v51 = vld [vmem:[#allocation2 + $0x98] sm:$0xff]  ;;  %v872_v52 = vor.u32 %v871_v39, %v6549_v38  ;;  %v2654_v53 = vunpack.c.l.b16 %v2413_v34  ;;  %v313_v39 = vld [vmem:[#allocation2 + $0xe0] sm:$0xff] }
  0xa4   : > { %582 = vst.msk [vmem:[#allocation2 + $0x50] sm:$0xff] %vm217_vm8, %v550_v60  ;;  %5462 = vmatmul.msk.bf16.gmra.mxu1 %vm398_vm1, %v1110_v41  ;;  %5495 = vmatmul.msk.bf16.gmra.mxu2 %vm398_vm1, %v1607_v42  ;;  %v1085_v42 = vunpack.c.l.b16 %v844_v19  ;;  %v2655_v54 = vunpack.c.l.b16 %v2423_v46  ;;  %v297_v60 = vld [vmem:[#allocation2 + $0x60] sm:$0xff]  ;;  %v6049_v61 = vld [vmem:[%s6193_s29 + $0x54] sm:$0xff]  ;;  %v1509_v19 = vrot.slane %v1507_v57, 4  ;;  %v2438_v28 = vshrl.u32 %v5641_v9, 16 }
  0xa5   : > { %5608 = vmatmul.msk.bf16.gmra.mxu3 %vm398_vm1, %v6048_v43  ;;  %574 = vst.msk [vmem:[#allocation2 + $0x10] sm:$0xff] %vm217_vm8, %v542_v5  ;;  %5673 = vmatmul.msk.bf16.gmra.mxu0 %vm398_vm1, %v2679_v58  ;;  %v5640_v58 = vld [vmem:[%s6193_s29 + $0x60] sm:$0xf]  ;;  %v1608_v5 = vpack.c.b16 %v1583_v49, %v1582_v48  ;;  %v6569_v7 = vrot.slane %v875_v50, 5  ;;  %v889_v33 = vshll.u32 %v629_v21, 16  ;;  %v868_v40 = vsel %vm6246_vm6, %v6567_v62, %v6549_v38  ;;  %v290_v49 = vld [vmem:[#allocation2 + $0x28] sm:$0xff] }
  0xa6   : > { %v2425_v63 = vshrl.u32 %v5640_v58, 16  ;;  %v1111_v3 = vpack.c.b16 %v1086_v47, %v1085_v42  ;;  %v2680_v15 = vpack.c.b16 %v2655_v54, %v2654_v53  ;;  %v2440_v37 = vrot.slane %v2438_v28, 4  ;;  %v298_v42 = vld [vmem:[#allocation2 + $0x68] sm:$0xff]  ;;  %v6608_v9 = vld [vmem:[%s6193_s29 + $0x64] sm:$0xf] }
  0xa7   : > { %v505_v22 = vpop.f32.mrf.mxu2  ;;  %v1511_v44 = vsel %vm6254_vm7, %v1509_v19, %v1510_v25  ;;  %v2446_v46 = vrot.slane %v2444_v31, 5  ;;  %v6595_v54 = vrot.slane %v889_v33, 5  ;;  %v5645_v28 = vld [vmem:[%s6193_s29 + $0x74] sm:$0x1] }
  0xa8   : > { %v558_v29 = vadd.f32 %v505_v22, %v303_v12  ;;  %v525_v30 = vpop.f32.mrf.mxu3  ;;  %v873_v12 = vrot.slane %v872_v52, 4  ;;  %v2427_v22 = vrot.slane %v2425_v63, 4 }
  0xa9   : > { %v487_v35 = vpop.f32.mrf.mxu1  ;;  %v566_v36 = vadd.f32 %v525_v30, %v311_v18  ;;  %v883_v30 = vshll.u32 %v628_v16, 16 }
  0xaa   : > { %590 = vst.msk [vmem:[#allocation2 + $0x90] sm:$0xff] %vm217_vm8, %v558_v29  ;;  %v551_v41 = vadd.f32 %v487_v35, %v296_v24  ;;  %v467_v23 = vpop.f32.mrf.mxu0  ;;  %v2428_v24 = vshll.u32 %v5640_v58, 16  ;;  %v880_v29 = vshrl.u32 %v628_v16, 16  ;;  %v893_v35 = vshrl.u32 %v629_v21, 16  ;;  %v299_v16 = vld [vmem:[#allocation2 + $0x70] sm:$0xff] }
  0xab   : > { %598 = vst.msk [vmem:[#allocation2 + $0xd0] sm:$0xff] %vm217_vm8, %v566_v36  ;;  %v543_v43 = vadd.f32 %v467_v23, %v288_v32  ;;  %v305_v32 = vld [vmem:[#allocation2 + $0xa0] sm:$0xff]  ;;  %v2436_v36 = vrot.slane %v2434_v27, 5  ;;  %v885_v50 = vrot.slane %v883_v30, 5  ;;  %v291_v27 = vld [vmem:[#allocation2 + $0x30] sm:$0xff] }
  0xac   : > { %583 = vst.msk [vmem:[#allocation2 + $0x58] sm:$0xff] %vm217_vm8, %v551_v41  ;;  %v2430_v14 = vrot.slane %v2428_v24, 5  ;;  %v878_v41 = vsel %vm6246_vm6, %v873_v12, %v6569_v7  ;;  %v882_v38 = vrot.slane %v880_v29, 4  ;;  %v306_v7 = vld [vmem:[#allocation2 + $0xa8] sm:$0xff]  ;;  %v6050_v24 = vld [vmem:[%s6193_s29 + $0x60] sm:$0xff] }
  0xad   : > { %575 = vst.msk [vmem:[#allocation2 + $0x18] sm:$0xff] %vm217_vm8, %v543_v43  ;;  %v1508_v43 = vsel %vm6254_vm7, %v5480_v13, %v1507_v57  ;;  %v2441_v45 = vor.u32 %v2440_v37, %v2436_v36  ;;  %v1088_v62 = vunpack.c.l.b16 %v878_v41  ;;  %v314_v12 = vld [vmem:[#allocation2 + $0xe8] sm:$0xff] }
  0xae   : > { %v2431_v23 = vor.u32 %v2430_v14, %v2427_v22  ;;  %v5643_v13 = vld [vmem:[%s6193_s29 + $0x6c] sm:$0xf]  ;;  %v1351_v37 = vld [vmem:[%s6193_s29 + $0x68] sm:$0x1] }
  0xaf   : > { %v507_v59 = vpop.f32.mrf.mxu2  ;;  %v2442_v56 = vrot.slane %v2441_v45, 4  ;;  %v2449_v19 = vshrl.u32 %v5643_v13, 16  ;;  %v2452_v41 = vshll.u32 %v5643_v13, 16 }
  0xb0   : > { %v559_v2 = vadd.f32 %v507_v59, %v304_v51  ;;  %v527_v4 = vpop.f32.mrf.mxu3  ;;  %v2432_v51 = vrot.slane %v2431_v23, 4  ;;  %v630_v59 = vld [vmem:[%s6193_s29 + $0x68] sm:$0x1] }
  0xb1   : > { %v490_v10 = vpop.f32.mrf.mxu1  ;;  %v567_v11 = vadd.f32 %v527_v4, %v312_v55  ;;  %v895_v55 = vrot.slane %v893_v35, 4  ;;  %v886_v4 = vor.u32 %v885_v50, %v882_v38  ;;  %v631_v35 = vld [vmem:[%s6193_s29 + $0x6c] sm:$0xf] }
  0xb2   : > { %591 = vst.msk [vmem:[#allocation2 + $0x98] sm:$0xff] %vm217_vm8, %v559_v2  ;;  %v552_v18 = vadd.f32 %v490_v10, %v297_v60  ;;  %v470_v20 = vpop.f32.mrf.mxu0  ;;  %v2437_v60 = vsel %vm6246_vm6, %v2432_v51, %v2436_v36  ;;  %v2447_v2 = vsel %vm6246_vm6, %v2442_v56, %v2446_v46  ;;  %v904_v45 = vshrl.u32 %v631_v35, 16 }
  0xb3   : > { %599 = vst.msk [vmem:[#allocation2 + $0xd8] sm:$0xff] %vm217_vm8, %v567_v11  ;;  %v544_v26 = vadd.f32 %v470_v20, %v289_v0  ;;  %v896_v8 = vor.u32 %v895_v55, %v6595_v54  ;;  %v899_v0 = vshll.u32 %v630_v59, 16  ;;  %v2656_v10 = vunpack.c.l.b16 %v2437_v60  ;;  %v300_v59 = vld [vmem:[#allocation2 + $0x78] sm:$0xff] }
  0xb4   : > { %584 = vst.msk [vmem:[#allocation2 + $0x60] sm:$0xff] %vm217_vm8, %v552_v18  ;;  %5463 = vmatmul.msk.bf16.gmra.mxu1 %vm398_vm1, %v1111_v3  ;;  %5496 = vmatmul.msk.bf16.gmra.mxu2 %vm398_vm1, %v1608_v5  ;;  %v1584_v3 = vunpack.c.l.b16 %v1508_v43  ;;  %v1585_v5 = vunpack.c.l.b16 %v1511_v44  ;;  %v2657_v11 = vunpack.c.l.b16 %v2447_v2  ;;  %v5644_v18 = vld [vmem:[%s6193_s29 + $0x70] sm:$0xf]  ;;  %v887_v25 = vrot.slane %v886_v4, 4 }
  0xb5   : > { %5609 = vmatmul.msk.bf16.gmra.mxu3 %vm398_vm1, %v6049_v61  ;;  %576 = vst.msk [vmem:[#allocation2 + $0x20] sm:$0xff] %vm217_vm8, %v544_v26  ;;  %5674 = vmatmul.msk.bf16.gmra.mxu0 %vm398_vm1, %v2680_v15  ;;  %v1087_v61 = vunpack.c.l.b16 %v868_v40  ;;  %v1514_v26 = vrot.slane %v6608_v9, 5  ;;  %v897_v14 = vrot.slane %v896_v8, 4  ;;  %v901_v31 = vrot.slane %v899_v0, 5 }
  0xb6   : > { %v1609_v21 = vpack.c.b16 %v1585_v5, %v1584_v3  ;;  %v2681_v33 = vpack.c.b16 %v2657_v11, %v2656_v10  ;;  %v2451_v40 = vrot.slane %v2449_v19, 4  ;;  %v2458_v23 = vshll.u32 %v5644_v18, 16  ;;  %v292_v5 = vld [vmem:[#allocation2 + $0x38] sm:$0xff] }
  0xb7   : > { %v510_v34 = vpop.f32.mrf.mxu2  ;;  %v1112_v17 = vpack.c.b16 %v1088_v62, %v1087_v61  ;;  %v2462_v43 = vshrl.u32 %v5644_v18, 16  ;;  %v2468_v44 = vshll.u32 %v5645_v28, 16  ;;  %v907_v46 = vshll.u32 %v631_v35, 16  ;;  %v633_v28 = vld [vmem:[%s6193_s29 + $0x74] sm:$0x1] }
  0xb8   : > { %v560_v47 = vadd.f32 %v510_v34, %v305_v32  ;;  %v530_v48 = vpop.f32.mrf.mxu3  ;;  %v1349_v32 = vld [vmem:[%s6193_s29 + $0x60] sm:$0xe]  ;;  %v1516_v50 = vrot.slane %v1514_v26, 4  ;;  %v1517_v51 = vrot.slane %v1351_v37, 5  ;;  %v892_v55 = vsel %vm6246_vm6, %v887_v25, %v6595_v54  ;;  %v5647_v37 = vld [vmem:[%s6193_s29 + $0x7c] sm:$0xf] }
  0xb9   : > { %v492_v52 = vpop.f32.mrf.mxu1  ;;  %v568_v53 = vadd.f32 %v530_v48, %v313_v39  ;;  %v2460_v48 = vrot.slane %v2458_v23, 5  ;;  %v5481_v38 = vrot.slane %v1349_v32, 9  ;;  %v902_v56 = vsel %vm6246_vm6, %v897_v14, %v901_v31  ;;  %v1352_v14 = vld [vmem:[%s6193_s29 + $0x6c] sm:$0xe]  ;;  %v1353_v31 = vld [vmem:[%s6193_s29 + $0x70] sm:$0xf] }
  0xba   : > { %592 = vst.msk [vmem:[#allocation2 + $0xa0] sm:$0xff] %vm217_vm8, %v560_v47  ;;  %v553_v57 = vadd.f32 %v492_v52, %v298_v42  ;;  %v472_v58 = vpop.f32.mrf.mxu0  ;;  %v632_v42 = vld [vmem:[%s6193_s29 + $0x70] sm:$0xf]  ;;  %v2454_v47 = vrot.slane %v2452_v41, 5  ;;  %v2464_v52 = vrot.slane %v2462_v43, 4  ;;  %v906_v4 = vrot.slane %v904_v45, 4 }
  0xbb   : > { %600 = vst.msk [vmem:[#allocation2 + $0xe0] sm:$0xff] %vm217_vm8, %v568_v53  ;;  %v545_v63 = vadd.f32 %v472_v58, %v290_v49  ;;  %v307_v49 = vld [vmem:[#allocation2 + $0xb0] sm:$0xff]  ;;  %v913_v60 = vshll.u32 %v632_v42, 16  ;;  %v917_v61 = vshrl.u32 %v632_v42, 16  ;;  %v1515_v54 = vsel %vm6254_vm7, %v5481_v38, %v1514_v26  ;;  %v308_v26 = vld [vmem:[#allocation2 + $0xb8] sm:$0xff] }
  0xbc   : > { %585 = vst.msk [vmem:[#allocation2 + $0x68] sm:$0xff] %vm217_vm8, %v553_v57  ;;  %v315_v53 = vld [vmem:[#allocation2 + $0xf0] sm:$0xff]  ;;  %v2455_v57 = vor.u32 %v2454_v47, %v2451_v40  ;;  %v2465_v62 = vor.u32 %v2464_v52, %v2460_v48  ;;  %v1518_v10 = vsel %vm6254_vm7, %v1516_v50, %v1517_v51  ;;  %v1089_v13 = vunpack.c.l.b16 %v892_v55  ;;  %v5646_v32 = vld [vmem:[%s6193_s29 + $0x78] sm:$0xf]  ;;  %v5648_v43 = vld [vmem:[%s6193_s29 + $0x80] sm:$0x1] }
  0xbd   : > { %577 = vst.msk [vmem:[#allocation2 + $0x28] sm:$0xff] %vm217_vm8, %v545_v63  ;;  %v2470_v63 = vrot.slane %v2468_v44, 5  ;;  %v6640_v19 = vrot.slane %v913_v60, 5  ;;  %v923_v42 = vshll.u32 %v633_v28, 16  ;;  %v652_v44 = vld [vmem:[#allocation2] sm:$0xff]  ;;  %v6051_v47 = vld [vmem:[%s6193_s29 + $0x6c] sm:$0xff] }
  0xbe   : > { %v2456_v8 = vrot.slane %v2455_v57, 4  ;;  %v2466_v11 = vrot.slane %v2465_v62, 4  ;;  %v1354_v51 = vld [vmem:[%s6193_s29 + $0x74] sm:$0x1]  ;;  %v2476_v55 = vshll.u32 %v5646_v32, 16 }
  0xbf   : > { %v512_v15 = vpop.f32.mrf.mxu2  ;;  %v925_v60 = vrot.slane %v923_v42, 5  ;;  %v5650_v42 = vld [vmem:[%s6193_s29 + $0x88] sm:$0xf] }
  0xc0   : > { %v561_v20 = vadd.f32 %v512_v15, %v306_v7  ;;  %v532_v22 = vpop.f32.mrf.mxu3  ;;  %v909_v7 = vrot.slane %v907_v46, 5  ;;  %v1090_v15 = vunpack.c.l.b16 %v902_v56  ;;  %v2482_v56 = vshll.u32 %v5647_v37, 16 }
  0xc1   : > { %v495_v29 = vpop.f32.mrf.mxu1  ;;  %v569_v30 = vadd.f32 %v532_v22, %v314_v12  ;;  %v1586_v22 = vunpack.c.l.b16 %v1515_v54  ;;  %v2478_v62 = vrot.slane %v2476_v55, 5  ;;  %v1357_v55 = vld [vmem:[%s6193_s29 + $0x80] sm:$0x1] }
  0xc2   : > { %593 = vst.msk [vmem:[#allocation2 + $0xa8] sm:$0xff] %vm217_vm8, %v561_v20  ;;  %v554_v36 = vadd.f32 %v495_v29, %v299_v16  ;;  %v475_v39 = vpop.f32.mrf.mxu0  ;;  %v919_v20 = vrot.slane %v917_v61, 4  ;;  %v910_v25 = vor.u32 %v909_v7, %v906_v4  ;;  %v1113_v35 = vpack.c.b16 %v1090_v15, %v1089_v13  ;;  %v634_v61 = vld [vmem:[%s6193_s29 + $0x78] sm:$0xf] }
  0xc3   : > { %601 = vst.msk [vmem:[#allocation2 + $0xe8] sm:$0xff] %vm217_vm8, %v569_v30  ;;  %v546_v34 = vadd.f32 %v475_v39, %v291_v27  ;;  %v316_v27 = vld [vmem:[#allocation2 + $0xf8] sm:$0xff]  ;;  %v2473_v39 = vshrl.u32 %v5646_v32, 16  ;;  %v928_v54 = vshrl.u32 %v634_v61, 16 }
  0xc4   : > { %586 = vst.msk [vmem:[#allocation2 + $0x70] sm:$0xff] %vm217_vm8, %v554_v36  ;;  %5464 = vmatmul.msk.bf16.gmra.mxu1 %vm398_vm1, %v1112_v17  ;;  %5497 = vmatmul.msk.bf16.gmra.mxu2 %vm398_vm1, %v1609_v21  ;;  %v2461_v17 = vsel %vm6246_vm6, %v2456_v8, %v2460_v48  ;;  %v2471_v21 = vsel %vm6246_vm6, %v2466_v11, %v2470_v63  ;;  %v5482_v48 = vrot.slane %v1352_v14, 9  ;;  %v2484_v63 = vrot.slane %v2482_v56, 5  ;;  %v5651_v56 = vld [vmem:[%s6193_s29 + $0x8c] sm:$0x1] }
  0xc5   : > { %5610 = vmatmul.msk.bf16.gmra.mxu3 %vm398_vm1, %v6050_v24  ;;  %578 = vst.msk [vmem:[#allocation2 + $0x30] sm:$0xff] %vm217_vm8, %v546_v34  ;;  %5675 = vmatmul.msk.bf16.gmra.mxu0 %vm398_vm1, %v2681_v33  ;;  %v1587_v24 = vunpack.c.l.b16 %v1518_v10  ;;  %v2658_v29 = vunpack.c.l.b16 %v2461_v17  ;;  %v2659_v30 = vunpack.c.l.b16 %v2471_v21  ;;  %v920_v36 = vor.u32 %v919_v20, %v6640_v19  ;;  %v653_v20 = vld [vmem:[#allocation2 + $0x8] sm:$0xff] }
  0xc6   : > { %v911_v34 = vrot.slane %v910_v25, 4  ;;  %v931_v10 = vshll.u32 %v634_v61, 16  ;;  %v930_v14 = vrot.slane %v928_v54, 4 }
  0xc7   : > { %v515_v58 = vpop.f32.mrf.mxu2  ;;  %v1610_v41 = vpack.c.b16 %v1587_v24, %v1586_v22  ;;  %v2682_v38 = vpack.c.b16 %v2659_v30, %v2658_v29  ;;  %v921_v57 = vrot.slane %v920_v36, 4  ;;  %v636_v36 = vld [vmem:[%s6193_s29 + $0x80] sm:$0x1] }
  0xc8   : > { %v562_v2 = vadd.f32 %v515_v58, %v307_v49  ;;  %v535_v3 = vpop.f32.mrf.mxu3  ;;  %v1521_v49 = vrot.slane %v1353_v31, 5  ;;  %v2486_v58 = vshrl.u32 %v5647_v37, 16  ;;  %v916_v7 = vsel %vm6246_vm6, %v911_v34, %v6640_v19  ;;  %v1356_v34 = vld [vmem:[%s6193_s29 + $0x7c] sm:$0xf] }
  0xc9   : > { %v497_v0 = vpop.f32.mrf.mxu1  ;;  %v570_v9 = vadd.f32 %v535_v3, %v315_v53  ;;  %v2475_v53 = vrot.slane %v2473_v39, 4  ;;  %v1524_v3 = vrot.slane %v1354_v51, 5  ;;  %v926_v15 = vsel %vm6246_vm6, %v921_v57, %v925_v60  ;;  %v654_v57 = vld [vmem:[#allocation2 + $0x10] sm:$0xff] }
  0xca   : > { %594 = vst.msk [vmem:[#allocation2 + $0xb0] sm:$0xff] %vm217_vm8, %v562_v2  ;;  %v555_v12 = vadd.f32 %v497_v0, %v300_v59  ;;  %v477_v16 = vpop.f32.mrf.mxu0  ;;  %v2492_v59 = vshll.u32 %v5648_v43, 16  ;;  %v1523_v2 = vrot.slane %v1521_v49, 4  ;;  %v2488_v4 = vrot.slane %v2486_v58, 4 }
  0xcb   : > { %602 = vst.msk [vmem:[#allocation2 + $0xf0] sm:$0xff] %vm217_vm8, %v570_v9  ;;  %v547_v18 = vadd.f32 %v477_v16, %v292_v5  ;;  %v635_v5 = vld [vmem:[%s6193_s29 + $0x7c] sm:$0xf]  ;;  %v1522_v8 = vsel %vm6254_vm7, %v5482_v48, %v1521_v49  ;;  %v2479_v0 = vor.u32 %v2478_v62, %v2475_v53  ;;  %v1091_v25 = vunpack.c.l.b16 %v916_v7  ;;  %v1355_v53 = vld [vmem:[%s6193_s29 + $0x78] sm:$0xe] }
  0xcc   : > { %587 = vst.msk [vmem:[#allocation2 + $0x78] sm:$0xff] %vm217_vm8, %v555_v12  ;;  %v2489_v11 = vor.u32 %v2488_v4, %v2484_v63  ;;  %v2494_v12 = vrot.slane %v2492_v59, 5  ;;  %v937_v16 = vshll.u32 %v635_v5, 16  ;;  %v941_v17 = vshrl.u32 %v635_v5, 16  ;;  %v6052_v59 = vld [vmem:[%s6193_s29 + $0x78] sm:$0xff] }
  0xcd   : > { %579 = vst.msk [vmem:[#allocation2 + $0x38] sm:$0xff] %vm217_vm8, %v547_v18  ;;  %v2480_v18 = vrot.slane %v2479_v0, 4  ;;  %v1525_v19 = vsel %vm6254_vm7, %v1523_v2, %v1524_v3  ;;  %v1092_v30 = vunpack.c.l.b16 %v926_v15  ;;  %v933_v31 = vrot.slane %v931_v10, 5  ;;  %v637_v5 = vld [vmem:[%s6193_s29 + $0x84] sm:$0xf] }
  0xce   : > { %v2490_v22 = vrot.slane %v2489_v11, 4  ;;  %v6685_v37 = vrot.slane %v937_v16, 5  ;;  %v943_v39 = vrot.slane %v941_v17, 4  ;;  %v2506_v48 = vshll.u32 %v5650_v42, 16 }
  0xcf   : > { %v517_v33 = vpop.f32.mrf.mxu2  ;;  %v2485_v28 = vsel %vm6246_vm6, %v2480_v18, %v2484_v63  ;;  %v1114_v49 = vpack.c.b16 %v1092_v30, %v1091_v25  ;;  %v1528_v60 = vrot.slane %v1356_v34, 5  ;;  %v2510_v7 = vshrl.u32 %v5650_v42, 16 }
  0xd0   : > { %v563_v40 = vadd.f32 %v517_v33, %v308_v26  ;;  %v537_v23 = vpop.f32.mrf.mxu3  ;;  %v1588_v26 = vunpack.c.l.b16 %v1522_v8  ;;  %v2495_v32 = vsel %vm6246_vm6, %v2490_v22, %v2494_v12  ;;  %v944_v51 = vor.u32 %v943_v39, %v6685_v37 }
  0xd1   : > { %v1181_v45 = vpop.f32.mrf.mxu1  ;;  %v571_v46 = vadd.f32 %v537_v23, %v316_v27  ;;  %v5649_v23 = vld [vmem:[%s6193_s29 + $0x84] sm:$0xf]  ;;  %v2508_v4 = vrot.slane %v2506_v48, 5  ;;  %v2516_v8 = vshll.u32 %v5651_v56, 16  ;;  %v5483_v54 = vrot.slane %v1355_v53, 9 }
  0xd2   : > { %595 = vst.msk [vmem:[#allocation2 + $0xb8] sm:$0xff] %vm217_vm8, %v563_v40  ;;  %v1261_v50 = vadd.f32 %v1181_v45, %v652_v44  ;;  %v6656_v52 = vpop.f32.mrf.mxu0  ;;  %v2660_v40 = vunpack.c.l.b16 %v2485_v28  ;;  %v2497_v43 = vshrl.u32 %v5649_v23, 16  ;;  %v934_v45 = vor.u32 %v933_v31, %v930_v14 }
  0xd3   : > { %603 = vst.msk [vmem:[#allocation2 + $0xf8] sm:$0xff] %vm217_vm8, %v571_v46  ;;  %v947_v46 = vshll.u32 %v636_v36, 16  ;;  %v1531_v10 = vrot.slane %v1357_v55, 5  ;;  %v945_v15 = vrot.slane %v944_v51, 4  ;;  %v2512_v17 = vrot.slane %v2510_v7, 4  ;;  %v655_v36 = vld [vmem:[#allocation2 + $0x18] sm:$0xff] }
  0xd4   : > { %1293 = vst.msk [vmem:[#allocation2] sm:$0xff] %vm217_vm8, %v1261_v50  ;;  %5465 = vmatmul.msk.bf16.gmra.mxu1 %vm398_vm1, %v1113_v35  ;;  %5498 = vmatmul.msk.bf16.gmra.mxu2 %vm398_vm1, %v1610_v41  ;;  %v1589_v35 = vunpack.c.l.b16 %v1525_v19  ;;  %v2661_v41 = vunpack.c.l.b16 %v2495_v32  ;;  %v2499_v62 = vrot.slane %v2497_v43, 4  ;;  %v952_v19 = vshrl.u32 %v637_v5, 16 }
  0xd5   : > { %5611 = vmatmul.msk.bf16.gmra.mxu3 %vm398_vm1, %v6051_v47  ;;  %5676 = vmatmul.msk.bf16.gmra.mxu0 %vm398_vm1, %v2682_v38  ;;  %v2500_v47 = vshll.u32 %v5649_v23, 16  ;;  %v949_v16 = vrot.slane %v947_v46, 5  ;;  %v955_v22 = vshll.u32 %v637_v5, 16  ;;  %v2518_v28 = vrot.slane %v2516_v8, 5 }
  0xd6   : > { %v1611_v38 = vpack.c.b16 %v1589_v35, %v1588_v26  ;;  %v2683_v61 = vpack.c.b16 %v2661_v41, %v2660_v40  ;;  %v2513_v26 = vor.u32 %v2512_v17, %v2508_v4  ;;  %v1529_v14 = vsel %vm6254_vm7, %v5483_v54, %v1528_v60  ;;  %v6053_v17 = vld [vmem:[%s6193_s29 + $0x84] sm:$0xff] }
  0xd7   : > { %v1678_v9 = vpop.f32.mrf.mxu2  ;;  %v2502_v63 = vrot.slane %v2500_v47, 5  ;;  %v957_v41 = vrot.slane %v955_v22, 5  ;;  %v1590_v47 = vunpack.c.l.b16 %v1529_v14 }
  0xd8   : > { %v6671_v13 = vpop.f32.mrf.mxu3  ;;  %v2514_v35 = vrot.slane %v2513_v26, 4 }
  0xd9   : > { %v1183_v21 = vpop.f32.mrf.mxu1  ;;  %v2503_v11 = vor.u32 %v2502_v63, %v2499_v62  ;;  %v6738_v62 = vld [vmem:[%s6193_s29 + $0x88] sm:$0xf] }
  0xda   : > { %v1262_v24 = vadd.f32 %v1183_v21, %v653_v20  ;;  %v6677_v27 = vpop.f32.mrf.mxu0  ;;  %v1530_v20 = vrot.slane %v1528_v60, 4  ;;  %v638_v21 = vld [vmem:[%s6193_s29 + $0x88] sm:$0xf]  ;;  %v2519_v43 = vsel %vm6246_vm6, %v2514_v35, %v2518_v28  ;;  %v641_v35 = vld [vmem:[%s6193_s29 + $0x94] sm:$0xf] }
  0xdb   : > { %v1373_v29 = vld [vmem:[#allocation2] sm:$0xff]  ;;  %v2504_v25 = vrot.slane %v2503_v11, 4  ;;  %v961_v32 = vshll.u32 %v638_v21, 16  ;;  %v1360_v11 = vld [vmem:[%s6193_s29 + $0x8c] sm:$0x1] }
  0xdc   : > { %v1758_v33 = vadd.f32 %v1678_v9, %v1373_v29  ;;  %1294 = vst.msk [vmem:[#allocation2 + $0x8] sm:$0xff] %vm217_vm8, %v1262_v24  ;;  %v935_v9 = vrot.slane %v934_v45, 4  ;;  %v1532_v40 = vsel %vm6254_vm7, %v1530_v20, %v1531_v10  ;;  %v1535_v20 = vrot.slane %v6738_v62, 5 }
  0xdd   : > { %v2509_v42 = vsel %vm6246_vm6, %v2504_v25, %v2508_v4  ;;  %v6729_v51 = vrot.slane %v961_v32, 5  ;;  %v5653_v4 = vld [vmem:[%s6193_s29 + $0x94] sm:$0xf] }
  0xde   : > { %1790 = vst.msk [vmem:[#allocation2] sm:$0xff] %vm217_vm8, %v1758_v33  ;;  %v940_v30 = vsel %vm6246_vm6, %v935_v9, %v6685_v37  ;;  %v965_v33 = vshrl.u32 %v638_v21, 16  ;;  %v954_v37 = vrot.slane %v952_v19, 4  ;;  %v2530_v26 = vshll.u32 %v5653_v4, 16 }
  0xdf   : > { %v1680_v44 = vpop.f32.mrf.mxu2  ;;  %v1093_v45 = vunpack.c.l.b16 %v940_v30  ;;  %v2534_v28 = vshrl.u32 %v5653_v4, 16 }
  0xe0   : > { %v6691_v50 = vpop.f32.mrf.mxu3  ;;  %v967_v53 = vrot.slane %v965_v33, 4  ;;  %v958_v56 = vor.u32 %v957_v41, %v954_v37 }
  0xe1   : > { %v1186_v58 = vpop.f32.mrf.mxu1 }
  0xe2   : > { %v1263_v2 = vadd.f32 %v1186_v58, %v654_v57  ;;  %v6698_v3 = vpop.f32.mrf.mxu0  ;;  %v2662_v57 = vunpack.c.l.b16 %v2509_v42  ;;  %v2663_v58 = vunpack.c.l.b16 %v2519_v43  ;;  %v968_v10 = vor.u32 %v967_v53, %v6729_v51 }
  0xe3   : > { %v1374_v0 = vld [vmem:[#allocation2 + $0x8] sm:$0xff]  ;;  %v989_v53 = vshrl.u32 %v641_v35, 16 }
  0xe4   : > { %v1759_v12 = vadd.f32 %v1680_v44, %v1374_v0  ;;  %1295 = vst.msk [vmem:[#allocation2 + $0x10] sm:$0xff] %vm217_vm8, %v1263_v2  ;;  %5466 = vmatmul.msk.bf16.gmra.mxu1 %vm398_vm1, %v1114_v49  ;;  %5499 = vmatmul.msk.bf16.gmra.mxu2 %vm398_vm1, %v1611_v38  ;;  %v1591_v49 = vunpack.c.l.b16 %v1532_v40  ;;  %v639_v38 = vld [vmem:[%s6193_s29 + $0x8c] sm:$0x1]  ;;  %v2684_v21 = vpack.c.b16 %v2663_v58, %v2662_v57  ;;  %v2536_v40 = vrot.slane %v2534_v28, 4  ;;  %v658_v28 = vld [vmem:[#allocation2 + $0x30] sm:$0xff] }
  0xe5   : > { %v1858_v18 = vld [vmem:[#allocation2] sm:$0xff]  ;;  %5612 = vmatmul.msk.bf16.gmra.mxu3 %vm398_vm1, %v6052_v59  ;;  %5677 = vmatmul.msk.bf16.gmra.mxu0 %vm398_vm1, %v2683_v61  ;;  %v5652_v59 = vld [vmem:[%s6193_s29 + $0x90] sm:$0xf]  ;;  %v971_v5 = vshll.u32 %v639_v38, 16  ;;  %v969_v41 = vrot.slane %v968_v10, 4  ;;  %v985_v38 = vshll.u32 %v641_v35, 16 }
  0xe6   : > { %v2112_v24 = vadd.f32 %v6671_v13, %v1858_v18  ;;  %1791 = vst.msk [vmem:[#allocation2 + $0x8] sm:$0xff] %vm217_vm8, %v1759_v12  ;;  %v950_v13 = vsel %vm6246_vm6, %v945_v15, %v949_v16  ;;  %v6735_v61 = vld [vmem:[%s6193_s29 + $0x84] sm:$0xe]  ;;  %v2521_v7 = vshrl.u32 %v5652_v59, 16  ;;  %v2524_v8 = vshll.u32 %v5652_v59, 16  ;;  %v657_v59 = vld [vmem:[#allocation2 + $0x28] sm:$0xff] }
  0xe7   : > { %v1683_v29 = vpop.f32.mrf.mxu2  ;;  %v1094_v46 = vunpack.c.l.b16 %v950_v13  ;;  %v1612_v9 = vpack.c.b16 %v1591_v49, %v1590_v47  ;;  %v5654_v12 = vld [vmem:[%s6193_s29 + $0x98] sm:$0x1]  ;;  %v656_v15 = vld [vmem:[#allocation2 + $0x20] sm:$0xff]  ;;  %v959_v18 = vrot.slane %v958_v56, 4  ;;  %v973_v30 = vrot.slane %v971_v5, 5 }
  0xe8   : > { %2144 = vst.msk [vmem:[#allocation2] sm:$0xff] %vm217_vm8, %v2112_v24  ;;  %v6715_v31 = vpop.f32.mrf.mxu3  ;;  %v2523_v19 = vrot.slane %v2521_v7, 4  ;;  %v640_v24 = vld [vmem:[%s6193_s29 + $0x90] sm:$0xf]  ;;  %v2526_v25 = vrot.slane %v2524_v8, 5  ;;  %v5484_v14 = vrot.slane %v6735_v61, 9 }
  0xe9   : > { %v1188_v39 = vpop.f32.mrf.mxu1  ;;  %v1538_v13 = vrot.slane %v1360_v11, 5  ;;  %v2540_v32 = vshll.u32 %v5654_v12, 16  ;;  %v976_v42 = vshrl.u32 %v640_v24, 16  ;;  %v979_v43 = vshll.u32 %v640_v24, 16 }
  0xea   : > { %v1264_v23 = vadd.f32 %v1188_v39, %v655_v36  ;;  %v6721_v34 = vpop.f32.mrf.mxu0  ;;  %v2527_v36 = vor.u32 %v2526_v25, %v2523_v19  ;;  %v2532_v39 = vrot.slane %v2530_v26, 5  ;;  %v1536_v57 = vsel %vm6254_vm7, %v5484_v14, %v1535_v20 }
  0xeb   : > { %v1375_v44 = vld [vmem:[#allocation2 + $0x10] sm:$0xff]  ;;  %v2542_v47 = vrot.slane %v2540_v32, 5  ;;  %v974_v61 = vsel %vm6246_vm6, %v969_v41, %v973_v30  ;;  %v1592_v12 = vunpack.c.l.b16 %v1536_v57  ;;  %v5656_v30 = vld [vmem:[%s6193_s29 + $0xa0] sm:$0xf] }
  0xec   : > { %v1760_v48 = vadd.f32 %v1683_v29, %v1375_v44  ;;  %1296 = vst.msk [vmem:[#allocation2 + $0x18] sm:$0xff] %vm217_vm8, %v1264_v23  ;;  %v1537_v23 = vrot.slane %v1535_v20, 4  ;;  %v1096_v11 = vunpack.c.l.b16 %v974_v61  ;;  %v6788_v20 = vld [vmem:[%s6193_s29 + $0x94] sm:$0xf] }
  0xed   : > { %v1859_v55 = vld [vmem:[#allocation2 + $0x8] sm:$0xff]  ;;  %v6054_v41 = vld [vmem:[%s6193_s29 + $0x90] sm:$0xff] }
  0xee   : > { %v2113_v60 = vadd.f32 %v6691_v50, %v1859_v55  ;;  %1792 = vst.msk [vmem:[#allocation2 + $0x10] sm:$0xff] %vm217_vm8, %v1760_v48  ;;  %v1115_v50 = vpack.c.b16 %v1094_v46, %v1093_v45  ;;  %v2528_v45 = vrot.slane %v2527_v36, 4  ;;  %v2537_v46 = vor.u32 %v2536_v40, %v2532_v39  ;;  %v5657_v40 = vld [vmem:[%s6193_s29 + $0xa4] sm:$0x1] }
  0xef   : > { %v2224_v63 = vld [vmem:[#allocation2] sm:$0xff]  ;;  %v1685_v2 = vpop.f32.mrf.mxu2  ;;  %v1539_v62 = vsel %vm6254_vm7, %v1537_v23, %v1538_v13  ;;  %v1542_v36 = vrot.slane %v6788_v20, 5 }
  0xf0   : > { %2145 = vst.msk [vmem:[#allocation2 + $0x8] sm:$0xff] %vm217_vm8, %v2113_v60  ;;  %v2830_v0 = vadd.f32 %v6656_v52, %v2224_v63  ;;  %v6743_v54 = vpop.f32.mrf.mxu3  ;;  %v2538_v58 = vrot.slane %v2537_v46, 4  ;;  %v978_v63 = vrot.slane %v976_v42, 4  ;;  %v2533_v4 = vsel %vm6246_vm6, %v2528_v45, %v2532_v39  ;;  %v643_v39 = vld [vmem:[%s6193_s29 + $0x9c] sm:$0xf] }
  0xf1   : > { %v1191_v16 = vpop.f32.mrf.mxu1  ;;  %v1363_v46 = vld [vmem:[%s6193_s29 + $0x98] sm:$0x1]  ;;  %v1003_v57 = vshll.u32 %v643_v39, 16 }
  0xf2   : > { %2862 = vst.msk [vmem:[#allocation2] sm:$0xff] %vm217_vm8, %v2830_v0  ;;  %v1265_v52 = vadd.f32 %v1191_v16, %v656_v15  ;;  %v6751_v22 = vpop.f32.mrf.mxu0  ;;  %v2543_v7 = vsel %vm6246_vm6, %v2538_v58, %v2542_v47  ;;  %v1593_v15 = vunpack.c.l.b16 %v1539_v62  ;;  %v2564_v58 = vshll.u32 %v5657_v40, 16 }
  0xf3   : > { %v1376_v29 = vld [vmem:[#allocation2 + $0x18] sm:$0xff]  ;;  %v2665_v19 = vunpack.c.l.b16 %v2543_v7 }
  0xf4   : > { %v1761_v33 = vadd.f32 %v1685_v2, %v1376_v29  ;;  %1297 = vst.msk [vmem:[#allocation2 + $0x20] sm:$0xff] %vm217_vm8, %v1265_v52  ;;  %5467 = vmatmul.msk.bf16.gmra.mxu1 %vm398_vm1, %v1115_v50  ;;  %5500 = vmatmul.msk.bf16.gmra.mxu2 %vm398_vm1, %v1612_v9  ;;  %v6784_v50 = vrot.slane %v985_v38, 5  ;;  %v991_v9 = vrot.slane %v989_v53, 4  ;;  %v5655_v52 = vld [vmem:[%s6193_s29 + $0x9c] sm:$0xf]  ;;  %v2558_v38 = vshrl.u32 %v5656_v30, 16 }
  0xf5   : > { %v1860_v37 = vld [vmem:[#allocation2 + $0x10] sm:$0xff]  ;;  %5613 = vmatmul.msk.bf16.gmra.mxu3 %vm398_vm1, %v6053_v17  ;;  %5678 = vmatmul.msk.bf16.gmra.mxu0 %vm398_vm1, %v2684_v21  ;;  %v2664_v21 = vunpack.c.l.b16 %v2533_v4  ;;  %v2545_v14 = vshrl.u32 %v5655_v52, 16  ;;  %v2548_v13 = vshll.u32 %v5655_v52, 16  ;;  %v1545_v4 = vrot.slane %v1363_v46, 5  ;;  %v659_v52 = vld [vmem:[#allocation2 + $0x38] sm:$0xff] }
  0xf6   : > { %v2114_v44 = vadd.f32 %v6715_v31, %v1860_v37  ;;  %1793 = vst.msk [vmem:[#allocation2 + $0x18] sm:$0xff] %vm217_vm8, %v1761_v33  ;;  %v964_v31 = vsel %vm6246_vm6, %v959_v18, %v6729_v51  ;;  %v642_v51 = vld [vmem:[%s6193_s29 + $0x98] sm:$0x1]  ;;  %v992_v29 = vor.u32 %v991_v9, %v6784_v50  ;;  %v2566_v9 = vrot.slane %v2564_v58, 5  ;;  %v6847_v46 = vld [vmem:[%s6193_s29 + $0x9c] sm:$0xe] }
  0xf7   : > { %v2225_v48 = vld [vmem:[#allocation2 + $0x8] sm:$0xff]  ;;  %v1688_v49 = vpop.f32.mrf.mxu2  ;;  %v1095_v0 = vunpack.c.l.b16 %v964_v31  ;;  %v995_v18 = vshll.u32 %v642_v51, 16  ;;  %v2547_v45 = vrot.slane %v2545_v14, 4  ;;  %v1000_v31 = vshrl.u32 %v643_v39, 16 }
  0xf8   : > { %2146 = vst.msk [vmem:[#allocation2 + $0x10] sm:$0xff] %vm217_vm8, %v2114_v44  ;;  %v2831_v55 = vadd.f32 %v6677_v27, %v2225_v48  ;;  %v6765_v56 = vpop.f32.mrf.mxu3  ;;  %v981_v27 = vrot.slane %v979_v43, 5  ;;  %v1361_v43 = vld [vmem:[%s6193_s29 + $0x90] sm:$0xe]  ;;  %v2685_v44 = vpack.c.b16 %v2665_v19, %v2664_v21  ;;  %v2550_v48 = vrot.slane %v2548_v13, 5 }
  0xf9   : > { %v1193_v60 = vpop.f32.mrf.mxu1  ;;  %v1116_v33 = vpack.c.b16 %v1096_v11, %v1095_v0  ;;  %v997_v42 = vrot.slane %v995_v18, 5  ;;  %v1544_v51 = vrot.slane %v1542_v36, 4  ;;  %v1002_v20 = vrot.slane %v1000_v31, 4  ;;  %v5659_v31 = vld [vmem:[%s6193_s29 + $0xac] sm:$0xf] }
  0xfa   : > { %2863 = vst.msk [vmem:[#allocation2 + $0x8] sm:$0xff] %vm217_vm8, %v2831_v55  ;;  %v1266_v2 = vadd.f32 %v1193_v60, %v657_v59  ;;  %v6777_v5 = vpop.f32.mrf.mxu0  ;;  %v982_v17 = vor.u32 %v981_v27, %v978_v63  ;;  %v993_v55 = vrot.slane %v992_v29, 4  ;;  %v644_v60 = vld [vmem:[%s6193_s29 + $0xa0] sm:$0xf]  ;;  %v2551_v61 = vor.u32 %v2550_v48, %v2547_v45  ;;  %v5658_v45 = vld [vmem:[%s6193_s29 + $0xa8] sm:$0xf] }
  0xfb   : > { %v1377_v8 = vld [vmem:[#allocation2 + $0x20] sm:$0xff]  ;;  %v2560_v63 = vrot.slane %v2558_v38, 4  ;;  %v1005_v21 = vrot.slane %v1003_v57, 5  ;;  %v2569_v57 = vshrl.u32 %v5658_v45, 16  ;;  %v2572_v58 = vshll.u32 %v5658_v45, 16 }
  0xfc   : > { %v1762_v10 = vadd.f32 %v1688_v49, %v1377_v8  ;;  %1298 = vst.msk [vmem:[#allocation2 + $0x28] sm:$0xff] %vm217_vm8, %v1266_v2  ;;  %v983_v23 = vrot.slane %v982_v17, 4  ;;  %v2554_v49 = vshll.u32 %v5656_v30, 16  ;;  %v5485_v2 = vrot.slane %v1361_v43, 9  ;;  %v660_v38 = vld [vmem:[#allocation2 + $0x40] sm:$0xff] }
  0xfd   : > { %v1861_v16 = vld [vmem:[#allocation2 + $0x18] sm:$0xff]  ;;  %v2552_v8 = vrot.slane %v2551_v61, 4  ;;  %v1013_v17 = vshrl.u32 %v644_v60, 16 }
  0xfe   : > { %v2115_v24 = vadd.f32 %v6743_v54, %v1861_v16  ;;  %1794 = vst.msk [vmem:[#allocation2 + $0x20] sm:$0xff] %vm217_vm8, %v1762_v10  ;;  %v1613_v54 = vpack.c.b16 %v1593_v15, %v1592_v12  ;;  %v2556_v62 = vrot.slane %v2554_v49, 5  ;;  %v988_v12 = vsel %vm6246_vm6, %v983_v23, %v6784_v50 }
  0xff   : > { %v2226_v25 = vld [vmem:[#allocation2 + $0x10] sm:$0xff]  ;;  %v1690_v26 = vpop.f32.mrf.mxu2  ;;  %v998_v15 = vsel %vm6246_vm6, %v993_v55, %v997_v42  ;;  %v1009_v16 = vshll.u32 %v644_v60, 16  ;;  %v1543_v50 = vsel %vm6254_vm7, %v5485_v2, %v1542_v36  ;;  %v1097_v13 = vunpack.c.l.b16 %v988_v12 }
 0x100   : > { %2147 = vst.msk [vmem:[#allocation2 + $0x18] sm:$0xff] %vm217_vm8, %v2115_v24  ;;  %v2832_v32 = vadd.f32 %v6698_v3, %v2226_v25  ;;  %v6797_v35 = vpop.f32.mrf.mxu3  ;;  %v2561_v0 = vor.u32 %v2560_v63, %v2556_v62  ;;  %v1546_v25 = vsel %vm6254_vm7, %v1544_v51, %v1545_v4  ;;  %v2557_v29 = vsel %vm6246_vm6, %v2552_v8, %v2556_v62  ;;  %v646_v63 = vld [vmem:[%s6193_s29 + $0xa8] sm:$0xf]  ;;  %v6055_v51 = vld [vmem:[%s6193_s29 + $0x9c] sm:$0xff] }
 0x101   : > { %v1196_v37 = vpop.f32.mrf.mxu1  ;;  %v1594_v39 = vunpack.c.l.b16 %v1543_v50  ;;  %v1595_v40 = vunpack.c.l.b16 %v1546_v25  ;;  %v2666_v43 = vunpack.c.l.b16 %v2557_v29  ;;  %v5486_v8 = vrot.slane %v6847_v46, 9 }
 0x102   : > { %2864 = vst.msk [vmem:[#allocation2 + $0x10] sm:$0xff] %vm217_vm8, %v2832_v32  ;;  %v1267_v3 = vadd.f32 %v1196_v37, %v658_v28  ;;  %v6806_v47 = vpop.f32.mrf.mxu0  ;;  %v2562_v19 = vrot.slane %v2561_v0, 4  ;;  %v1098_v32 = vunpack.c.l.b16 %v998_v15  ;;  %v1006_v37 = vor.u32 %v1005_v21, %v1002_v20 }
 0x103   : > { %v1378_v53 = vld [vmem:[#allocation2 + $0x28] sm:$0xff]  ;;  %v1614_v60 = vpack.c.b16 %v1595_v40, %v1594_v39  ;;  %v2574_v12 = vrot.slane %v2572_v58, 5  ;;  %v2578_v15 = vshll.u32 %v5659_v31, 16  ;;  %v1024_v20 = vshrl.u32 %v646_v63, 16 }
 0x104   : > { %v1763_v59 = vadd.f32 %v1690_v26, %v1378_v53  ;;  %1299 = vst.msk [vmem:[#allocation2 + $0x30] sm:$0xff] %vm217_vm8, %v1267_v3  ;;  %5468 = vmatmul.msk.bf16.gmra.mxu1 %vm398_vm1, %v1116_v33  ;;  %5501 = vmatmul.msk.bf16.gmra.mxu2 %vm398_vm1, %v1613_v54  ;;  %v2567_v30 = vsel %vm6246_vm6, %v2562_v19, %v2566_v9  ;;  %v6837_v33 = vrot.slane %v1009_v16, 5  ;;  %v1015_v54 = vrot.slane %v1013_v17, 4 }
 0x105   : > { %v1862_v27 = vld [vmem:[#allocation2 + $0x20] sm:$0xff]  ;;  %5614 = vmatmul.msk.bf16.gmra.mxu3 %vm398_vm1, %v6054_v41  ;;  %5679 = vmatmul.msk.bf16.gmra.mxu0 %vm398_vm1, %v2685_v44  ;;  %v2667_v44 = vunpack.c.l.b16 %v2567_v30  ;;  %v6856_v62 = vrot.slane %v1006_v37, 4  ;;  %v2571_v9 = vrot.slane %v2569_v57, 4  ;;  %v2582_v16 = vshrl.u32 %v5659_v31, 16  ;;  %v648_v31 = vld [vmem:[%s6193_s29 + $0xb0] sm:$0x1] }
 0x106   : > { %v2116_v7 = vadd.f32 %v6765_v56, %v1862_v27  ;;  %1795 = vst.msk [vmem:[#allocation2 + $0x28] sm:$0xff] %vm217_vm8, %v1763_v59  ;;  %v6841_v41 = vld [vmem:[%s6193_s29 + $0xa0] sm:$0xf]  ;;  %v1016_v53 = vor.u32 %v1015_v54, %v6837_v33  ;;  %v1117_v59 = vpack.c.b16 %v1098_v32, %v1097_v13  ;;  %v5660_v27 = vld [vmem:[%s6193_s29 + $0xb0] sm:$0x1]  ;;  %v1027_v21 = vshll.u32 %v646_v63, 16 }
 0x107   : > { %v2227_v10 = vld [vmem:[#allocation2 + $0x18] sm:$0xff]  ;;  %v1693_v11 = vpop.f32.mrf.mxu2  ;;  %v1549_v55 = vrot.slane %v6841_v41, 5  ;;  %v2686_v0 = vpack.c.b16 %v2667_v44, %v2666_v43  ;;  %v2588_v19 = vshll.u32 %v5660_v27, 16  ;;  %v2580_v50 = vrot.slane %v2578_v15, 5  ;;  %v6904_v27 = vld [vmem:[%s6193_s29 + $0xac] sm:$0xf] }
 0x108   : > { %2148 = vst.msk [vmem:[#allocation2 + $0x20] sm:$0xff] %vm217_vm8, %v2116_v7  ;;  %v2833_v56 = vadd.f32 %v6721_v34, %v2227_v10  ;;  %v6823_v18 = vpop.f32.mrf.mxu3  ;;  %v645_v34 = vld [vmem:[%s6193_s29 + $0xa4] sm:$0x1]  ;;  %v2584_v25 = vrot.slane %v2582_v16, 4  ;;  %v1012_v37 = vsel %vm6246_vm6, %v6856_v62, %v6837_v33  ;;  %v1026_v43 = vrot.slane %v1024_v20, 4 }
 0x109   : > { %v1198_v24 = vpop.f32.mrf.mxu1  ;;  %v1019_v42 = vshll.u32 %v645_v34, 16  ;;  %v1366_v7 = vld [vmem:[%s6193_s29 + $0xa4] sm:$0x1]  ;;  %v1551_v34 = vrot.slane %v1549_v55, 4  ;;  %v1029_v44 = vrot.slane %v1027_v21, 5  ;;  %v1550_v33 = vsel %vm6254_vm7, %v5486_v8, %v1549_v55 }
 0x10a   : > { %2865 = vst.msk [vmem:[#allocation2 + $0x18] sm:$0xff] %vm217_vm8, %v2833_v56  ;;  %v1268_v26 = vadd.f32 %v1198_v24, %v659_v52  ;;  %v6830_v28 = vpop.f32.mrf.mxu0  ;;  %v1017_v56 = vrot.slane %v1016_v53, 4  ;;  %v2575_v24 = vor.u32 %v2574_v12, %v2571_v9  ;;  %v1552_v29 = vrot.slane %v1366_v7, 5  ;;  %v5662_v16 = vld [vmem:[%s6193_s29 + $0xb8] sm:$0xf] }
 0x10b   : > { %v1379_v14 = vld [vmem:[#allocation2 + $0x30] sm:$0xff]  ;;  %v1021_v4 = vrot.slane %v1019_v42, 5  ;;  %v2585_v54 = vor.u32 %v2584_v25, %v2580_v50  ;;  %v1099_v58 = vunpack.c.l.b16 %v1012_v37  ;;  %v1030_v63 = vor.u32 %v1029_v44, %v1026_v43 }
 0x10c   : > { %v1764_v36 = vadd.f32 %v1693_v11, %v1379_v14  ;;  %1300 = vst.msk [vmem:[#allocation2 + $0x38] sm:$0xff] %vm217_vm8, %v1268_v26  ;;  %v647_v11 = vld [vmem:[%s6193_s29 + $0xac] sm:$0xf]  ;;  %v2576_v32 = vrot.slane %v2575_v24, 4  ;;  %v1556_v15 = vrot.slane %v6904_v27, 5  ;;  %v662_v25 = vld [vmem:[#allocation2 + $0x50] sm:$0xff] }
 0x10d   : > { %v1863_v23 = vld [vmem:[#allocation2 + $0x28] sm:$0xff]  ;;  %v1033_v30 = vshll.u32 %v647_v11, 16  ;;  %v1037_v14 = vshrl.u32 %v647_v11, 16  ;;  %v2586_v45 = vrot.slane %v2585_v54, 4  ;;  %v1369_v24 = vld [vmem:[%s6193_s29 + $0xb0] sm:$0x1] }
 0x10e   : > { %v2117_v3 = vadd.f32 %v6797_v35, %v1863_v23  ;;  %1796 = vst.msk [vmem:[#allocation2 + $0x30] sm:$0xff] %vm217_vm8, %v1764_v36  ;;  %v2590_v36 = vrot.slane %v2588_v19, 5  ;;  %v1022_v23 = vsel %vm6246_vm6, %v1017_v56, %v1021_v4  ;;  %v2581_v57 = vsel %vm6246_vm6, %v2576_v32, %v2580_v50  ;;  %v5663_v50 = vld [vmem:[%s6193_s29 + $0xbc] sm:$0x1]  ;;  %v649_v54 = vld [vmem:[%s6193_s29 + $0xb4] sm:$0xf] }
 0x10f   : > { %v2228_v48 = vld [vmem:[#allocation2 + $0x20] sm:$0xff]  ;;  %v1695_v49 = vpop.f32.mrf.mxu2  ;;  %v1043_v4 = vshll.u32 %v648_v31, 16  ;;  %v2668_v7 = vunpack.c.l.b16 %v2581_v57  ;;  %v1559_v43 = vrot.slane %v1369_v24, 5  ;;  %v2612_v44 = vshll.u32 %v5663_v50, 16  ;;  %v6961_v50 = vld [vmem:[%s6193_s29 + $0xb8] sm:$0xf] }
 0x110   : > { %2149 = vst.msk [vmem:[#allocation2 + $0x28] sm:$0xff] %vm217_vm8, %v2117_v3  ;;  %v2834_v35 = vadd.f32 %v6751_v22, %v2228_v48  ;;  %v6854_v61 = vpop.f32.mrf.mxu3  ;;  %v661_v3 = vld [vmem:[#allocation2 + $0x48] sm:$0xff]  ;;  %v1553_v48 = vsel %vm6254_vm7, %v1551_v34, %v1552_v29  ;;  %v2591_v41 = vsel %vm6246_vm6, %v2586_v45, %v2590_v36  ;;  %v1048_v57 = vshrl.u32 %v649_v54, 16 }
 0x111   : > { %v1201_v2 = vpop.f32.mrf.mxu1  ;;  %v1597_v62 = vunpack.c.l.b16 %v1553_v48  ;;  %v2669_v8 = vunpack.c.l.b16 %v2591_v41  ;;  %v6056_v34 = vld [vmem:[%s6193_s29 + $0xa8] sm:$0xff]  ;;  %v1051_v41 = vshll.u32 %v649_v54, 16 }
 0x112   : > { %2866 = vst.msk [vmem:[#allocation2 + $0x20] sm:$0xff] %vm217_vm8, %v2834_v35  ;;  %v1269_v22 = vadd.f32 %v1201_v2, %v660_v38  ;;  %v6864_v10 = vpop.f32.mrf.mxu0  ;;  %v1039_v38 = vrot.slane %v1037_v14, 4  ;;  %v1100_v35 = vunpack.c.l.b16 %v1022_v23 }
 0x113   : > { %v1380_v17 = vld [vmem:[#allocation2 + $0x38] sm:$0xff]  ;;  %v2687_v14 = vpack.c.b16 %v2669_v8, %v2668_v7 }
 0x114   : > { %v1765_v52 = vadd.f32 %v1695_v49, %v1380_v17  ;;  %1301 = vst.msk [vmem:[#allocation2 + $0x40] sm:$0xff] %vm217_vm8, %v1269_v22  ;;  %5469 = vmatmul.msk.bf16.gmra.mxu1 %vm398_vm1, %v1117_v59  ;;  %5502 = vmatmul.msk.bf16.gmra.mxu2 %vm398_vm1, %v1614_v60  ;;  %v6892_v49 = vrot.slane %v1033_v30, 5  ;;  %v1596_v60 = vunpack.c.l.b16 %v1550_v33  ;;  %v1367_v22 = vld [vmem:[%s6193_s29 + $0xa8] sm:$0xe]  ;;  %v1118_v21 = vpack.c.b16 %v1100_v35, %v1099_v58 }
 0x115   : > { %v1864_v26 = vld [vmem:[#allocation2 + $0x30] sm:$0xff]  ;;  %5615 = vmatmul.msk.bf16.gmra.mxu3 %vm398_vm1, %v6055_v51  ;;  %5680 = vmatmul.msk.bf16.gmra.mxu0 %vm398_vm1, %v2686_v0  ;;  %v1045_v30 = vrot.slane %v1043_v4, 5  ;;  %v5487_v23 = vrot.slane %v1367_v22, 9  ;;  %v1050_v22 = vrot.slane %v1048_v57, 4 }
 0x116   : > { %v2118_v13 = vadd.f32 %v6823_v18, %v1864_v26  ;;  %1797 = vst.msk [vmem:[#allocation2 + $0x38] sm:$0xff] %vm217_vm8, %v1765_v52  ;;  %v1040_v51 = vor.u32 %v1039_v38, %v6892_v49  ;;  %v5661_v0 = vld [vmem:[%s6193_s29 + $0xb4] sm:$0xf]  ;;  %v1615_v19 = vpack.c.b16 %v1597_v62, %v1596_v60  ;;  %v1031_v52 = vrot.slane %v1030_v63, 4 }
 0x117   : > { %v2229_v39 = vld [vmem:[#allocation2 + $0x28] sm:$0xff]  ;;  %v1698_v40 = vpop.f32.mrf.mxu2  ;;  %v2593_v17 = vshrl.u32 %v5661_v0, 16  ;;  %v2596_v56 = vshll.u32 %v5661_v0, 16 }
 0x118   : > { %2150 = vst.msk [vmem:[#allocation2 + $0x30] sm:$0xff] %vm217_vm8, %v2118_v13  ;;  %v2835_v18 = vadd.f32 %v6777_v5, %v2229_v39  ;;  %v6884_v42 = vpop.f32.mrf.mxu3  ;;  %v1041_v29 = vrot.slane %v1040_v51, 4  ;;  %v2602_v39 = vshll.u32 %v5662_v16, 16 }
 0x119   : > { %v1203_v46 = vpop.f32.mrf.mxu1  ;;  %v2595_v13 = vrot.slane %v2593_v17, 4  ;;  %v2598_v36 = vrot.slane %v2596_v56, 5 }
 0x11a   : > { %2867 = vst.msk [vmem:[#allocation2 + $0x28] sm:$0xff] %vm217_vm8, %v2835_v18  ;;  %v1270_v5 = vadd.f32 %v1203_v46, %v661_v3  ;;  %v6895_v53 = vpop.f32.mrf.mxu0  ;;  %v1558_v18 = vrot.slane %v1556_v15, 4  ;;  %v650_v3 = vld [vmem:[%s6193_s29 + $0xb8] sm:$0xf]  ;;  %v2604_v33 = vrot.slane %v2602_v39, 5  ;;  %v1046_v31 = vsel %vm6246_vm6, %v1041_v29, %v1045_v30 }
 0x11b   : > { %v1381_v55 = vld [vmem:[#allocation2 + $0x40] sm:$0xff]  ;;  %v2599_v46 = vor.u32 %v2598_v36, %v2595_v13  ;;  %v1057_v63 = vshll.u32 %v650_v3, 16  ;;  %v1061_v51 = vshrl.u32 %v650_v3, 16  ;;  %v6945_v0 = vunpack.c.l.b16 %v1046_v31  ;;  %v6057_v31 = vld [vmem:[%s6193_s29 + $0xb4] sm:$0xff] }
 0x11c   : > { %v1766_v59 = vadd.f32 %v1698_v40, %v1381_v55  ;;  %1302 = vst.msk [vmem:[#allocation2 + $0x48] sm:$0xff] %vm217_vm8, %v1270_v5  ;;  %v2606_v40 = vshrl.u32 %v5662_v16, 16  ;;  %v1036_v5 = vsel %vm6246_vm6, %v1031_v52, %v6892_v49  ;;  %v651_v52 = vld [vmem:[%s6193_s29 + $0xbc] sm:$0x1]  ;;  %v5664_v30 = vld [vmem:[%s6193_s29 + $0xc0] sm:$0xf] }
 0x11d   : > { %v1865_v2 = vld [vmem:[#allocation2 + $0x38] sm:$0xff]  ;;  %v2600_v58 = vrot.slane %v2599_v46, 4  ;;  %v6943_v8 = vunpack.c.l.b16 %v1036_v5  ;;  %v6956_v56 = vrot.slane %v1057_v63, 5  ;;  %v1063_v24 = vrot.slane %v1061_v51, 4  ;;  %v1370_v46 = vld [vmem:[%s6193_s29 + $0xb4] sm:$0xe] }
 0x11e   : > { %v2119_v9 = vadd.f32 %v6854_v61, %v1865_v2  ;;  %1798 = vst.msk [vmem:[#allocation2 + $0x40] sm:$0xff] %vm217_vm8, %v1766_v59  ;;  %v2608_v48 = vrot.slane %v2606_v40, 4  ;;  %v2614_v59 = vrot.slane %v2612_v44, 5  ;;  %v1557_v2 = vsel %vm6254_vm7, %v5487_v23, %v1556_v15 }
 0x11f   : > { %v2230_v11 = vld [vmem:[#allocation2 + $0x30] sm:$0xff]  ;;  %v1700_v12 = vpop.f32.mrf.mxu2  ;;  %v2605_v15 = vsel %vm6246_vm6, %v2600_v58, %v2604_v33  ;;  %v2617_v54 = vshrl.u32 %v5664_v30, 16  ;;  %v2620_v36 = vshll.u32 %v5664_v30, 16  ;;  %v1563_v23 = vrot.slane %v6961_v50, 5 }
 0x120   : > { %2151 = vst.msk [vmem:[#allocation2 + $0x38] sm:$0xff] %vm217_vm8, %v2119_v9  ;;  %v2836_v20 = vadd.f32 %v6806_v47, %v2230_v11  ;;  %v6915_v61 = vpop.f32.mrf.mxu3  ;;  %v2609_v35 = vor.u32 %v2608_v48, %v2604_v33  ;;  %v1560_v9 = vsel %vm6254_vm7, %v1558_v18, %v1559_v43  ;;  %v1064_v3 = vor.u32 %v1063_v24, %v6956_v56  ;;  %v5666_v33 = vld [vmem:[%s6193_s29 + $0xc8] sm:$0x1] }
 0x121   : > { %v1206_v26 = vpop.f32.mrf.mxu1  ;;  %v2619_v48 = vrot.slane %v2617_v54, 4 }
 0x122   : > { %2868 = vst.msk [vmem:[#allocation2 + $0x30] sm:$0xff] %vm217_vm8, %v2836_v20  ;;  %v1271_v32 = vadd.f32 %v1206_v26, %v662_v25  ;;  %v6921_v47 = vpop.f32.mrf.mxu0  ;;  %v2610_v4 = vrot.slane %v2609_v35, 4  ;;  %v1119_v26 = vpack.c.b16 %v6945_v0, %v6943_v8  ;;  %v1565_v0 = vrot.slane %v1563_v23, 4 }
 0x123   : > { %v1382_v37 = vld [vmem:[#allocation2 + $0x48] sm:$0xff] }
 0x124   : > { %v1767_v45 = vadd.f32 %v1700_v12, %v1382_v37  ;;  %1303 = vst.msk [vmem:[#allocation2 + $0x50] sm:$0xff] %vm217_vm8, %v1271_v32  ;;  %5470 = vmatmul.msk.bf16.gmra.mxu1 %vm398_vm1, %v1118_v21  ;;  %5503 = vmatmul.msk.bf16.gmra.mxu2 %vm398_vm1, %v1615_v19  ;;  %v1053_v12 = vrot.slane %v1051_v41, 5  ;;  %v2615_v16 = vsel %vm6246_vm6, %v2610_v4, %v2614_v59  ;;  %v1598_v21 = vunpack.c.l.b16 %v1557_v2  ;;  %v5665_v32 = vld [vmem:[%s6193_s29 + $0xc4] sm:$0xf] }
 0x125   : > { %v1866_v38 = vld [vmem:[#allocation2 + $0x40] sm:$0xff]  ;;  %5616 = vmatmul.msk.bf16.gmra.mxu3 %vm398_vm1, %v6056_v34  ;;  %5681 = vmatmul.msk.bf16.gmra.mxu0 %vm398_vm1, %v2687_v14  ;;  %v1599_v19 = vunpack.c.l.b16 %v1560_v9  ;;  %v2670_v34 = vunpack.c.l.b16 %v2605_v15  ;;  %v2671_v29 = vunpack.c.l.b16 %v2615_v16  ;;  %v1067_v37 = vshll.u32 %v651_v52, 16 }
 0x126   : > { %v2120_v55 = vadd.f32 %v6884_v42, %v1866_v38  ;;  %1799 = vst.msk [vmem:[#allocation2 + $0x48] sm:$0xff] %vm217_vm8, %v1767_v45  ;;  %v663_v42 = vld [vmem:[#allocation2 + $0x58] sm:$0xff]  ;;  %v1054_v13 = vor.u32 %v1053_v12, %v1050_v22  ;;  %v2626_v18 = vshll.u32 %v5665_v32, 16  ;;  %v2630_v43 = vshrl.u32 %v5665_v32, 16  ;;  %v664_v38 = vld [vmem:[#allocation2 + $0x60] sm:$0xff] }
 0x127   : > { %v2231_v60 = vld [vmem:[#allocation2 + $0x38] sm:$0xff]  ;;  %v1703_v62 = vpop.f32.mrf.mxu2  ;;  %v1616_v44 = vpack.c.b16 %v1599_v19, %v1598_v21  ;;  %v2688_v57 = vpack.c.b16 %v2671_v29, %v2670_v34  ;;  %v2622_v41 = vrot.slane %v2620_v36, 5  ;;  %v665_v34 = vld [vmem:[#allocation2 + $0x68] sm:$0xff] }
 0x128   : > { %2152 = vst.msk [vmem:[#allocation2 + $0x40] sm:$0xff] %vm217_vm8, %v2120_v55  ;;  %v2837_v49 = vadd.f32 %v6830_v28, %v2231_v60  ;;  %v6939_v27 = vpop.f32.mrf.mxu3  ;;  %v2628_v55 = vrot.slane %v2626_v18, 5  ;;  %v2632_v58 = vrot.slane %v2630_v43, 4  ;;  %v2636_v60 = vshll.u32 %v5666_v33, 16  ;;  %v5878_v22 = vld [vmem:[%s6193_s29 + $0x18] sm:$0xf] }
 0x129   : > { %v1208_v7 = vpop.f32.mrf.mxu1  ;;  %v1055_v63 = vrot.slane %v1054_v13, 4  ;;  %v2623_v2 = vor.u32 %v2622_v41, %v2619_v48 }
 0x12a   : > { %2869 = vst.msk [vmem:[#allocation2 + $0x38] sm:$0xff] %vm217_vm8, %v2837_v49  ;;  %v1272_v28 = vadd.f32 %v1208_v7, %v663_v42  ;;  %v6950_v11 = vpop.f32.mrf.mxu0  ;;  %v5488_v49 = vrot.slane %v1370_v46, 9  ;;  %v2633_v51 = vor.u32 %v2632_v58, %v2628_v55  ;;  %v1065_v42 = vrot.slane %v1064_v3, 4  ;;  %v5684_v58 = vld [vmem:[%s6193_s29 + $0xc] sm:$0xe] }
 0x12b   : > { %v1383_v17 = vld [vmem:[#allocation2 + $0x50] sm:$0xff]  ;;  %v1069_v7 = vrot.slane %v1067_v37, 5  ;;  %v2624_v12 = vrot.slane %v2623_v2, 4  ;;  %v2638_v16 = vrot.slane %v2636_v60, 5  ;;  %v1060_v19 = vsel %vm6246_vm6, %v1055_v63, %v6956_v56 }
 0x12c   : > { %v1768_v20 = vadd.f32 %v1703_v62, %v1383_v17  ;;  %1304 = vst.msk [vmem:[#allocation2 + $0x58] sm:$0xff] %vm217_vm8, %v1272_v28  ;;  %v2634_v15 = vrot.slane %v2633_v51, 4  ;;  %v5879_v17 = vld [vmem:[%s6193_s29 + $0x1c] sm:$0xf]  ;;  %v1564_v52 = vsel %vm6254_vm7, %v5488_v49, %v1563_v23  ;;  %v7012_v23 = vld [vmem:[%s6193_s29 + $0x10] sm:$0xf] }
 0x12d   : > { %v1867_v25 = vld [vmem:[#allocation2 + $0x48] sm:$0xff]  ;;  %v1070_v50 = vsel %vm6246_vm6, %v1065_v42, %v1069_v7  ;;  %v3832_v30 = vshll.u32 %v5879_v17, 16  ;;  %v1600_v37 = vunpack.c.l.b16 %v1564_v52  ;;  %v5686_v63 = vld [vmem:[%s6193_s29 + $0x14] sm:$0x1] }
 0x12e   : > { %v2121_v14 = vadd.f32 %v6915_v61, %v1867_v25  ;;  %1800 = vst.msk [vmem:[#allocation2 + $0x50] sm:$0xff] %vm217_vm8, %v1768_v20  ;;  %v3823_v25 = vshrl.u32 %v5878_v22, 16  ;;  %v2639_v54 = vsel %vm6246_vm6, %v2634_v15, %v2638_v16  ;;  %v666_v2 = vld [vmem:[#allocation2 + $0x70] sm:$0xff]  ;;  %v3027_v15 = vrot.slane %v5686_v63, 5  ;;  %v5943_v16 = vld [vmem:[%s6193_s29 + $0x18] sm:$0xe] }
 0x12f   : > { %v2232_v39 = vld [vmem:[#allocation2 + $0x40] sm:$0xff]  ;;  %v1705_v40 = vpop.f32.mrf.mxu2  ;;  %v2673_v33 = vunpack.c.l.b16 %v2639_v54  ;;  %v7015_v48 = vrot.slane %v3832_v30, 5 }
 0x130   : > { %2153 = vst.msk [vmem:[#allocation2 + $0x48] sm:$0xff] %vm217_vm8, %v2121_v14  ;;  %v2838_v61 = vadd.f32 %v6864_v10, %v2232_v39  ;;  %v6972_v45 = vpop.f32.mrf.mxu3  ;;  %v1372_v10 = vld [vmem:[%s6193_s29 + $0xbc] sm:$0x1]  ;;  %v3836_v14 = vshrl.u32 %v5879_v17, 16  ;;  %v1103_v39 = vunpack.c.l.b16 %v1060_v19  ;;  %v5945_v17 = vld [vmem:[%s6193_s29 + $0x20] sm:$0x1] }
 0x131   : > { %v1211_v5 = vpop.f32.mrf.mxu1  ;;  %v1566_v9 = vrot.slane %v1372_v10, 5 }
 0x132   : > { %2870 = vst.msk [vmem:[#allocation2 + $0x40] sm:$0xff] %vm217_vm8, %v2838_v61  ;;  %v1273_v35 = vadd.f32 %v1211_v5, %v664_v38  ;;  %v6980_v59 = vpop.f32.mrf.mxu0  ;;  %v3825_v61 = vrot.slane %v3823_v25, 4  ;;  %v3838_v38 = vrot.slane %v3836_v14, 4 }
 0x133   : > { %v1384_v62 = vld [vmem:[#allocation2 + $0x58] sm:$0xff]  ;;  %v1567_v56 = vsel %vm6254_vm7, %v1565_v0, %v1566_v9 }
 0x134   : > { %v1769_v4 = vadd.f32 %v1705_v40, %v1384_v62  ;;  %1305 = vst.msk [vmem:[#allocation2 + $0x60] sm:$0xff] %vm217_vm8, %v1273_v35  ;;  %5471 = vmatmul.msk.bf16.gmra.mxu1 %vm398_vm1, %v1119_v26  ;;  %5504 = vmatmul.msk.bf16.gmra.mxu2 %vm398_vm1, %v1616_v44  ;;  %v3826_v26 = vshll.u32 %v5878_v22, 16  ;;  %v1104_v40 = vunpack.c.l.b16 %v1070_v50  ;;  %v1601_v43 = vunpack.c.l.b16 %v1567_v56  ;;  %v5881_v50 = vld [vmem:[%s6193_s29 + $0x24] sm:$0xf] }
 0x135   : > { %v1868_v8 = vld [vmem:[#allocation2 + $0x50] sm:$0xff]  ;;  %5617 = vmatmul.msk.bf16.gmra.mxu3 %vm398_vm1, %v6057_v31  ;;  %5682 = vmatmul.msk.bf16.gmra.mxu0 %vm398_vm1, %v2688_v57  ;;  %v3024_v31 = vrot.slane %v7012_v23, 5  ;;  %v5880_v57 = vld [vmem:[%s6193_s29 + $0x20] sm:$0x1]  ;;  %v3839_v7 = vor.u32 %v3838_v38, %v7015_v48  ;;  %v4593_v56 = vrot.slane %v5945_v17, 5 }
 0x136   : > { %v2122_v28 = vadd.f32 %v6939_v27, %v1868_v8  ;;  %1801 = vst.msk [vmem:[#allocation2 + $0x58] sm:$0xff] %vm217_vm8, %v1769_v4  ;;  %v3828_v44 = vrot.slane %v3826_v26, 5  ;;  %v1120_v10 = vpack.c.b16 %v1104_v40, %v1103_v39  ;;  %v1617_v60 = vpack.c.b16 %v1601_v43, %v1600_v37  ;;  %v6058_v4 = vld [vmem:[%s6193_s29 + $0xc0] sm:$0xff]  ;;  %v5882_v26 = vld [vmem:[%s6193_s29 + $0x28] sm:$0xf]  ;;  %v667_v37 = vld [vmem:[#allocation2 + $0x78] sm:$0xff] }
 0x137   : > { %v2233_v20 = vld [vmem:[#allocation2 + $0x48] sm:$0xff]  ;;  %v1708_v21 = vpop.f32.mrf.mxu2  ;;  %v3842_v8 = vshll.u32 %v5880_v57, 16  ;;  %v3026_v9 = vrot.slane %v3024_v31, 4  ;;  %v3840_v52 = vrot.slane %v3839_v7, 4  ;;  %v3847_v39 = vshrl.u32 %v5881_v50, 16 }
 0x138   : > { %2154 = vst.msk [vmem:[#allocation2 + $0x50] sm:$0xff] %vm217_vm8, %v2122_v28  ;;  %v2839_v24 = vadd.f32 %v6895_v53, %v2233_v20  ;;  %v6998_v27 = vpop.f32.mrf.mxu3  ;;  %v2629_v53 = vsel %vm6246_vm6, %v2624_v12, %v2628_v55  ;;  %v3829_v49 = vor.u32 %v3828_v44, %v3825_v61  ;;  %v3850_v40 = vshll.u32 %v5881_v50, 16  ;;  %v5687_v7 = vld [vmem:[%s6193_s29 + $0x18] sm:$0xe] }
 0x139   : > { %v1213_v29 = vpop.f32.mrf.mxu1  ;;  %v2672_v46 = vunpack.c.l.b16 %v2629_v53  ;;  %v3028_v53 = vsel %vm6254_vm7, %v3026_v9, %v3027_v15  ;;  %v3856_v43 = vshll.u32 %v5882_v26, 16  ;;  %v3860_v61 = vshrl.u32 %v5882_v26, 16 }
 0x13a   : > { %2871 = vst.msk [vmem:[#allocation2 + $0x48] sm:$0xff] %vm217_vm8, %v2839_v24  ;;  %v1274_v13 = vadd.f32 %v1213_v29, %v665_v34  ;;  %v7005_v32 = vpop.f32.mrf.mxu0  ;;  %v3844_v24 = vrot.slane %v3842_v8, 5  ;;  %v5991_v34 = vrot.slane %v5943_v16, 9  ;;  %v3137_v38 = vunpack.c.l.b16 %v3028_v53 }
 0x13b   : > { %v1385_v36 = vld [vmem:[#allocation2 + $0x60] sm:$0xff]  ;;  %v2689_v42 = vpack.c.b16 %v2673_v33, %v2672_v46 }
 0x13c   : > { %v1770_v18 = vadd.f32 %v1708_v21, %v1385_v36  ;;  %1306 = vst.msk [vmem:[#allocation2 + $0x68] sm:$0xff] %vm217_vm8, %v1274_v13  ;;  %v3830_v21 = vrot.slane %v3829_v49, 4 }
 0x13d   : > { %v1869_v3 = vld [vmem:[#allocation2 + $0x58] sm:$0xff] }
 0x13e   : > { %v2123_v5 = vadd.f32 %v6972_v45, %v1869_v3  ;;  %1802 = vst.msk [vmem:[#allocation2 + $0x60] sm:$0xff] %vm217_vm8, %v1770_v18  ;;  %v5944_v45 = vld [vmem:[%s6193_s29 + $0x1c] sm:$0xf]  ;;  %v3845_v18 = vsel %vm6246_vm6, %v3840_v52, %v3844_v24 }
 0x13f   : > { %v2234_v41 = vld [vmem:[#allocation2 + $0x50] sm:$0xff]  ;;  %v1710_v55 = vpop.f32.mrf.mxu2  ;;  %v4590_v28 = vrot.slane %v5944_v45, 5 }
 0x140   : > { %2155 = vst.msk [vmem:[#allocation2 + $0x58] sm:$0xff] %vm217_vm8, %v2123_v5  ;;  %v2840_v35 = vadd.f32 %v6921_v47, %v2234_v41  ;;  %v7024_v62 = vpop.f32.mrf.mxu3  ;;  %v5732_v47 = vrot.slane %v5684_v58, 9  ;;  %v4209_v41 = vunpack.c.l.b16 %v3845_v18  ;;  %v3852_v58 = vrot.slane %v3850_v40, 5  ;;  %v5885_v40 = vld [vmem:[%s6193_s29 + $0x34] sm:$0xf] }
 0x141   : > { %v1216_v51 = vpop.f32.mrf.mxu1  ;;  %v4592_v29 = vrot.slane %v4590_v28, 4  ;;  %v4591_v3 = vsel %vm6254_vm7, %v5991_v34, %v4590_v28  ;;  %v5689_v28 = vld [vmem:[%s6193_s29 + $0x20] sm:$0x1]  ;;  %v5946_v34 = vld [vmem:[%s6193_s29 + $0x24] sm:$0xe] }
 0x142   : > { %2872 = vst.msk [vmem:[#allocation2 + $0x50] sm:$0xff] %vm217_vm8, %v2840_v35  ;;  %v1275_v0 = vadd.f32 %v1216_v51, %v666_v2  ;;  %v7031_v22 = vpop.f32.mrf.mxu0  ;;  %v3025_v13 = vsel %vm6254_vm7, %v5732_v47, %v3024_v31  ;;  %v7065_v31 = vld [vmem:[%s6193_s29 + $0x1c] sm:$0xf]  ;;  %v4702_v63 = vunpack.c.l.b16 %v4591_v3  ;;  %v5883_v51 = vld [vmem:[%s6193_s29 + $0x2c] sm:$0x1]  ;;  %v3034_v26 = vrot.slane %v5689_v28, 5 }
 0x143   : > { %v1386_v12 = vld [vmem:[#allocation2 + $0x68] sm:$0xff]  ;;  %v4594_v46 = vsel %vm6254_vm7, %v4592_v29, %v4593_v56  ;;  %v3031_v2 = vrot.slane %v7065_v31, 5  ;;  %v6059_v47 = vld [vmem:[%s6193_s29 + $0x18] sm:$0xff] }
 0x144   : > { %v1771_v20 = vadd.f32 %v1710_v55, %v1386_v12  ;;  %1307 = vst.msk [vmem:[#allocation2 + $0x70] sm:$0xff] %vm217_vm8, %v1275_v0  ;;  %5472 = vmatmul.msk.bf16.gmra.mxu1 %vm398_vm1, %v1120_v10  ;;  %5505 = vmatmul.msk.bf16.gmra.mxu2 %vm398_vm1, %v1617_v60  ;;  %v3849_v55 = vrot.slane %v3847_v39, 4  ;;  %v7068_v10 = vrot.slane %v3856_v43, 5  ;;  %v3862_v60 = vrot.slane %v3860_v61, 4  ;;  %v668_v12 = vld [vmem:[#allocation2 + $0x80] sm:$0xff] }
 0x145   : > { %v1870_v19 = vld [vmem:[#allocation2 + $0x60] sm:$0xff]  ;;  %5618 = vmatmul.msk.bf16.gmra.mxu3 %vm398_vm1, %v6058_v4  ;;  %5683 = vmatmul.msk.bf16.gmra.mxu0 %vm398_vm1, %v2689_v42  ;;  %v4703_v49 = vunpack.c.l.b16 %v4594_v46  ;;  %v3033_v24 = vrot.slane %v3031_v2, 4  ;;  %v5948_v29 = vld [vmem:[%s6193_s29 + $0x2c] sm:$0x1] }
 0x146   : > { %v2124_v25 = vadd.f32 %v6998_v27, %v1870_v19  ;;  %1803 = vst.msk [vmem:[#allocation2 + $0x68] sm:$0xff] %vm217_vm8, %v1771_v20  ;;  %v3835_v27 = vsel %vm6246_vm6, %v3830_v21, %v7015_v48  ;;  %v3136_v48 = vunpack.c.l.b16 %v3025_v13  ;;  %v3863_v17 = vor.u32 %v3862_v60, %v7068_v10  ;;  %v5947_v19 = vld [vmem:[%s6193_s29 + $0x28] sm:$0xf] }
 0x147   : > { %v2235_v30 = vld [vmem:[#allocation2 + $0x58] sm:$0xff]  ;;  %v1713_v14 = vpop.f32.mrf.mxu2  ;;  %v4208_v5 = vunpack.c.l.b16 %v3835_v27  ;;  %v3866_v20 = vshll.u32 %v5883_v51, 16  ;;  %v4734_v21 = vpack.c.b16 %v4703_v49, %v4702_v63  ;;  %v5884_v27 = vld [vmem:[%s6193_s29 + $0x30] sm:$0xf]  ;;  %v4600_v18 = vrot.slane %v5948_v29, 5 }
 0x148   : > { %2156 = vst.msk [vmem:[#allocation2 + $0x60] sm:$0xff] %vm217_vm8, %v2124_v25  ;;  %v2841_v54 = vadd.f32 %v6950_v11, %v2235_v30  ;;  %v7050_v36 = vpop.f32.mrf.mxu3  ;;  %v3168_v0 = vpack.c.b16 %v3137_v38, %v3136_v48  ;;  %v3864_v53 = vrot.slane %v3863_v17, 4  ;;  %v3035_v3 = vsel %vm6254_vm7, %v3033_v24, %v3034_v26  ;;  %v670_v26 = vld [vmem:[#allocation2 + $0x90] sm:$0xff] }
 0x149   : > { %v1218_v23 = vpop.f32.mrf.mxu1  ;;  %v4240_v16 = vpack.c.b16 %v4209_v41, %v4208_v5  ;;  %v3871_v48 = vshrl.u32 %v5884_v27, 16  ;;  %v3874_v38 = vshll.u32 %v5884_v27, 16  ;;  %v669_v5 = vld [vmem:[#allocation2 + $0x88] sm:$0xff]  ;;  %v3880_v41 = vshll.u32 %v5885_v40, 16 }
 0x14a   : > { %2873 = vst.msk [vmem:[#allocation2 + $0x58] sm:$0xff] %vm217_vm8, %v2841_v54  ;;  %v1276_v44 = vadd.f32 %v1218_v23, %v667_v37  ;;  %v7058_v11 = vpop.f32.mrf.mxu0  ;;  %v3868_v54 = vrot.slane %v3866_v20, 5  ;;  %v5992_v37 = vrot.slane %v5946_v34, 9  ;;  %v3139_v49 = vunpack.c.l.b16 %v3035_v3 }
 0x14b   : > { %v1387_v33 = vld [vmem:[#allocation2 + $0x70] sm:$0xff] }
 0x14c   : > { %v1772_v57 = vadd.f32 %v1713_v14, %v1387_v33  ;;  %1308 = vst.msk [vmem:[#allocation2 + $0x78] sm:$0xff] %vm217_vm8, %v1276_v44  ;;  %v4597_v14 = vrot.slane %v5947_v19, 5 }
 0x14d   : > { %v1871_v35 = vld [vmem:[#allocation2 + $0x68] sm:$0xff] }
 0x14e   : > { %v2125_v45 = vadd.f32 %v7024_v62, %v1871_v35  ;;  %1804 = vst.msk [vmem:[#allocation2 + $0x70] sm:$0xff] %vm217_vm8, %v1772_v57  ;;  %v3853_v62 = vor.u32 %v3852_v58, %v3849_v55  ;;  %v4599_v23 = vrot.slane %v4597_v14, 4  ;;  %v3869_v57 = vsel %vm6246_vm6, %v3864_v53, %v3868_v54 }
 0x14f   : > { %v2236_v4 = vld [vmem:[#allocation2 + $0x60] sm:$0xff]  ;;  %v1715_v42 = vpop.f32.mrf.mxu2  ;;  %v3884_v55 = vshrl.u32 %v5885_v40, 16  ;;  %v4598_v35 = vsel %vm6254_vm7, %v5992_v37, %v4597_v14  ;;  %v5949_v37 = vld [vmem:[%s6193_s29 + $0x30] sm:$0xe] }
 0x150   : > { %2157 = vst.msk [vmem:[#allocation2 + $0x68] sm:$0xff] %vm217_vm8, %v2125_v45  ;;  %v2842_v8 = vadd.f32 %v6980_v59, %v2236_v4  ;;  %v7078_v9 = vpop.f32.mrf.mxu3  ;;  %v5733_v59 = vrot.slane %v5687_v7, 9  ;;  %v3854_v30 = vrot.slane %v3853_v62, 4  ;;  %v4211_v4 = vunpack.c.l.b16 %v3869_v57 }
 0x151   : > { %v1221_v15 = vpop.f32.mrf.mxu1  ;;  %v3876_v7 = vrot.slane %v3874_v38, 5  ;;  %v4704_v28 = vunpack.c.l.b16 %v4598_v35  ;;  %v5888_v38 = vld [vmem:[%s6193_s29 + $0x40] sm:$0xf] }
 0x152   : > { %2874 = vst.msk [vmem:[#allocation2 + $0x60] sm:$0xff] %vm217_vm8, %v2842_v8  ;;  %v1277_v52 = vadd.f32 %v1221_v15, %v668_v12  ;;  %v7084_v50 = vpop.f32.mrf.mxu0  ;;  %v3032_v44 = vsel %vm6254_vm7, %v5733_v59, %v3031_v2  ;;  %v7118_v2 = vld [vmem:[%s6193_s29 + $0x28] sm:$0xf] }
 0x153   : > { %v1388_v25 = vld [vmem:[#allocation2 + $0x78] sm:$0xff]  ;;  %v3138_v63 = vunpack.c.l.b16 %v3032_v44  ;;  %v3038_v15 = vrot.slane %v7118_v2, 5  ;;  %v6060_v59 = vld [vmem:[%s6193_s29 + $0x24] sm:$0xff] }
 0x154   : > { %v1773_v56 = vadd.f32 %v1715_v42, %v1388_v25  ;;  %1309 = vst.msk [vmem:[#allocation2 + $0x80] sm:$0xff] %vm217_vm8, %v1277_v52  ;;  %5749 = vmatmul.msk.bf16.vlgmr.msra.gmra.mxu1 %vm398_vm1, %v3168_v0  ;;  %5862 = vmatmul.msk.bf16.vlgmr.msra.gmra.mxu2 %vm398_vm1, %v6059_v47  ;;  %v3873_v42 = vrot.slane %v3871_v48, 4  ;;  %v7121_v0 = vrot.slane %v3880_v41, 5  ;;  %v3886_v47 = vrot.slane %v3884_v55, 4  ;;  %v5692_v25 = vld [vmem:[%s6193_s29 + $0x2c] sm:$0x1] }
 0x155   : > { %v1872_v13 = vld [vmem:[#allocation2 + $0x70] sm:$0xff]  ;;  %5927 = vmatmul.msk.bf16.vlgmr.msra.gmra.mxu3 %vm398_vm1, %v4240_v16  ;;  %6008 = vmatmul.msk.bf16.vlgmr.msra.gmra.mxu0 %vm398_vm1, %v4734_v21  ;;  %v5886_v16 = vld [vmem:[%s6193_s29 + $0x38] sm:$0x1]  ;;  %v5690_v21 = vld [vmem:[%s6193_s29 + $0x24] sm:$0xe]  ;;  %v3169_v52 = vpack.c.b16 %v3139_v49, %v3138_v63  ;;  %v3040_v54 = vrot.slane %v3038_v15, 4 }
 0x156   : > { %v2126_v39 = vadd.f32 %v7050_v36, %v1872_v13  ;;  %1805 = vst.msk [vmem:[#allocation2 + $0x78] sm:$0xff] %vm217_vm8, %v1773_v56  ;;  %v3859_v36 = vsel %vm6246_vm6, %v3854_v30, %v7068_v10  ;;  %v4601_v10 = vsel %vm6254_vm7, %v4599_v23, %v4600_v18  ;;  %v3887_v56 = vor.u32 %v3886_v47, %v7121_v0  ;;  %v5950_v13 = vld [vmem:[%s6193_s29 + $0x34] sm:$0xf]  ;;  %v5951_v23 = vld [vmem:[%s6193_s29 + $0x38] sm:$0x1] }
 0x157   : > { %v2237_v43 = vld [vmem:[#allocation2 + $0x68] sm:$0xff]  ;;  %v1718_v61 = vpop.f32.mrf.mxu2  ;;  %v4210_v45 = vunpack.c.l.b16 %v3859_v36  ;;  %v4705_v62 = vunpack.c.l.b16 %v4601_v10  ;;  %v3890_v30 = vshll.u32 %v5886_v16, 16  ;;  %v3041_v40 = vrot.slane %v5692_v25, 5  ;;  %v5887_v36 = vld [vmem:[%s6193_s29 + $0x3c] sm:$0xf] }
 0x158   : > { %2158 = vst.msk [vmem:[#allocation2 + $0x70] sm:$0xff] %vm217_vm8, %v2126_v39  ;;  %v2843_v46 = vadd.f32 %v7005_v32, %v2237_v43  ;;  %v7103_v33 = vpop.f32.mrf.mxu3  ;;  %v3888_v3 = vrot.slane %v3887_v56, 4  ;;  %v4607_v57 = vrot.slane %v5951_v23, 5  ;;  %v3895_v63 = vshrl.u32 %v5887_v36, 16 }
 0x159   : > { %v1223_v31 = vpop.f32.mrf.mxu1  ;;  %v4241_v29 = vpack.c.b16 %v4211_v4, %v4210_v45  ;;  %v4735_v14 = vpack.c.b16 %v4705_v62, %v4704_v28  ;;  %v3042_v35 = vsel %vm6254_vm7, %v3040_v54, %v3041_v40  ;;  %v3898_v49 = vshll.u32 %v5887_v36, 16  ;;  %v671_v45 = vld [vmem:[#allocation2 + $0x98] sm:$0xff]  ;;  %v672_v40 = vld [vmem:[#allocation2 + $0xa0] sm:$0xff] }
 0x15a   : > { %2875 = vst.msk [vmem:[#allocation2 + $0x68] sm:$0xff] %vm217_vm8, %v2843_v46  ;;  %v1278_v58 = vadd.f32 %v1223_v31, %v669_v5  ;;  %v7111_v32 = vpop.f32.mrf.mxu0  ;;  %v3892_v46 = vrot.slane %v3890_v30, 5  ;;  %v5993_v5 = vrot.slane %v5949_v37, 9  ;;  %v3904_v4 = vshll.u32 %v5888_v38, 16 }
 0x15b   : > { %v1389_v60 = vld [vmem:[#allocation2 + $0x80] sm:$0xff]  ;;  %v3141_v62 = vunpack.c.l.b16 %v3042_v35 }
 0x15c   : > { %v1774_v51 = vadd.f32 %v1718_v61, %v1389_v60  ;;  %1310 = vst.msk [vmem:[#allocation2 + $0x88] sm:$0xff] %vm217_vm8, %v1278_v58  ;;  %v4604_v61 = vrot.slane %v5950_v13, 5 }
 0x15d   : > { %v1873_v8 = vld [vmem:[#allocation2 + $0x78] sm:$0xff] }
 0x15e   : > { %v2127_v12 = vadd.f32 %v7078_v9, %v1873_v8  ;;  %1806 = vst.msk [vmem:[#allocation2 + $0x80] sm:$0xff] %vm217_vm8, %v1774_v51  ;;  %v3877_v9 = vor.u32 %v3876_v7, %v3873_v42  ;;  %v4606_v31 = vrot.slane %v4604_v61, 4  ;;  %v3893_v51 = vsel %vm6246_vm6, %v3888_v3, %v3892_v46 }
 0x15f   : > { %v2238_v17 = vld [vmem:[#allocation2 + $0x70] sm:$0xff]  ;;  %v1720_v20 = vpop.f32.mrf.mxu2  ;;  %v3908_v42 = vshrl.u32 %v5888_v38, 16  ;;  %v4605_v8 = vsel %vm6254_vm7, %v5993_v5, %v4604_v61  ;;  %v5952_v5 = vld [vmem:[%s6193_s29 + $0x3c] sm:$0xe] }
 0x160   : > { %2159 = vst.msk [vmem:[#allocation2 + $0x78] sm:$0xff] %vm217_vm8, %v2127_v12  ;;  %v2844_v19 = vadd.f32 %v7031_v22, %v2238_v17  ;;  %v7131_v24 = vpop.f32.mrf.mxu3  ;;  %v5734_v22 = vrot.slane %v5690_v21, 9  ;;  %v3878_v43 = vrot.slane %v3877_v9, 4  ;;  %v4213_v17 = vunpack.c.l.b16 %v3893_v51 }
 0x161   : > { %v1226_v34 = vpop.f32.mrf.mxu1  ;;  %v3900_v21 = vrot.slane %v3898_v49, 5  ;;  %v4706_v25 = vunpack.c.l.b16 %v4605_v8  ;;  %v5891_v49 = vld [vmem:[%s6193_s29 + $0x4c] sm:$0xf] }
 0x162   : > { %2876 = vst.msk [vmem:[#allocation2 + $0x70] sm:$0xff] %vm217_vm8, %v2844_v19  ;;  %v1279_v53 = vadd.f32 %v1226_v34, %v670_v26  ;;  %v7137_v27 = vpop.f32.mrf.mxu0  ;;  %v3039_v58 = vsel %vm6254_vm7, %v5734_v22, %v3038_v15  ;;  %v7171_v15 = vld [vmem:[%s6193_s29 + $0x34] sm:$0xf] }
 0x163   : > { %v1390_v39 = vld [vmem:[#allocation2 + $0x88] sm:$0xff]  ;;  %v3140_v28 = vunpack.c.l.b16 %v3039_v58  ;;  %v3045_v34 = vrot.slane %v7171_v15, 5  ;;  %v6061_v22 = vld [vmem:[%s6193_s29 + $0x30] sm:$0xff] }
 0x164   : > { %v1775_v18 = vadd.f32 %v1720_v20, %v1390_v39  ;;  %1311 = vst.msk [vmem:[#allocation2 + $0x90] sm:$0xff] %vm217_vm8, %v1279_v53  ;;  %5750 = vmatmul.msk.bf16.gmra.mxu1 %vm398_vm1, %v3169_v52  ;;  %5863 = vmatmul.msk.bf16.gmra.mxu2 %vm398_vm1, %v6060_v59  ;;  %v3897_v20 = vrot.slane %v3895_v63, 4  ;;  %v7174_v52 = vrot.slane %v3904_v4, 5  ;;  %v3910_v59 = vrot.slane %v3908_v42, 4  ;;  %v5695_v39 = vld [vmem:[%s6193_s29 + $0x38] sm:$0x1] }
 0x165   : > { %v1874_v44 = vld [vmem:[#allocation2 + $0x80] sm:$0xff]  ;;  %5928 = vmatmul.msk.bf16.gmra.mxu3 %vm398_vm1, %v4241_v29  ;;  %6009 = vmatmul.msk.bf16.gmra.mxu0 %vm398_vm1, %v4735_v14  ;;  %v5693_v14 = vld [vmem:[%s6193_s29 + $0x30] sm:$0xe]  ;;  %v3170_v53 = vpack.c.b16 %v3141_v62, %v3140_v28  ;;  %v3047_v46 = vrot.slane %v3045_v34, 4  ;;  %v3048_v38 = vrot.slane %v5695_v39, 5 }
 0x166   : > { %v2128_v48 = vadd.f32 %v7103_v33, %v1874_v44  ;;  %1807 = vst.msk [vmem:[#allocation2 + $0x88] sm:$0xff] %vm217_vm8, %v1775_v18  ;;  %v3883_v33 = vsel %vm6246_vm6, %v3878_v43, %v7121_v0  ;;  %v4608_v0 = vsel %vm6254_vm7, %v4606_v31, %v4607_v57  ;;  %v5889_v29 = vld [vmem:[%s6193_s29 + $0x44] sm:$0x1]  ;;  %v3911_v18 = vor.u32 %v3910_v59, %v7174_v52  ;;  %v5953_v44 = vld [vmem:[%s6193_s29 + $0x40] sm:$0xf] }
 0x167   : > { %v2239_v41 = vld [vmem:[#allocation2 + $0x78] sm:$0xff]  ;;  %v1723_v55 = vpop.f32.mrf.mxu2  ;;  %v4212_v12 = vunpack.c.l.b16 %v3883_v33  ;;  %v4707_v9 = vunpack.c.l.b16 %v4608_v0  ;;  %v3914_v43 = vshll.u32 %v5889_v29, 16  ;;  %v5954_v31 = vld [vmem:[%s6193_s29 + $0x44] sm:$0x1]  ;;  %v5890_v33 = vld [vmem:[%s6193_s29 + $0x48] sm:$0xf]  ;;  %v3049_v8 = vsel %vm6254_vm7, %v3047_v46, %v3048_v38 }
 0x168   : > { %2160 = vst.msk [vmem:[#allocation2 + $0x80] sm:$0xff] %vm217_vm8, %v2128_v48  ;;  %v2845_v10 = vadd.f32 %v7058_v11, %v2239_v41  ;;  %v7156_v60 = vpop.f32.mrf.mxu3  ;;  %v3912_v35 = vrot.slane %v3911_v18, 4  ;;  %v4614_v51 = vrot.slane %v5954_v31, 5  ;;  %v3919_v28 = vshrl.u32 %v5890_v33, 16  ;;  %v674_v38 = vld [vmem:[#allocation2 + $0xb0] sm:$0xff] }
 0x169   : > { %v1228_v2 = vpop.f32.mrf.mxu1  ;;  %v4242_v23 = vpack.c.b16 %v4213_v17, %v4212_v12  ;;  %v4736_v61 = vpack.c.b16 %v4707_v9, %v4706_v25  ;;  %v3922_v62 = vshll.u32 %v5890_v33, 16  ;;  %v673_v12 = vld [vmem:[#allocation2 + $0xa8] sm:$0xff]  ;;  %v3928_v17 = vshll.u32 %v5891_v49, 16 }
 0x16a   : > { %2877 = vst.msk [vmem:[#allocation2 + $0x78] sm:$0xff] %vm217_vm8, %v2845_v10  ;;  %v1280_v7 = vadd.f32 %v1228_v2, %v671_v45  ;;  %v7164_v11 = vpop.f32.mrf.mxu0  ;;  %v3916_v10 = vrot.slane %v3914_v43, 5  ;;  %v5994_v45 = vrot.slane %v5952_v5, 9  ;;  %v3143_v9 = vunpack.c.l.b16 %v3049_v8 }
 0x16b   : > { %v1391_v47 = vld [vmem:[#allocation2 + $0x90] sm:$0xff] }
 0x16c   : > { %v1776_v16 = vadd.f32 %v1723_v55, %v1391_v47  ;;  %1312 = vst.msk [vmem:[#allocation2 + $0x98] sm:$0xff] %vm217_vm8, %v1280_v7  ;;  %v4611_v55 = vrot.slane %v5953_v44, 5 }
 0x16d   : > { %v1875_v19 = vld [vmem:[#allocation2 + $0x88] sm:$0xff] }
 0x16e   : > { %v2129_v26 = vadd.f32 %v7131_v24, %v1875_v19  ;;  %1808 = vst.msk [vmem:[#allocation2 + $0x90] sm:$0xff] %vm217_vm8, %v1776_v16  ;;  %v3901_v24 = vor.u32 %v3900_v21, %v3897_v20  ;;  %v4613_v2 = vrot.slane %v4611_v55, 4  ;;  %v3917_v16 = vsel %vm6246_vm6, %v3912_v35, %v3916_v10 }
 0x16f   : > { %v2240_v56 = vld [vmem:[#allocation2 + $0x80] sm:$0xff]  ;;  %v1725_v30 = vpop.f32.mrf.mxu2  ;;  %v3932_v20 = vshrl.u32 %v5891_v49, 16  ;;  %v4612_v19 = vsel %vm6254_vm7, %v5994_v45, %v4611_v55  ;;  %v5955_v45 = vld [vmem:[%s6193_s29 + $0x48] sm:$0xe] }
 0x170   : > { %2161 = vst.msk [vmem:[#allocation2 + $0x88] sm:$0xff] %vm217_vm8, %v2129_v26  ;;  %v2846_v13 = vadd.f32 %v7084_v50, %v2240_v56  ;;  %v7184_v54 = vpop.f32.mrf.mxu3  ;;  %v5735_v50 = vrot.slane %v5693_v14, 9  ;;  %v3902_v41 = vrot.slane %v3901_v24, 4  ;;  %v4215_v56 = vunpack.c.l.b16 %v3917_v16 }
 0x171   : > { %v1231_v37 = vpop.f32.mrf.mxu1  ;;  %v3924_v14 = vrot.slane %v3922_v62, 5  ;;  %v4708_v39 = vunpack.c.l.b16 %v4612_v19  ;;  %v5894_v62 = vld [vmem:[%s6193_s29 + $0x58] sm:$0xf] }
 0x172   : > { %2878 = vst.msk [vmem:[#allocation2 + $0x80] sm:$0xff] %vm217_vm8, %v2846_v13  ;;  %v1281_v3 = vadd.f32 %v1231_v37, %v672_v40  ;;  %v7190_v36 = vpop.f32.mrf.mxu0  ;;  %v3046_v7 = vsel %vm6254_vm7, %v5735_v50, %v3045_v34  ;;  %v7224_v34 = vld [vmem:[%s6193_s29 + $0x40] sm:$0xf] }
 0x173   : > { %v1392_v48 = vld [vmem:[#allocation2 + $0x98] sm:$0xff]  ;;  %v3142_v25 = vunpack.c.l.b16 %v3046_v7  ;;  %v3052_v37 = vrot.slane %v7224_v34, 5 }
 0x174   : > { %v1777_v57 = vadd.f32 %v1725_v30, %v1392_v48  ;;  %1313 = vst.msk [vmem:[#allocation2 + $0xa0] sm:$0xff] %vm217_vm8, %v1281_v3  ;;  %5751 = vmatmul.msk.bf16.gmra.mxu1 %vm398_vm1, %v3170_v53  ;;  %5864 = vmatmul.msk.bf16.gmra.mxu2 %vm398_vm1, %v6061_v22  ;;  %v3921_v30 = vrot.slane %v3919_v28, 4  ;;  %v7227_v53 = vrot.slane %v3928_v17, 5  ;;  %v3934_v22 = vrot.slane %v3932_v20, 4  ;;  %v6062_v50 = vld [vmem:[%s6193_s29 + $0x3c] sm:$0xff] }
 0x175   : > { %v1876_v58 = vld [vmem:[#allocation2 + $0x90] sm:$0xff]  ;;  %5929 = vmatmul.msk.bf16.gmra.mxu3 %vm398_vm1, %v4242_v23  ;;  %6010 = vmatmul.msk.bf16.gmra.mxu0 %vm398_vm1, %v4736_v61  ;;  %v5696_v61 = vld [vmem:[%s6193_s29 + $0x3c] sm:$0xe]  ;;  %v3171_v3 = vpack.c.b16 %v3143_v9, %v3142_v25  ;;  %v5698_v48 = vld [vmem:[%s6193_s29 + $0x44] sm:$0x1]  ;;  %v3054_v10 = vrot.slane %v3052_v37, 4 }
 0x176   : > { %v2130_v63 = vadd.f32 %v7156_v60, %v1876_v58  ;;  %1809 = vst.msk [vmem:[#allocation2 + $0x98] sm:$0xff] %vm217_vm8, %v1777_v57  ;;  %v3907_v60 = vsel %vm6246_vm6, %v3902_v41, %v7174_v52  ;;  %v4615_v52 = vsel %vm6254_vm7, %v4613_v2, %v4614_v51  ;;  %v5892_v23 = vld [vmem:[%s6193_s29 + $0x50] sm:$0x1]  ;;  %v3935_v57 = vor.u32 %v3934_v22, %v7227_v53  ;;  %v5956_v58 = vld [vmem:[%s6193_s29 + $0x4c] sm:$0xf] }
 0x177   : > { %v2241_v4 = vld [vmem:[#allocation2 + $0x88] sm:$0xff]  ;;  %v1728_v42 = vpop.f32.mrf.mxu2  ;;  %v4214_v26 = vunpack.c.l.b16 %v3907_v60  ;;  %v4709_v24 = vunpack.c.l.b16 %v4615_v52  ;;  %v3938_v41 = vshll.u32 %v5892_v23, 16  ;;  %v3055_v49 = vrot.slane %v5698_v48, 5  ;;  %v5957_v2 = vld [vmem:[%s6193_s29 + $0x50] sm:$0x1] }
 0x178   : > { %2162 = vst.msk [vmem:[#allocation2 + $0x90] sm:$0xff] %vm217_vm8, %v2130_v63  ;;  %v2847_v0 = vadd.f32 %v7111_v32, %v2241_v4  ;;  %v7209_v47 = vpop.f32.mrf.mxu3  ;;  %v3936_v8 = vrot.slane %v3935_v57, 4  ;;  %v5893_v60 = vld [vmem:[%s6193_s29 + $0x54] sm:$0xf]  ;;  %v4621_v16 = vrot.slane %v5957_v2, 5 }
 0x179   : > { %v1233_v15 = vpop.f32.mrf.mxu1  ;;  %v4243_v31 = vpack.c.b16 %v4215_v56, %v4214_v26  ;;  %v4737_v55 = vpack.c.b16 %v4709_v24, %v4708_v39  ;;  %v3056_v19 = vsel %vm6254_vm7, %v3054_v10, %v3055_v49  ;;  %v3943_v25 = vshrl.u32 %v5893_v60, 16  ;;  %v675_v26 = vld [vmem:[#allocation2 + $0xb8] sm:$0xff]  ;;  %v676_v49 = vld [vmem:[#allocation2 + $0xc0] sm:$0xff] }
 0x17a   : > { %2879 = vst.msk [vmem:[#allocation2 + $0x88] sm:$0xff] %vm217_vm8, %v2847_v0  ;;  %v1282_v21 = vadd.f32 %v1233_v15, %v673_v12  ;;  %v7217_v32 = vpop.f32.mrf.mxu0  ;;  %v3940_v0 = vrot.slane %v3938_v41, 5  ;;  %v5995_v12 = vrot.slane %v5955_v45, 9  ;;  %v3946_v9 = vshll.u32 %v5893_v60, 16 }
 0x17b   : > { %v1393_v59 = vld [vmem:[#allocation2 + $0xa0] sm:$0xff]  ;;  %v3952_v56 = vshll.u32 %v5894_v62, 16  ;;  %v3145_v24 = vunpack.c.l.b16 %v3056_v19 }
 0x17c   : > { %v1778_v29 = vadd.f32 %v1728_v42, %v1393_v59  ;;  %1314 = vst.msk [vmem:[#allocation2 + $0xa8] sm:$0xff] %vm217_vm8, %v1282_v21  ;;  %v4618_v42 = vrot.slane %v5956_v58, 5 }
 0x17d   : > { %v1877_v13 = vld [vmem:[#allocation2 + $0x98] sm:$0xff] }
 0x17e   : > { %v2131_v40 = vadd.f32 %v7184_v54, %v1877_v13  ;;  %1810 = vst.msk [vmem:[#allocation2 + $0xa0] sm:$0xff] %vm217_vm8, %v1778_v29  ;;  %v3925_v54 = vor.u32 %v3924_v14, %v3921_v30  ;;  %v4620_v15 = vrot.slane %v4618_v42, 4  ;;  %v3941_v29 = vsel %vm6246_vm6, %v3936_v8, %v3940_v0 }
 0x17f   : > { %v2242_v18 = vld [vmem:[#allocation2 + $0x90] sm:$0xff]  ;;  %v1730_v43 = vpop.f32.mrf.mxu2  ;;  %v3956_v30 = vshrl.u32 %v5894_v62, 16  ;;  %v4619_v13 = vsel %vm6254_vm7, %v5995_v12, %v4618_v42 }
 0x180   : > { %2163 = vst.msk [vmem:[#allocation2 + $0x98] sm:$0xff] %vm217_vm8, %v2131_v40  ;;  %v2848_v44 = vadd.f32 %v7137_v27, %v2242_v18  ;;  %v7237_v46 = vpop.f32.mrf.mxu3  ;;  %v5736_v27 = vrot.slane %v5696_v61, 9  ;;  %v3926_v4 = vrot.slane %v3925_v54, 4  ;;  %v4217_v18 = vunpack.c.l.b16 %v3941_v29  ;;  %v5958_v12 = vld [vmem:[%s6193_s29 + $0x54] sm:$0xe] }
 0x181   : > { %v1236_v5 = vpop.f32.mrf.mxu1  ;;  %v3948_v61 = vrot.slane %v3946_v9, 5  ;;  %v4710_v48 = vunpack.c.l.b16 %v4619_v13  ;;  %v5897_v9 = vld [vmem:[%s6193_s29 + $0x64] sm:$0xf] }
 0x182   : > { %2880 = vst.msk [vmem:[#allocation2 + $0x90] sm:$0xff] %vm217_vm8, %v2848_v44  ;;  %v1283_v35 = vadd.f32 %v1236_v5, %v674_v38  ;;  %v7243_v33 = vpop.f32.mrf.mxu0  ;;  %v3053_v21 = vsel %vm6254_vm7, %v5736_v27, %v3052_v37  ;;  %v7277_v37 = vld [vmem:[%s6193_s29 + $0x4c] sm:$0xf] }
 0x183   : > { %v1394_v63 = vld [vmem:[#allocation2 + $0xa8] sm:$0xff]  ;;  %v3144_v39 = vunpack.c.l.b16 %v3053_v21  ;;  %v3059_v5 = vrot.slane %v7277_v37, 5 }
 0x184   : > { %v1779_v51 = vadd.f32 %v1730_v43, %v1394_v63  ;;  %1315 = vst.msk [vmem:[#allocation2 + $0xb0] sm:$0xff] %vm217_vm8, %v1283_v35  ;;  %5752 = vmatmul.msk.bf16.gmra.mxu1 %vm398_vm1, %v3171_v3  ;;  %5865 = vmatmul.msk.bf16.gmra.mxu2 %vm398_vm1, %v6062_v50  ;;  %v3945_v43 = vrot.slane %v3943_v25, 4  ;;  %v7280_v3 = vrot.slane %v3952_v56, 5  ;;  %v3958_v50 = vrot.slane %v3956_v30, 4  ;;  %v6063_v27 = vld [vmem:[%s6193_s29 + $0x48] sm:$0xff] }
 0x185   : > { %v1878_v7 = vld [vmem:[#allocation2 + $0xa0] sm:$0xff]  ;;  %5930 = vmatmul.msk.bf16.gmra.mxu3 %vm398_vm1, %v4243_v31  ;;  %6011 = vmatmul.msk.bf16.gmra.mxu0 %vm398_vm1, %v4737_v55  ;;  %v5895_v31 = vld [vmem:[%s6193_s29 + $0x5c] sm:$0x1]  ;;  %v5699_v55 = vld [vmem:[%s6193_s29 + $0x48] sm:$0xe]  ;;  %v3172_v35 = vpack.c.b16 %v3145_v24, %v3144_v39  ;;  %v3061_v0 = vrot.slane %v3059_v5, 4 }
 0x186   : > { %v2132_v28 = vadd.f32 %v7209_v47, %v1878_v7  ;;  %1811 = vst.msk [vmem:[#allocation2 + $0xa8] sm:$0xff] %vm217_vm8, %v1779_v51  ;;  %v3931_v47 = vsel %vm6246_vm6, %v3926_v4, %v7227_v53  ;;  %v4622_v53 = vsel %vm6254_vm7, %v4620_v15, %v4621_v16  ;;  %v5701_v63 = vld [vmem:[%s6193_s29 + $0x50] sm:$0x1]  ;;  %v3959_v51 = vor.u32 %v3958_v50, %v7280_v3  ;;  %v5959_v7 = vld [vmem:[%s6193_s29 + $0x58] sm:$0xf] }
 0x187   : > { %v2243_v17 = vld [vmem:[#allocation2 + $0x98] sm:$0xff]  ;;  %v1733_v20 = vpop.f32.mrf.mxu2  ;;  %v4216_v40 = vunpack.c.l.b16 %v3931_v47  ;;  %v4711_v54 = vunpack.c.l.b16 %v4622_v53  ;;  %v3962_v4 = vshll.u32 %v5895_v31, 16  ;;  %v3062_v62 = vrot.slane %v5701_v63, 5  ;;  %v5896_v47 = vld [vmem:[%s6193_s29 + $0x60] sm:$0xf] }
 0x188   : > { %2164 = vst.msk [vmem:[#allocation2 + $0xa0] sm:$0xff] %vm217_vm8, %v2132_v28  ;;  %v2849_v52 = vadd.f32 %v7164_v11, %v2243_v17  ;;  %v7262_v59 = vpop.f32.mrf.mxu3  ;;  %v5960_v15 = vld [vmem:[%s6193_s29 + $0x5c] sm:$0x1]  ;;  %v3960_v19 = vrot.slane %v3959_v51, 4  ;;  %v3967_v39 = vshrl.u32 %v5896_v47, 16  ;;  %v3970_v24 = vshll.u32 %v5896_v47, 16 }
 0x189   : > { %v1238_v34 = vpop.f32.mrf.mxu1  ;;  %v4244_v2 = vpack.c.b16 %v4217_v18, %v4216_v40  ;;  %v4738_v42 = vpack.c.b16 %v4711_v54, %v4710_v48  ;;  %v4628_v29 = vrot.slane %v5960_v15, 5  ;;  %v3063_v13 = vsel %vm6254_vm7, %v3061_v0, %v3062_v62  ;;  %v677_v40 = vld [vmem:[#allocation2 + $0xc8] sm:$0xff]  ;;  %v678_v62 = vld [vmem:[#allocation2 + $0xd0] sm:$0xff] }
 0x18a   : > { %2881 = vst.msk [vmem:[#allocation2 + $0x98] sm:$0xff] %vm217_vm8, %v2849_v52  ;;  %v1284_v14 = vadd.f32 %v1238_v34, %v675_v26  ;;  %v7270_v11 = vpop.f32.mrf.mxu0  ;;  %v3964_v52 = vrot.slane %v3962_v4, 5  ;;  %v5996_v26 = vrot.slane %v5958_v12, 9  ;;  %v3976_v18 = vshll.u32 %v5897_v9, 16 }
 0x18b   : > { %v1395_v22 = vld [vmem:[#allocation2 + $0xb0] sm:$0xff]  ;;  %v3147_v54 = vunpack.c.l.b16 %v3063_v13 }
 0x18c   : > { %v1780_v23 = vadd.f32 %v1733_v20, %v1395_v22  ;;  %1316 = vst.msk [vmem:[#allocation2 + $0xb8] sm:$0xff] %vm217_vm8, %v1284_v14  ;;  %v4625_v20 = vrot.slane %v5959_v7, 5 }
 0x18d   : > { %v1879_v44 = vld [vmem:[#allocation2 + $0xa8] sm:$0xff] }
 0x18e   : > { %v2133_v38 = vadd.f32 %v7237_v46, %v1879_v44  ;;  %1812 = vst.msk [vmem:[#allocation2 + $0xb0] sm:$0xff] %vm217_vm8, %v1780_v23  ;;  %v3949_v46 = vor.u32 %v3948_v61, %v3945_v43  ;;  %v4627_v34 = vrot.slane %v4625_v20, 4  ;;  %v3965_v23 = vsel %vm6246_vm6, %v3960_v19, %v3964_v52 }
 0x18f   : > { %v2244_v57 = vld [vmem:[#allocation2 + $0xa0] sm:$0xff]  ;;  %v1735_v41 = vpop.f32.mrf.mxu2  ;;  %v3980_v43 = vshrl.u32 %v5897_v9, 16  ;;  %v4626_v44 = vsel %vm6254_vm7, %v5996_v26, %v4625_v20 }
 0x190   : > { %2165 = vst.msk [vmem:[#allocation2 + $0xa8] sm:$0xff] %vm217_vm8, %v2133_v38  ;;  %v2850_v58 = vadd.f32 %v7190_v36, %v2244_v57  ;;  %v7290_v10 = vpop.f32.mrf.mxu3  ;;  %v5737_v36 = vrot.slane %v5699_v55, 9  ;;  %v3950_v17 = vrot.slane %v3949_v46, 4  ;;  %v4219_v57 = vunpack.c.l.b16 %v3965_v23  ;;  %v5961_v26 = vld [vmem:[%s6193_s29 + $0x60] sm:$0xe] }
 0x191   : > { %v1241_v45 = vpop.f32.mrf.mxu1  ;;  %v3972_v55 = vrot.slane %v3970_v24, 5  ;;  %v4712_v63 = vunpack.c.l.b16 %v4626_v44  ;;  %v5900_v24 = vld [vmem:[%s6193_s29 + $0x70] sm:$0xf] }
 0x192   : > { %2882 = vst.msk [vmem:[#allocation2 + $0xa0] sm:$0xff] %vm217_vm8, %v2850_v58  ;;  %v1285_v8 = vadd.f32 %v1241_v45, %v676_v49  ;;  %v7296_v60 = vpop.f32.mrf.mxu0  ;;  %v3060_v14 = vsel %vm6254_vm7, %v5737_v36, %v3059_v5  ;;  %v7330_v5 = vld [vmem:[%s6193_s29 + $0x58] sm:$0xf] }
 0x193   : > { %v1396_v28 = vld [vmem:[#allocation2 + $0xb8] sm:$0xff]  ;;  %v3146_v48 = vunpack.c.l.b16 %v3060_v14  ;;  %v3066_v45 = vrot.slane %v7330_v5, 5 }
 0x194   : > { %v1781_v16 = vadd.f32 %v1735_v41, %v1396_v28  ;;  %1317 = vst.msk [vmem:[#allocation2 + $0xc0] sm:$0xff] %vm217_vm8, %v1285_v8  ;;  %5753 = vmatmul.msk.bf16.gmra.mxu1 %vm398_vm1, %v3172_v35  ;;  %5866 = vmatmul.msk.bf16.gmra.mxu2 %vm398_vm1, %v6063_v27  ;;  %v3969_v41 = vrot.slane %v3967_v39, 4  ;;  %v7333_v35 = vrot.slane %v3976_v18, 5  ;;  %v3982_v27 = vrot.slane %v3980_v43, 4  ;;  %v6064_v36 = vld [vmem:[%s6193_s29 + $0x54] sm:$0xff] }
 0x195   : > { %v1880_v21 = vld [vmem:[#allocation2 + $0xb0] sm:$0xff]  ;;  %5931 = vmatmul.msk.bf16.gmra.mxu3 %vm398_vm1, %v4244_v2  ;;  %6012 = vmatmul.msk.bf16.gmra.mxu0 %vm398_vm1, %v4738_v42  ;;  %v5898_v2 = vld [vmem:[%s6193_s29 + $0x68] sm:$0x1]  ;;  %v3173_v8 = vpack.c.b16 %v3147_v54, %v3146_v48  ;;  %v5704_v28 = vld [vmem:[%s6193_s29 + $0x5c] sm:$0x1]  ;;  %v3068_v52 = vrot.slane %v3066_v45, 4 }
 0x196   : > { %v2134_v25 = vadd.f32 %v7262_v59, %v1880_v21  ;;  %1813 = vst.msk [vmem:[#allocation2 + $0xb8] sm:$0xff] %vm217_vm8, %v1781_v16  ;;  %v3955_v59 = vsel %vm6246_vm6, %v3950_v17, %v7280_v3  ;;  %v4629_v3 = vsel %vm6254_vm7, %v4627_v34, %v4628_v29  ;;  %v5702_v42 = vld [vmem:[%s6193_s29 + $0x54] sm:$0xe]  ;;  %v3983_v16 = vor.u32 %v3982_v27, %v7333_v35  ;;  %v5962_v21 = vld [vmem:[%s6193_s29 + $0x64] sm:$0xf] }
 0x197   : > { %v2245_v56 = vld [vmem:[#allocation2 + $0xa8] sm:$0xff]  ;;  %v1738_v30 = vpop.f32.mrf.mxu2  ;;  %v4218_v38 = vunpack.c.l.b16 %v3955_v59  ;;  %v4713_v46 = vunpack.c.l.b16 %v4629_v3  ;;  %v3986_v17 = vshll.u32 %v5898_v2, 16  ;;  %v3069_v9 = vrot.slane %v5704_v28, 5 }
 0x198   : > { %2166 = vst.msk [vmem:[#allocation2 + $0xb0] sm:$0xff] %vm217_vm8, %v2134_v25  ;;  %v2851_v53 = vadd.f32 %v7217_v32, %v2245_v56  ;;  %v7315_v22 = vpop.f32.mrf.mxu3  ;;  %v5963_v34 = vld [vmem:[%s6193_s29 + $0x68] sm:$0x1]  ;;  %v3984_v13 = vrot.slane %v3983_v16, 4  ;;  %v5899_v59 = vld [vmem:[%s6193_s29 + $0x6c] sm:$0xf] }
 0x199   : > { %v1243_v37 = vpop.f32.mrf.mxu1  ;;  %v4245_v15 = vpack.c.b16 %v4219_v57, %v4218_v38  ;;  %v4739_v20 = vpack.c.b16 %v4713_v46, %v4712_v63  ;;  %v4635_v23 = vrot.slane %v5963_v34, 5  ;;  %v3070_v44 = vsel %vm6254_vm7, %v3068_v52, %v3069_v9  ;;  %v679_v38 = vld [vmem:[#allocation2 + $0xd8] sm:$0xff]  ;;  %v680_v9 = vld [vmem:[#allocation2 + $0xe0] sm:$0xff] }
 0x19a   : > { %2883 = vst.msk [vmem:[#allocation2 + $0xa8] sm:$0xff] %vm217_vm8, %v2851_v53  ;;  %v1286_v61 = vadd.f32 %v1243_v37, %v677_v40  ;;  %v7323_v32 = vpop.f32.mrf.mxu0  ;;  %v3988_v53 = vrot.slane %v3986_v17, 5  ;;  %v5997_v40 = vrot.slane %v5961_v26, 9  ;;  %v3991_v48 = vshrl.u32 %v5899_v59, 16 }
 0x19b   : > { %v1397_v50 = vld [vmem:[#allocation2 + $0xc0] sm:$0xff]  ;;  %v3994_v54 = vshll.u32 %v5899_v59, 16  ;;  %v4000_v57 = vshll.u32 %v5900_v24, 16  ;;  %v3149_v46 = vunpack.c.l.b16 %v3070_v44 }
 0x19c   : > { %v1782_v31 = vadd.f32 %v1738_v30, %v1397_v50  ;;  %1318 = vst.msk [vmem:[#allocation2 + $0xc8] sm:$0xff] %vm217_vm8, %v1286_v61  ;;  %v4632_v30 = vrot.slane %v5962_v21, 5 }
 0x19d   : > { %v1881_v58 = vld [vmem:[#allocation2 + $0xb8] sm:$0xff] }
 0x19e   : > { %v2135_v49 = vadd.f32 %v7290_v10, %v1881_v58  ;;  %1814 = vst.msk [vmem:[#allocation2 + $0xc0] sm:$0xff] %vm217_vm8, %v1782_v31  ;;  %v3973_v10 = vor.u32 %v3972_v55, %v3969_v41  ;;  %v4634_v37 = vrot.slane %v4632_v30, 4  ;;  %v3989_v31 = vsel %vm6246_vm6, %v3984_v13, %v3988_v53 }
 0x19f   : > { %v2246_v51 = vld [vmem:[#allocation2 + $0xb0] sm:$0xff]  ;;  %v1740_v4 = vpop.f32.mrf.mxu2  ;;  %v4004_v41 = vshrl.u32 %v5900_v24, 16  ;;  %v4633_v58 = vsel %vm6254_vm7, %v5997_v40, %v4632_v30  ;;  %v5964_v40 = vld [vmem:[%s6193_s29 + $0x6c] sm:$0xe] }
 0x1a0   : > { %2167 = vst.msk [vmem:[#allocation2 + $0xb8] sm:$0xff] %vm217_vm8, %v2135_v49  ;;  %v2852_v7 = vadd.f32 %v7243_v33, %v2246_v51  ;;  %v7343_v0 = vpop.f32.mrf.mxu3  ;;  %v5738_v33 = vrot.slane %v5702_v42, 9  ;;  %v3974_v56 = vrot.slane %v3973_v10, 4  ;;  %v4221_v51 = vunpack.c.l.b16 %v3989_v31 }
 0x1a1   : > { %v1246_v12 = vpop.f32.mrf.mxu1  ;;  %v3996_v42 = vrot.slane %v3994_v54, 5  ;;  %v4714_v28 = vunpack.c.l.b16 %v4633_v58  ;;  %v5903_v54 = vld [vmem:[%s6193_s29 + $0x7c] sm:$0xf] }
 0x1a2   : > { %2884 = vst.msk [vmem:[#allocation2 + $0xb0] sm:$0xff] %vm217_vm8, %v2852_v7  ;;  %v1287_v19 = vadd.f32 %v1246_v12, %v678_v62  ;;  %v7349_v47 = vpop.f32.mrf.mxu0  ;;  %v3067_v61 = vsel %vm6254_vm7, %v5738_v33, %v3066_v45  ;;  %v7383_v45 = vld [vmem:[%s6193_s29 + $0x64] sm:$0xf] }
 0x1a3   : > { %v1398_v25 = vld [vmem:[#allocation2 + $0xc8] sm:$0xff]  ;;  %v3148_v63 = vunpack.c.l.b16 %v3067_v61  ;;  %v3073_v12 = vrot.slane %v7383_v45, 5  ;;  %v6065_v33 = vld [vmem:[%s6193_s29 + $0x60] sm:$0xff] }
 0x1a4   : > { %v1783_v29 = vadd.f32 %v1740_v4, %v1398_v25  ;;  %1319 = vst.msk [vmem:[#allocation2 + $0xd0] sm:$0xff] %vm217_vm8, %v1287_v19  ;;  %5754 = vmatmul.msk.bf16.gmra.mxu1 %vm398_vm1, %v3173_v8  ;;  %5867 = vmatmul.msk.bf16.gmra.mxu2 %vm398_vm1, %v6064_v36  ;;  %v3993_v4 = vrot.slane %v3991_v48, 4  ;;  %v7386_v8 = vrot.slane %v4000_v57, 5  ;;  %v4006_v36 = vrot.slane %v4004_v41, 4  ;;  %v5707_v25 = vld [vmem:[%s6193_s29 + $0x68] sm:$0x1] }
 0x1a5   : > { %v1882_v14 = vld [vmem:[#allocation2 + $0xc0] sm:$0xff]  ;;  %5932 = vmatmul.msk.bf16.gmra.mxu3 %vm398_vm1, %v4245_v15  ;;  %6013 = vmatmul.msk.bf16.gmra.mxu0 %vm398_vm1, %v4739_v20  ;;  %v5901_v15 = vld [vmem:[%s6193_s29 + $0x74] sm:$0x1]  ;;  %v3174_v19 = vpack.c.b16 %v3149_v46, %v3148_v63  ;;  %v3075_v53 = vrot.slane %v3073_v12, 4  ;;  %v3076_v24 = vrot.slane %v5707_v25, 5 }
 0x1a6   : > { %v2136_v39 = vadd.f32 %v7315_v22, %v1882_v14  ;;  %1815 = vst.msk [vmem:[#allocation2 + $0xc8] sm:$0xff] %vm217_vm8, %v1783_v29  ;;  %v3979_v22 = vsel %vm6246_vm6, %v3974_v56, %v7333_v35  ;;  %v4636_v35 = vsel %vm6254_vm7, %v4634_v37, %v4635_v23  ;;  %v5705_v20 = vld [vmem:[%s6193_s29 + $0x60] sm:$0xe]  ;;  %v4007_v29 = vor.u32 %v4006_v36, %v7386_v8  ;;  %v5965_v14 = vld [vmem:[%s6193_s29 + $0x70] sm:$0xf] }
 0x1a7   : > { %v2247_v18 = vld [vmem:[#allocation2 + $0xb8] sm:$0xff]  ;;  %v1743_v43 = vpop.f32.mrf.mxu2  ;;  %v4220_v49 = vunpack.c.l.b16 %v3979_v22  ;;  %v4715_v10 = vunpack.c.l.b16 %v4636_v35  ;;  %v4010_v56 = vshll.u32 %v5901_v15, 16  ;;  %v5966_v37 = vld [vmem:[%s6193_s29 + $0x74] sm:$0x1]  ;;  %v3077_v58 = vsel %vm6254_vm7, %v3075_v53, %v3076_v24 }
 0x1a8   : > { %2168 = vst.msk [vmem:[#allocation2 + $0xc0] sm:$0xff] %vm217_vm8, %v2136_v39  ;;  %v2853_v3 = vadd.f32 %v7270_v11, %v2247_v18  ;;  %v7368_v50 = vpop.f32.mrf.mxu3  ;;  %v4008_v44 = vrot.slane %v4007_v29, 4  ;;  %v5902_v22 = vld [vmem:[%s6193_s29 + $0x78] sm:$0xf]  ;;  %v4642_v31 = vrot.slane %v5966_v37, 5  ;;  %v682_v24 = vld [vmem:[#allocation2 + $0xf0] sm:$0xff] }
 0x1a9   : > { %v1248_v5 = vpop.f32.mrf.mxu1  ;;  %v4246_v34 = vpack.c.b16 %v4221_v51, %v4220_v49  ;;  %v4740_v30 = vpack.c.b16 %v4715_v10, %v4714_v28  ;;  %v4015_v63 = vshrl.u32 %v5902_v22, 16  ;;  %v4018_v46 = vshll.u32 %v5902_v22, 16  ;;  %v681_v49 = vld [vmem:[#allocation2 + $0xe8] sm:$0xff] }
 0x1aa   : > { %2885 = vst.msk [vmem:[#allocation2 + $0xb8] sm:$0xff] %vm217_vm8, %v2853_v3  ;;  %v1288_v55 = vadd.f32 %v1248_v5, %v679_v38  ;;  %v7376_v11 = vpop.f32.mrf.mxu0  ;;  %v4012_v3 = vrot.slane %v4010_v56, 5  ;;  %v5998_v38 = vrot.slane %v5964_v40, 9  ;;  %v4024_v51 = vshll.u32 %v5903_v54, 16 }
 0x1ab   : > { %v1399_v27 = vld [vmem:[#allocation2 + $0xd0] sm:$0xff]  ;;  %v3151_v10 = vunpack.c.l.b16 %v3077_v58 }
 0x1ac   : > { %v1784_v2 = vadd.f32 %v1743_v43, %v1399_v27  ;;  %1320 = vst.msk [vmem:[#allocation2 + $0xd8] sm:$0xff] %vm217_vm8, %v1288_v55  ;;  %v4639_v43 = vrot.slane %v5965_v14, 5 }
 0x1ad   : > { %v1883_v7 = vld [vmem:[#allocation2 + $0xc8] sm:$0xff] }
 0x1ae   : > { %v2137_v62 = vadd.f32 %v7343_v0, %v1883_v7  ;;  %1816 = vst.msk [vmem:[#allocation2 + $0xd0] sm:$0xff] %vm217_vm8, %v1784_v2  ;;  %v3997_v0 = vor.u32 %v3996_v42, %v3993_v4  ;;  %v4641_v5 = vrot.slane %v4639_v43, 4  ;;  %v4013_v2 = vsel %vm6246_vm6, %v4008_v44, %v4012_v3 }
 0x1af   : > { %v2248_v16 = vld [vmem:[#allocation2 + $0xc0] sm:$0xff]  ;;  %v1745_v17 = vpop.f32.mrf.mxu2  ;;  %v4028_v4 = vshrl.u32 %v5903_v54, 16  ;;  %v4640_v7 = vsel %vm6254_vm7, %v5998_v38, %v4639_v43  ;;  %v5967_v38 = vld [vmem:[%s6193_s29 + $0x78] sm:$0xe] }
 0x1b0   : > { %2169 = vst.msk [vmem:[#allocation2 + $0xc8] sm:$0xff] %vm217_vm8, %v2137_v62  ;;  %v2854_v21 = vadd.f32 %v7296_v60, %v2248_v16  ;;  %v7396_v52 = vpop.f32.mrf.mxu3  ;;  %v5739_v60 = vrot.slane %v5705_v20, 9  ;;  %v3998_v18 = vrot.slane %v3997_v0, 4  ;;  %v4223_v16 = vunpack.c.l.b16 %v4013_v2 }
 0x1b1   : > { %v1251_v26 = vpop.f32.mrf.mxu1  ;;  %v4020_v20 = vrot.slane %v4018_v46, 5  ;;  %v4716_v25 = vunpack.c.l.b16 %v4640_v7  ;;  %v5906_v46 = vld [vmem:[%s6193_s29 + $0x88] sm:$0xf] }
 0x1b2   : > { %2886 = vst.msk [vmem:[#allocation2 + $0xc0] sm:$0xff] %vm217_vm8, %v2854_v21  ;;  %v1289_v13 = vadd.f32 %v1251_v26, %v680_v9  ;;  %v7402_v59 = vpop.f32.mrf.mxu0  ;;  %v3074_v55 = vsel %vm6254_vm7, %v5739_v60, %v3073_v12  ;;  %v7436_v12 = vld [vmem:[%s6193_s29 + $0x70] sm:$0xf] }
 0x1b3   : > { %v1400_v39 = vld [vmem:[#allocation2 + $0xd8] sm:$0xff]  ;;  %v3150_v28 = vunpack.c.l.b16 %v3074_v55  ;;  %v3080_v26 = vrot.slane %v7436_v12, 5  ;;  %v6066_v60 = vld [vmem:[%s6193_s29 + $0x6c] sm:$0xff] }
 0x1b4   : > { %v1785_v23 = vadd.f32 %v1745_v17, %v1400_v39  ;;  %1321 = vst.msk [vmem:[#allocation2 + $0xe0] sm:$0xff] %vm217_vm8, %v1289_v13  ;;  %5755 = vmatmul.msk.bf16.gmra.mxu1 %vm398_vm1, %v3174_v19  ;;  %5868 = vmatmul.msk.bf16.gmra.mxu2 %vm398_vm1, %v6065_v33  ;;  %v4017_v17 = vrot.slane %v4015_v63, 4  ;;  %v7439_v19 = vrot.slane %v4024_v51, 5  ;;  %v4030_v33 = vrot.slane %v4028_v4, 4  ;;  %v5710_v39 = vld [vmem:[%s6193_s29 + $0x74] sm:$0x1] }
 0x1b5   : > { %v1884_v61 = vld [vmem:[#allocation2 + $0xd0] sm:$0xff]  ;;  %5933 = vmatmul.msk.bf16.gmra.mxu3 %vm398_vm1, %v4246_v34  ;;  %6014 = vmatmul.msk.bf16.gmra.mxu0 %vm398_vm1, %v4740_v30  ;;  %v5904_v34 = vld [vmem:[%s6193_s29 + $0x80] sm:$0x1]  ;;  %v5708_v30 = vld [vmem:[%s6193_s29 + $0x6c] sm:$0xe]  ;;  %v3175_v13 = vpack.c.b16 %v3151_v10, %v3150_v28  ;;  %v3082_v3 = vrot.slane %v3080_v26, 4 }
 0x1b6   : > { %v2138_v48 = vadd.f32 %v7368_v50, %v1884_v61  ;;  %1817 = vst.msk [vmem:[#allocation2 + $0xd8] sm:$0xff] %vm217_vm8, %v1785_v23  ;;  %v4003_v50 = vsel %vm6246_vm6, %v3998_v18, %v7386_v8  ;;  %v4643_v8 = vsel %vm6254_vm7, %v4641_v5, %v4642_v31  ;;  %v4031_v23 = vor.u32 %v4030_v33, %v7439_v19  ;;  %v5968_v61 = vld [vmem:[%s6193_s29 + $0x7c] sm:$0xf]  ;;  %v5969_v5 = vld [vmem:[%s6193_s29 + $0x80] sm:$0x1] }
 0x1b7   : > { %v2249_v57 = vld [vmem:[#allocation2 + $0xc8] sm:$0xff]  ;;  %v1748_v41 = vpop.f32.mrf.mxu2  ;;  %v4222_v62 = vunpack.c.l.b16 %v4003_v50  ;;  %v4717_v0 = vunpack.c.l.b16 %v4643_v8  ;;  %v4034_v18 = vshll.u32 %v5904_v34, 16  ;;  %v3083_v54 = vrot.slane %v5710_v39, 5  ;;  %v5905_v50 = vld [vmem:[%s6193_s29 + $0x84] sm:$0xf] }
 0x1b8   : > { %2170 = vst.msk [vmem:[#allocation2 + $0xd0] sm:$0xff] %vm217_vm8, %v2138_v48  ;;  %v2855_v35 = vadd.f32 %v7323_v32, %v2249_v57  ;;  %v7421_v27 = vpop.f32.mrf.mxu3  ;;  %v4032_v58 = vrot.slane %v4031_v23, 4  ;;  %v4649_v2 = vrot.slane %v5969_v5, 5  ;;  %v4039_v28 = vshrl.u32 %v5905_v50, 16 }
 0x1b9   : > { %v1253_v45 = vpop.f32.mrf.mxu1  ;;  %v4247_v37 = vpack.c.b16 %v4223_v16, %v4222_v62  ;;  %v4741_v43 = vpack.c.b16 %v4717_v0, %v4716_v25  ;;  %v3084_v7 = vsel %vm6254_vm7, %v3082_v3, %v3083_v54  ;;  %v4042_v10 = vshll.u32 %v5905_v50, 16  ;;  %v683_v62 = vld [vmem:[#allocation2 + $0xf8] sm:$0xff]  ;;  %v2942_v54 = vld [vmem:[#allocation2] sm:$0xff] }
 0x1ba   : > { %2887 = vst.msk [vmem:[#allocation2 + $0xc8] sm:$0xff] %vm217_vm8, %v2855_v35  ;;  %v1290_v42 = vadd.f32 %v1253_v45, %v681_v49  ;;  %v7429_v32 = vpop.f32.mrf.mxu0  ;;  %v4036_v35 = vrot.slane %v4034_v18, 5  ;;  %v5999_v49 = vrot.slane %v5967_v38, 9  ;;  %v4048_v16 = vshll.u32 %v5906_v46, 16  ;;  %v6067_v3 = vld [vmem:[%s6193_s29 + $0x78] sm:$0xff] }
 0x1bb   : > { %v1401_v36 = vld [vmem:[#allocation2 + $0xe0] sm:$0xff]  ;;  %v3153_v0 = vunpack.c.l.b16 %v3084_v7 }
 0x1bc   : > { %v1786_v15 = vadd.f32 %v1748_v41, %v1401_v36  ;;  %1322 = vst.msk [vmem:[#allocation2 + $0xe8] sm:$0xff] %vm217_vm8, %v1290_v42  ;;  %v4646_v41 = vrot.slane %v5968_v61, 5  ;;  %v5713_v61 = vld [vmem:[%s6193_s29 + $0x80] sm:$0x1] }
 0x1bd   : > { %v1885_v21 = vld [vmem:[#allocation2 + $0xd8] sm:$0xff] }
 0x1be   : > { %v2139_v9 = vadd.f32 %v7396_v52, %v1885_v21  ;;  %1818 = vst.msk [vmem:[#allocation2 + $0xe0] sm:$0xff] %vm217_vm8, %v1786_v15  ;;  %v4021_v52 = vor.u32 %v4020_v20, %v4017_v17  ;;  %v4648_v45 = vrot.slane %v4646_v41, 4  ;;  %v4037_v15 = vsel %vm6246_vm6, %v4032_v58, %v4036_v35 }
 0x1bf   : > { %v2250_v29 = vld [vmem:[#allocation2 + $0xd0] sm:$0xff]  ;;  %v1750_v56 = vpop.f32.mrf.mxu2  ;;  %v4052_v17 = vshrl.u32 %v5906_v46, 16  ;;  %v4647_v21 = vsel %vm6254_vm7, %v5999_v49, %v4646_v41  ;;  %v3090_v35 = vrot.slane %v5713_v61, 5  ;;  %v5970_v49 = vld [vmem:[%s6193_s29 + $0x84] sm:$0xe] }
 0x1c0   : > { %2171 = vst.msk [vmem:[#allocation2 + $0xd8] sm:$0xff] %vm217_vm8, %v2139_v9  ;;  %v2856_v14 = vadd.f32 %v7349_v47, %v2250_v29  ;;  %v7449_v53 = vpop.f32.mrf.mxu3  ;;  %v5740_v47 = vrot.slane %v5708_v30, 9  ;;  %v4022_v57 = vrot.slane %v4021_v52, 4  ;;  %v4225_v29 = vunpack.c.l.b16 %v4037_v15 }
 0x1c1   : > { %v1256_v40 = vpop.f32.mrf.mxu1  ;;  %v4044_v30 = vrot.slane %v4042_v10, 5  ;;  %v4718_v39 = vunpack.c.l.b16 %v4647_v21 }
 0x1c2   : > { %2888 = vst.msk [vmem:[#allocation2 + $0xd0] sm:$0xff] %vm217_vm8, %v2856_v14  ;;  %v1291_v44 = vadd.f32 %v1256_v40, %v682_v24  ;;  %v7455_v22 = vpop.f32.mrf.mxu0  ;;  %v3081_v42 = vsel %vm6254_vm7, %v5740_v47, %v3080_v26  ;;  %v7489_v26 = vld [vmem:[%s6193_s29 + $0x7c] sm:$0xf] }
 0x1c3   : > { %v1402_v48 = vld [vmem:[#allocation2 + $0xe8] sm:$0xff]  ;;  %v3152_v25 = vunpack.c.l.b16 %v3081_v42  ;;  %v3087_v40 = vrot.slane %v7489_v26, 5 }
 0x1c4   : > { %v1787_v31 = vadd.f32 %v1750_v56, %v1402_v48  ;;  %1323 = vst.msk [vmem:[#allocation2 + $0xf0] sm:$0xff] %vm217_vm8, %v1291_v44  ;;  %5756 = vmatmul.msk.bf16.gmra.mxu1 %vm398_vm1, %v3175_v13  ;;  %5869 = vmatmul.msk.bf16.gmra.mxu2 %vm398_vm1, %v6066_v60  ;;  %v4041_v56 = vrot.slane %v4039_v28, 4  ;;  %v7492_v13 = vrot.slane %v4048_v16, 5  ;;  %v4054_v60 = vrot.slane %v4052_v17, 4  ;;  %v5909_v28 = vld [vmem:[%s6193_s29 + $0x94] sm:$0xf] }
 0x1c5   : > { %v1886_v55 = vld [vmem:[#allocation2 + $0xe0] sm:$0xff]  ;;  %5934 = vmatmul.msk.bf16.gmra.mxu3 %vm398_vm1, %v4247_v37  ;;  %6015 = vmatmul.msk.bf16.gmra.mxu0 %vm398_vm1, %v4741_v43  ;;  %v5907_v37 = vld [vmem:[%s6193_s29 + $0x8c] sm:$0x1]  ;;  %v5711_v43 = vld [vmem:[%s6193_s29 + $0x78] sm:$0xe]  ;;  %v3176_v47 = vpack.c.b16 %v3153_v0, %v3152_v25  ;;  %v3089_v58 = vrot.slane %v3087_v40, 4 }
 0x1c6   : > { %v2140_v63 = vadd.f32 %v7421_v27, %v1886_v55  ;;  %1819 = vst.msk [vmem:[#allocation2 + $0xe8] sm:$0xff] %vm217_vm8, %v1787_v31  ;;  %v4027_v27 = vsel %vm6246_vm6, %v4022_v57, %v7439_v19  ;;  %v4650_v19 = vsel %vm6254_vm7, %v4648_v45, %v4649_v2  ;;  %v4045_v5 = vor.u32 %v4044_v30, %v4041_v56  ;;  %v5972_v45 = vld [vmem:[%s6193_s29 + $0x8c] sm:$0x1] }
 0x1c7   : > { %v2251_v51 = vld [vmem:[#allocation2 + $0xd8] sm:$0xff]  ;;  %v1753_v4 = vpop.f32.mrf.mxu2  ;;  %v4224_v9 = vunpack.c.l.b16 %v4027_v27  ;;  %v4719_v52 = vunpack.c.l.b16 %v4650_v19  ;;  %v4055_v31 = vor.u32 %v4054_v60, %v7492_v13  ;;  %v4058_v57 = vshll.u32 %v5907_v37, 16  ;;  %v2943_v26 = vld [vmem:[#allocation2 + $0x8] sm:$0xff] }
 0x1c8   : > { %2172 = vst.msk [vmem:[#allocation2 + $0xe0] sm:$0xff] %vm217_vm8, %v2140_v63  ;;  %v2857_v8 = vadd.f32 %v7376_v11, %v2251_v51  ;;  %v7474_v36 = vpop.f32.mrf.mxu3  ;;  %v5971_v63 = vld [vmem:[%s6193_s29 + $0x88] sm:$0xf]  ;;  %v4046_v7 = vrot.slane %v4045_v5, 4  ;;  %v4656_v15 = vrot.slane %v5972_v45, 5  ;;  %v3091_v21 = vsel %vm6254_vm7, %v3089_v58, %v3090_v35  ;;  %v2944_v45 = vld [vmem:[#allocation2 + $0x10] sm:$0xff] }
 0x1c9   : > { %v1258_v12 = vpop.f32.mrf.mxu1  ;;  %v4742_v41 = vpack.c.b16 %v4719_v52, %v4718_v39  ;;  %v4653_v2 = vrot.slane %v5971_v63, 5  ;;  %v4060_v27 = vrot.slane %v4058_v57, 5  ;;  %v4072_v0 = vshll.u32 %v5909_v28, 16  ;;  %v7543_v37 = vld [vmem:[%s6193_s29 + $0x88] sm:$0xf] }
 0x1ca   : > { %2889 = vst.msk [vmem:[#allocation2 + $0xd8] sm:$0xff] %vm217_vm8, %v2857_v8  ;;  %v1292_v20 = vadd.f32 %v1258_v12, %v683_v62  ;;  %v7482_v11 = vpop.f32.mrf.mxu0  ;;  %v4056_v8 = vrot.slane %v4055_v31, 4  ;;  %v6000_v62 = vrot.slane %v5970_v49, 9  ;;  %v6068_v58 = vld [vmem:[%s6193_s29 + $0x84] sm:$0xff]  ;;  %v5716_v63 = vld [vmem:[%s6193_s29 + $0x8c] sm:$0x1] }
 0x1cb   : > { %v1403_v33 = vld [vmem:[#allocation2 + $0xf0] sm:$0xff]  ;;  %v4655_v12 = vrot.slane %v4653_v2, 4 }
 0x1cc   : > { %v1788_v34 = vadd.f32 %v1753_v4, %v1403_v33  ;;  %1324 = vst.msk [vmem:[#allocation2 + $0xf8] sm:$0xff] %vm217_vm8, %v1292_v20  ;;  %v5908_v4 = vld [vmem:[%s6193_s29 + $0x90] sm:$0xf]  ;;  %v4061_v30 = vsel %vm6246_vm6, %v4056_v8, %v4060_v27  ;;  %v5911_v27 = vld [vmem:[%s6193_s29 + $0x9c] sm:$0xf] }
 0x1cd   : > { %v1887_v14 = vld [vmem:[#allocation2 + $0xe8] sm:$0xff]  ;;  %v4063_v19 = vshrl.u32 %v5908_v4, 16  ;;  %v4657_v60 = vsel %vm6254_vm7, %v4655_v12, %v4656_v15  ;;  %v3097_v12 = vrot.slane %v5716_v63, 5  ;;  %v5973_v15 = vld [vmem:[%s6193_s29 + $0x90] sm:$0xe] }
 0x1ce   : > { %v2141_v24 = vadd.f32 %v7449_v53, %v1887_v14  ;;  %1820 = vst.msk [vmem:[#allocation2 + $0xf0] sm:$0xff] %vm217_vm8, %v1788_v34  ;;  %v4248_v53 = vpack.c.b16 %v4225_v29, %v4224_v9  ;;  %v4076_v9 = vshrl.u32 %v5909_v28, 16  ;;  %v4051_v29 = vsel %vm6246_vm6, %v4046_v7, %v7492_v13  ;;  %v5912_v28 = vld [vmem:[%s6193_s29 + $0xa0] sm:$0xf] }
 0x1cf   : > { %v2252_v23 = vld [vmem:[#allocation2 + $0xe0] sm:$0xff]  ;;  %v1755_v18 = vpop.f32.mrf.mxu2 }
 0x1d0   : > { %2173 = vst.msk [vmem:[#allocation2 + $0xe8] sm:$0xff] %vm217_vm8, %v2141_v24  ;;  %v2858_v44 = vadd.f32 %v7402_v59, %v2252_v23  ;;  %v7503_v48 = vpop.f32.mrf.mxu3  ;;  %v5741_v59 = vrot.slane %v5711_v43, 9  ;;  %v3155_v24 = vunpack.c.l.b16 %v3091_v21  ;;  %v4078_v43 = vrot.slane %v4076_v9, 4 }
 0x1d1   : > { %v3244_v38 = vpop.f32.mrf.mxu1  ;;  %v4090_v9 = vshll.u32 %v5911_v27, 16 }
 0x1d2   : > { %2890 = vst.msk [vmem:[#allocation2 + $0xe0] sm:$0xff] %vm217_vm8, %v2858_v44  ;;  %v3324_v55 = vadd.f32 %v3244_v38, %v2942_v54  ;;  %v7507_v50 = vpop.f32.mrf.mxu0  ;;  %v3088_v20 = vsel %vm6254_vm7, %v5741_v59, %v3087_v40  ;;  %v4065_v40 = vrot.slane %v4063_v19, 4  ;;  %v4226_v44 = vunpack.c.l.b16 %v4051_v29 }
 0x1d3   : > { %v1404_v46 = vld [vmem:[#allocation2 + $0xf8] sm:$0xff]  ;;  %v3154_v52 = vunpack.c.l.b16 %v3088_v20  ;;  %v4721_v54 = vunpack.c.l.b16 %v4657_v60 }
 0x1d4   : > { %v1789_v51 = vadd.f32 %v1755_v18, %v1404_v46  ;;  %3356 = vst.msk [vmem:[#allocation2] sm:$0xff] %vm217_vm8, %v3324_v55  ;;  %5757 = vmatmul.msk.bf16.gmra.mxu1 %vm398_vm1, %v3176_v47  ;;  %5870 = vmatmul.msk.bf16.gmra.mxu2 %vm398_vm1, %v6067_v3  ;;  %v7545_v18 = vrot.slane %v4072_v0, 5  ;;  %v4227_v47 = vunpack.c.l.b16 %v4061_v30  ;;  %v5910_v3 = vld [vmem:[%s6193_s29 + $0x98] sm:$0x1]  ;;  %v3094_v55 = vrot.slane %v7543_v37, 5 }
 0x1d5   : > { %v1888_v42 = vld [vmem:[#allocation2 + $0xf0] sm:$0xff]  ;;  %5935 = vmatmul.msk.bf16.gmra.mxu3 %vm398_vm1, %v4248_v53  ;;  %6016 = vmatmul.msk.bf16.gmra.mxu0 %vm398_vm1, %v4742_v41  ;;  %v3177_v57 = vpack.c.b16 %v3155_v24, %v3154_v52  ;;  %v5714_v41 = vld [vmem:[%s6193_s29 + $0x84] sm:$0xe]  ;;  %v4082_v49 = vshll.u32 %v5910_v3, 16  ;;  %v4087_v0 = vshrl.u32 %v5911_v27, 16  ;;  %v2945_v37 = vld [vmem:[#allocation2 + $0x18] sm:$0xff] }
 0x1d6   : > { %v2142_v10 = vadd.f32 %v7474_v36, %v1888_v42  ;;  %1821 = vst.msk [vmem:[#allocation2 + $0xf8] sm:$0xff] %vm217_vm8, %v1789_v51  ;;  %v4066_v36 = vshll.u32 %v5908_v4, 16  ;;  %v4079_v46 = vor.u32 %v4078_v43, %v7545_v18  ;;  %v4249_v51 = vpack.c.b16 %v4227_v47, %v4226_v44  ;;  %v5974_v42 = vld [vmem:[%s6193_s29 + $0x94] sm:$0xf] }
 0x1d7   : > { %v2253_v16 = vld [vmem:[#allocation2 + $0xe8] sm:$0xff]  ;;  %v3598_v17 = vpop.f32.mrf.mxu2  ;;  %v4084_v19 = vrot.slane %v4082_v49, 5 }
 0x1d8   : > { %2174 = vst.msk [vmem:[#allocation2 + $0xf0] sm:$0xff] %vm217_vm8, %v2142_v10  ;;  %v2859_v33 = vadd.f32 %v7429_v32, %v2253_v16  ;;  %v7527_v25 = vpop.f32.mrf.mxu3  ;;  %v4654_v32 = vsel %vm6254_vm7, %v6000_v62, %v4653_v2  ;;  %v4068_v23 = vrot.slane %v4066_v36, 5  ;;  %v3096_v62 = vrot.slane %v3094_v55, 4 }
 0x1d9   : > { %v3246_v34 = vpop.f32.mrf.mxu1  ;;  %v4720_v53 = vunpack.c.l.b16 %v4654_v32  ;;  %v4660_v16 = vrot.slane %v5974_v42, 5  ;;  %v4080_v21 = vrot.slane %v4079_v46, 4 }
 0x1da   : > { %2891 = vst.msk [vmem:[#allocation2 + $0xe8] sm:$0xff] %vm217_vm8, %v2859_v33  ;;  %v3325_v56 = vadd.f32 %v3246_v34, %v2943_v26  ;;  %v7535_v14 = vpop.f32.mrf.mxu0  ;;  %v5975_v33 = vld [vmem:[%s6193_s29 + $0x98] sm:$0x1]  ;;  %v4096_v26 = vshll.u32 %v5912_v28, 16  ;;  %v4100_v34 = vshrl.u32 %v5912_v28, 16 }
 0x1db   : > { %v3424_v39 = vld [vmem:[#allocation2] sm:$0xff]  ;;  %v4743_v4 = vpack.c.b16 %v4721_v54, %v4720_v53  ;;  %v4662_v30 = vrot.slane %v4660_v16, 4  ;;  %v4663_v32 = vrot.slane %v5975_v33, 5  ;;  %v4085_v43 = vsel %vm6246_vm6, %v4080_v21, %v4084_v19  ;;  %v5718_v53 = vld [vmem:[%s6193_s29 + $0x94] sm:$0xf] }
 0x1dc   : > { %v3678_v13 = vadd.f32 %v3598_v17, %v3424_v39  ;;  %3357 = vst.msk [vmem:[#allocation2 + $0x8] sm:$0xff] %vm217_vm8, %v3325_v56  ;;  %v6001_v56 = vrot.slane %v5973_v15, 9  ;;  %v7587_v44 = vrot.slane %v4096_v26, 5  ;;  %v4102_v54 = vrot.slane %v4100_v34, 4 }
 0x1dd   : > { %v1889_v61 = vld [vmem:[#allocation2 + $0xf8] sm:$0xff]  ;;  %v4229_v63 = vunpack.c.l.b16 %v4085_v43  ;;  %v3101_v46 = vrot.slane %v5718_v53, 5 }
 0x1de   : > { %v2143_v38 = vadd.f32 %v7503_v48, %v1889_v61  ;;  %3710 = vst.msk [vmem:[#allocation2] sm:$0xff] %vm217_vm8, %v3678_v13  ;;  %v4069_v48 = vor.u32 %v4068_v23, %v4065_v40  ;;  %v4089_v61 = vrot.slane %v4087_v0, 4  ;;  %v4103_v42 = vor.u32 %v4102_v54, %v7587_v44  ;;  %v5977_v0 = vld [vmem:[%s6193_s29 + $0xa0] sm:$0xf] }
 0x1df   : > { %v2254_v5 = vld [vmem:[#allocation2 + $0xf0] sm:$0xff]  ;;  %v3600_v31 = vpop.f32.mrf.mxu2  ;;  %v3103_v21 = vrot.slane %v3101_v46, 4 }
 0x1e0   : > { %2175 = vst.msk [vmem:[#allocation2 + $0xf8] sm:$0xff] %vm217_vm8, %v2143_v38  ;;  %v2860_v59 = vadd.f32 %v7455_v22, %v2254_v5  ;;  %v7555_v35 = vpop.f32.mrf.mxu3  ;;  %v5742_v22 = vrot.slane %v5714_v41, 9  ;;  %v4070_v20 = vrot.slane %v4069_v48, 4  ;;  %v4664_v38 = vsel %vm6254_vm7, %v4662_v30, %v4663_v32  ;;  %v5717_v48 = vld [vmem:[%s6193_s29 + $0x90] sm:$0xe] }
 0x1e1   : > { %v3249_v2 = vpop.f32.mrf.mxu1  ;;  %v4104_v34 = vrot.slane %v4103_v42, 4 }
 0x1e2   : > { %2892 = vst.msk [vmem:[#allocation2 + $0xf0] sm:$0xff] %vm217_vm8, %v2860_v59  ;;  %v3326_v7 = vadd.f32 %v3249_v2, %v2944_v45  ;;  %v7561_v8 = vpop.f32.mrf.mxu0  ;;  %v3095_v40 = vsel %vm6254_vm7, %v5742_v22, %v3094_v55  ;;  %v4075_v13 = vsel %vm6246_vm6, %v4070_v20, %v7545_v18  ;;  %v4661_v18 = vsel %vm6254_vm7, %v6001_v56, %v4660_v16  ;;  %v5914_v16 = vld [vmem:[%s6193_s29 + $0xa8] sm:$0xf] }
 0x1e3   : > { %v3425_v10 = vld [vmem:[#allocation2 + $0x8] sm:$0xff]  ;;  %v3156_v41 = vunpack.c.l.b16 %v3095_v40  ;;  %v4228_v59 = vunpack.c.l.b16 %v4075_v13  ;;  %v4722_v49 = vunpack.c.l.b16 %v4661_v18  ;;  %v4723_v45 = vunpack.c.l.b16 %v4664_v38  ;;  %v5978_v13 = vld [vmem:[%s6193_s29 + $0xa4] sm:$0x1] }
 0x1e4   : > { %v3679_v17 = vadd.f32 %v3600_v31, %v3425_v10  ;;  %3358 = vst.msk [vmem:[#allocation2 + $0x10] sm:$0xff] %vm217_vm8, %v3326_v7  ;;  %5758 = vmatmul.msk.bf16.gmra.mxu1 %vm398_vm1, %v3177_v57  ;;  %5871 = vmatmul.msk.bf16.gmra.mxu2 %vm398_vm1, %v6068_v58  ;;  %v5913_v31 = vld [vmem:[%s6193_s29 + $0xa4] sm:$0x1]  ;;  %v4111_v30 = vshrl.u32 %v5914_v16, 16  ;;  %v4114_v32 = vshll.u32 %v5914_v16, 16  ;;  %v4670_v54 = vrot.slane %v5978_v13, 5 }
 0x1e5   : > { %v3790_v36 = vld [vmem:[#allocation2] sm:$0xff]  ;;  %5936 = vmatmul.msk.bf16.gmra.mxu3 %vm398_vm1, %v4249_v51  ;;  %6017 = vmatmul.msk.bf16.gmra.mxu0 %vm398_vm1, %v4743_v4  ;;  %v5719_v51 = vld [vmem:[%s6193_s29 + $0x98] sm:$0x1]  ;;  %v4106_v7 = vshll.u32 %v5913_v31, 16  ;;  %v4250_v20 = vpack.c.b16 %v4229_v63, %v4228_v59  ;;  %v4744_v33 = vpack.c.b16 %v4723_v45, %v4722_v49  ;;  %v5720_v59 = vld [vmem:[%s6193_s29 + $0x9c] sm:$0xe] }
 0x1e6   : > { %v4396_v29 = vadd.f32 %v7527_v25, %v3790_v36  ;;  %3711 = vst.msk [vmem:[#allocation2 + $0x8] sm:$0xff] %vm217_vm8, %v3679_v17  ;;  %v3098_v25 = vsel %vm6254_vm7, %v3096_v62, %v3097_v12  ;;  %v2946_v10 = vld [vmem:[#allocation2 + $0x20] sm:$0xff]  ;;  %v6069_v12 = vld [vmem:[%s6193_s29 + $0x90] sm:$0xff]  ;;  %v3104_v19 = vrot.slane %v5719_v51, 5  ;;  %v5915_v36 = vld [vmem:[%s6193_s29 + $0xac] sm:$0xf] }
 0x1e7   : > { %v2255_v60 = vld [vmem:[#allocation2 + $0xf8] sm:$0xff]  ;;  %v3603_v39 = vpop.f32.mrf.mxu2  ;;  %v3157_v55 = vunpack.c.l.b16 %v3098_v25  ;;  %v4120_v40 = vshll.u32 %v5915_v36, 16  ;;  %v4124_v25 = vshrl.u32 %v5915_v36, 16  ;;  %v5917_v13 = vld [vmem:[%s6193_s29 + $0xb4] sm:$0xf] }
 0x1e8   : > { %4428 = vst.msk [vmem:[#allocation2] sm:$0xff] %vm217_vm8, %v4396_v29  ;;  %v2861_v52 = vadd.f32 %v7482_v11, %v2255_v60  ;;  %v7576_v24 = vpop.f32.mrf.mxu3  ;;  %v4092_v11 = vrot.slane %v4090_v9, 5  ;;  %v4108_v29 = vrot.slane %v4106_v7, 5  ;;  %v5976_v60 = vld [vmem:[%s6193_s29 + $0x9c] sm:$0xe]  ;;  %v3105_v43 = vsel %vm6254_vm7, %v3103_v21, %v3104_v19 }
 0x1e9   : > { %v3251_v23 = vpop.f32.mrf.mxu1  ;;  %v3178_v62 = vpack.c.b16 %v3157_v55, %v3156_v41  ;;  %v4116_v41 = vrot.slane %v4114_v32, 5  ;;  %v7643_v63 = vrot.slane %v4120_v40, 5  ;;  %v3159_v45 = vunpack.c.l.b16 %v3105_v43  ;;  %v5722_v7 = vld [vmem:[%s6193_s29 + $0xa4] sm:$0x1] }
 0x1ea   : > { %2893 = vst.msk [vmem:[#allocation2 + $0xf8] sm:$0xff] %vm217_vm8, %v2861_v52  ;;  %v3327_v47 = vadd.f32 %v3251_v23, %v2945_v37  ;;  %v7590_v3 = vpop.f32.mrf.mxu0  ;;  %v4093_v4 = vor.u32 %v4092_v11, %v4089_v61  ;;  %v7627_v61 = vld [vmem:[%s6193_s29 + $0xa0] sm:$0xf]  ;;  %v4109_v31 = vsel %vm6246_vm6, %v4104_v34, %v4108_v29  ;;  %v3111_v36 = vrot.slane %v5722_v7, 5 }
 0x1eb   : > { %v3426_v5 = vld [vmem:[#allocation2 + $0x10] sm:$0xff] }
 0x1ec   : > { %v3680_v57 = vadd.f32 %v3603_v39, %v3426_v5  ;;  %3359 = vst.msk [vmem:[#allocation2 + $0x18] sm:$0xff] %vm217_vm8, %v3327_v47  ;;  %v4094_v26 = vrot.slane %v4093_v4, 4  ;;  %v4667_v39 = vrot.slane %v5977_v0, 5  ;;  %v6002_v47 = vrot.slane %v5976_v60, 9 }
 0x1ed   : > { %v3791_v58 = vld [vmem:[#allocation2 + $0x8] sm:$0xff] }
 0x1ee   : > { %v4397_v2 = vadd.f32 %v7555_v35, %v3791_v58  ;;  %3712 = vst.msk [vmem:[#allocation2 + $0x10] sm:$0xff] %vm217_vm8, %v3680_v57  ;;  %v5743_v35 = vrot.slane %v5717_v48, 9  ;;  %v4669_v53 = vrot.slane %v4667_v39, 4  ;;  %v4099_v5 = vsel %vm6246_vm6, %v4094_v26, %v7587_v44 }
 0x1ef   : > { %v4508_v22 = vld [vmem:[#allocation2] sm:$0xff]  ;;  %v3605_v27 = vpop.f32.mrf.mxu2  ;;  %v4113_v57 = vrot.slane %v4111_v30, 4  ;;  %v3108_v58 = vrot.slane %v7627_v61, 5  ;;  %v4126_v48 = vrot.slane %v4124_v25, 4  ;;  %v2948_v61 = vld [vmem:[#allocation2 + $0x30] sm:$0xff] }
 0x1f0   : > { %4429 = vst.msk [vmem:[#allocation2 + $0x8] sm:$0xff] %vm217_vm8, %v4397_v2  ;;  %v4890_v28 = vadd.f32 %v7507_v50, %v4508_v22  ;;  %v7607_v15 = vpop.f32.mrf.mxu3  ;;  %v3102_v23 = vsel %vm6254_vm7, %v5743_v35, %v3101_v46  ;;  %v2947_v46 = vld [vmem:[#allocation2 + $0x28] sm:$0xff]  ;;  %v5916_v2 = vld [vmem:[%s6193_s29 + $0xb0] sm:$0x1]  ;;  %v4668_v22 = vsel %vm6254_vm7, %v6002_v47, %v4667_v39  ;;  %v6070_v39 = vld [vmem:[%s6193_s29 + $0x9c] sm:$0xff] }
 0x1f1   : > { %v3254_v17 = vpop.f32.mrf.mxu1  ;;  %v4117_v35 = vor.u32 %v4116_v41, %v4113_v57  ;;  %v4130_v21 = vshll.u32 %v5916_v2, 16  ;;  %v4724_v0 = vunpack.c.l.b16 %v4668_v22  ;;  %v5918_v57 = vld [vmem:[%s6193_s29 + $0xb8] sm:$0xf] }
 0x1f2   : > { %4922 = vst.msk [vmem:[#allocation2] sm:$0xff] %vm217_vm8, %v4890_v28  ;;  %v3328_v9 = vadd.f32 %v3254_v17, %v2946_v10  ;;  %v7613_v50 = vpop.f32.mrf.mxu0  ;;  %v7659_v10 = vunpack.c.l.b16 %v4099_v5  ;;  %v3110_v17 = vrot.slane %v3108_v58, 4 }
 0x1f3   : > { %v3427_v56 = vld [vmem:[#allocation2 + $0x18] sm:$0xff]  ;;  %v4118_v32 = vrot.slane %v4117_v35, 4  ;;  %v4132_v25 = vrot.slane %v4130_v21, 5 }
 0x1f4   : > { %v3681_v52 = vadd.f32 %v3605_v27, %v3427_v56  ;;  %3360 = vst.msk [vmem:[#allocation2 + $0x20] sm:$0xff] %vm217_vm8, %v3328_v9  ;;  %5759 = vmatmul.msk.bf16.gmra.mxu1 %vm398_vm1, %v3178_v62  ;;  %5872 = vmatmul.msk.bf16.gmra.mxu2 %vm398_vm1, %v6069_v12  ;;  %v4671_v27 = vsel %vm6254_vm7, %v4669_v53, %v4670_v54  ;;  %v4231_v62 = vunpack.c.l.b16 %v4109_v31  ;;  %v5744_v12 = vrot.slane %v5720_v59, 9  ;;  %v7689_v31 = vld [vmem:[%s6193_s29 + $0xac] sm:$0xf] }
 0x1f5   : > { %v3792_v37 = vld [vmem:[#allocation2 + $0x10] sm:$0xff]  ;;  %5937 = vmatmul.msk.bf16.gmra.mxu3 %vm398_vm1, %v4250_v20  ;;  %6018 = vmatmul.msk.bf16.gmra.mxu0 %vm398_vm1, %v4744_v33  ;;  %v4127_v20 = vor.u32 %v4126_v48, %v7643_v63  ;;  %v4725_v9 = vunpack.c.l.b16 %v4671_v27  ;;  %v4135_v59 = vshrl.u32 %v5917_v13, 16  ;;  %v5979_v48 = vld [vmem:[%s6193_s29 + $0xa8] sm:$0xe]  ;;  %v3115_v7 = vrot.slane %v7689_v31, 5 }
 0x1f6   : > { %v4398_v11 = vadd.f32 %v7576_v24, %v3792_v37  ;;  %3713 = vst.msk [vmem:[#allocation2 + $0x18] sm:$0xff] %vm217_vm8, %v3681_v52  ;;  %v4251_v30 = vpack.c.b16 %v4231_v62, %v7659_v10  ;;  %v7675_v40 = vsel %vm6254_vm7, %v5744_v12, %v3108_v58  ;;  %v4138_v58 = vshll.u32 %v5917_v13, 16  ;;  %v5723_v10 = vld [vmem:[%s6193_s29 + $0xa8] sm:$0xe] }
 0x1f7   : > { %v4509_v18 = vld [vmem:[#allocation2 + $0x8] sm:$0xff]  ;;  %v3608_v38 = vpop.f32.mrf.mxu2  ;;  %v4745_v47 = vpack.c.b16 %v4725_v9, %v4724_v0  ;;  %v4144_v62 = vshll.u32 %v5918_v57, 16  ;;  %v5725_v0 = vld [vmem:[%s6193_s29 + $0xb0] sm:$0x1]  ;;  %v4137_v9 = vrot.slane %v4135_v59, 4 }
 0x1f8   : > { %4430 = vst.msk [vmem:[#allocation2 + $0x10] sm:$0xff] %vm217_vm8, %v4398_v11  ;;  %v4891_v24 = vadd.f32 %v7535_v14, %v4509_v18  ;;  %v7639_v55 = vpop.f32.mrf.mxu3  ;;  %v3158_v14 = vunpack.c.l.b16 %v3102_v23  ;;  %v7682_v11 = vsel %vm6254_vm7, %v3110_v17, %v3111_v36  ;;  %v6003_v17 = vrot.slane %v5979_v48, 9 }
 0x1f9   : > { %v4954_v44 = vld [vmem:[#allocation2] sm:$0xff]  ;;  %v3256_v49 = vpop.f32.mrf.mxu1  ;;  %v3161_v27 = vunpack.c.l.b16 %v7682_v11 }
 0x1fa   : > { %v5164_v51 = vpack.c.bf16 %v4954_v44, %v4954_v44  ;;  %4923 = vst.msk [vmem:[#allocation2 + $0x8] sm:$0xff] %vm217_vm8, %v4891_v24  ;;  %v3329_v4 = vadd.f32 %v3256_v49, %v2947_v46  ;;  %v7652_v42 = vpop.f32.mrf.mxu0  ;;  %v5055_v19 = vmul.f32 %v4954_v44, %v4954_v44  ;;  %v3179_v56 = vpack.c.b16 %v3159_v45, %v3158_v14  ;;  %v5981_v45 = vld [vmem:[%s6193_s29 + $0xb0] sm:$0x1] }
 0x1fb   : > { %v3428_v28 = vld [vmem:[#allocation2 + $0x20] sm:$0xff]  ;;  %v4986_v37 = vsel %vm217_vm8, %v4954_v44, 0.0  ;;  %v4123_v24 = vsel %vm6246_vm6, %v4118_v32, %v7643_v63  ;;  %v5980_v44 = vld [vmem:[%s6193_s29 + $0xac] sm:$0xf]  ;;  %v4677_v21 = vrot.slane %v5981_v45, 5 }
 0x1fc   : > { %5197 = vst.msk [vmem:[%s7648_s18] sm:$0xf] %vm5196_vm9, %v5164_v51  ;;  %v3682_v16 = vadd.f32 %v3608_v38, %v3428_v28  ;;  %v5087_v23 = vsel %vm217_vm8, %v5055_v19, 0.0  ;;  %v7712_v28 = vunpack.c.l.b16 %v4123_v24  ;;  %v2949_v19 = vld [vmem:[#allocation2 + $0x38] sm:$0xff] }
 0x1fd   : > { %v3793_v33 = vld [vmem:[#allocation2 + $0x18] sm:$0xff]  ;;  %3361 = vst.msk [vmem:[#allocation2 + $0x28] sm:$0xff] %vm217_vm8, %v3329_v4  ;;  %v3160_v4 = vunpack.c.l.b16 %v7675_v40 }
 0x1fe   : > { %v4399_v26 = vadd.f32 %v7607_v15, %v3793_v33  ;;  %3714 = vst.msk [vmem:[#allocation2 + $0x20] sm:$0xff] %vm217_vm8, %v3682_v16  ;;  %v4128_v15 = vrot.slane %v4127_v20, 4  ;;  %v4148_v16 = vshrl.u32 %v5918_v57, 16  ;;  %v4674_v20 = vrot.slane %v5980_v44, 5  ;;  %v5919_v32 = vld [vmem:[%s6193_s29 + $0xbc] sm:$0x1] }
 0x1ff   : > { %v4510_v34 = vld [vmem:[#allocation2 + $0x10] sm:$0xff]  ;;  %v3610_v29 = vpop.f32.mrf.mxu2 }
 0x200   : > { %4431 = vst.msk [vmem:[#allocation2 + $0x18] sm:$0xff] %vm217_vm8, %v4399_v26  ;;  %v4892_v60 = vadd.f32 %v7561_v8, %v4510_v34  ;;  %v7671_v52 = vpop.f32.mrf.mxu3  ;;  %v4133_v14 = vsel %vm6246_vm6, %v4128_v15, %v4132_v25  ;;  %v4140_v26 = vrot.slane %v4138_v58, 5 }
 0x201   : > { %v4955_v43 = vld [vmem:[#allocation2 + $0x8] sm:$0xff]  ;;  %v3259_v8 = vpop.f32.mrf.mxu1  ;;  %v7720_v36 = vunpack.c.l.b16 %v4133_v14 }
 0x202   : > { %v4987_v53 = vsel %vm217_vm8, %v4955_v43, 0.0  ;;  %v5056_v54 = vmul.f32 %v4955_v43, %v4955_v43  ;;  %v5165_v18 = vpack.c.bf16 %v4955_v43, %v4955_v43  ;;  %4924 = vst.msk [vmem:[#allocation2 + $0x10] sm:$0xff] %vm217_vm8, %v4892_v60  ;;  %v3330_v38 = vadd.f32 %v3259_v8, %v2948_v61  ;;  %v7686_v5 = vpop.f32.mrf.mxu0 }
 0x203   : > { %v4988_v41 = vadd.f32 %v4987_v53, %v4986_v37  ;;  %v4675_v60 = vsel %vm6254_vm7, %v6003_v17, %v4674_v20  ;;  %v4150_v43 = vrot.slane %v4148_v16, 4  ;;  %v4141_v53 = vor.u32 %v4140_v26, %v4137_v9 }
 0x204   : > { %v5088_v46 = vsel %vm217_vm8, %v5056_v54, 0.0  ;;  %5198 = vst.msk [vmem:[%s7648_s18 + $0x4] sm:$0xf] %vm5196_vm9, %v5165_v18  ;;  %v3429_v49 = vld [vmem:[#allocation2 + $0x28] sm:$0xff]  ;;  %5760 = vmatmul.msk.bf16.gmra.mxu1 %vm398_vm1, %v3179_v56  ;;  %5873 = vmatmul.msk.bf16.gmra.mxu2 %vm398_vm1, %v6070_v39  ;;  %v5745_v56 = vrot.slane %v5723_v10, 9  ;;  %v4676_v39 = vrot.slane %v4674_v20, 4  ;;  %v4726_v31 = vunpack.c.l.b16 %v4675_v60 }
 0x205   : > { %v5089_v2 = vadd.f32 %v5088_v46, %v5087_v23  ;;  %v3794_v63 = vld [vmem:[#allocation2 + $0x20] sm:$0xff]  ;;  %v3683_v51 = vadd.f32 %v3610_v29, %v3429_v49  ;;  %3362 = vst.msk [vmem:[#allocation2 + $0x30] sm:$0xff] %vm217_vm8, %v3330_v38  ;;  %5938 = vmatmul.msk.bf16.gmra.mxu3 %vm398_vm1, %v4251_v30  ;;  %6019 = vmatmul.msk.bf16.gmra.mxu0 %vm398_vm1, %v4745_v47  ;;  %v3117_v30 = vrot.slane %v3115_v7, 4  ;;  %v7730_v23 = vrot.slane %v4144_v62, 5  ;;  %v6071_v49 = vld [vmem:[%s6193_s29 + $0xa8] sm:$0xff] }
 0x206   : > { %v4400_v22 = vadd.f32 %v7639_v55, %v3794_v63  ;;  %v4678_v61 = vsel %vm6254_vm7, %v4676_v39, %v4677_v21  ;;  %v3118_v47 = vrot.slane %v5725_v0, 5  ;;  %v4154_v54 = vshll.u32 %v5919_v32, 16  ;;  %v5983_v0 = vld [vmem:[%s6193_s29 + $0xb8] sm:$0xf] }
 0x207   : > { %3715 = vst.msk [vmem:[#allocation2 + $0x28] sm:$0xff] %vm217_vm8, %v3683_v51  ;;  %v4511_v12 = vld [vmem:[#allocation2 + $0x18] sm:$0xff]  ;;  %v3613_v35 = vpop.f32.mrf.mxu2  ;;  %v4727_v57 = vunpack.c.l.b16 %v4678_v61  ;;  %v4151_v48 = vor.u32 %v4150_v43, %v7730_v23  ;;  %v3180_v46 = vpack.c.b16 %v3161_v27, %v3160_v4  ;;  %v4252_v45 = vpack.c.b16 %v7720_v36, %v7712_v28  ;;  %v2950_v51 = vld [vmem:[#allocation2 + $0x40] sm:$0xff] }
 0x208   : > { %4432 = vst.msk [vmem:[#allocation2 + $0x20] sm:$0xff] %vm217_vm8, %v4400_v22  ;;  %v4893_v55 = vadd.f32 %v7590_v3, %v4511_v12  ;;  %v7718_v33 = vpop.f32.mrf.mxu3  ;;  %v4142_v4 = vrot.slane %v4141_v53, 4  ;;  %v4156_v27 = vrot.slane %v4154_v54, 5 }
 0x209   : > { %v4956_v34 = vld [vmem:[#allocation2 + $0x10] sm:$0xff]  ;;  %v3261_v29 = vpop.f32.mrf.mxu1  ;;  %v4746_v10 = vpack.c.b16 %v4727_v57, %v4726_v31  ;;  %v4152_v17 = vrot.slane %v4151_v48, 4 }
 0x20a   : > { %v4989_v3 = vsel %vm217_vm8, %v4956_v34, 0.0  ;;  %v5057_v40 = vmul.f32 %v4956_v34, %v4956_v34  ;;  %v5166_v15 = vpack.c.bf16 %v4956_v34, %v4956_v34  ;;  %4925 = vst.msk [vmem:[#allocation2 + $0x18] sm:$0xff] %vm217_vm8, %v4893_v55  ;;  %v3331_v25 = vadd.f32 %v3261_v29, %v2949_v19  ;;  %v7728_v13 = vpop.f32.mrf.mxu0  ;;  %v5982_v55 = vld [vmem:[%s6193_s29 + $0xb4] sm:$0xe]  ;;  %v5921_v34 = vld [vmem:[%s6193_s29 + $0xc4] sm:$0xf] }
 0x20b   : > { %v4990_v37 = vadd.f32 %v4989_v3, %v4988_v41  ;;  %v5984_v29 = vld [vmem:[%s6193_s29 + $0xbc] sm:$0x1]  ;;  %v4147_v60 = vsel %vm6246_vm6, %v4142_v4, %v7730_v23  ;;  %v6004_v39 = vrot.slane %v5982_v55, 9  ;;  %v4168_v53 = vshll.u32 %v5921_v34, 16 }
 0x20c   : > { %v5090_v8 = vsel %vm217_vm8, %v5057_v40, 0.0  ;;  %5199 = vst.msk [vmem:[%s7648_s18 + $0x8] sm:$0xf] %vm5196_vm9, %v5166_v15  ;;  %v3430_v11 = vld [vmem:[#allocation2 + $0x30] sm:$0xff]  ;;  %v4157_v15 = vsel %vm6246_vm6, %v4152_v17, %v4156_v27  ;;  %v4684_v43 = vrot.slane %v5984_v29, 5  ;;  %v4172_v23 = vshrl.u32 %v5921_v34, 16 }
 0x20d   : > { %v5091_v18 = vadd.f32 %v5090_v8, %v5089_v2  ;;  %v3684_v38 = vadd.f32 %v3613_v35, %v3430_v11  ;;  %3363 = vst.msk [vmem:[#allocation2 + $0x38] sm:$0xff] %vm217_vm8, %v3331_v25  ;;  %v7749_v2 = vsel %vm6254_vm7, %v5745_v56, %v3115_v7  ;;  %v7783_v25 = vld [vmem:[%s6193_s29 + $0xb8] sm:$0xf]  ;;  %v7789_v31 = vunpack.c.l.b16 %v4147_v60  ;;  %v2952_v29 = vld [vmem:[#allocation2 + $0x50] sm:$0xff] }
 0x20e   : > { %v3795_v41 = vld [vmem:[#allocation2 + $0x28] sm:$0xff] }
 0x20f   : > { %v4401_v24 = vadd.f32 %v7671_v52, %v3795_v41  ;;  %3716 = vst.msk [vmem:[#allocation2 + $0x30] sm:$0xff] %vm217_vm8, %v3684_v38  ;;  %v4512_v59 = vld [vmem:[#allocation2 + $0x20] sm:$0xff]  ;;  %v3615_v58 = vpop.f32.mrf.mxu2 }
 0x210   : > { %v4894_v44 = vadd.f32 %v7613_v50, %v4512_v59  ;;  %v7743_v14 = vpop.f32.mrf.mxu3  ;;  %v5920_v52 = vld [vmem:[%s6193_s29 + $0xc0] sm:$0xf]  ;;  %v7755_v50 = vsel %vm6254_vm7, %v3117_v30, %v3118_v47  ;;  %v3162_v30 = vunpack.c.l.b16 %v7749_v2 }
 0x211   : > { %v4957_v63 = vld [vmem:[#allocation2 + $0x18] sm:$0xff]  ;;  %4433 = vst.msk [vmem:[#allocation2 + $0x28] sm:$0xff] %vm217_vm8, %v4401_v24  ;;  %v3264_v22 = vpop.f32.mrf.mxu1  ;;  %v4159_v20 = vshrl.u32 %v5920_v52, 16  ;;  %v4162_v21 = vshll.u32 %v5920_v52, 16  ;;  %v3163_v32 = vunpack.c.l.b16 %v7755_v50  ;;  %v4174_v50 = vrot.slane %v4172_v23, 4 }
 0x212   : > { %v4991_v28 = vsel %vm217_vm8, %v4957_v63, 0.0  ;;  %v5058_v7 = vmul.f32 %v4957_v63, %v4957_v63  ;;  %v5167_v62 = vpack.c.bf16 %v4957_v63, %v4957_v63  ;;  %4926 = vst.msk [vmem:[#allocation2 + $0x20] sm:$0xff] %vm217_vm8, %v4894_v44  ;;  %v3332_v12 = vadd.f32 %v3264_v22, %v2950_v51  ;;  %v7759_v35 = vpop.f32.mrf.mxu0 }
 0x213   : > { %v4992_v16 = vadd.f32 %v4991_v28, %v4990_v37  ;;  %v4681_v37 = vrot.slane %v5983_v0, 5  ;;  %v4161_v11 = vrot.slane %v4159_v20, 4  ;;  %v4164_v47 = vrot.slane %v4162_v21, 5  ;;  %v5922_v28 = vld [vmem:[%s6193_s29 + $0xc8] sm:$0x1] }
 0x214   : > { %v5092_v19 = vsel %vm217_vm8, %v5058_v7, 0.0  ;;  %5200 = vst.msk [vmem:[%s7648_s18 + $0xc] sm:$0xf] %vm5196_vm9, %v5167_v62  ;;  %v3431_v36 = vld [vmem:[#allocation2 + $0x38] sm:$0xff]  ;;  %5761 = vmatmul.msk.bf16.gmra.mxu1 %vm398_vm1, %v3180_v46  ;;  %5874 = vmatmul.msk.bf16.gmra.mxu2 %vm398_vm1, %v6071_v49  ;;  %v5726_v49 = vld [vmem:[%s6193_s29 + $0xb4] sm:$0xe]  ;;  %v3181_v20 = vpack.c.b16 %v3163_v32, %v3162_v30 }
 0x215   : > { %v5093_v9 = vadd.f32 %v5092_v19, %v5091_v18  ;;  %v3685_v26 = vadd.f32 %v3615_v58, %v3431_v36  ;;  %3364 = vst.msk [vmem:[#allocation2 + $0x40] sm:$0xff] %vm217_vm8, %v3332_v12  ;;  %5939 = vmatmul.msk.bf16.gmra.mxu3 %vm398_vm1, %v4252_v45  ;;  %6020 = vmatmul.msk.bf16.gmra.mxu0 %vm398_vm1, %v4746_v10  ;;  %v2951_v18 = vld [vmem:[#allocation2 + $0x48] sm:$0xff]  ;;  %v4683_v41 = vrot.slane %v4681_v37, 4  ;;  %v3122_v45 = vrot.slane %v7783_v25, 5  ;;  %v5728_v10 = vld [vmem:[%s6193_s29 + $0xbc] sm:$0x1] }
 0x216   : > { %v3796_v56 = vld [vmem:[#allocation2 + $0x30] sm:$0xff]  ;;  %v4682_v57 = vsel %vm6254_vm7, %v6004_v39, %v4681_v37  ;;  %v4165_v51 = vor.u32 %v4164_v47, %v4161_v11  ;;  %v7804_v22 = vrot.slane %v4168_v53, 5  ;;  %v5746_v21 = vrot.slane %v5726_v49, 9  ;;  %v5986_v11 = vld [vmem:[%s6193_s29 + $0xc4] sm:$0xf] }
 0x217   : > { %v4402_v3 = vadd.f32 %v7718_v33, %v3796_v56  ;;  %3717 = vst.msk [vmem:[#allocation2 + $0x38] sm:$0xff] %vm217_vm8, %v3685_v26  ;;  %v3618_v40 = vpop.f32.mrf.mxu2  ;;  %v4685_v2 = vsel %vm6254_vm7, %v4683_v41, %v4684_v43  ;;  %v4728_v7 = vunpack.c.l.b16 %v4682_v57  ;;  %v6072_v19 = vld [vmem:[%s6193_s29 + $0xb4] sm:$0xff]  ;;  %v3125_v26 = vrot.slane %v5728_v10, 5  ;;  %v5924_v41 = vld [vmem:[%s6193_s29 + $0xd0] sm:$0xf] }
 0x218   : > { %v4513_v61 = vld [vmem:[#allocation2 + $0x28] sm:$0xff]  ;;  %v7785_v8 = vpop.f32.mrf.mxu3  ;;  %v4729_v62 = vunpack.c.l.b16 %v4685_v2  ;;  %v4178_v34 = vshll.u32 %v5922_v28, 16  ;;  %v4166_v30 = vrot.slane %v4165_v51, 4  ;;  %v4175_v32 = vor.u32 %v4174_v50, %v7804_v22  ;;  %v2953_v10 = vld [vmem:[#allocation2 + $0x58] sm:$0xff] }
 0x219   : > { %v4958_v54 = vld [vmem:[#allocation2 + $0x20] sm:$0xff]  ;;  %4434 = vst.msk [vmem:[#allocation2 + $0x30] sm:$0xff] %vm217_vm8, %v4402_v3  ;;  %v4895_v33 = vadd.f32 %v7652_v42, %v4513_v61  ;;  %v3266_v38 = vpop.f32.mrf.mxu1  ;;  %v4235_v42 = vunpack.c.l.b16 %v4157_v15  ;;  %v5923_v15 = vld [vmem:[%s6193_s29 + $0xcc] sm:$0xf]  ;;  %v4196_v50 = vshrl.u32 %v5924_v41, 16 }
 0x21a   : > { %v4993_v24 = vsel %vm217_vm8, %v4958_v54, 0.0  ;;  %v5059_v59 = vmul.f32 %v4958_v54, %v4958_v54  ;;  %v5168_v58 = vpack.c.bf16 %v4958_v54, %v4958_v54  ;;  %v3333_v48 = vadd.f32 %v3266_v38, %v2951_v18  ;;  %v7794_v44 = vpop.f32.mrf.mxu0  ;;  %v5985_v61 = vld [vmem:[%s6193_s29 + $0xc0] sm:$0xe] }
 0x21b   : > { %v4994_v46 = vadd.f32 %v4993_v24, %v4992_v16  ;;  %4927 = vst.msk [vmem:[#allocation2 + $0x28] sm:$0xff] %vm217_vm8, %v4895_v33  ;;  %v4253_v0 = vpack.c.b16 %v4235_v42, %v7789_v31  ;;  %v4747_v60 = vpack.c.b16 %v4729_v62, %v4728_v7  ;;  %v4180_v54 = vrot.slane %v4178_v34, 5  ;;  %v5987_v33 = vld [vmem:[%s6193_s29 + $0xc8] sm:$0x1] }
 0x21c   : > { %v5094_v52 = vsel %vm217_vm8, %v5059_v59, 0.0  ;;  %5201 = vst.msk [vmem:[%s7648_s18 + $0x10] sm:$0xf] %vm5196_vm9, %v5168_v58  ;;  %v3432_v63 = vld [vmem:[#allocation2 + $0x40] sm:$0xff]  ;;  %v4171_v31 = vsel %vm6246_vm6, %v4166_v30, %v7804_v22  ;;  %v4176_v57 = vrot.slane %v4175_v32, 4  ;;  %v4183_v58 = vshrl.u32 %v5923_v15, 16 }
 0x21d   : > { %v5095_v4 = vadd.f32 %v5094_v52, %v5093_v9  ;;  %v3686_v27 = vadd.f32 %v3618_v40, %v3432_v63  ;;  %3365 = vst.msk [vmem:[#allocation2 + $0x48] sm:$0xff] %vm217_vm8, %v3333_v48  ;;  %v3124_v9 = vrot.slane %v3122_v45, 4  ;;  %v6005_v48 = vrot.slane %v5985_v61, 9  ;;  %v5729_v61 = vld [vmem:[%s6193_s29 + $0xc0] sm:$0xe] }
 0x21e   : > { %v3797_v12 = vld [vmem:[#allocation2 + $0x38] sm:$0xff]  ;;  %v4691_v2 = vrot.slane %v5987_v33, 5  ;;  %v4192_v22 = vshll.u32 %v5924_v41, 16  ;;  %v4181_v7 = vsel %vm6246_vm6, %v4176_v57, %v4180_v54  ;;  %v7856_v62 = vunpack.c.l.b16 %v4171_v31  ;;  %v6073_v54 = vld [vmem:[%s6193_s29 + $0xc0] sm:$0xff] }
 0x21f   : > { %v4403_v16 = vadd.f32 %v7743_v14, %v3797_v12  ;;  %3718 = vst.msk [vmem:[#allocation2 + $0x40] sm:$0xff] %vm217_vm8, %v3686_v27  ;;  %v3620_v17 = vpop.f32.mrf.mxu2  ;;  %v7834_v23 = vsel %vm6254_vm7, %v3124_v9, %v3125_v26  ;;  %v4198_v30 = vrot.slane %v4196_v50, 4  ;;  %v2954_v57 = vld [vmem:[#allocation2 + $0x60] sm:$0xff] }
 0x220   : > { %v4514_v55 = vld [vmem:[#allocation2 + $0x30] sm:$0xff]  ;;  %v7812_v36 = vpop.f32.mrf.mxu3 }
 0x221   : > { %4435 = vst.msk [vmem:[#allocation2 + $0x38] sm:$0xff] %vm217_vm8, %v4403_v16  ;;  %v4896_v14 = vadd.f32 %v7686_v5, %v4514_v55  ;;  %v3269_v56 = vpop.f32.mrf.mxu1  ;;  %v7825_v5 = vsel %vm6254_vm7, %v5746_v21, %v3122_v45  ;;  %v4186_v45 = vshll.u32 %v5923_v15, 16 }
 0x222   : > { %v4959_v39 = vld [vmem:[#allocation2 + $0x28] sm:$0xff]  ;;  %v3334_v3 = vadd.f32 %v3269_v56, %v2952_v29  ;;  %v7818_v40 = vpop.f32.mrf.mxu0  ;;  %v3164_v51 = vunpack.c.l.b16 %v7825_v5  ;;  %v7868_v29 = vld [vmem:[%s6193_s29 + $0xc4] sm:$0xf]  ;;  %v7870_v56 = vrot.slane %v4192_v22, 5 }
 0x223   : > { %v4995_v25 = vsel %vm217_vm8, %v4959_v39, 0.0  ;;  %v5060_v37 = vmul.f32 %v4959_v39, %v4959_v39  ;;  %v5169_v43 = vpack.c.bf16 %v4959_v39, %v4959_v39  ;;  %4928 = vst.msk [vmem:[#allocation2 + $0x30] sm:$0xff] %vm217_vm8, %v4896_v14  ;;  %v4188_v26 = vrot.slane %v4186_v45, 5 }
 0x224   : > { %v4996_v47 = vadd.f32 %v4995_v25, %v4994_v46  ;;  %v3433_v53 = vld [vmem:[#allocation2 + $0x48] sm:$0xff]  ;;  %3366 = vst.msk [vmem:[#allocation2 + $0x50] sm:$0xff] %vm217_vm8, %v3334_v3  ;;  %5762 = vmatmul.msk.bf16.gmra.mxu1 %vm398_vm1, %v3181_v20  ;;  %5875 = vmatmul.msk.bf16.gmra.mxu2 %vm398_vm1, %v6072_v19  ;;  %v4688_v46 = vrot.slane %v5986_v11, 5  ;;  %v4185_v20 = vrot.slane %v4183_v58, 4  ;;  %v5989_v58 = vld [vmem:[%s6193_s29 + $0xd0] sm:$0xf] }
 0x225   : > { %v5096_v18 = vsel %vm217_vm8, %v5060_v37, 0.0  ;;  %5202 = vst.msk [vmem:[%s7648_s18 + $0x14] sm:$0xf] %vm5196_vm9, %v5169_v43  ;;  %v3687_v38 = vadd.f32 %v3620_v17, %v3433_v53  ;;  %5940 = vmatmul.msk.bf16.gmra.mxu3 %vm398_vm1, %v4253_v0  ;;  %6021 = vmatmul.msk.bf16.gmra.mxu0 %vm398_vm1, %v4747_v60  ;;  %v4237_v60 = vunpack.c.l.b16 %v4181_v7  ;;  %v5925_v37 = vld [vmem:[%s6193_s29 + $0xd4] sm:$0x1] }
 0x226   : > { %v5097_v24 = vadd.f32 %v5096_v18, %v5095_v4  ;;  %v3798_v59 = vld [vmem:[#allocation2 + $0x40] sm:$0xff]  ;;  %v4690_v27 = vrot.slane %v4688_v46, 4  ;;  %v4689_v21 = vsel %vm6254_vm7, %v6005_v48, %v4688_v46  ;;  %v5731_v11 = vld [vmem:[%s6193_s29 + $0xc8] sm:$0x1]  ;;  %v4189_v18 = vor.u32 %v4188_v26, %v4185_v20  ;;  %v5990_v7 = vld [vmem:[%s6193_s29 + $0xd4] sm:$0x1] }
 0x227   : > { %v4404_v42 = vadd.f32 %v7785_v8, %v3798_v59  ;;  %3719 = vst.msk [vmem:[#allocation2 + $0x48] sm:$0xff] %vm217_vm8, %v3687_v38  ;;  %v3623_v49 = vpop.f32.mrf.mxu2  ;;  %v3165_v8 = vunpack.c.l.b16 %v7834_v23  ;;  %v4730_v39 = vunpack.c.l.b16 %v4689_v21  ;;  %v4199_v38 = vor.u32 %v4198_v30, %v7870_v56 }
 0x228   : > { %v4515_v52 = vld [vmem:[#allocation2 + $0x38] sm:$0xff]  ;;  %v7848_v63 = vpop.f32.mrf.mxu3  ;;  %v4254_v41 = vpack.c.b16 %v4237_v60, %v7856_v62 }
 0x229   : > { %4436 = vst.msk [vmem:[#allocation2 + $0x40] sm:$0xff] %vm217_vm8, %v4404_v42  ;;  %v4897_v4 = vadd.f32 %v7728_v13, %v4515_v52  ;;  %v3271_v28 = vpop.f32.mrf.mxu1  ;;  %v4692_v13 = vsel %vm6254_vm7, %v4690_v27, %v4691_v2  ;;  %v3182_v23 = vpack.c.b16 %v3165_v8, %v3164_v51  ;;  %v5747_v42 = vrot.slane %v5729_v61, 9  ;;  %v5988_v27 = vld [vmem:[%s6193_s29 + $0xcc] sm:$0xe] }
 0x22a   : > { %v4960_v12 = vld [vmem:[#allocation2 + $0x30] sm:$0xff]  ;;  %v3335_v16 = vadd.f32 %v3271_v28, %v2953_v10  ;;  %v7858_v17 = vpop.f32.mrf.mxu0  ;;  %v4731_v3 = vunpack.c.l.b16 %v4692_v13  ;;  %v4695_v2 = vrot.slane %v5989_v58, 5  ;;  %v4190_v28 = vrot.slane %v4189_v18, 4 }
 0x22b   : > { %v4997_v55 = vsel %vm217_vm8, %v4960_v12, 0.0  ;;  %v5061_v19 = vmul.f32 %v4960_v12, %v4960_v12  ;;  %v5170_v0 = vpack.c.bf16 %v4960_v12, %v4960_v12  ;;  %4929 = vst.msk [vmem:[#allocation2 + $0x38] sm:$0xff] %vm217_vm8, %v4897_v4  ;;  %v3434_v9 = vld [vmem:[#allocation2 + $0x50] sm:$0xff]  ;;  %v4200_v8 = vrot.slane %v4199_v38, 4 }
 0x22c   : > { %v4998_v34 = vadd.f32 %v4997_v55, %v4996_v47  ;;  %v3688_v14 = vadd.f32 %v3623_v49, %v3434_v9  ;;  %3367 = vst.msk [vmem:[#allocation2 + $0x58] sm:$0xff] %vm217_vm8, %v3335_v16  ;;  %v3129_v47 = vrot.slane %v7868_v29, 5  ;;  %v4748_v59 = vpack.c.b16 %v4731_v3, %v4730_v39  ;;  %v2955_v29 = vld [vmem:[#allocation2 + $0x68] sm:$0xff] }
 0x22d   : > { %v5098_v32 = vsel %vm217_vm8, %v5061_v19, 0.0  ;;  %5203 = vst.msk [vmem:[%s7648_s18 + $0x18] sm:$0xf] %vm5196_vm9, %v5170_v0  ;;  %v3132_v49 = vrot.slane %v5731_v11, 5  ;;  %v6006_v20 = vrot.slane %v5988_v27, 9  ;;  %v4697_v55 = vrot.slane %v4695_v2, 4 }
 0x22e   : > { %v5099_v15 = vadd.f32 %v5098_v32, %v5097_v24  ;;  %v3799_v25 = vld [vmem:[#allocation2 + $0x48] sm:$0xff]  ;;  %3720 = vst.msk [vmem:[#allocation2 + $0x50] sm:$0xff] %vm217_vm8, %v3688_v14  ;;  %v4202_v24 = vshll.u32 %v5925_v37, 16  ;;  %v3131_v50 = vrot.slane %v3129_v47, 4  ;;  %v4698_v19 = vrot.slane %v5990_v7, 5 }
 0x22f   : > { %v4405_v43 = vadd.f32 %v7812_v36, %v3799_v25  ;;  %v3625_v5 = vpop.f32.mrf.mxu2  ;;  %v4195_v32 = vsel %vm6246_vm6, %v4190_v28, %v7870_v56  ;;  %v6074_v58 = vld [vmem:[%s6193_s29 + $0xcc] sm:$0xff] }
 0x230   : > { %v4516_v53 = vld [vmem:[#allocation2 + $0x40] sm:$0xff]  ;;  %v7882_v33 = vpop.f32.mrf.mxu3  ;;  %v4204_v16 = vrot.slane %v4202_v24, 5  ;;  %v4699_v25 = vsel %vm6254_vm7, %v4697_v55, %v4698_v19 }
 0x231   : > { %4437 = vst.msk [vmem:[#allocation2 + $0x48] sm:$0xff] %vm217_vm8, %v4405_v43  ;;  %v4898_v31 = vadd.f32 %v7759_v35, %v4516_v53  ;;  %v3274_v36 = vpop.f32.mrf.mxu1  ;;  %v4238_v53 = vunpack.c.l.b16 %v4195_v32  ;;  %v4733_v38 = vunpack.c.l.b16 %v4699_v25 }
 0x232   : > { %v4961_v48 = vld [vmem:[#allocation2 + $0x38] sm:$0xff]  ;;  %v3336_v46 = vadd.f32 %v3274_v36, %v2954_v57  ;;  %v7889_v45 = vpop.f32.mrf.mxu0  ;;  %v4205_v3 = vsel %vm6246_vm6, %v4200_v8, %v4204_v16 }
 0x233   : > { %v4999_v52 = vsel %vm217_vm8, %v4961_v48, 0.0  ;;  %v5062_v35 = vmul.f32 %v4961_v48, %v4961_v48  ;;  %v5171_v51 = vpack.c.bf16 %v4961_v48, %v4961_v48  ;;  %4930 = vst.msk [vmem:[#allocation2 + $0x40] sm:$0xff] %vm217_vm8, %v4898_v31  ;;  %v3435_v22 = vld [vmem:[#allocation2 + $0x58] sm:$0xff] }
 0x234   : > { %v5000_v4 = vadd.f32 %v4999_v52, %v4998_v34  ;;  %v3689_v10 = vadd.f32 %v3625_v5, %v3435_v22  ;;  %3368 = vst.msk [vmem:[#allocation2 + $0x60] sm:$0xff] %vm217_vm8, %v3336_v46  ;;  %5763 = vmatmul.msk.bf16.gmra.mxu1 %vm398_vm1, %v3182_v23  ;;  %5876 = vmatmul.msk.bf16.gmra.mxu2 %vm398_vm1, %v6073_v54  ;;  %v4239_v54 = vunpack.c.l.b16 %v4205_v3  ;;  %v2956_v46 = vld [vmem:[#allocation2 + $0x70] sm:$0xff] }
 0x235   : > { %v5100_v62 = vsel %vm217_vm8, %v5062_v35, 0.0  ;;  %5204 = vst.msk [vmem:[%s7648_s18 + $0x1c] sm:$0xf] %vm5196_vm9, %v5171_v51  ;;  %v3800_v12 = vld [vmem:[#allocation2 + $0x50] sm:$0xff]  ;;  %5941 = vmatmul.msk.bf16.gmra.mxu3 %vm398_vm1, %v4254_v41  ;;  %6022 = vmatmul.msk.bf16.gmra.mxu0 %vm398_vm1, %v4748_v59  ;;  %v3130_v34 = vsel %vm6254_vm7, %v5747_v42, %v3129_v47 }
 0x236   : > { %v5101_v21 = vadd.f32 %v5100_v62, %v5099_v15  ;;  %v4406_v13 = vadd.f32 %v7848_v63, %v3800_v12  ;;  %3721 = vst.msk [vmem:[#allocation2 + $0x58] sm:$0xff] %vm217_vm8, %v3689_v10  ;;  %v3133_v63 = vsel %vm6254_vm7, %v3131_v50, %v3132_v49  ;;  %v3166_v61 = vunpack.c.l.b16 %v3130_v34 }
 0x237   : > { %v3628_v0 = vpop.f32.mrf.mxu2  ;;  %v3167_v47 = vunpack.c.l.b16 %v3133_v63  ;;  %v4255_v49 = vpack.c.b16 %v4239_v54, %v4238_v53 }
 0x238   : > { %4438 = vst.msk [vmem:[#allocation2 + $0x50] sm:$0xff] %vm217_vm8, %v4406_v13  ;;  %v4517_v9 = vld [vmem:[#allocation2 + $0x48] sm:$0xff]  ;;  %v7906_v26 = vpop.f32.mrf.mxu3  ;;  %v2957_v13 = vld [vmem:[#allocation2 + $0x78] sm:$0xff] }
 0x239   : > { %v4899_v14 = vadd.f32 %v7794_v44, %v4517_v9  ;;  %v3276_v30 = vpop.f32.mrf.mxu1  ;;  %v4696_v44 = vsel %vm6254_vm7, %v6006_v20, %v4695_v2  ;;  %v3183_v59 = vpack.c.b16 %v3167_v47, %v3166_v61 }
 0x23a   : > { %v4962_v60 = vld [vmem:[#allocation2 + $0x40] sm:$0xff]  ;;  %v3337_v39 = vadd.f32 %v3276_v30, %v2955_v29  ;;  %v7918_v15 = vpop.f32.mrf.mxu0  ;;  %v4732_v18 = vunpack.c.l.b16 %v4696_v44 }
 0x23b   : > { %v5001_v37 = vsel %vm217_vm8, %v4962_v60, 0.0  ;;  %v5063_v43 = vmul.f32 %v4962_v60, %v4962_v60  ;;  %v5172_v5 = vpack.c.bf16 %v4962_v60, %v4962_v60  ;;  %4931 = vst.msk [vmem:[#allocation2 + $0x48] sm:$0xff] %vm217_vm8, %v4899_v14  ;;  %v3436_v56 = vld [vmem:[#allocation2 + $0x60] sm:$0xff] }
 0x23c   : > { %v5002_v11 = vadd.f32 %v5001_v37, %v5000_v4  ;;  %v3690_v1 = vadd.f32 %v3628_v0, %v3436_v56  ;;  %3369 = vst.msk [vmem:[#allocation2 + $0x68] sm:$0xff] %vm217_vm8, %v3337_v39  ;;  %v4749_v2 = vpack.c.b16 %v4733_v38, %v4732_v18 }
 0x23d   : > { %v5102_v23 = vsel %vm217_vm8, %v5063_v43, 0.0  ;;  %5205 = vst.msk [vmem:[%s7648_s18 + $0x20] sm:$0xf] %vm5196_vm9, %v5172_v5  ;;  %v3801_v6 = vld [vmem:[#allocation2 + $0x58] sm:$0xff]  ;;  %v2958_v43 = vld [vmem:[#allocation2 + $0x80] sm:$0xff] }
 0x23e   : > { %v5103_v31 = vadd.f32 %v5102_v23, %v5101_v21  ;;  %v4407_v57 = vadd.f32 %v7882_v33, %v3801_v6  ;;  %3722 = vst.msk [vmem:[#allocation2 + $0x60] sm:$0xff] %vm217_vm8, %v3690_v1 }
 0x23f   : > { %v4518_v36 = vld [vmem:[#allocation2 + $0x50] sm:$0xff]  ;;  %v3630_v41 = vpop.f32.mrf.mxu2 }
 0x240   : > { %4439 = vst.msk [vmem:[#allocation2 + $0x58] sm:$0xff] %vm217_vm8, %v4407_v57  ;;  %v4900_v24 = vadd.f32 %v7818_v40, %v4518_v36  ;;  %v4348_v48 = vpop.f32.mrf.mxu3 }
 0x241   : > { %v3279_v42 = vpop.f32.mrf.mxu1 }
 0x242   : > { %v4963_v52 = vld [vmem:[#allocation2 + $0x48] sm:$0xff]  ;;  %4932 = vst.msk [vmem:[#allocation2 + $0x50] sm:$0xff] %vm217_vm8, %v4900_v24  ;;  %v3338_v33 = vadd.f32 %v3279_v42, %v2956_v46  ;;  %v7936_v35 = vpop.f32.mrf.mxu0 }
 0x243   : > { %v5003_v51 = vsel %vm217_vm8, %v4963_v52, 0.0  ;;  %v5064_v22 = vmul.f32 %v4963_v52, %v4963_v52  ;;  %v5173_v50 = vpack.c.bf16 %v4963_v52, %v4963_v52  ;;  %v3437_v27 = vld [vmem:[#allocation2 + $0x68] sm:$0xff] }
 0x244   : > { %v5004_v40 = vadd.f32 %v5003_v51, %v5002_v11  ;;  %v3691_v4 = vadd.f32 %v3630_v41, %v3437_v27  ;;  %3370 = vst.msk [vmem:[#allocation2 + $0x70] sm:$0xff] %vm217_vm8, %v3338_v33  ;;  %5764 = vmatmul.msk.bf16.gmra.mxu1 %vm398_vm1, %v3183_v59  ;;  %5877 = vmatmul.msk.bf16.gmra.mxu2 %vm398_vm1, %v6074_v58  ;;  %v2959_v59 = vld [vmem:[#allocation2 + $0x88] sm:$0xff] }
 0x245   : > { %v5104_v10 = vsel %vm217_vm8, %v5064_v22, 0.0  ;;  %5206 = vst.msk [vmem:[%s7648_s18 + $0x24] sm:$0xf] %vm5196_vm9, %v5173_v50  ;;  %v3802_v28 = vld [vmem:[#allocation2 + $0x60] sm:$0xff]  ;;  %5942 = vmatmul.msk.bf16.gmra.mxu3 %vm398_vm1, %v4255_v49  ;;  %6023 = vmatmul.msk.bf16.gmra.mxu0 %vm398_vm1, %v4749_v2 }
 0x246   : > { %v5105_v8 = vadd.f32 %v5104_v10, %v5103_v31  ;;  %v4408_v7 = vadd.f32 %v7906_v26, %v3802_v28  ;;  %3723 = vst.msk [vmem:[#allocation2 + $0x68] sm:$0xff] %vm217_vm8, %v3691_v4 }
 0x247   : > { %v4519_v62 = vld [vmem:[#allocation2 + $0x58] sm:$0xff]  ;;  %v3633_v12 = vpop.f32.mrf.mxu2 }
 0x248   : > { %4440 = vst.msk [vmem:[#allocation2 + $0x60] sm:$0xff] %vm217_vm8, %v4408_v7  ;;  %v4901_v16 = vadd.f32 %v7858_v17, %v4519_v62  ;;  %v4351_v20 = vpop.f32.mrf.mxu3  ;;  %v2960_v7 = vld [vmem:[#allocation2 + $0x90] sm:$0xff] }
 0x249   : > { %v4964_v21 = vld [vmem:[#allocation2 + $0x50] sm:$0xff]  ;;  %v3281_v55 = vpop.f32.mrf.mxu1 }
 0x24a   : > { %v5005_v19 = vsel %vm217_vm8, %v4964_v21, 0.0  ;;  %v5065_v0 = vmul.f32 %v4964_v21, %v4964_v21  ;;  %v5174_v9 = vpack.c.bf16 %v4964_v21, %v4964_v21  ;;  %4933 = vst.msk [vmem:[#allocation2 + $0x58] sm:$0xff] %vm217_vm8, %v4901_v16  ;;  %v3339_v26 = vadd.f32 %v3281_v55, %v2957_v13  ;;  %v7953_v34 = vpop.f32.mrf.mxu0 }
 0x24b   : > { %v5006_v14 = vadd.f32 %v5005_v19, %v5004_v40  ;;  %v3438_v29 = vld [vmem:[#allocation2 + $0x70] sm:$0xff] }
 0x24c   : > { %v5106_v30 = vsel %vm217_vm8, %v5065_v0, 0.0  ;;  %5207 = vst.msk [vmem:[%s7648_s18 + $0x28] sm:$0xf] %vm5196_vm9, %v5174_v9  ;;  %v3692_v17 = vadd.f32 %v3633_v12, %v3438_v29 }
 0x24d   : > { %v5107_v63 = vadd.f32 %v5106_v30, %v5105_v8  ;;  %v3803_v32 = vld [vmem:[#allocation2 + $0x68] sm:$0xff]  ;;  %3371 = vst.msk [vmem:[#allocation2 + $0x78] sm:$0xff] %vm217_vm8, %v3339_v26 }
 0x24e   : > { %v4409_v60 = vadd.f32 %v4348_v48, %v3803_v32  ;;  %3724 = vst.msk [vmem:[#allocation2 + $0x70] sm:$0xff] %vm217_vm8, %v3692_v17 }
 0x24f   : > { %v4520_v39 = vld [vmem:[#allocation2 + $0x60] sm:$0xff]  ;;  %v3635_v3 = vpop.f32.mrf.mxu2 }
 0x250   : > { %4441 = vst.msk [vmem:[#allocation2 + $0x68] sm:$0xff] %vm217_vm8, %v4409_v60  ;;  %v4902_v44 = vadd.f32 %v7889_v45, %v4520_v39  ;;  %v4353_v25 = vpop.f32.mrf.mxu3  ;;  %v2961_v60 = vld [vmem:[#allocation2 + $0x98] sm:$0xff] }
 0x251   : > { %v4965_v37 = vld [vmem:[#allocation2 + $0x58] sm:$0xff]  ;;  %v3284_v5 = vpop.f32.mrf.mxu1 }
 0x252   : > { %v5007_v56 = vsel %vm217_vm8, %v4965_v37, 0.0  ;;  %v5066_v61 = vmul.f32 %v4965_v37, %v4965_v37  ;;  %v5175_v11 = vpack.c.bf16 %v4965_v37, %v4965_v37  ;;  %4934 = vst.msk [vmem:[#allocation2 + $0x60] sm:$0xff] %vm217_vm8, %v4902_v44  ;;  %v3340_v1 = vadd.f32 %v3284_v5, %v2958_v43  ;;  %v7964_v47 = vpop.f32.mrf.mxu0 }
 0x253   : > { %v5008_v53 = vadd.f32 %v5007_v56, %v5006_v14 }
 0x254   : > { %v5108_v23 = vsel %vm217_vm8, %v5066_v61, 0.0  ;;  %5208 = vst.msk [vmem:[%s7648_s18 + $0x2c] sm:$0xf] %vm5196_vm9, %v5175_v11  ;;  %v3439_v6 = vld [vmem:[#allocation2 + $0x78] sm:$0xff] }
 0x255   : > { %v5109_v45 = vadd.f32 %v5108_v23, %v5107_v63  ;;  %v3804_v54 = vld [vmem:[#allocation2 + $0x70] sm:$0xff]  ;;  %v3693_v18 = vadd.f32 %v3635_v3, %v3439_v6  ;;  %3372 = vst.msk [vmem:[#allocation2 + $0x80] sm:$0xff] %vm217_vm8, %v3340_v1 }
 0x256   : > { %v4410_v38 = vadd.f32 %v4351_v20, %v3804_v54 }
 0x257   : > { %3725 = vst.msk [vmem:[#allocation2 + $0x78] sm:$0xff] %vm217_vm8, %v3693_v18  ;;  %v4521_v31 = vld [vmem:[#allocation2 + $0x68] sm:$0xff]  ;;  %v3638_v57 = vpop.f32.mrf.mxu2  ;;  %v2962_v18 = vld [vmem:[#allocation2 + $0xa0] sm:$0xff] }
 0x258   : > { %4442 = vst.msk [vmem:[#allocation2 + $0x70] sm:$0xff] %vm217_vm8, %v4410_v38  ;;  %v4903_v36 = vadd.f32 %v7918_v15, %v4521_v31  ;;  %v4356_v41 = vpop.f32.mrf.mxu3 }
 0x259   : > { %v4966_v24 = vld [vmem:[#allocation2 + $0x60] sm:$0xff]  ;;  %v3286_v58 = vpop.f32.mrf.mxu1 }
 0x25a   : > { %v5009_v48 = vsel %vm217_vm8, %v4966_v24, 0.0  ;;  %v5067_v46 = vmul.f32 %v4966_v24, %v4966_v24  ;;  %v5176_v42 = vpack.c.bf16 %v4966_v24, %v4966_v24  ;;  %4935 = vst.msk [vmem:[#allocation2 + $0x68] sm:$0xff] %vm217_vm8, %v4903_v36  ;;  %v3341_v49 = vadd.f32 %v3286_v58, %v2959_v59  ;;  %v7975_v2 = vpop.f32.mrf.mxu0 }
 0x25b   : > { %v5010_v52 = vadd.f32 %v5009_v48, %v5008_v53 }
 0x25c   : > { %v5110_v33 = vsel %vm217_vm8, %v5067_v46, 0.0  ;;  %5209 = vst.msk [vmem:[%s7648_s18 + $0x30] sm:$0xf] %vm5196_vm9, %v5176_v42  ;;  %v3440_v51 = vld [vmem:[#allocation2 + $0x80] sm:$0xff] }
 0x25d   : > { %v5111_v15 = vadd.f32 %v5110_v33, %v5109_v45  ;;  %v3694_v22 = vadd.f32 %v3638_v57, %v3440_v51  ;;  %3373 = vst.msk [vmem:[#allocation2 + $0x88] sm:$0xff] %vm217_vm8, %v3341_v49 }
 0x25e   : > { %v3805_v50 = vld [vmem:[#allocation2 + $0x78] sm:$0xff] }
 0x25f   : > { %v4411_v27 = vadd.f32 %v4353_v25, %v3805_v50  ;;  %3726 = vst.msk [vmem:[#allocation2 + $0x80] sm:$0xff] %vm217_vm8, %v3694_v22  ;;  %v4522_v40 = vld [vmem:[#allocation2 + $0x70] sm:$0xff]  ;;  %v3640_v4 = vpop.f32.mrf.mxu2  ;;  %v2963_v50 = vld [vmem:[#allocation2 + $0xa8] sm:$0xff] }
 0x260   : > { %v4904_v10 = vadd.f32 %v7936_v35, %v4522_v40  ;;  %v4358_v28 = vpop.f32.mrf.mxu3 }
 0x261   : > { %v4967_v8 = vld [vmem:[#allocation2 + $0x68] sm:$0xff]  ;;  %4443 = vst.msk [vmem:[#allocation2 + $0x78] sm:$0xff] %vm217_vm8, %v4411_v27  ;;  %v3289_v62 = vpop.f32.mrf.mxu1 }
 0x262   : > { %v5011_v12 = vsel %vm217_vm8, %v4967_v8, 0.0  ;;  %v5068_v16 = vmul.f32 %v4967_v8, %v4967_v8  ;;  %v5177_v20 = vpack.c.bf16 %v4967_v8, %v4967_v8  ;;  %4936 = vst.msk [vmem:[#allocation2 + $0x70] sm:$0xff] %vm217_vm8, %v4904_v10  ;;  %v3342_v21 = vadd.f32 %v3289_v62, %v2960_v7  ;;  %v7989_v35 = vpop.f32.mrf.mxu0 }
 0x263   : > { %v5012_v13 = vadd.f32 %v5011_v12, %v5010_v52 }
 0x264   : > { %v5112_v55 = vsel %vm217_vm8, %v5068_v16, 0.0  ;;  %5210 = vst.msk [vmem:[%s7648_s18 + $0x34] sm:$0xf] %vm5196_vm9, %v5177_v20  ;;  %v3441_v19 = vld [vmem:[#allocation2 + $0x88] sm:$0xff] }
 0x265   : > { %v5113_v0 = vadd.f32 %v5112_v55, %v5111_v15  ;;  %v3695_v9 = vadd.f32 %v3640_v4, %v3441_v19  ;;  %3374 = vst.msk [vmem:[#allocation2 + $0x90] sm:$0xff] %vm217_vm8, %v3342_v21 }
 0x266   : > { %v3806_v26 = vld [vmem:[#allocation2 + $0x80] sm:$0xff] }
 0x267   : > { %v4412_v14 = vadd.f32 %v4356_v41, %v3806_v26  ;;  %3727 = vst.msk [vmem:[#allocation2 + $0x88] sm:$0xff] %vm217_vm8, %v3695_v9  ;;  %v3643_v29 = vpop.f32.mrf.mxu2  ;;  %v2964_v9 = vld [vmem:[#allocation2 + $0xb0] sm:$0xff] }
 0x268   : > { %v4523_v30 = vld [vmem:[#allocation2 + $0x78] sm:$0xff]  ;;  %v4361_v17 = vpop.f32.mrf.mxu3 }
 0x269   : > { %v4968_v63 = vld [vmem:[#allocation2 + $0x70] sm:$0xff]  ;;  %4444 = vst.msk [vmem:[#allocation2 + $0x80] sm:$0xff] %vm217_vm8, %v4412_v14  ;;  %v4905_v32 = vadd.f32 %v7953_v34, %v4523_v30  ;;  %v3291_v39 = vpop.f32.mrf.mxu1 }
 0x26a   : > { %v5013_v3 = vsel %vm217_vm8, %v4968_v63, 0.0  ;;  %v5069_v44 = vmul.f32 %v4968_v63, %v4968_v63  ;;  %v5178_v25 = vpack.c.bf16 %v4968_v63, %v4968_v63  ;;  %v3343_v37 = vadd.f32 %v3291_v39, %v2961_v60  ;;  %v8001_v1 = vpop.f32.mrf.mxu0 }
 0x26b   : > { %v5014_v43 = vadd.f32 %v5013_v3, %v5012_v13  ;;  %4937 = vst.msk [vmem:[#allocation2 + $0x78] sm:$0xff] %vm217_vm8, %v4905_v32 }
 0x26c   : > { %v5114_v5 = vsel %vm217_vm8, %v5069_v44, 0.0  ;;  %5211 = vst.msk [vmem:[%s7648_s18 + $0x38] sm:$0xf] %vm5196_vm9, %v5178_v25  ;;  %v3442_v56 = vld [vmem:[#allocation2 + $0x90] sm:$0xff] }
 0x26d   : > { %v5115_v61 = vadd.f32 %v5114_v5, %v5113_v0  ;;  %v3696_v11 = vadd.f32 %v3643_v29, %v3442_v56  ;;  %3375 = vst.msk [vmem:[#allocation2 + $0x98] sm:$0xff] %vm217_vm8, %v3343_v37 }
 0x26e   : > { %v3807_v34 = vld [vmem:[#allocation2 + $0x88] sm:$0xff] }
 0x26f   : > { %v4413_v53 = vadd.f32 %v4358_v28, %v3807_v34  ;;  %3728 = vst.msk [vmem:[#allocation2 + $0x90] sm:$0xff] %vm217_vm8, %v3696_v11  ;;  %v3645_v23 = vpop.f32.mrf.mxu2  ;;  %v2965_v11 = vld [vmem:[#allocation2 + $0xb8] sm:$0xff] }
 0x270   : > { %v4524_v6 = vld [vmem:[#allocation2 + $0x80] sm:$0xff]  ;;  %v4363_v45 = vpop.f32.mrf.mxu3 }
 0x271   : > { %4445 = vst.msk [vmem:[#allocation2 + $0x88] sm:$0xff] %vm217_vm8, %v4413_v53  ;;  %v4906_v54 = vadd.f32 %v7964_v47, %v4524_v6  ;;  %v3294_v38 = vpop.f32.mrf.mxu1 }
 0x272   : > { %v4969_v31 = vld [vmem:[#allocation2 + $0x78] sm:$0xff]  ;;  %v3344_v57 = vadd.f32 %v3294_v38, %v2962_v18  ;;  %v8013_v15 = vpop.f32.mrf.mxu0 }
 0x273   : > { %v5015_v36 = vsel %vm217_vm8, %v4969_v31, 0.0  ;;  %v5070_v41 = vmul.f32 %v4969_v31, %v4969_v31  ;;  %v5179_v24 = vpack.c.bf16 %v4969_v31, %v4969_v31  ;;  %4938 = vst.msk [vmem:[#allocation2 + $0x80] sm:$0xff] %vm217_vm8, %v4906_v54 }
 0x274   : > { %v5016_v59 = vadd.f32 %v5015_v36, %v5014_v43  ;;  %v3443_v58 = vld [vmem:[#allocation2 + $0x98] sm:$0xff]  ;;  %3376 = vst.msk [vmem:[#allocation2 + $0xa0] sm:$0xff] %vm217_vm8, %v3344_v57 }
 0x275   : > { %v5116_v48 = vsel %vm217_vm8, %v5070_v41, 0.0  ;;  %5212 = vst.msk [vmem:[%s7648_s18 + $0x3c] sm:$0xf] %vm5196_vm9, %v5179_v24  ;;  %v3697_v46 = vadd.f32 %v3645_v23, %v3443_v58 }
 0x276   : > { %v5117_v47 = vadd.f32 %v5116_v48, %v5115_v61  ;;  %v3808_v42 = vld [vmem:[#allocation2 + $0x90] sm:$0xff] }
 0x277   : > { %v4414_v49 = vadd.f32 %v4361_v17, %v3808_v42  ;;  %3729 = vst.msk [vmem:[#allocation2 + $0x98] sm:$0xff] %vm217_vm8, %v3697_v46  ;;  %v3648_v52 = vpop.f32.mrf.mxu2 }
 0x278   : > { %v4525_v33 = vld [vmem:[#allocation2 + $0x88] sm:$0xff]  ;;  %v4366_v51 = vpop.f32.mrf.mxu3 }
 0x279   : > { %4446 = vst.msk [vmem:[#allocation2 + $0x90] sm:$0xff] %vm217_vm8, %v4414_v49  ;;  %v4907_v22 = vadd.f32 %v7975_v2, %v4525_v33  ;;  %v3296_v27 = vpop.f32.mrf.mxu1 }
 0x27a   : > { %v4970_v40 = vld [vmem:[#allocation2 + $0x80] sm:$0xff]  ;;  %v3345_v4 = vadd.f32 %v3296_v27, %v2963_v50  ;;  %v8026_v30 = vpop.f32.mrf.mxu0 }
 0x27b   : > { %v5017_v10 = vsel %vm217_vm8, %v4970_v40, 0.0  ;;  %v5071_v28 = vmul.f32 %v4970_v40, %v4970_v40  ;;  %v5180_v8 = vpack.c.bf16 %v4970_v40, %v4970_v40  ;;  %4939 = vst.msk [vmem:[#allocation2 + $0x88] sm:$0xff] %vm217_vm8, %v4907_v22  ;;  %v3444_v7 = vld [vmem:[#allocation2 + $0xa0] sm:$0xff] }
 0x27c   : > { %v5018_v62 = vadd.f32 %v5017_v10, %v5016_v59  ;;  %v3698_v12 = vadd.f32 %v3648_v52, %v3444_v7  ;;  %3377 = vst.msk [vmem:[#allocation2 + $0xa8] sm:$0xff] %vm217_vm8, %v3345_v4 }
 0x27d   : > { %v5118_v16 = vsel %vm217_vm8, %v5071_v28, 0.0  ;;  %5213 = vst.msk [vmem:[%s7648_s18 + $0x40] sm:$0xf] %vm5196_vm9, %v5180_v8 }
 0x27e   : > { %v5119_v2 = vadd.f32 %v5118_v16, %v5117_v47  ;;  %v3809_v20 = vld [vmem:[#allocation2 + $0x98] sm:$0xff]  ;;  %3730 = vst.msk [vmem:[#allocation2 + $0xa0] sm:$0xff] %vm217_vm8, %v3698_v12  ;;  %v2966_v47 = vld [vmem:[#allocation2 + $0xc0] sm:$0xff] }
 0x27f   : > { %v4415_v21 = vadd.f32 %v4363_v45, %v3809_v20  ;;  %v3650_v13 = vpop.f32.mrf.mxu2  ;;  %v2967_v20 = vld [vmem:[#allocation2 + $0xc8] sm:$0xff] }
 0x280   : > { %v4526_v55 = vld [vmem:[#allocation2 + $0x90] sm:$0xff]  ;;  %v4368_v19 = vpop.f32.mrf.mxu3 }
 0x281   : > { %4447 = vst.msk [vmem:[#allocation2 + $0x98] sm:$0xff] %vm217_vm8, %v4415_v21  ;;  %v4908_v0 = vadd.f32 %v7989_v35, %v4526_v55  ;;  %v3299_v26 = vpop.f32.mrf.mxu1 }
 0x282   : > { %v4971_v14 = vld [vmem:[#allocation2 + $0x88] sm:$0xff]  ;;  %v3346_v29 = vadd.f32 %v3299_v26, %v2964_v9  ;;  %v4865_v57 = vpop.f32.mrf.mxu0 }
 0x283   : > { %v5019_v17 = vsel %vm217_vm8, %v4971_v14, 0.0  ;;  %v5072_v63 = vmul.f32 %v4971_v14, %v4971_v14  ;;  %v5181_v32 = vpack.c.bf16 %v4971_v14, %v4971_v14  ;;  %4940 = vst.msk [vmem:[#allocation2 + $0x90] sm:$0xff] %vm217_vm8, %v4908_v0  ;;  %v3445_v60 = vld [vmem:[#allocation2 + $0xa8] sm:$0xff] }
 0x284   : > { %v5020_v39 = vadd.f32 %v5019_v17, %v5018_v62  ;;  %v3699_v3 = vadd.f32 %v3650_v13, %v3445_v60  ;;  %3378 = vst.msk [vmem:[#allocation2 + $0xb0] sm:$0xff] %vm217_vm8, %v3346_v29 }
 0x285   : > { %v5120_v44 = vsel %vm217_vm8, %v5072_v63, 0.0  ;;  %5214 = vst.msk [vmem:[%s7648_s18 + $0x44] sm:$0xf] %vm5196_vm9, %v5181_v32  ;;  %v3810_v35 = vld [vmem:[#allocation2 + $0xa0] sm:$0xff] }
 0x286   : > { %v5121_v25 = vadd.f32 %v5120_v44, %v5119_v2  ;;  %v4416_v37 = vadd.f32 %v4366_v51, %v3810_v35  ;;  %3731 = vst.msk [vmem:[#allocation2 + $0xa8] sm:$0xff] %vm217_vm8, %v3699_v3 }
 0x287   : > { %v3653_v43 = vpop.f32.mrf.mxu2 }
 0x288   : > { %4448 = vst.msk [vmem:[#allocation2 + $0xa0] sm:$0xff] %vm217_vm8, %v4416_v37  ;;  %v4527_v5 = vld [vmem:[#allocation2 + $0x98] sm:$0xff]  ;;  %v4371_v56 = vpop.f32.mrf.mxu3 }
 0x289   : > { %v4909_v61 = vadd.f32 %v8001_v1, %v4527_v5  ;;  %v3301_v34 = vpop.f32.mrf.mxu1 }
 0x28a   : > { %v4972_v53 = vld [vmem:[#allocation2 + $0x90] sm:$0xff]  ;;  %v3347_v23 = vadd.f32 %v3301_v34, %v2965_v11  ;;  %v4867_v8 = vpop.f32.mrf.mxu0 }
 0x28b   : > { %v5021_v6 = vsel %vm217_vm8, %v4972_v53, 0.0  ;;  %v5073_v45 = vmul.f32 %v4972_v53, %v4972_v53  ;;  %v5182_v54 = vpack.c.bf16 %v4972_v53, %v4972_v53  ;;  %4941 = vst.msk [vmem:[#allocation2 + $0x98] sm:$0xff] %vm217_vm8, %v4909_v61  ;;  %v3446_v18 = vld [vmem:[#allocation2 + $0xb0] sm:$0xff] }
 0x28c   : > { %v5022_v38 = vadd.f32 %v5021_v6, %v5020_v39  ;;  %v3700_v31 = vadd.f32 %v3653_v43, %v3446_v18  ;;  %3379 = vst.msk [vmem:[#allocation2 + $0xb8] sm:$0xff] %vm217_vm8, %v3347_v23 }
 0x28d   : > { %v5122_v36 = vsel %vm217_vm8, %v5073_v45, 0.0  ;;  %5215 = vst.msk [vmem:[%s7648_s18 + $0x48] sm:$0xf] %vm5196_vm9, %v5182_v54  ;;  %v3811_v1 = vld [vmem:[#allocation2 + $0xa8] sm:$0xff]  ;;  %v2969_v54 = vld [vmem:[#allocation2 + $0xd8] sm:$0xff] }
 0x28e   : > { %v5123_v41 = vadd.f32 %v5122_v36, %v5121_v25  ;;  %v4417_v24 = vadd.f32 %v4368_v19, %v3811_v1  ;;  %3732 = vst.msk [vmem:[#allocation2 + $0xb0] sm:$0xff] %vm217_vm8, %v3700_v31  ;;  %v2968_v25 = vld [vmem:[#allocation2 + $0xd0] sm:$0xff] }
 0x28f   : > { %v4528_v59 = vld [vmem:[#allocation2 + $0xa0] sm:$0xff]  ;;  %v3655_v58 = vpop.f32.mrf.mxu2 }
 0x290   : > { %4449 = vst.msk [vmem:[#allocation2 + $0xa8] sm:$0xff] %vm217_vm8, %v4417_v24  ;;  %v4910_v48 = vadd.f32 %v8013_v15, %v4528_v59  ;;  %v4373_v46 = vpop.f32.mrf.mxu3 }
 0x291   : > { %v3304_v42 = vpop.f32.mrf.mxu1 }
 0x292   : > { %v4973_v49 = vld [vmem:[#allocation2 + $0x98] sm:$0xff]  ;;  %4942 = vst.msk [vmem:[#allocation2 + $0xa0] sm:$0xff] %vm217_vm8, %v4910_v48  ;;  %v3348_v52 = vadd.f32 %v3304_v42, %v2966_v47  ;;  %v4870_v44 = vpop.f32.mrf.mxu0  ;;  %v2970_v42 = vld [vmem:[#allocation2 + $0xe0] sm:$0xff] }
 0x293   : > { %v5023_v33 = vsel %vm217_vm8, %v4973_v49, 0.0  ;;  %v5074_v51 = vmul.f32 %v4973_v49, %v4973_v49  ;;  %v5183_v22 = vpack.c.bf16 %v4973_v49, %v4973_v49  ;;  %v3447_v50 = vld [vmem:[#allocation2 + $0xb8] sm:$0xff] }
 0x294   : > { %v5024_v27 = vadd.f32 %v5023_v33, %v5022_v38  ;;  %v3701_v40 = vadd.f32 %v3655_v58, %v3447_v50  ;;  %3380 = vst.msk [vmem:[#allocation2 + $0xc0] sm:$0xff] %vm217_vm8, %v3348_v52 }
 0x295   : > { %v5124_v4 = vsel %vm217_vm8, %v5074_v51, 0.0  ;;  %5216 = vst.msk [vmem:[%s7648_s18 + $0x4c] sm:$0xf] %vm5196_vm9, %v5183_v22  ;;  %v3812_v15 = vld [vmem:[#allocation2 + $0xb0] sm:$0xff] }
 0x296   : > { %v5125_v10 = vadd.f32 %v5124_v4, %v5123_v41  ;;  %v4418_v28 = vadd.f32 %v4371_v56, %v3812_v15  ;;  %3733 = vst.msk [vmem:[#allocation2 + $0xb8] sm:$0xff] %vm217_vm8, %v3701_v40 }
 0x297   : > { %v4529_v7 = vld [vmem:[#allocation2 + $0xa8] sm:$0xff]  ;;  %v3658_v62 = vpop.f32.mrf.mxu2 }
 0x298   : > { %4450 = vst.msk [vmem:[#allocation2 + $0xb0] sm:$0xff] %vm217_vm8, %v4418_v28  ;;  %v4911_v12 = vadd.f32 %v8026_v30, %v4529_v7  ;;  %v4376_v16 = vpop.f32.mrf.mxu3  ;;  %v2971_v7 = vld [vmem:[#allocation2 + $0xe8] sm:$0xff] }
 0x299   : > { %v4974_v2 = vld [vmem:[#allocation2 + $0xa0] sm:$0xff]  ;;  %v3306_v21 = vpop.f32.mrf.mxu1 }
 0x29a   : > { %v5025_v13 = vsel %vm217_vm8, %v4974_v2, 0.0  ;;  %v5075_v55 = vmul.f32 %v4974_v2, %v4974_v2  ;;  %v5184_v19 = vpack.c.bf16 %v4974_v2, %v4974_v2  ;;  %4943 = vst.msk [vmem:[#allocation2 + $0xa8] sm:$0xff] %vm217_vm8, %v4911_v12  ;;  %v3349_v0 = vadd.f32 %v3306_v21, %v2967_v20  ;;  %v4872_v36 = vpop.f32.mrf.mxu0 }
 0x29b   : > { %v8057_v9 = vadd.f32 %v5025_v13, %v5024_v27  ;;  %v3448_v26 = vld [vmem:[#allocation2 + $0xc0] sm:$0xff] }
 0x29c   : > { %v5126_v14 = vsel %vm217_vm8, %v5075_v55, 0.0  ;;  %5217 = vst.msk [vmem:[%s7648_s18 + $0x50] sm:$0xf] %vm5196_vm9, %v5184_v19  ;;  %v3702_v29 = vadd.f32 %v3658_v62, %v3448_v26 }
 0x29d   : > { %v8062_v30 = vadd.f32 %v5126_v14, %v5125_v10  ;;  %v3813_v17 = vld [vmem:[#allocation2 + $0xb8] sm:$0xff]  ;;  %3381 = vst.msk [vmem:[#allocation2 + $0xc8] sm:$0xff] %vm217_vm8, %v3349_v0 }
 0x29e   : > { %v4419_v63 = vadd.f32 %v4373_v46, %v3813_v17  ;;  %3734 = vst.msk [vmem:[#allocation2 + $0xc0] sm:$0xff] %vm217_vm8, %v3702_v29  ;;  %v2972_v29 = vld [vmem:[#allocation2 + $0xf0] sm:$0xff] }
 0x29f   : > { %v4530_v32 = vld [vmem:[#allocation2 + $0xb0] sm:$0xff]  ;;  %v3660_v60 = vpop.f32.mrf.mxu2 }
 0x2a0   : > { %4451 = vst.msk [vmem:[#allocation2 + $0xb8] sm:$0xff] %vm217_vm8, %v4419_v63  ;;  %v4912_v39 = vadd.f32 %v4865_v57, %v4530_v32  ;;  %v4378_v3 = vpop.f32.mrf.mxu3 }
 0x2a1   : > { %v8067_v35 = vld [vmem:[#allocation2 + $0xa8] sm:$0xff]  ;;  %v3309_v37 = vpop.f32.mrf.mxu1 }
 0x2a2   : > { %v5185_v43 = vpack.c.bf16 %v8067_v35, %v8067_v35  ;;  %4944 = vst.msk [vmem:[#allocation2 + $0xb0] sm:$0xff] %vm217_vm8, %v4912_v39  ;;  %v3350_v5 = vadd.f32 %v3309_v37, %v2968_v25  ;;  %v4875_v50 = vpop.f32.mrf.mxu0 }
 0x2a4   : > { %5218 = vst.msk [vmem:[%s7648_s18 + $0x54] sm:$0xf] %vm5196_vm9, %v5185_v43  ;;  %v3449_v56 = vld [vmem:[#allocation2 + $0xc8] sm:$0xff] }
 0x2a5   : > { %v3814_v61 = vld [vmem:[#allocation2 + $0xc0] sm:$0xff]  ;;  %v3703_v11 = vadd.f32 %v3660_v60, %v3449_v56  ;;  %3382 = vst.msk [vmem:[#allocation2 + $0xd0] sm:$0xff] %vm217_vm8, %v3350_v5 }
 0x2a6   : > { %v4420_v34 = vadd.f32 %v4376_v16, %v3814_v61 }
 0x2a7   : > { %3735 = vst.msk [vmem:[#allocation2 + $0xc8] sm:$0xff] %vm217_vm8, %v3703_v11  ;;  %v4531_v53 = vld [vmem:[#allocation2 + $0xb8] sm:$0xff]  ;;  %v3663_v23 = vpop.f32.mrf.mxu2 }
 0x2a8   : > { %4452 = vst.msk [vmem:[#allocation2 + $0xc0] sm:$0xff] %vm217_vm8, %v4420_v34  ;;  %v4913_v6 = vadd.f32 %v4867_v8, %v4531_v53  ;;  %v4381_v57 = vpop.f32.mrf.mxu3  ;;  %v2973_v11 = vld [vmem:[#allocation2 + $0xf8] sm:$0xff] }
 0x2a9   : > { %v8077_v45 = vld [vmem:[#allocation2 + $0xb0] sm:$0xff]  ;;  %v3311_v18 = vpop.f32.mrf.mxu1 }
 0x2aa   : > { %v5186_v38 = vpack.c.bf16 %v8077_v45, %v8077_v45  ;;  %4945 = vst.msk [vmem:[#allocation2 + $0xb8] sm:$0xff] %vm217_vm8, %v4913_v6  ;;  %v3351_v31 = vadd.f32 %v3311_v18, %v2969_v54  ;;  %v4877_v55 = vpop.f32.mrf.mxu0 }
 0x2ac   : > { %5219 = vst.msk [vmem:[%s7648_s18 + $0x58] sm:$0xf] %vm5196_vm9, %v5186_v38  ;;  %v3450_v1 = vld [vmem:[#allocation2 + $0xd0] sm:$0xff] }
 0x2ad   : > { %v3704_v41 = vadd.f32 %v3663_v23, %v3450_v1  ;;  %3383 = vst.msk [vmem:[#allocation2 + $0xd8] sm:$0xff] %vm217_vm8, %v3351_v31 }
 0x2ae   : > { %v3815_v24 = vld [vmem:[#allocation2 + $0xc8] sm:$0xff] }
 0x2af   : > { %v4421_v59 = vadd.f32 %v4378_v3, %v3815_v24  ;;  %3736 = vst.msk [vmem:[#allocation2 + $0xd0] sm:$0xff] %vm217_vm8, %v3704_v41  ;;  %v4532_v58 = vld [vmem:[#allocation2 + $0xc0] sm:$0xff]  ;;  %v3665_v48 = vpop.f32.mrf.mxu2 }
 0x2b0   : > { %v4914_v46 = vadd.f32 %v4870_v44, %v4532_v58  ;;  %v4383_v22 = vpop.f32.mrf.mxu3 }
 0x2b1   : > { %v8086_v47 = vld [vmem:[#allocation2 + $0xb8] sm:$0xff]  ;;  %4453 = vst.msk [vmem:[#allocation2 + $0xc8] sm:$0xff] %vm217_vm8, %v4421_v59  ;;  %v3314_v49 = vpop.f32.mrf.mxu1 }
 0x2b2   : > { %v5187_v52 = vpack.c.bf16 %v8086_v47, %v8086_v47  ;;  %4946 = vst.msk [vmem:[#allocation2 + $0xc0] sm:$0xff] %vm217_vm8, %v4914_v46  ;;  %v3352_v33 = vadd.f32 %v3314_v49, %v2970_v42  ;;  %v4880_v5 = vpop.f32.mrf.mxu0 }
 0x2b4   : > { %5220 = vst.msk [vmem:[%s7648_s18 + $0x5c] sm:$0xf] %vm5196_vm9, %v5187_v52  ;;  %v3451_v51 = vld [vmem:[#allocation2 + $0xd8] sm:$0xff] }
 0x2b5   : > { %v3705_v27 = vadd.f32 %v3665_v48, %v3451_v51  ;;  %3384 = vst.msk [vmem:[#allocation2 + $0xe0] sm:$0xff] %vm217_vm8, %v3352_v33  ;;  %v5076_v51 = vmul.f32 %v8067_v35, %v8067_v35 }
 0x2b6   : > { %v3816_v40 = vld [vmem:[#allocation2 + $0xd0] sm:$0xff] }
 0x2b7   : > { %v4422_v4 = vadd.f32 %v4381_v57, %v3816_v40  ;;  %3737 = vst.msk [vmem:[#allocation2 + $0xd8] sm:$0xff] %vm217_vm8, %v3705_v27  ;;  %v3668_v15 = vpop.f32.mrf.mxu2  ;;  %v5027_v27 = vsel %vm217_vm8, %v8067_v35, 0.0  ;;  %v5077_v40 = vmul.f32 %v8077_v45, %v8077_v45 }
 0x2b8   : > { %v4533_v10 = vld [vmem:[#allocation2 + $0xc8] sm:$0xff]  ;;  %v4386_v13 = vpop.f32.mrf.mxu3 }
 0x2b9   : > { %v8096_v28 = vld [vmem:[#allocation2 + $0xc0] sm:$0xff]  ;;  %4454 = vst.msk [vmem:[#allocation2 + $0xd0] sm:$0xff] %vm217_vm8, %v4422_v4  ;;  %v4915_v8 = vadd.f32 %v4872_v36, %v4533_v10  ;;  %v3316_v62 = vpop.f32.mrf.mxu1 }
 0x2ba   : > { %v5188_v12 = vpack.c.bf16 %v8096_v28, %v8096_v28  ;;  %v3353_v16 = vadd.f32 %v3316_v62, %v2971_v7  ;;  %v4882_v41 = vpop.f32.mrf.mxu0  ;;  %v5029_v7 = vsel %vm217_vm8, %v8077_v45, 0.0  ;;  %v5078_v62 = vmul.f32 %v8086_v47, %v8086_v47 }
 0x2bb   : > { %4947 = vst.msk [vmem:[#allocation2 + $0xc8] sm:$0xff] %vm217_vm8, %v4915_v8  ;;  %v5128_v8 = vsel %vm217_vm8, %v5076_v51, 0.0 }
 0x2bc   : > { %5221 = vst.msk [vmem:[%s7648_s18 + $0x60] sm:$0xf] %vm5196_vm9, %v5188_v12  ;;  %v3452_v2 = vld [vmem:[#allocation2 + $0xe0] sm:$0xff]  ;;  %v5129_v45 = vadd.f32 %v5128_v8, %v8062_v30 }
 0x2bd   : > { %v3706_v20 = vadd.f32 %v3668_v15, %v3452_v2  ;;  %3385 = vst.msk [vmem:[#allocation2 + $0xe8] sm:$0xff] %vm217_vm8, %v3353_v16  ;;  %v5028_v16 = vadd.f32 %v5027_v27, %v8057_v9  ;;  %v5130_v2 = vsel %vm217_vm8, %v5077_v40, 0.0  ;;  %v5033_v9 = vsel %vm217_vm8, %v8096_v28, 0.0 }
 0x2be   : > { %v3817_v21 = vld [vmem:[#allocation2 + $0xd8] sm:$0xff] }
 0x2bf   : > { %v4423_v19 = vadd.f32 %v4383_v22, %v3817_v21  ;;  %3738 = vst.msk [vmem:[#allocation2 + $0xe0] sm:$0xff] %vm217_vm8, %v3706_v20  ;;  %v3670_v0 = vpop.f32.mrf.mxu2  ;;  %v5031_v20 = vsel %vm217_vm8, %v8086_v47, 0.0  ;;  %v5079_v21 = vmul.f32 %v8096_v28, %v8096_v28  ;;  %v5131_v47 = vadd.f32 %v5130_v2, %v5129_v45 }
 0x2c0   : > { %v4534_v26 = vld [vmem:[#allocation2 + $0xd0] sm:$0xff]  ;;  %v4388_v43 = vpop.f32.mrf.mxu3 }
 0x2c1   : > { %4455 = vst.msk [vmem:[#allocation2 + $0xd8] sm:$0xff] %vm217_vm8, %v4423_v19  ;;  %v4916_v14 = vadd.f32 %v4875_v50, %v4534_v26  ;;  %v3319_v17 = vpop.f32.mrf.mxu1  ;;  %v5132_v19 = vsel %vm217_vm8, %v5078_v62, 0.0 }
 0x2c2   : > { %v8107_v63 = vld [vmem:[#allocation2 + $0xc8] sm:$0xff]  ;;  %v3354_v32 = vadd.f32 %v3319_v17, %v2972_v29  ;;  %v4885_v10 = vpop.f32.mrf.mxu0  ;;  %v5134_v17 = vsel %vm217_vm8, %v5079_v21, 0.0 }
 0x2c3   : > { %v5189_v60 = vpack.c.bf16 %v8107_v63, %v8107_v63  ;;  %4948 = vst.msk [vmem:[#allocation2 + $0xd0] sm:$0xff] %vm217_vm8, %v4916_v14  ;;  %v5035_v30 = vsel %vm217_vm8, %v8107_v63, 0.0 }
 0x2c4   : > { %v3453_v39 = vld [vmem:[#allocation2 + $0xe8] sm:$0xff]  ;;  %3386 = vst.msk [vmem:[#allocation2 + $0xf0] sm:$0xff] %vm217_vm8, %v3354_v32 }
 0x2c5   : > { %5222 = vst.msk [vmem:[%s7648_s18 + $0x64] sm:$0xf] %vm5196_vm9, %v5189_v60  ;;  %v3707_v3 = vadd.f32 %v3670_v0, %v3453_v39  ;;  %v5080_v0 = vmul.f32 %v8107_v63, %v8107_v63  ;;  %v5133_v60 = vadd.f32 %v5132_v19, %v5131_v47 }
 0x2c6   : > { %v3818_v44 = vld [vmem:[#allocation2 + $0xe0] sm:$0xff] }
 0x2c7   : > { %v4424_v25 = vadd.f32 %v4386_v13, %v3818_v44  ;;  %3739 = vst.msk [vmem:[#allocation2 + $0xe8] sm:$0xff] %vm217_vm8, %v3707_v3  ;;  %v3673_v61 = vpop.f32.mrf.mxu2  ;;  %v5136_v28 = vsel %vm217_vm8, %v5080_v0, 0.0 }
 0x2c8   : > { %v4535_v37 = vld [vmem:[#allocation2 + $0xd8] sm:$0xff]  ;;  %v4391_v59 = vpop.f32.mrf.mxu3 }
 0x2c9   : > { %4456 = vst.msk [vmem:[#allocation2 + $0xe0] sm:$0xff] %vm217_vm8, %v4424_v25  ;;  %v4917_v56 = vadd.f32 %v4877_v55, %v4535_v37  ;;  %v3321_v34 = vpop.f32.mrf.mxu1  ;;  %v5030_v55 = vadd.f32 %v5029_v7, %v5028_v16  ;;  %v5135_v25 = vadd.f32 %v5134_v17, %v5133_v60 }
 0x2ca   : > { %v8117_v53 = vld [vmem:[#allocation2 + $0xd0] sm:$0xff]  ;;  %v3355_v23 = vadd.f32 %v3321_v34, %v2973_v11 }
 0x2cb   : > { %v5190_v6 = vpack.c.bf16 %v8117_v53, %v8117_v53  ;;  %4949 = vst.msk [vmem:[#allocation2 + $0xd8] sm:$0xff] %vm217_vm8, %v4917_v56  ;;  %v3454_v54 = vld [vmem:[#allocation2 + $0xf0] sm:$0xff]  ;;  %v5032_v14 = vadd.f32 %v5031_v20, %v5030_v55  ;;  %v5081_v32 = vmul.f32 %v8117_v53, %v8117_v53  ;;  %v5037_v3 = vsel %vm217_vm8, %v8117_v53, 0.0 }
 0x2cc   : > { %v3708_v18 = vadd.f32 %v3673_v61, %v3454_v54  ;;  %3387 = vst.msk [vmem:[#allocation2 + $0xf8] sm:$0xff] %vm217_vm8, %v3355_v23  ;;  %v5137_v34 = vadd.f32 %v5136_v28, %v5135_v25 }
 0x2cd   : > { %5223 = vst.msk [vmem:[%s7648_s18 + $0x68] sm:$0xf] %vm5196_vm9, %v5190_v6  ;;  %v5034_v39 = vadd.f32 %v5033_v9, %v5032_v14  ;;  %v5138_v56 = vsel %vm217_vm8, %v5081_v32, 0.0 }
 0x2ce   : > { %v3819_v38 = vld [vmem:[#allocation2 + $0xe8] sm:$0xff]  ;;  %3740 = vst.msk [vmem:[#allocation2 + $0xf0] sm:$0xff] %vm217_vm8, %v3708_v18 }
 0x2cf   : > { %v4425_v31 = vadd.f32 %v4388_v43, %v3819_v38  ;;  %v3675_v48 = vpop.f32.mrf.mxu2  ;;  %v5036_v37 = vadd.f32 %v5035_v30, %v5034_v39 }
 0x2d0   : > { %v4536_v57 = vld [vmem:[#allocation2 + $0xe0] sm:$0xff]  ;;  %v4393_v15 = vpop.f32.mrf.mxu3 }
 0x2d1   : > { %4457 = vst.msk [vmem:[#allocation2 + $0xe8] sm:$0xff] %vm217_vm8, %v4425_v31  ;;  %v4918_v36 = vadd.f32 %v4880_v5, %v4536_v57  ;;  %v4887_v5 = vpop.f32.mrf.mxu0  ;;  %v5038_v23 = vadd.f32 %v5037_v3, %v5036_v37  ;;  %v5139_v31 = vadd.f32 %v5138_v56, %v5137_v34 }
 0x2d2   : > { %v4981_v1 = vld [vmem:[#allocation2 + $0xd8] sm:$0xff] }
 0x2d3   : > { %v5191_v24 = vpack.c.bf16 %v4981_v1, %v4981_v1  ;;  %4950 = vst.msk [vmem:[#allocation2 + $0xe0] sm:$0xff] %vm217_vm8, %v4918_v36  ;;  %v3455_v58 = vld [vmem:[#allocation2 + $0xf8] sm:$0xff]  ;;  %v5082_v44 = vmul.f32 %v4981_v1, %v4981_v1  ;;  %v5039_v63 = vsel %vm217_vm8, %v4981_v1, 0.0 }
 0x2d4   : > { %v3709_v46 = vadd.f32 %v3675_v48, %v3455_v58  ;;  %v5040_v57 = vadd.f32 %v5039_v63, %v5038_v23 }
 0x2d5   : > { %5224 = vst.msk [vmem:[%s7648_s18 + $0x6c] sm:$0xf] %vm5196_vm9, %v5191_v24  ;;  %v3820_v42 = vld [vmem:[#allocation2 + $0xf0] sm:$0xff]  ;;  %v5140_v54 = vsel %vm217_vm8, %v5082_v44, 0.0 }
 0x2d6   : > { %v4426_v49 = vadd.f32 %v4391_v59, %v3820_v42  ;;  %3741 = vst.msk [vmem:[#allocation2 + $0xf8] sm:$0xff] %vm217_vm8, %v3709_v46  ;;  %v5141_v24 = vadd.f32 %v5140_v54, %v5139_v31 }
 0x2d8   : > { %4458 = vst.msk [vmem:[#allocation2 + $0xf0] sm:$0xff] %vm217_vm8, %v4426_v49  ;;  %v4537_v52 = vld [vmem:[#allocation2 + $0xe8] sm:$0xff] }
 0x2d9   : > { %v4919_v33 = vadd.f32 %v4882_v41, %v4537_v52 }
 0x2da   : > { %v4982_v22 = vld [vmem:[#allocation2 + $0xe0] sm:$0xff] }
 0x2db   : > { %v5192_v50 = vpack.c.bf16 %v4982_v22, %v4982_v22  ;;  %4951 = vst.msk [vmem:[#allocation2 + $0xe8] sm:$0xff] %vm217_vm8, %v4919_v33  ;;  %v5083_v61 = vmul.f32 %v4982_v22, %v4982_v22  ;;  %v5041_v18 = vsel %vm217_vm8, %v4982_v22, 0.0 }
 0x2dc   : > { %v5042_v59 = vadd.f32 %v5041_v18, %v5040_v57 }
 0x2dd   : > { %5225 = vst.msk [vmem:[%s7648_s18 + $0x70] sm:$0xf] %vm5196_vm9, %v5192_v50  ;;  %v3821_v4 = vld [vmem:[#allocation2 + $0xf8] sm:$0xff]  ;;  %v5142_v36 = vsel %vm217_vm8, %v5083_v61, 0.0 }
 0x2de   : > { %v4427_v12 = vadd.f32 %v4393_v15, %v3821_v4  ;;  %v5143_v46 = vadd.f32 %v5142_v36, %v5141_v24 }
 0x2df   : > { %v4538_v35 = vld [vmem:[#allocation2 + $0xf0] sm:$0xff] }
 0x2e0   : > { %4459 = vst.msk [vmem:[#allocation2 + $0xf8] sm:$0xff] %vm217_vm8, %v4427_v12  ;;  %v4920_v13 = vadd.f32 %v4885_v10, %v4538_v35  ;;  %v5156_v12 = vlaneseq }
 0x2e2   : > { %v4983_v26 = vld [vmem:[#allocation2 + $0xe8] sm:$0xff]  ;;  %4952 = vst.msk [vmem:[#allocation2 + $0xf0] sm:$0xff] %vm217_vm8, %v4920_v13  ;;  %v5157_v21 = vshrl.u32 %v5156_v12, 7 }
 0x2e3   : > { %v5193_v29 = vpack.c.bf16 %v4983_v26, %v4983_v26  ;;  %v5084_v53 = vmul.f32 %v4983_v26, %v4983_v26  ;;  %v5043_v1 = vsel %vm217_vm8, %v4983_v26, 0.0 }
 0x2e4   : > { %v5044_v42 = vadd.f32 %v5043_v1, %v5042_v59  ;;  %vm5158_vm10 = vcmp.eq.s32.totalorder %v5157_v21, 0 }
 0x2e5   : > { %5226 = vst.msk [vmem:[%s7648_s18 + $0x74] sm:$0xf] %vm5196_vm9, %v5193_v29  ;;  %v5144_v58 = vsel %vm217_vm8, %v5084_v53, 0.0 }
 0x2e6   : > { %v5145_v52 = vadd.f32 %v5144_v58, %v5143_v46 }
 0x2e7   : > { %v4539_v43 = vld [vmem:[#allocation2 + $0xf8] sm:$0xff] }
 0x2e8   : > { %v4921_v11 = vadd.f32 %v4887_v5, %v4539_v43 }
 0x2e9   : > { %v4984_v6 = vld [vmem:[#allocation2 + $0xf0] sm:$0xff] }
 0x2ea   : > { %v5194_v38 = vpack.c.bf16 %v4984_v6, %v4984_v6  ;;  %4953 = vst.msk [vmem:[#allocation2 + $0xf8] sm:$0xff] %vm217_vm8, %v4921_v11  ;;  %v5085_v41 = vmul.f32 %v4984_v6, %v4984_v6  ;;  %v5045_v48 = vsel %vm217_vm8, %v4984_v6, 0.0 }
 0x2eb   : > { %v5046_v33 = vadd.f32 %v5045_v48, %v5044_v42 }
 0x2ec   : > { %5227 = vst.msk [vmem:[%s7648_s18 + $0x78] sm:$0xf] %vm5196_vm9, %v5194_v38  ;;  %v5146_v49 = vsel %vm217_vm8, %v5085_v41, 0.0 }
 0x2ed   : > { %v5147_v40 = vadd.f32 %v5146_v49, %v5145_v52 }
 0x2f1   : > { %v4985_v51 = vld [vmem:[#allocation2 + $0xf8] sm:$0xff] }
 0x2f2   : > { %v5047_v22 = vsel %vm217_vm8, %v4985_v51, 0.0  ;;  %v5086_v50 = vmul.f32 %v4985_v51, %v4985_v51  ;;  %v5195_v27 = vpack.c.bf16 %v4985_v51, %v4985_v51 }
 0x2f3   : > { %v5048_v4 = vadd.f32 %v5047_v22, %v5046_v33 }
 0x2f4   : > { %v5148_v15 = vsel %vm217_vm8, %v5086_v50, 0.0  ;;  %5228 = vst.msk [vmem:[%s7648_s18 + $0x7c] sm:$0xf] %vm5196_vm9, %v5195_v27 }
 0x2f5   : > { %v5049_v10 = vrot.slane %v5048_v4, 4  ;;  %v5149_v8 = vadd.f32 %v5148_v15, %v5147_v40 }
 0x2f7   : > { %v5050_v7 = vadd.f32 %v5049_v10, %v5048_v4  ;;  %v5150_v62 = vrot.slane %v5149_v8, 4 }
 0x2f9   : > { %v5051_v16 = vrot.slane %v5050_v7, 2  ;;  %v5151_v35 = vadd.f32 %v5150_v62, %v5149_v8 }
 0x2fb   : > { %v5052_v2 = vadd.f32 %v5051_v16, %v5050_v7  ;;  %v5152_v20 = vrot.slane %v5151_v35, 2 }
 0x2fd   : > { %v5053_v13 = vrot.slane %v5052_v2, 1  ;;  %v5153_v45 = vadd.f32 %v5152_v20, %v5151_v35 }
 0x2ff   : > { %v5154_v55 = vrot.slane %v5153_v45, 1  ;;  %v5054_v19 = vadd.f32 %v5053_v13, %v5052_v2 }
 0x301   : > { %v5155_v9 = vadd.f32 %v5154_v55, %v5153_v45 }
 0x303   : > { %v5161_v0 = vsel %vm5158_vm10, %v5054_v19, %v5155_v9 }
 0x304   : > { %5163 = vst.msk [vmem:[%s214_s22] sm:$0x3] %vm5162_vm11, %v5161_v0 }
 0x305 PF: > { %s14_s14 = sadd.s32 1, %s6126_s14   ;;  %s8207_s12 = smov %s6122_s13 }
 0x306   : > { %p11_p5 = scmp.ge.s32.totalorder %s14_s14, 4   ;;  %s8208_s13 = smov %s8210_s15 }
 0x308   :  { %13 = sbr.rel (!%p11_p5) target bundleno = 2 (0x2), region = 81 }

</bundles_post_ra>
